<compile_context>
chip_gen: v6e
topology: v6e:2x2x1
jax: 0.10.0
libtpu: 0.0.40
codegen_flags: <defaults>
</compile_context>

<pallas_src>
import jax
import jax.numpy as jnp
from jax.experimental import pallas as pl
from jax.experimental.pallas import tpu as pltpu


# ---------------------------------------------------------------------------
# Pallas kernels
# ---------------------------------------------------------------------------
_COMPILER_PARAMS = pltpu.CompilerParams(
    dimension_semantics=("parallel",),        # shard M blocks across v7x's 2 TensorCores
    vmem_limit_bytes=32 * 1024 * 1024,        # explicit budget (working set << 32 MiB)
)


def _row_tiles(m):
    """(tile_m, num_tiles): 2 parallel blocks when M is large, else one full-M block."""
    if m >= 1024 and (m // 2) % 16 == 0:      # 16-row granularity covers bf16 packing
        return m // 2, 2
    return m, 1


def _conv_relu_kernel(p_ref, w_ref, b_ref, o_ref):
    # (tm, K) @ (K, Co) + bias, ReLU.  bf16 in, f32 accumulate, bf16 out.
    y = jnp.dot(p_ref[...], w_ref[...], preferred_element_type=jnp.float32)
    y = jnp.maximum(y + b_ref[...], 0.0)
    o_ref[...] = y.astype(o_ref.dtype)


def conv_matmul_relu(patches, w, b):
    M, K = patches.shape
    Kw, Co = w.shape
    assert K == Kw
    tm, nt = _row_tiles(M)
    return pl.pallas_call(
        _conv_relu_kernel,
        out_shape=jax.ShapeDtypeStruct((M, Co), jnp.bfloat16),
        grid=(nt,),
        in_specs=[
            pl.BlockSpec((tm, K), lambda i: (i, 0)),
            pl.BlockSpec((K, Co), lambda i: (0, 0)),
            pl.BlockSpec((1, Co), lambda i: (0, 0)),
        ],
        out_specs=pl.BlockSpec((tm, Co), lambda i: (i, 0)),
        compiler_params=_COMPILER_PARAMS,
    )(patches, w, b)


def _dec_stage_kernel(x_ref, s_ref, wu_ref, bu_ref, wd_ref, bd_ref, o_ref):
    # up (transpose conv k=s=2 as matmul into (kd,kh,kw,Co) columns) + skip add
    z = jnp.dot(x_ref[...], wu_ref[...], preferred_element_type=jnp.float32)
    z = z + bu_ref[...] + s_ref[...].astype(jnp.float32)
    # decode 1x1 conv applied per fine position via block-diagonal weight, ReLU
    h = jnp.dot(z.astype(jnp.bfloat16), wd_ref[...], preferred_element_type=jnp.float32)
    h = jnp.maximum(h + bd_ref[...], 0.0)
    o_ref[...] = h.astype(o_ref.dtype)


def _dec_out_kernel(x_ref, s_ref, wu_ref, bu_ref, wd_ref, bd_ref,
                    wo_ref, bo_ref, o_ref):
    z = jnp.dot(x_ref[...], wu_ref[...], preferred_element_type=jnp.float32)
    z = z + bu_ref[...] + s_ref[...].astype(jnp.float32)
    h = jnp.dot(z.astype(jnp.bfloat16), wd_ref[...], preferred_element_type=jnp.float32)
    h = jnp.maximum(h + bd_ref[...], 0.0)
    o = jnp.dot(h.astype(jnp.bfloat16), wo_ref[...], preferred_element_type=jnp.float32)
    o = jax.nn.sigmoid(o + bo_ref[...])
    o_ref[...] = o.astype(o_ref.dtype)


def decoder_stage(x, skip, wu, bu, wd, bd, wo=None, bo=None):
    """Fused up(conv-transpose 2,2,2) + skip-add + decode(1x1, ReLU) [+ out(1x1)+Sigmoid]."""
    M, Ci = x.shape
    _, E = wu.shape                           # E = 8 * Co
    tm, nt = _row_tiles(M)
    in_specs = [
        pl.BlockSpec((tm, Ci), lambda i: (i, 0)),
        pl.BlockSpec((tm, E), lambda i: (i, 0)),
        pl.BlockSpec((Ci, E), lambda i: (0, 0)),
        pl.BlockSpec((1, E), lambda i: (0, 0)),
        pl.BlockSpec((E, E), lambda i: (0, 0)),
        pl.BlockSpec((1, E), lambda i: (0, 0)),
    ]
    if wo is None:
        kern, args = _dec_stage_kernel, (x, skip, wu, bu, wd, bd)
        out_cols, out_dtype = E, jnp.bfloat16
    else:
        kern, args = _dec_out_kernel, (x, skip, wu, bu, wd, bd, wo, bo)
        out_cols, out_dtype = wo.shape[1], jnp.float32
        in_specs += [
            pl.BlockSpec((wo.shape[0], wo.shape[1]), lambda i: (0, 0)),
            pl.BlockSpec((1, wo.shape[1]), lambda i: (0, 0)),
        ]
    return pl.pallas_call(
        kern,
        out_shape=jax.ShapeDtypeStruct((M, out_cols), out_dtype),
        grid=(nt,),
        in_specs=in_specs,
        out_specs=pl.BlockSpec((tm, out_cols), lambda i: (i, 0)),
        compiler_params=_COMPILER_PARAMS,
    )(*args)


# ---------------------------------------------------------------------------
# XLA-side glue: im2col, pooling, spatial interleave (cheap, small tensors)
# ---------------------------------------------------------------------------
def _im2col_3x3x3(x, window_major):
    """x: (N,D,H,W,Ci) -> (N*D*H*W, 27*Ci) patch rows (bf16).

    window_major orders rows as (n, d//2, h//2, w//2, d%2, h%2, w%2) so that 8
    consecutive rows form one 2x2x2 pool window and the conv output reshapes for
    free into the decoder's (kd,kh,kw,Co)-column skip layout.
    """
    N, D, H, W, Ci = x.shape
    xp = jnp.pad(x, ((0, 0), (1, 1), (1, 1), (1, 1), (0, 0)))
    taps = []
    for kd in range(3):
        for kh in range(3):
            for kw in range(3):
                taps.append(xp[:, kd:kd + D, kh:kh + H, kw:kw + W, :])
    p = jnp.stack(taps, axis=-2).reshape(N, D, H, W, 27 * Ci)
    if window_major:
        p = p.reshape(N, D // 2, 2, H // 2, 2, W // 2, 2, 27 * Ci)
        p = p.transpose(0, 1, 3, 5, 2, 4, 6, 7)
    return p.reshape(-1, 27 * Ci)


def _interleave(z, N, Dc, Hc, Wc, Co):
    """(N*Dc*Hc*Wc, 8*Co) window-major -> (N*(2Dc)*(2Hc)*(2Wc), Co) standard rows."""
    z = z.reshape(N, Dc, Hc, Wc, 2, 2, 2, Co)
    z = z.transpose(0, 1, 4, 2, 5, 3, 6, 7)
    return z.reshape(-1, Co)


def encoder_stage(x, w, b):
    """BasicBlock(3x3x3 'same' conv + ReLU) with MaxPool3d(2) epilogue.

    Returns (skip, pooled): skip is (M//8, 8*Co) bf16 in decoder-ready layout,
    pooled is (N, D//2, H//2, W//2, Co) NDHWC bf16 for the next stage.
    """
    N, D, H, W, _ = x.shape
    Co = w.shape[1]
    pat = _im2col_3x3x3(x, window_major=True)
    y = conv_matmul_relu(pat, w, b)                       # (M, Co), window-major rows
    M = y.shape[0]
    skip = y.reshape(M // 8, 8 * Co)                      # decoder-ready skip layout
    pooled = jnp.max(y.reshape(M // 8, 8, Co), axis=1)    # MaxPool3d(2)
    pooled = pooled.reshape(N, D // 2, H // 2, W // 2, Co)
    return skip, pooled


def bottleneck_stage(x, w, b):
    pat = _im2col_3x3x3(x, window_major=False)
    return conv_matmul_relu(pat, w, b)                    # standard-order rows


# ---------------------------------------------------------------------------
# EncoderConvOnly: parameters + forward
# ---------------------------------------------------------------------------
def init_params(key, base_channels=8, depth=4):
    C = base_channels
    ks = iter(jax.random.split(key, 64))

    def cw(shape, fan_in):
        return jax.random.normal(next(ks), shape, jnp.float32) / jnp.sqrt(float(fan_in))

    def cb(co):
        return 0.01 * jax.random.normal(next(ks), (co,), jnp.float32)

    p = {}
    enc_ch = [(1, C), (C, 2 * C), (2 * C, 4 * C)]
    for i, (ci, co) in enumerate(enc_ch):
        p[f"enc{i}_w"] = cw((3, 3, 3, ci, co), 27 * ci)
        p[f"enc{i}_b"] = cb(co)
    p["bott_w"] = cw((3, 3, 3, 4 * C, 8 * C), 27 * 4 * C)
    p["bott_b"] = cb(8 * C)
    for i in range(depth - 1):
        ci, co = (2 ** (i + 1)) * C, (2 ** i) * C
        p[f"up{i}_w"] = cw((ci, 2, 2, 2, co), ci)      # ConvTranspose3d(ci->co, k=s=2)
        p[f"up{i}_b"] = cb(co)
        p[f"dec{i}_w"] = cw((co, co), co)              # decode: 1x1 conv
        p[f"dec{i}_b"] = cb(co)
    p["out_w"] = cw((C, 1), C)                         # out: 1x1 conv -> sigmoid
    p["out_b"] = cb(1)
    return p


def prepare_params(p):
    """Convert raw params to fused-kernel layouts: bf16 matmul weights, (1,n) f32
    biases, 8x-tiled biases and block-diagonal 1x1 weights for the fused decoder."""
    q = {}
    eye8 = jnp.eye(8, dtype=jnp.float32)
    for name in ("enc0", "enc1", "enc2", "bott"):
        w = p[f"{name}_w"]
        ci, co = w.shape[3], w.shape[4]
        q[f"{name}_w"] = w.reshape(27 * ci, co).astype(jnp.bfloat16)
        q[f"{name}_b"] = p[f"{name}_b"].reshape(1, co).astype(jnp.float32)
    for i in range(3):
        wu = p[f"up{i}_w"]
        ci, co = wu.shape[0], wu.shape[-1]
        q[f"up{i}_w"] = wu.reshape(ci, 8 * co).astype(jnp.bfloat16)
        q[f"up{i}_b"] = jnp.tile(p[f"up{i}_b"], 8).reshape(1, 8 * co).astype(jnp.float32)
        q[f"dec{i}_w"] = jnp.kron(eye8, p[f"dec{i}_w"]).astype(jnp.bfloat16)
        q[f"dec{i}_b"] = jnp.tile(p[f"dec{i}_b"], 8).reshape(1, 8 * co).astype(jnp.float32)
    q["out_w"] = jnp.kron(eye8, p["out_w"]).astype(jnp.bfloat16)   # (8C, 8) block-diag
    q["out_b"] = jnp.tile(p["out_b"], 8).reshape(1, 8).astype(jnp.float32)
    return q


def encoder_conv_only_forward(x, p):
    """x: NDHWC (N, D, H, W, 1) f32 (== PyTorch NCDHW (N, 1, D, H, W))."""
    N, D, H, W, _ = x.shape
    h = x.astype(jnp.bfloat16)

    skips = []
    for i in range(3):                                   # encoder path (+ fused pool)
        skip, h = encoder_stage(h, p[f"enc{i}_w"], p[f"enc{i}_b"])
        skips.append(skip)

    z = bottleneck_stage(h, p["bott_w"], p["bott_b"])    # (N*2*2*2, 8C) standard rows

    for i in (2, 1):                                     # fused up + skip + decode
        z = decoder_stage(z, skips[i], p[f"up{i}_w"], p[f"up{i}_b"],
                          p[f"dec{i}_w"], p[f"dec{i}_b"])
        s = 1 << (i + 1)                                 # coarse-grid shrink factor
        co = p[f"dec{i}_w"].shape[1] // 8
        z = _interleave(z, N, D // s, H // s, W // s, co)

    # final stage: up0 + skip + decode0 + out(1x1) + sigmoid fused into one kernel
    o = decoder_stage(z, skips[0], p["up0_w"], p["up0_b"],
                      p["dec0_w"], p["dec0_b"], p["out_w"], p["out_b"])
    out = _interleave(o, N, D // 2, H // 2, W // 2, 1)   # (N*D*H*W, 1) f32
    return out.reshape(N, D, H, W, 1)


# ---------------------------------------------------------------------------
if __name__ == "__main__":
    key = jax.random.PRNGKey(0)
    k_in, k_par = jax.random.split(key)

    N, D, H, W = 2, 16, 16, 16            # PyTorch NCDHW input (2, 1, 16, 16, 16)
    x_ndhwc = jax.random.normal(k_in, (N, D, H, W, 1), jnp.float32)

    params = prepare_params(init_params(k_par, base_channels=8, depth=4))

    fwd = jax.jit(encoder_conv_only_forward)
    out = jax.block_until_ready(fwd(x_ndhwc, params))

    assert out.shape == (N, D, H, W, 1), out.shape
    assert bool(jnp.all(jnp.isfinite(out)))
    assert bool(jnp.all((out >= 0.0) & (out <= 1.0)))    # sigmoid range
    print("KERNEL_OK")
</pallas_src>

<mosaic_0001>
module attributes {stable_mosaic.version = 11 : i64} {
  func.func @_conv_relu_kernel(%arg0: i32, %arg1: memref<4096x27xbf16, #tpu.memory_space<vmem>>, %arg2: memref<27x8xbf16, #tpu.memory_space<vmem>>, %arg3: memref<1x8xf32, #tpu.memory_space<vmem>>, %arg4: memref<4096x8xbf16, #tpu.memory_space<vmem>>) attributes {dimension_semantics = [#tpu.dimension_semantics<parallel>], iteration_bounds = array<i64: 2>, scalar_prefetch = 0 : i64, scratch_operands = 0 : i64, tpu.core_type = #tpu.core_type<tc>, window_params = [{transform_indices = @transform_0, window_bounds = array<i64: 4096, 27>}, {pipeline_mode = #tpu.pipeline_mode<synchronous>, transform_indices = @transform_1, window_bounds = array<i64: 27, 8>}, {pipeline_mode = #tpu.pipeline_mode<synchronous>, transform_indices = @transform_2, window_bounds = array<i64: 1, 8>}, {transform_indices = @transform_3, window_bounds = array<i64: 4096, 8>}]} {
    %c0 = arith.constant 0 : index
    %c0_0 = arith.constant 0 : index
    %0 = vector.load %arg1[%c0, %c0_0] : memref<4096x27xbf16, #tpu.memory_space<vmem>>, vector<4096x27xbf16>
    %c0_1 = arith.constant 0 : index
    %c0_2 = arith.constant 0 : index
    %1 = vector.load %arg2[%c0_1, %c0_2] : memref<27x8xbf16, #tpu.memory_space<vmem>>, vector<27x8xbf16>
    %cst = arith.constant dense<0.000000e+00> : vector<4096x8xf32>
    %2 = tpu.matmul %0, %1, %cst {dimension_numbers = #tpu.dot_dimension_numbers<[1], [0], [0], [1], [0, 0, 1, 1], [], []>} : vector<4096x27xbf16>, vector<27x8xbf16>, vector<4096x8xf32> -> vector<4096x8xf32>
    %c0_3 = arith.constant 0 : index
    %c0_4 = arith.constant 0 : index
    %3 = vector.load %arg3[%c0_3, %c0_4] : memref<1x8xf32, #tpu.memory_space<vmem>>, vector<1x8xf32>
    %4 = vector.broadcast %3 : vector<1x8xf32> to vector<4096x8xf32>
    %5 = arith.addf %2, %4 : vector<4096x8xf32>
    %cst_5 = arith.constant 0.000000e+00 : f32
    %6 = vector.broadcast %cst_5 : f32 to vector<4096x8xf32>
    %7 = arith.maximumf %5, %6 : vector<4096x8xf32>
    %8 = arith.truncf %7 : vector<4096x8xf32> to vector<4096x8xbf16>
    %c0_6 = arith.constant 0 : index
    %c0_7 = arith.constant 0 : index
    %9 = vector.load %arg4[%c0_6, %c0_7] : memref<4096x8xbf16, #tpu.memory_space<vmem>>, vector<4096x8xbf16>
    tpu.vector_store %arg4[%c0_6, %c0_7], %8 {strides = array<i32>} : memref<4096x8xbf16, #tpu.memory_space<vmem>>, vector<4096x8xbf16>,
    return
  }
  func.func @transform_0(%arg0: i32) -> (i32, i32) {
    %c0_i32 = arith.constant 0 : i32
    %c0_i32_0 = arith.constant 0 : i32
    return %arg0, %c0_i32 : i32, i32
  }
  func.func @transform_1(%arg0: i32) -> (i32, i32) {
    %c0_i32 = arith.constant 0 : i32
    %c0_i32_0 = arith.constant 0 : i32
    %c0_i32_1 = arith.constant 0 : i32
    return %c0_i32, %c0_i32_0 : i32, i32
  }
  func.func @transform_2(%arg0: i32) -> (i32, i32) {
    %c0_i32 = arith.constant 0 : i32
    %c0_i32_0 = arith.constant 0 : i32
    %c0_i32_1 = arith.constant 0 : i32
    return %c0_i32, %c0_i32_0 : i32, i32
  }
  func.func @transform_3(%arg0: i32) -> (i32, i32) {
    %c0_i32 = arith.constant 0 : i32
    %c0_i32_0 = arith.constant 0 : i32
    return %arg0, %c0_i32 : i32, i32
  }
}

module attributes {stable_mosaic.version = 11 : i64} {
  func.func @_conv_relu_kernel(%arg0: i32, %arg1: memref<512x216xbf16, #tpu.memory_space<vmem>>, %arg2: memref<216x16xbf16, #tpu.memory_space<vmem>>, %arg3: memref<1x16xf32, #tpu.memory_space<vmem>>, %arg4: memref<512x16xbf16, #tpu.memory_space<vmem>>) attributes {dimension_semantics = [#tpu.dimension_semantics<parallel>], iteration_bounds = array<i64: 2>, scalar_prefetch = 0 : i64, scratch_operands = 0 : i64, tpu.core_type = #tpu.core_type<tc>, window_params = [{transform_indices = @transform_0, window_bounds = array<i64: 512, 216>}, {pipeline_mode = #tpu.pipeline_mode<synchronous>, transform_indices = @transform_1, window_bounds = array<i64: 216, 16>}, {pipeline_mode = #tpu.pipeline_mode<synchronous>, transform_indices = @transform_2, window_bounds = array<i64: 1, 16>}, {transform_indices = @transform_3, window_bounds = array<i64: 512, 16>}]} {
    %c0 = arith.constant 0 : index
    %c0_0 = arith.constant 0 : index
    %0 = vector.load %arg1[%c0, %c0_0] : memref<512x216xbf16, #tpu.memory_space<vmem>>, vector<512x216xbf16>
    %c0_1 = arith.constant 0 : index
    %c0_2 = arith.constant 0 : index
    %1 = vector.load %arg2[%c0_1, %c0_2] : memref<216x16xbf16, #tpu.memory_space<vmem>>, vector<216x16xbf16>
    %cst = arith.constant dense<0.000000e+00> : vector<512x16xf32>
    %2 = tpu.matmul %0, %1, %cst {dimension_numbers = #tpu.dot_dimension_numbers<[1], [0], [0], [1], [0, 0, 1, 1], [], []>} : vector<512x216xbf16>, vector<216x16xbf16>, vector<512x16xf32> -> vector<512x16xf32>
    %c0_3 = arith.constant 0 : index
    %c0_4 = arith.constant 0 : index
    %3 = vector.load %arg3[%c0_3, %c0_4] : memref<1x16xf32, #tpu.memory_space<vmem>>, vector<1x16xf32>
    %4 = vector.broadcast %3 : vector<1x16xf32> to vector<512x16xf32>
    %5 = arith.addf %2, %4 : vector<512x16xf32>
    %cst_5 = arith.constant 0.000000e+00 : f32
    %6 = vector.broadcast %cst_5 : f32 to vector<512x16xf32>
    %7 = arith.maximumf %5, %6 : vector<512x16xf32>
    %8 = arith.truncf %7 : vector<512x16xf32> to vector<512x16xbf16>
    %c0_6 = arith.constant 0 : index
    %c0_7 = arith.constant 0 : index
    %9 = vector.load %arg4[%c0_6, %c0_7] : memref<512x16xbf16, #tpu.memory_space<vmem>>, vector<512x16xbf16>
    tpu.vector_store %arg4[%c0_6, %c0_7], %8 {strides = array<i32>} : memref<512x16xbf16, #tpu.memory_space<vmem>>, vector<512x16xbf16>,
    return
  }
  func.func @transform_0(%arg0: i32) -> (i32, i32) {
    %c0_i32 = arith.constant 0 : i32
    %c0_i32_0 = arith.constant 0 : i32
    return %arg0, %c0_i32 : i32, i32
  }
  func.func @transform_1(%arg0: i32) -> (i32, i32) {
    %c0_i32 = arith.constant 0 : i32
    %c0_i32_0 = arith.constant 0 : i32
    %c0_i32_1 = arith.constant 0 : i32
    return %c0_i32, %c0_i32_0 : i32, i32
  }
  func.func @transform_2(%arg0: i32) -> (i32, i32) {
    %c0_i32 = arith.constant 0 : i32
    %c0_i32_0 = arith.constant 0 : i32
    %c0_i32_1 = arith.constant 0 : i32
    return %c0_i32, %c0_i32_0 : i32, i32
  }
  func.func @transform_3(%arg0: i32) -> (i32, i32) {
    %c0_i32 = arith.constant 0 : i32
    %c0_i32_0 = arith.constant 0 : i32
    return %arg0, %c0_i32 : i32, i32
  }
}

module attributes {stable_mosaic.version = 11 : i64} {
  func.func @_conv_relu_kernel(%arg0: i32, %arg1: memref<128x432xbf16, #tpu.memory_space<vmem>>, %arg2: memref<432x32xbf16, #tpu.memory_space<vmem>>, %arg3: memref<1x32xf32, #tpu.memory_space<vmem>>, %arg4: memref<128x32xbf16, #tpu.memory_space<vmem>>) attributes {dimension_semantics = [#tpu.dimension_semantics<parallel>], iteration_bounds = array<i64: 1>, scalar_prefetch = 0 : i64, scratch_operands = 0 : i64, tpu.core_type = #tpu.core_type<tc>, window_params = [{transform_indices = @transform_0, window_bounds = array<i64: 128, 432>}, {pipeline_mode = #tpu.pipeline_mode<synchronous>, transform_indices = @transform_1, window_bounds = array<i64: 432, 32>}, {pipeline_mode = #tpu.pipeline_mode<synchronous>, transform_indices = @transform_2, window_bounds = array<i64: 1, 32>}, {transform_indices = @transform_3, window_bounds = array<i64: 128, 32>}]} {
    %c0 = arith.constant 0 : index
    %c0_0 = arith.constant 0 : index
    %0 = vector.load %arg1[%c0, %c0_0] : memref<128x432xbf16, #tpu.memory_space<vmem>>, vector<128x432xbf16>
    %c0_1 = arith.constant 0 : index
    %c0_2 = arith.constant 0 : index
    %1 = vector.load %arg2[%c0_1, %c0_2] : memref<432x32xbf16, #tpu.memory_space<vmem>>, vector<432x32xbf16>
    %cst = arith.constant dense<0.000000e+00> : vector<128x32xf32>
    %2 = tpu.matmul %0, %1, %cst {dimension_numbers = #tpu.dot_dimension_numbers<[1], [0], [0], [1], [0, 0, 1, 1], [], []>} : vector<128x432xbf16>, vector<432x32xbf16>, vector<128x32xf32> -> vector<128x32xf32>
    %c0_3 = arith.constant 0 : index
    %c0_4 = arith.constant 0 : index
    %3 = vector.load %arg3[%c0_3, %c0_4] : memref<1x32xf32, #tpu.memory_space<vmem>>, vector<1x32xf32>
    %4 = vector.broadcast %3 : vector<1x32xf32> to vector<128x32xf32>
    %5 = arith.addf %2, %4 : vector<128x32xf32>
    %cst_5 = arith.constant 0.000000e+00 : f32
    %6 = vector.broadcast %cst_5 : f32 to vector<128x32xf32>
    %7 = arith.maximumf %5, %6 : vector<128x32xf32>
    %8 = arith.truncf %7 : vector<128x32xf32> to vector<128x32xbf16>
    %c0_6 = arith.constant 0 : index
    %c0_7 = arith.constant 0 : index
    %9 = vector.load %arg4[%c0_6, %c0_7] : memref<128x32xbf16, #tpu.memory_space<vmem>>, vector<128x32xbf16>
    tpu.vector_store %arg4[%c0_6, %c0_7], %8 {strides = array<i32>} : memref<128x32xbf16, #tpu.memory_space<vmem>>, vector<128x32xbf16>,
    return
  }
  func.func @transform_0(%arg0: i32) -> (i32, i32) {
    %c0_i32 = arith.constant 0 : i32
    %c0_i32_0 = arith.constant 0 : i32
    return %arg0, %c0_i32 : i32, i32
  }
  func.func @transform_1(%arg0: i32) -> (i32, i32) {
    %c0_i32 = arith.constant 0 : i32
    %c0_i32_0 = arith.constant 0 : i32
    %c0_i32_1 = arith.constant 0 : i32
    return %c0_i32, %c0_i32_0 : i32, i32
  }
  func.func @transform_2(%arg0: i32) -> (i32, i32) {
    %c0_i32 = arith.constant 0 : i32
    %c0_i32_0 = arith.constant 0 : i32
    %c0_i32_1 = arith.constant 0 : i32
    return %c0_i32, %c0_i32_0 : i32, i32
  }
  func.func @transform_3(%arg0: i32) -> (i32, i32) {
    %c0_i32 = arith.constant 0 : i32
    %c0_i32_0 = arith.constant 0 : i32
    return %arg0, %c0_i32 : i32, i32
  }
}

module attributes {stable_mosaic.version = 11 : i64} {
  func.func @_conv_relu_kernel(%arg0: i32, %arg1: memref<16x864xbf16, #tpu.memory_space<vmem>>, %arg2: memref<864x64xbf16, #tpu.memory_space<vmem>>, %arg3: memref<1x64xf32, #tpu.memory_space<vmem>>, %arg4: memref<16x64xbf16, #tpu.memory_space<vmem>>) attributes {dimension_semantics = [#tpu.dimension_semantics<parallel>], iteration_bounds = array<i64: 1>, scalar_prefetch = 0 : i64, scratch_operands = 0 : i64, tpu.core_type = #tpu.core_type<tc>, window_params = [{transform_indices = @transform_0, window_bounds = array<i64: 16, 864>}, {pipeline_mode = #tpu.pipeline_mode<synchronous>, transform_indices = @transform_1, window_bounds = array<i64: 864, 64>}, {pipeline_mode = #tpu.pipeline_mode<synchronous>, transform_indices = @transform_2, window_bounds = array<i64: 1, 64>}, {transform_indices = @transform_3, window_bounds = array<i64: 16, 64>}]} {
    %c0 = arith.constant 0 : index
    %c0_0 = arith.constant 0 : index
    %0 = vector.load %arg1[%c0, %c0_0] : memref<16x864xbf16, #tpu.memory_space<vmem>>, vector<16x864xbf16>
    %c0_1 = arith.constant 0 : index
    %c0_2 = arith.constant 0 : index
    %1 = vector.load %arg2[%c0_1, %c0_2] : memref<864x64xbf16, #tpu.memory_space<vmem>>, vector<864x64xbf16>
    %cst = arith.constant dense<0.000000e+00> : vector<16x64xf32>
    %2 = tpu.matmul %0, %1, %cst {dimension_numbers = #tpu.dot_dimension_numbers<[1], [0], [0], [1], [0, 0, 1, 1], [], []>} : vector<16x864xbf16>, vector<864x64xbf16>, vector<16x64xf32> -> vector<16x64xf32>
    %c0_3 = arith.constant 0 : index
    %c0_4 = arith.constant 0 : index
    %3 = vector.load %arg3[%c0_3, %c0_4] : memref<1x64xf32, #tpu.memory_space<vmem>>, vector<1x64xf32>
    %4 = vector.broadcast %3 : vector<1x64xf32> to vector<16x64xf32>
    %5 = arith.addf %2, %4 : vector<16x64xf32>
    %cst_5 = arith.constant 0.000000e+00 : f32
    %6 = vector.broadcast %cst_5 : f32 to vector<16x64xf32>
    %7 = arith.maximumf %5, %6 : vector<16x64xf32>
    %8 = arith.truncf %7 : vector<16x64xf32> to vector<16x64xbf16>
    %c0_6 = arith.constant 0 : index
    %c0_7 = arith.constant 0 : index
    %9 = vector.load %arg4[%c0_6, %c0_7] : memref<16x64xbf16, #tpu.memory_space<vmem>>, vector<16x64xbf16>
    tpu.vector_store %arg4[%c0_6, %c0_7], %8 {strides = array<i32>} : memref<16x64xbf16, #tpu.memory_space<vmem>>, vector<16x64xbf16>,
    return
  }
  func.func @transform_0(%arg0: i32) -> (i32, i32) {
    %c0_i32 = arith.constant 0 : i32
    %c0_i32_0 = arith.constant 0 : i32
    return %arg0, %c0_i32 : i32, i32
  }
  func.func @transform_1(%arg0: i32) -> (i32, i32) {
    %c0_i32 = arith.constant 0 : i32
    %c0_i32_0 = arith.constant 0 : i32
    %c0_i32_1 = arith.constant 0 : i32
    return %c0_i32, %c0_i32_0 : i32, i32
  }
  func.func @transform_2(%arg0: i32) -> (i32, i32) {
    %c0_i32 = arith.constant 0 : i32
    %c0_i32_0 = arith.constant 0 : i32
    %c0_i32_1 = arith.constant 0 : i32
    return %c0_i32, %c0_i32_0 : i32, i32
  }
  func.func @transform_3(%arg0: i32) -> (i32, i32) {
    %c0_i32 = arith.constant 0 : i32
    %c0_i32_0 = arith.constant 0 : i32
    return %arg0, %c0_i32 : i32, i32
  }
}

module attributes {stable_mosaic.version = 11 : i64} {
  func.func @_dec_stage_kernel(%arg0: i32, %arg1: memref<16x64xbf16, #tpu.memory_space<vmem>>, %arg2: memref<16x256xbf16, #tpu.memory_space<vmem>>, %arg3: memref<64x256xbf16, #tpu.memory_space<vmem>>, %arg4: memref<1x256xf32, #tpu.memory_space<vmem>>, %arg5: memref<256x256xbf16, #tpu.memory_space<vmem>>, %arg6: memref<1x256xf32, #tpu.memory_space<vmem>>, %arg7: memref<16x256xbf16, #tpu.memory_space<vmem>>) attributes {dimension_semantics = [#tpu.dimension_semantics<parallel>], iteration_bounds = array<i64: 1>, scalar_prefetch = 0 : i64, scratch_operands = 0 : i64, tpu.core_type = #tpu.core_type<tc>, window_params = [{transform_indices = @transform_0, window_bounds = array<i64: 16, 64>}, {transform_indices = @transform_1, window_bounds = array<i64: 16, 256>}, {pipeline_mode = #tpu.pipeline_mode<synchronous>, transform_indices = @transform_2, window_bounds = array<i64: 64, 256>}, {pipeline_mode = #tpu.pipeline_mode<synchronous>, transform_indices = @transform_3, window_bounds = array<i64: 1, 256>}, {pipeline_mode = #tpu.pipeline_mode<synchronous>, transform_indices = @transform_4, window_bounds = array<i64: 256, 256>}, {pipeline_mode = #tpu.pipeline_mode<synchronous>, transform_indices = @transform_5, window_bounds = array<i64: 1, 256>}, {transform_indices = @transform_6, window_bounds = array<i64: 16, 256>}]} {
    %c0 = arith.constant 0 : index
    %c0_0 = arith.constant 0 : index
    %0 = vector.load %arg1[%c0, %c0_0] : memref<16x64xbf16, #tpu.memory_space<vmem>>, vector<16x64xbf16>
    %c0_1 = arith.constant 0 : index
    %c0_2 = arith.constant 0 : index
    %1 = vector.load %arg3[%c0_1, %c0_2] : memref<64x256xbf16, #tpu.memory_space<vmem>>, vector<64x256xbf16>
    %cst = arith.constant dense<0.000000e+00> : vector<16x256xf32>
    %2 = tpu.matmul %0, %1, %cst {dimension_numbers = #tpu.dot_dimension_numbers<[1], [0], [0], [1], [0, 0, 1, 1], [], []>} : vector<16x64xbf16>, vector<64x256xbf16>, vector<16x256xf32> -> vector<16x256xf32>
    %c0_3 = arith.constant 0 : index
    %c0_4 = arith.constant 0 : index
    %3 = vector.load %arg4[%c0_3, %c0_4] : memref<1x256xf32, #tpu.memory_space<vmem>>, vector<1x256xf32>
    %4 = vector.broadcast %3 : vector<1x256xf32> to vector<16x256xf32>
    %5 = arith.addf %2, %4 : vector<16x256xf32>
    %c0_5 = arith.constant 0 : index
    %c0_6 = arith.constant 0 : index
    %6 = vector.load %arg2[%c0_5, %c0_6] : memref<16x256xbf16, #tpu.memory_space<vmem>>, vector<16x256xbf16>
    %7 = arith.extf %6 : vector<16x256xbf16> to vector<16x256xf32>
    %8 = arith.addf %5, %7 : vector<16x256xf32>
    %9 = arith.truncf %8 : vector<16x256xf32> to vector<16x256xbf16>
    %c0_7 = arith.constant 0 : index
    %c0_8 = arith.constant 0 : index
    %10 = vector.load %arg5[%c0_7, %c0_8] : memref<256x256xbf16, #tpu.memory_space<vmem>>, vector<256x256xbf16>
    %cst_9 = arith.constant dense<0.000000e+00> : vector<16x256xf32>
    %11 = tpu.matmul %9, %10, %cst_9 {dimension_numbers = #tpu.dot_dimension_numbers<[1], [0], [0], [1], [0, 0, 1, 1], [], []>} : vector<16x256xbf16>, vector<256x256xbf16>, vector<16x256xf32> -> vector<16x256xf32>
    %c0_10 = arith.constant 0 : index
    %c0_11 = arith.constant 0 : index
    %12 = vector.load %arg6[%c0_10, %c0_11] : memref<1x256xf32, #tpu.memory_space<vmem>>, vector<1x256xf32>
    %13 = vector.broadcast %12 : vector<1x256xf32> to vector<16x256xf32>
    %14 = arith.addf %11, %13 : vector<16x256xf32>
    %cst_12 = arith.constant 0.000000e+00 : f32
    %15 = vector.broadcast %cst_12 : f32 to vector<16x256xf32>
    %16 = arith.maximumf %14, %15 : vector<16x256xf32>
    %17 = arith.truncf %16 : vector<16x256xf32> to vector<16x256xbf16>
    %c0_13 = arith.constant 0 : index
    %c0_14 = arith.constant 0 : index
    %18 = vector.load %arg7[%c0_13, %c0_14] : memref<16x256xbf16, #tpu.memory_space<vmem>>, vector<16x256xbf16>
    tpu.vector_store %arg7[%c0_13, %c0_14], %17 {strides = array<i32>} : memref<16x256xbf16, #tpu.memory_space<vmem>>, vector<16x256xbf16>,
    return
  }
  func.func @transform_0(%arg0: i32) -> (i32, i32) {
    %c0_i32 = arith.constant 0 : i32
    %c0_i32_0 = arith.constant 0 : i32
    return %arg0, %c0_i32 : i32, i32
  }
  func.func @transform_1(%arg0: i32) -> (i32, i32) {
    %c0_i32 = arith.constant 0 : i32
    %c0_i32_0 = arith.constant 0 : i32
    return %arg0, %c0_i32 : i32, i32
  }
  func.func @transform_2(%arg0: i32) -> (i32, i32) {
    %c0_i32 = arith.constant 0 : i32
    %c0_i32_0 = arith.constant 0 : i32
    %c0_i32_1 = arith.constant 0 : i32
    return %c0_i32, %c0_i32_0 : i32, i32
  }
  func.func @transform_3(%arg0: i32) -> (i32, i32) {
    %c0_i32 = arith.constant 0 : i32
    %c0_i32_0 = arith.constant 0 : i32
    %c0_i32_1 = arith.constant 0 : i32
    return %c0_i32, %c0_i32_0 : i32, i32
  }
  func.func @transform_4(%arg0: i32) -> (i32, i32) {
    %c0_i32 = arith.constant 0 : i32
    %c0_i32_0 = arith.constant 0 : i32
    %c0_i32_1 = arith.constant 0 : i32
    return %c0_i32, %c0_i32_0 : i32, i32
  }
  func.func @transform_5(%arg0: i32) -> (i32, i32) {
    %c0_i32 = arith.constant 0 : i32
    %c0_i32_0 = arith.constant 0 : i32
    %c0_i32_1 = arith.constant 0 : i32
    return %c0_i32, %c0_i32_0 : i32, i32
  }
  func.func @transform_6(%arg0: i32) -> (i32, i32) {
    %c0_i32 = arith.constant 0 : i32
    %c0_i32_0 = arith.constant 0 : i32
    return %arg0, %c0_i32 : i32, i32
  }
}

module attributes {stable_mosaic.version = 11 : i64} {
  func.func @_dec_stage_kernel(%arg0: i32, %arg1: memref<128x32xbf16, #tpu.memory_space<vmem>>, %arg2: memref<128x128xbf16, #tpu.memory_space<vmem>>, %arg3: memref<32x128xbf16, #tpu.memory_space<vmem>>, %arg4: memref<1x128xf32, #tpu.memory_space<vmem>>, %arg5: memref<128x128xbf16, #tpu.memory_space<vmem>>, %arg6: memref<1x128xf32, #tpu.memory_space<vmem>>, %arg7: memref<128x128xbf16, #tpu.memory_space<vmem>>) attributes {dimension_semantics = [#tpu.dimension_semantics<parallel>], iteration_bounds = array<i64: 1>, scalar_prefetch = 0 : i64, scratch_operands = 0 : i64, tpu.core_type = #tpu.core_type<tc>, window_params = [{transform_indices = @transform_0, window_bounds = array<i64: 128, 32>}, {transform_indices = @transform_1, window_bounds = array<i64: 128, 128>}, {pipeline_mode = #tpu.pipeline_mode<synchronous>, transform_indices = @transform_2, window_bounds = array<i64: 32, 128>}, {pipeline_mode = #tpu.pipeline_mode<synchronous>, transform_indices = @transform_3, window_bounds = array<i64: 1, 128>}, {pipeline_mode = #tpu.pipeline_mode<synchronous>, transform_indices = @transform_4, window_bounds = array<i64: 128, 128>}, {pipeline_mode = #tpu.pipeline_mode<synchronous>, transform_indices = @transform_5, window_bounds = array<i64: 1, 128>}, {transform_indices = @transform_6, window_bounds = array<i64: 128, 128>}]} {
    %c0 = arith.constant 0 : index
    %c0_0 = arith.constant 0 : index
    %0 = vector.load %arg1[%c0, %c0_0] : memref<128x32xbf16, #tpu.memory_space<vmem>>, vector<128x32xbf16>
    %c0_1 = arith.constant 0 : index
    %c0_2 = arith.constant 0 : index
    %1 = vector.load %arg3[%c0_1, %c0_2] : memref<32x128xbf16, #tpu.memory_space<vmem>>, vector<32x128xbf16>
    %cst = arith.constant dense<0.000000e+00> : vector<128x128xf32>
    %2 = tpu.matmul %0, %1, %cst {dimension_numbers = #tpu.dot_dimension_numbers<[1], [0], [0], [1], [0, 0, 1, 1], [], []>} : vector<128x32xbf16>, vector<32x128xbf16>, vector<128x128xf32> -> vector<128x128xf32>
    %c0_3 = arith.constant 0 : index
    %c0_4 = arith.constant 0 : index
    %3 = vector.load %arg4[%c0_3, %c0_4] : memref<1x128xf32, #tpu.memory_space<vmem>>, vector<1x128xf32>
    %4 = vector.broadcast %3 : vector<1x128xf32> to vector<128x128xf32>
    %5 = arith.addf %2, %4 : vector<128x128xf32>
    %c0_5 = arith.constant 0 : index
    %c0_6 = arith.constant 0 : index
    %6 = vector.load %arg2[%c0_5, %c0_6] : memref<128x128xbf16, #tpu.memory_space<vmem>>, vector<128x128xbf16>
    %7 = arith.extf %6 : vector<128x128xbf16> to vector<128x128xf32>
    %8 = arith.addf %5, %7 : vector<128x128xf32>
    %9 = arith.truncf %8 : vector<128x128xf32> to vector<128x128xbf16>
    %c0_7 = arith.constant 0 : index
    %c0_8 = arith.constant 0 : index
    %10 = vector.load %arg5[%c0_7, %c0_8] : memref<128x128xbf16, #tpu.memory_space<vmem>>, vector<128x128xbf16>
    %cst_9 = arith.constant dense<0.000000e+00> : vector<128x128xf32>
    %11 = tpu.matmul %9, %10, %cst_9 {dimension_numbers = #tpu.dot_dimension_numbers<[1], [0], [0], [1], [0, 0, 1, 1], [], []>} : vector<128x128xbf16>, vector<128x128xbf16>, vector<128x128xf32> -> vector<128x128xf32>
    %c0_10 = arith.constant 0 : index
    %c0_11 = arith.constant 0 : index
    %12 = vector.load %arg6[%c0_10, %c0_11] : memref<1x128xf32, #tpu.memory_space<vmem>>, vector<1x128xf32>
    %13 = vector.broadcast %12 : vector<1x128xf32> to vector<128x128xf32>
    %14 = arith.addf %11, %13 : vector<128x128xf32>
    %cst_12 = arith.constant 0.000000e+00 : f32
    %15 = vector.broadcast %cst_12 : f32 to vector<128x128xf32>
    %16 = arith.maximumf %14, %15 : vector<128x128xf32>
    %17 = arith.truncf %16 : vector<128x128xf32> to vector<128x128xbf16>
    %c0_13 = arith.constant 0 : index
    %c0_14 = arith.constant 0 : index
    %18 = vector.load %arg7[%c0_13, %c0_14] : memref<128x128xbf16, #tpu.memory_space<vmem>>, vector<128x128xbf16>
    tpu.vector_store %arg7[%c0_13, %c0_14], %17 {strides = array<i32>} : memref<128x128xbf16, #tpu.memory_space<vmem>>, vector<128x128xbf16>,
    return
  }
  func.func @transform_0(%arg0: i32) -> (i32, i32) {
    %c0_i32 = arith.constant 0 : i32
    %c0_i32_0 = arith.constant 0 : i32
    return %arg0, %c0_i32 : i32, i32
  }
  func.func @transform_1(%arg0: i32) -> (i32, i32) {
    %c0_i32 = arith.constant 0 : i32
    %c0_i32_0 = arith.constant 0 : i32
    return %arg0, %c0_i32 : i32, i32
  }
  func.func @transform_2(%arg0: i32) -> (i32, i32) {
    %c0_i32 = arith.constant 0 : i32
    %c0_i32_0 = arith.constant 0 : i32
    %c0_i32_1 = arith.constant 0 : i32
    return %c0_i32, %c0_i32_0 : i32, i32
  }
  func.func @transform_3(%arg0: i32) -> (i32, i32) {
    %c0_i32 = arith.constant 0 : i32
    %c0_i32_0 = arith.constant 0 : i32
    %c0_i32_1 = arith.constant 0 : i32
    return %c0_i32, %c0_i32_0 : i32, i32
  }
  func.func @transform_4(%arg0: i32) -> (i32, i32) {
    %c0_i32 = arith.constant 0 : i32
    %c0_i32_0 = arith.constant 0 : i32
    %c0_i32_1 = arith.constant 0 : i32
    return %c0_i32, %c0_i32_0 : i32, i32
  }
  func.func @transform_5(%arg0: i32) -> (i32, i32) {
    %c0_i32 = arith.constant 0 : i32
    %c0_i32_0 = arith.constant 0 : i32
    %c0_i32_1 = arith.constant 0 : i32
    return %c0_i32, %c0_i32_0 : i32, i32
  }
  func.func @transform_6(%arg0: i32) -> (i32, i32) {
    %c0_i32 = arith.constant 0 : i32
    %c0_i32_0 = arith.constant 0 : i32
    return %arg0, %c0_i32 : i32, i32
  }
}

module attributes {stable_mosaic.version = 11 : i64} {
  func.func @_dec_out_kernel(%arg0: i32, %arg1: memref<512x16xbf16, #tpu.memory_space<vmem>>, %arg2: memref<512x64xbf16, #tpu.memory_space<vmem>>, %arg3: memref<16x64xbf16, #tpu.memory_space<vmem>>, %arg4: memref<1x64xf32, #tpu.memory_space<vmem>>, %arg5: memref<64x64xbf16, #tpu.memory_space<vmem>>, %arg6: memref<1x64xf32, #tpu.memory_space<vmem>>, %arg7: memref<64x8xbf16, #tpu.memory_space<vmem>>, %arg8: memref<1x8xf32, #tpu.memory_space<vmem>>, %arg9: memref<512x8xf32, #tpu.memory_space<vmem>>) attributes {dimension_semantics = [#tpu.dimension_semantics<parallel>], iteration_bounds = array<i64: 2>, scalar_prefetch = 0 : i64, scratch_operands = 0 : i64, tpu.core_type = #tpu.core_type<tc>, window_params = [{transform_indices = @transform_0, window_bounds = array<i64: 512, 16>}, {transform_indices = @transform_1, window_bounds = array<i64: 512, 64>}, {pipeline_mode = #tpu.pipeline_mode<synchronous>, transform_indices = @transform_2, window_bounds = array<i64: 16, 64>}, {pipeline_mode = #tpu.pipeline_mode<synchronous>, transform_indices = @transform_3, window_bounds = array<i64: 1, 64>}, {pipeline_mode = #tpu.pipeline_mode<synchronous>, transform_indices = @transform_4, window_bounds = array<i64: 64, 64>}, {pipeline_mode = #tpu.pipeline_mode<synchronous>, transform_indices = @transform_5, window_bounds = array<i64: 1, 64>}, {pipeline_mode = #tpu.pipeline_mode<synchronous>, transform_indices = @transform_6, window_bounds = array<i64: 64, 8>}, {pipeline_mode = #tpu.pipeline_mode<synchronous>, transform_indices = @transform_7, window_bounds = array<i64: 1, 8>}, {transform_indices = @transform_8, window_bounds = array<i64: 512, 8>}]} {
    %c0 = arith.constant 0 : index
    %c0_0 = arith.constant 0 : index
    %0 = vector.load %arg1[%c0, %c0_0] : memref<512x16xbf16, #tpu.memory_space<vmem>>, vector<512x16xbf16>
    %c0_1 = arith.constant 0 : index
    %c0_2 = arith.constant 0 : index
    %1 = vector.load %arg3[%c0_1, %c0_2] : memref<16x64xbf16, #tpu.memory_space<vmem>>, vector<16x64xbf16>
    %cst = arith.constant dense<0.000000e+00> : vector<512x64xf32>
    %2 = tpu.matmul %0, %1, %cst {dimension_numbers = #tpu.dot_dimension_numbers<[1], [0], [0], [1], [0, 0, 1, 1], [], []>} : vector<512x16xbf16>, vector<16x64xbf16>, vector<512x64xf32> -> vector<512x64xf32>
    %c0_3 = arith.constant 0 : index
    %c0_4 = arith.constant 0 : index
    %3 = vector.load %arg4[%c0_3, %c0_4] : memref<1x64xf32, #tpu.memory_space<vmem>>, vector<1x64xf32>
    %4 = vector.broadcast %3 : vector<1x64xf32> to vector<512x64xf32>
    %5 = arith.addf %2, %4 : vector<512x64xf32>
    %c0_5 = arith.constant 0 : index
    %c0_6 = arith.constant 0 : index
    %6 = vector.load %arg2[%c0_5, %c0_6] : memref<512x64xbf16, #tpu.memory_space<vmem>>, vector<512x64xbf16>
    %7 = arith.extf %6 : vector<512x64xbf16> to vector<512x64xf32>
    %8 = arith.addf %5, %7 : vector<512x64xf32>
    %9 = arith.truncf %8 : vector<512x64xf32> to vector<512x64xbf16>
    %c0_7 = arith.constant 0 : index
    %c0_8 = arith.constant 0 : index
    %10 = vector.load %arg5[%c0_7, %c0_8] : memref<64x64xbf16, #tpu.memory_space<vmem>>, vector<64x64xbf16>
    %cst_9 = arith.constant dense<0.000000e+00> : vector<512x64xf32>
    %11 = tpu.matmul %9, %10, %cst_9 {dimension_numbers = #tpu.dot_dimension_numbers<[1], [0], [0], [1], [0, 0, 1, 1], [], []>} : vector<512x64xbf16>, vector<64x64xbf16>, vector<512x64xf32> -> vector<512x64xf32>
    %c0_10 = arith.constant 0 : index
    %c0_11 = arith.constant 0 : index
    %12 = vector.load %arg6[%c0_10, %c0_11] : memref<1x64xf32, #tpu.memory_space<vmem>>, vector<1x64xf32>
    %13 = vector.broadcast %12 : vector<1x64xf32> to vector<512x64xf32>
    %14 = arith.addf %11, %13 : vector<512x64xf32>
    %cst_12 = arith.constant 0.000000e+00 : f32
    %15 = vector.broadcast %cst_12 : f32 to vector<512x64xf32>
    %16 = arith.maximumf %14, %15 : vector<512x64xf32>
    %17 = arith.truncf %16 : vector<512x64xf32> to vector<512x64xbf16>
    %c0_13 = arith.constant 0 : index
    %c0_14 = arith.constant 0 : index
    %18 = vector.load %arg7[%c0_13, %c0_14] : memref<64x8xbf16, #tpu.memory_space<vmem>>, vector<64x8xbf16>
    %cst_15 = arith.constant dense<0.000000e+00> : vector<512x8xf32>
    %19 = tpu.matmul %17, %18, %cst_15 {dimension_numbers = #tpu.dot_dimension_numbers<[1], [0], [0], [1], [0, 0, 1, 1], [], []>} : vector<512x64xbf16>, vector<64x8xbf16>, vector<512x8xf32> -> vector<512x8xf32>
    %c0_16 = arith.constant 0 : index
    %c0_17 = arith.constant 0 : index
    %20 = vector.load %arg8[%c0_16, %c0_17] : memref<1x8xf32, #tpu.memory_space<vmem>>, vector<1x8xf32>
    %21 = vector.broadcast %20 : vector<1x8xf32> to vector<512x8xf32>
    %22 = arith.addf %19, %21 : vector<512x8xf32>
    %23 = arith.negf %22 : vector<512x8xf32>
    %24 = math.exp %23 : vector<512x8xf32>
    %cst_18 = arith.constant 1.000000e+00 : f32
    %25 = vector.broadcast %cst_18 : f32 to vector<512x8xf32>
    %26 = arith.addf %25, %24 : vector<512x8xf32>
    %27 = arith.divf %25, %26 : vector<512x8xf32>
    %c0_19 = arith.constant 0 : index
    %c0_20 = arith.constant 0 : index
    %28 = vector.load %arg9[%c0_19, %c0_20] : memref<512x8xf32, #tpu.memory_space<vmem>>, vector<512x8xf32>
    tpu.vector_store %arg9[%c0_19, %c0_20], %27 {strides = array<i32>} : memref<512x8xf32, #tpu.memory_space<vmem>>, vector<512x8xf32>,
    return
  }
  func.func @transform_0(%arg0: i32) -> (i32, i32) {
    %c0_i32 = arith.constant 0 : i32
    %c0_i32_0 = arith.constant 0 : i32
    return %arg0, %c0_i32 : i32, i32
  }
  func.func @transform_1(%arg0: i32) -> (i32, i32) {
    %c0_i32 = arith.constant 0 : i32
    %c0_i32_0 = arith.constant 0 : i32
    return %arg0, %c0_i32 : i32, i32
  }
  func.func @transform_2(%arg0: i32) -> (i32, i32) {
    %c0_i32 = arith.constant 0 : i32
    %c0_i32_0 = arith.constant 0 : i32
    %c0_i32_1 = arith.constant 0 : i32
    return %c0_i32, %c0_i32_0 : i32, i32
  }
  func.func @transform_3(%arg0: i32) -> (i32, i32) {
    %c0_i32 = arith.constant 0 : i32
    %c0_i32_0 = arith.constant 0 : i32
    %c0_i32_1 = arith.constant 0 : i32
    return %c0_i32, %c0_i32_0 : i32, i32
  }
  func.func @transform_4(%arg0: i32) -> (i32, i32) {
    %c0_i32 = arith.constant 0 : i32
    %c0_i32_0 = arith.constant 0 : i32
    %c0_i32_1 = arith.constant 0 : i32
    return %c0_i32, %c0_i32_0 : i32, i32
  }
  func.func @transform_5(%arg0: i32) -> (i32, i32) {
    %c0_i32 = arith.constant 0 : i32
    %c0_i32_0 = arith.constant 0 : i32
    %c0_i32_1 = arith.constant 0 : i32
    return %c0_i32, %c0_i32_0 : i32, i32
  }
  func.func @transform_6(%arg0: i32) -> (i32, i32) {
    %c0_i32 = arith.constant 0 : i32
    %c0_i32_0 = arith.constant 0 : i32
    %c0_i32_1 = arith.constant 0 : i32
    return %c0_i32, %c0_i32_0 : i32, i32
  }
  func.func @transform_7(%arg0: i32) -> (i32, i32) {
    %c0_i32 = arith.constant 0 : i32
    %c0_i32_0 = arith.constant 0 : i32
    %c0_i32_1 = arith.constant 0 : i32
    return %c0_i32, %c0_i32_0 : i32, i32
  }
  func.func @transform_8(%arg0: i32) -> (i32, i32) {
    %c0_i32 = arith.constant 0 : i32
    %c0_i32_0 = arith.constant 0 : i32
    return %arg0, %c0_i32 : i32, i32
  }
}

</mosaic_0001>

<bundles_post_ra>
// kernel: encoder_conv_only_forward.7
= control target key start
LH: loop header
LB: loop body
LE: loop exit
PB: predicated region body
PF: predicated region fallthrough
CT: control target
= control target key end

     0   :  { %s10604_s12 = smov 0   ;;  %s12716_s0 = inlined_call_operand.vmem [shape: bf16[8192,27], index: 0, kind: input, shape index: {}]   ;;  %s12717_s1 = inlined_call_operand.vmem [shape: bf16[27,8], index: 1, kind: input, shape index: {}]   ;;  %s12718_s2 = inlined_call_operand.vmem [shape: f32[1,8], index: 2, kind: input, shape index: {}]   ;;  %s12719_s3 = inlined_call_operand.vmem [shape: bf16[8192,8], index: 3, kind: output, shape index: {}]  }
   0x1 LB: > { %s7975_s13 = sadd.s32 4294967295, %s10581_s12   ;;  %p7979_p0 = scmp.ge.s32.totalorder %s10581_s12, 1  ;;  %s10581_s12 = sphi %s10604_s12, %s13_s12  }
   0x2   : > { %p138_p1 = scmp.lt.s32.totalorder %s10581_s12, 3 }
   0x4   : > { %p139_p2 = pnand %p7979_p0, %p138_p1 }
   0x5   : > { %s7980_s16 = sshll.u32 (!%p139_p2), %s7975_s13, 9 }
   0x6   : > { %142 = sbr.rel (%p139_p2) target bundleno = 735 (0x2df), region = 32  ;;  %p163_p3 = scmp.lt.s32.totalorder (!%p139_p2), %s7980_s16, 1023 }
   0xb   : > { %v10312_v0 = vld [vmem:[%s12717_s1 + $0x8] sm:$0x3f]   ;;  %vm2758_vm0 = vcmask 1044480   ;;  %vm2759_vm1 = vcmask 1045504   ;;  %v10583_v1 = vmov 65535   ;;  %v10313_v5 = vld [vmem:[%s12717_s1] sm:$0xff]  }
   0xc   : > { %v2760_v2 = vsel %vm2758_vm0, 4294967295, %v10583_v1  ;;  %s12721_s16 = smov (!%p163_p3, %s7980_s16), 1023  ;;  %vm1989_vm2 = vcmask 220160   ;;  %vm7406_vm3 = vcmask 60416  }
   0xd   : > { %v2761_v3 = vsel %vm2759_vm1, %v2760_v2, 0  ;;  %s7981_s19 = sshll.u32 %s12721_s16, 2 }
   0xe   : > { %v2763_v4 = vand.u32 %v10312_v0, %v2761_v3  ;;  %s10626_s22 = scalar_lea.vmem %s12716_s0, %s7981_s19  ;;  %s10850_s27 = scalar_lea.vmem %s12719_s3, %s7981_s19 }
   0xf   : > { %v10314_v6 = vld [vmem:[%s10626_s22] sm:$0xff]   ;;  %v10316_v8 = vld [vmem:[%s10626_s22 + $0x8] sm:$0xff]   ;;  %v10318_v10 = vld [vmem:[%s10626_s22 + $0x10] sm:$0xff]  }
  0x10   : > { %9783 = vmatprep.subr.bf16.mxu0 %v2763_v4  ;;  %10299 = vmatprep.subr.bf16.mxu1 %v2763_v4  ;;  %v10315_v7 = vld [vmem:[%s10626_s22 + $0x400] sm:$0xff]   ;;  %v10317_v9 = vld [vmem:[%s10626_s22 + $0x408] sm:$0xff]   ;;  %v10319_v11 = vld [vmem:[%s10626_s22 + $0x410] sm:$0xff]  }
  0x11   : > { %9784 = vmatpush3.bf16.msra.mxu0 %v2763_v4  ;;  %10301 = vmatpush3.bf16.msra.mxu1 %v2763_v4  ;;  %v10320_v12 = vld [vmem:[%s10626_s22 + $0x18] sm:$0xff]   ;;  %v10322_v14 = vld [vmem:[%s10626_s22 + $0x20] sm:$0xff]   ;;  %v10324_v16 = vld [vmem:[%s10626_s22 + $0x28] sm:$0xff]  }
  0x12   : > { %9785 = vmatprep.subr.bf16.mxu0 %v10313_v5  ;;  %10300 = vmatprep.subr.bf16.mxu1 %v10313_v5  ;;  %v10321_v13 = vld [vmem:[%s10626_s22 + $0x418] sm:$0xff]   ;;  %v10323_v15 = vld [vmem:[%s10626_s22 + $0x420] sm:$0xff]   ;;  %v10325_v17 = vld [vmem:[%s10626_s22 + $0x428] sm:$0xff]  }
  0x13   : > { %9787 = vmatprep.mubr.msk.bf16.mxu0 %vm1989_vm2, %v10314_v6  ;;  %10043 = vmatprep.mubr.msk.bf16.mxu1 %vm1989_vm2, %v10315_v7  ;;  %v10326_v18 = vld [vmem:[%s10626_s22 + $0x30] sm:$0xff]   ;;  %v10328_v20 = vld [vmem:[%s10626_s22 + $0x38] sm:$0xff]   ;;  %v10330_v22 = vld [vmem:[%s10626_s22 + $0x40] sm:$0xff]  }
  0x14   : > { %v10327_v19 = vld [vmem:[%s10626_s22 + $0x430] sm:$0xff]   ;;  %v10329_v21 = vld [vmem:[%s10626_s22 + $0x438] sm:$0xff]   ;;  %v10331_v23 = vld [vmem:[%s10626_s22 + $0x440] sm:$0xff]  }
  0x15   : > { %9786 = vmatpush3.bf16.msra.mxu0 %v10313_v5  ;;  %10302 = vmatpush3.bf16.msra.mxu1 %v10313_v5  ;;  %v10332_v24 = vld [vmem:[%s10626_s22 + $0x48] sm:$0xff]   ;;  %v10334_v26 = vld [vmem:[%s10626_s22 + $0x50] sm:$0xff]   ;;  %v10336_v28 = vld [vmem:[%s10626_s22 + $0x58] sm:$0xff]  }
  0x16   : > { %v10333_v25 = vld [vmem:[%s10626_s22 + $0x448] sm:$0xff]   ;;  %v10335_v27 = vld [vmem:[%s10626_s22 + $0x450] sm:$0xff]   ;;  %v10337_v29 = vld [vmem:[%s10626_s22 + $0x458] sm:$0xff]  }
  0x17   : > { %v10338_v30 = vld [vmem:[%s10626_s22 + $0x60] sm:$0xff]   ;;  %v10340_v32 = vld [vmem:[%s10626_s22 + $0x68] sm:$0xff]   ;;  %v10342_v34 = vld [vmem:[%s10626_s22 + $0x70] sm:$0xff]  }
  0x18   : > { %9788 = vmatmul.mubr.msk.bf16.vlgmr.msra.gmra.mxu0 %vm1989_vm2, %v10316_v8  ;;  %10044 = vmatmul.mubr.msk.bf16.vlgmr.msra.gmra.mxu1 %vm1989_vm2, %v10317_v9  ;;  %v10339_v31 = vld [vmem:[%s10626_s22 + $0x460] sm:$0xff]   ;;  %v10341_v33 = vld [vmem:[%s10626_s22 + $0x468] sm:$0xff]   ;;  %v10343_v35 = vld [vmem:[%s10626_s22 + $0x470] sm:$0xff]  }
  0x19   : > { %9791 = vmatprep.mubr.msk.bf16.mxu0 %vm1989_vm2, %v10318_v10  ;;  %10047 = vmatprep.mubr.msk.bf16.mxu1 %vm1989_vm2, %v10319_v11  ;;  %v10344_v36 = vld [vmem:[%s10626_s22 + $0x78] sm:$0xff]   ;;  %v10346_v38 = vld [vmem:[%s10626_s22 + $0x80] sm:$0xff]   ;;  %v10348_v40 = vld [vmem:[%s10626_s22 + $0x88] sm:$0xff]  }
  0x1a   : > { %v10345_v37 = vld [vmem:[%s10626_s22 + $0x478] sm:$0xff]   ;;  %v10347_v39 = vld [vmem:[%s10626_s22 + $0x480] sm:$0xff]   ;;  %v10349_v41 = vld [vmem:[%s10626_s22 + $0x488] sm:$0xff]  }
  0x1b   : > { %v10350_v42 = vld [vmem:[%s10626_s22 + $0x90] sm:$0xff]   ;;  %v10352_v44 = vld [vmem:[%s10626_s22 + $0x98] sm:$0xff]   ;;  %v10354_v46 = vld [vmem:[%s10626_s22 + $0xa0] sm:$0xff]  }
  0x1c   : > { %v10351_v43 = vld [vmem:[%s10626_s22 + $0x490] sm:$0xff]   ;;  %v10353_v45 = vld [vmem:[%s10626_s22 + $0x498] sm:$0xff]   ;;  %v10355_v47 = vld [vmem:[%s10626_s22 + $0x4a0] sm:$0xff]  }
  0x1d   : > { %v10356_v48 = vld [vmem:[%s10626_s22 + $0xa8] sm:$0xff]   ;;  %v10358_v50 = vld [vmem:[%s10626_s22 + $0xb0] sm:$0xff]   ;;  %v10360_v52 = vld [vmem:[%s10626_s22 + $0xb8] sm:$0xff]  }
  0x1e   : > { %v10357_v49 = vld [vmem:[%s10626_s22 + $0x4a8] sm:$0xff]   ;;  %v10359_v51 = vld [vmem:[%s10626_s22 + $0x4b0] sm:$0xff]   ;;  %v10361_v53 = vld [vmem:[%s10626_s22 + $0x4b8] sm:$0xff]  }
  0x1f   : > { %v10362_v54 = vld [vmem:[%s10626_s22 + $0xc0] sm:$0xff]   ;;  %v10364_v56 = vld [vmem:[%s10626_s22 + $0xc8] sm:$0xff]   ;;  %v10366_v58 = vld [vmem:[%s10626_s22 + $0xd0] sm:$0xff]  }
  0x20   : > { %9792 = vmatmul.mubr.msk.bf16.gmra.mxu0 %vm1989_vm2, %v10320_v12  ;;  %10048 = vmatmul.mubr.msk.bf16.gmra.mxu1 %vm1989_vm2, %v10321_v13  ;;  %v10363_v55 = vld [vmem:[%s10626_s22 + $0x4c0] sm:$0xff]   ;;  %v10365_v57 = vld [vmem:[%s10626_s22 + $0x4c8] sm:$0xff]   ;;  %v10367_v59 = vld [vmem:[%s10626_s22 + $0x4d0] sm:$0xff]  }
  0x21   : > { %9795 = vmatprep.mubr.msk.bf16.mxu0 %vm1989_vm2, %v10322_v14  ;;  %10051 = vmatprep.mubr.msk.bf16.mxu1 %vm1989_vm2, %v10323_v15  ;;  %v10368_v60 = vld [vmem:[%s10626_s22 + $0xd8] sm:$0xff]   ;;  %v10370_v62 = vld [vmem:[%s10626_s22 + $0xe0] sm:$0xff]   ;;  %v10372_v0 = vld [vmem:[%s10626_s22 + $0xe8] sm:$0xff]  }
  0x22   : > { %v10369_v61 = vld [vmem:[%s10626_s22 + $0x4d8] sm:$0xff]   ;;  %v10371_v63 = vld [vmem:[%s10626_s22 + $0x4e0] sm:$0xff]   ;;  %v10373_v1 = vld [vmem:[%s10626_s22 + $0x4e8] sm:$0xff]  }
  0x23   : > { %v10374_v2 = vld [vmem:[%s10626_s22 + $0xf0] sm:$0xff]   ;;  %v10376_v4 = vld [vmem:[%s10626_s22 + $0xf8] sm:$0xff]   ;;  %v10378_v6 = vld [vmem:[%s10626_s22 + $0x100] sm:$0xff]  }
  0x24   : > { %v10375_v3 = vld [vmem:[%s10626_s22 + $0x4f0] sm:$0xff]   ;;  %v10377_v5 = vld [vmem:[%s10626_s22 + $0x4f8] sm:$0xff]   ;;  %v10379_v7 = vld [vmem:[%s10626_s22 + $0x500] sm:$0xff]  }
  0x25   : > { %v10380_v8 = vld [vmem:[%s10626_s22 + $0x108] sm:$0xff]   ;;  %v10382_v10 = vld [vmem:[%s10626_s22 + $0x110] sm:$0xff]   ;;  %v10384_v12 = vld [vmem:[%s10626_s22 + $0x118] sm:$0xff]  }
  0x26   : > { %v10381_v9 = vld [vmem:[%s10626_s22 + $0x508] sm:$0xff]   ;;  %v10383_v11 = vld [vmem:[%s10626_s22 + $0x510] sm:$0xff]   ;;  %v10385_v13 = vld [vmem:[%s10626_s22 + $0x518] sm:$0xff]  }
  0x27   : > { %v10386_v14 = vld [vmem:[%s10626_s22 + $0x120] sm:$0xff]  }
  0x28   : > { %9796 = vmatmul.mubr.msk.bf16.gmra.mxu0 %vm1989_vm2, %v10324_v16  ;;  %10052 = vmatmul.mubr.msk.bf16.gmra.mxu1 %vm1989_vm2, %v10325_v17  ;;  %v10387_v15 = vld [vmem:[%s10626_s22 + $0x520] sm:$0xff]   ;;  %v10388_v16 = vld [vmem:[%s10626_s22 + $0x128] sm:$0xff]  }
  0x29   : > { %9799 = vmatprep.mubr.msk.bf16.mxu0 %vm1989_vm2, %v10326_v18  ;;  %10055 = vmatprep.mubr.msk.bf16.mxu1 %vm1989_vm2, %v10327_v19  ;;  %v10389_v17 = vld [vmem:[%s10626_s22 + $0x528] sm:$0xff]   ;;  %v10390_v18 = vld [vmem:[%s10626_s22 + $0x130] sm:$0xff]  }
  0x2a   : > { %v10391_v19 = vld [vmem:[%s10626_s22 + $0x530] sm:$0xff]  }
  0x30   : > { %9800 = vmatmul.mubr.msk.bf16.gmra.mxu0 %vm1989_vm2, %v10328_v20  ;;  %10056 = vmatmul.mubr.msk.bf16.gmra.mxu1 %vm1989_vm2, %v10329_v21  ;;  %v10392_v20 = vld [vmem:[%s10626_s22 + $0x138] sm:$0xff]  }
  0x31   : > { %9803 = vmatprep.mubr.msk.bf16.mxu0 %vm1989_vm2, %v10330_v22  ;;  %10059 = vmatprep.mubr.msk.bf16.mxu1 %vm1989_vm2, %v10331_v23  ;;  %v10393_v21 = vld [vmem:[%s10626_s22 + $0x538] sm:$0xff]   ;;  %v10394_v22 = vld [vmem:[%s10626_s22 + $0x140] sm:$0xff]  }
  0x32   : > { %v10395_v23 = vld [vmem:[%s10626_s22 + $0x540] sm:$0xff]  }
  0x38   : > { %9804 = vmatmul.mubr.msk.bf16.gmra.mxu0 %vm1989_vm2, %v10332_v24  ;;  %10060 = vmatmul.mubr.msk.bf16.gmra.mxu1 %vm1989_vm2, %v10333_v25  ;;  %v10396_v24 = vld [vmem:[%s10626_s22 + $0x148] sm:$0xff]  }
  0x39   : > { %9807 = vmatprep.mubr.msk.bf16.mxu0 %vm1989_vm2, %v10334_v26  ;;  %10063 = vmatprep.mubr.msk.bf16.mxu1 %vm1989_vm2, %v10335_v27  ;;  %v10397_v25 = vld [vmem:[%s10626_s22 + $0x548] sm:$0xff]   ;;  %v10398_v26 = vld [vmem:[%s10626_s22 + $0x150] sm:$0xff]  }
  0x3a   : > { %v10399_v27 = vld [vmem:[%s10626_s22 + $0x550] sm:$0xff]  }
  0x40   : > { %9808 = vmatmul.mubr.msk.bf16.gmra.mxu0 %vm1989_vm2, %v10336_v28  ;;  %10064 = vmatmul.mubr.msk.bf16.gmra.mxu1 %vm1989_vm2, %v10337_v29  ;;  %v10400_v28 = vld [vmem:[%s10626_s22 + $0x158] sm:$0xff]  }
  0x41   : > { %9811 = vmatprep.mubr.msk.bf16.mxu0 %vm1989_vm2, %v10338_v30  ;;  %10067 = vmatprep.mubr.msk.bf16.mxu1 %vm1989_vm2, %v10339_v31  ;;  %v10401_v29 = vld [vmem:[%s10626_s22 + $0x558] sm:$0xff]   ;;  %v10402_v30 = vld [vmem:[%s10626_s22 + $0x160] sm:$0xff]  }
  0x42   : > { %v10403_v31 = vld [vmem:[%s10626_s22 + $0x560] sm:$0xff]  }
  0x48   : > { %9812 = vmatmul.mubr.msk.bf16.gmra.mxu0 %vm1989_vm2, %v10340_v32  ;;  %10068 = vmatmul.mubr.msk.bf16.gmra.mxu1 %vm1989_vm2, %v10341_v33  ;;  %v10404_v32 = vld [vmem:[%s10626_s22 + $0x168] sm:$0xff]  }
  0x49   : > { %9815 = vmatprep.mubr.msk.bf16.mxu0 %vm1989_vm2, %v10342_v34  ;;  %10071 = vmatprep.mubr.msk.bf16.mxu1 %vm1989_vm2, %v10343_v35  ;;  %v10405_v33 = vld [vmem:[%s10626_s22 + $0x568] sm:$0xff]   ;;  %v10406_v34 = vld [vmem:[%s10626_s22 + $0x170] sm:$0xff]  }
  0x4a   : > { %v10407_v35 = vld [vmem:[%s10626_s22 + $0x570] sm:$0xff]  }
  0x50   : > { %9816 = vmatmul.mubr.msk.bf16.gmra.mxu0 %vm1989_vm2, %v10344_v36  ;;  %10072 = vmatmul.mubr.msk.bf16.gmra.mxu1 %vm1989_vm2, %v10345_v37  ;;  %v10408_v36 = vld [vmem:[%s10626_s22 + $0x178] sm:$0xff]  }
  0x51   : > { %9819 = vmatprep.mubr.msk.bf16.mxu0 %vm1989_vm2, %v10346_v38  ;;  %10075 = vmatprep.mubr.msk.bf16.mxu1 %vm1989_vm2, %v10347_v39  ;;  %v10409_v37 = vld [vmem:[%s10626_s22 + $0x578] sm:$0xff]   ;;  %v10410_v38 = vld [vmem:[%s10626_s22 + $0x180] sm:$0xff]  }
  0x52   : > { %v10411_v39 = vld [vmem:[%s10626_s22 + $0x580] sm:$0xff]  }
  0x58   : > { %9820 = vmatmul.mubr.msk.bf16.gmra.mxu0 %vm1989_vm2, %v10348_v40  ;;  %10076 = vmatmul.mubr.msk.bf16.gmra.mxu1 %vm1989_vm2, %v10349_v41  ;;  %v10412_v40 = vld [vmem:[%s10626_s22 + $0x188] sm:$0xff]  }
  0x59   : > { %9823 = vmatprep.mubr.msk.bf16.mxu0 %vm1989_vm2, %v10350_v42  ;;  %10079 = vmatprep.mubr.msk.bf16.mxu1 %vm1989_vm2, %v10351_v43  ;;  %v10413_v41 = vld [vmem:[%s10626_s22 + $0x588] sm:$0xff]   ;;  %v10414_v42 = vld [vmem:[%s10626_s22 + $0x190] sm:$0xff]  }
  0x5a   : > { %v10415_v43 = vld [vmem:[%s10626_s22 + $0x590] sm:$0xff]  }
  0x60   : > { %9824 = vmatmul.mubr.msk.bf16.gmra.mxu0 %vm1989_vm2, %v10352_v44  ;;  %10080 = vmatmul.mubr.msk.bf16.gmra.mxu1 %vm1989_vm2, %v10353_v45  ;;  %v10831_v44 = vld [vmem:[%s12718_s2] ss:$0 sm:$0xff] }
  0x61   : > { %9827 = vmatprep.mubr.msk.bf16.mxu0 %vm1989_vm2, %v10354_v46  ;;  %10083 = vmatprep.mubr.msk.bf16.mxu1 %vm1989_vm2, %v10355_v47 }
  0x68   : > { %9828 = vmatmul.mubr.msk.bf16.gmra.mxu0 %vm1989_vm2, %v10356_v48  ;;  %10084 = vmatmul.mubr.msk.bf16.gmra.mxu1 %vm1989_vm2, %v10357_v49 }
  0x69   : > { %9831 = vmatprep.mubr.msk.bf16.mxu0 %vm1989_vm2, %v10358_v50  ;;  %10087 = vmatprep.mubr.msk.bf16.mxu1 %vm1989_vm2, %v10359_v51  ;;  %v10416_v51 = vld [vmem:[%s10626_s22 + $0x198] sm:$0xff]  }
  0x70   : > { %9832 = vmatmul.mubr.msk.bf16.gmra.mxu0 %vm1989_vm2, %v10360_v52  ;;  %10088 = vmatmul.mubr.msk.bf16.gmra.mxu1 %vm1989_vm2, %v10361_v53  ;;  %v10417_v52 = vld [vmem:[%s10626_s22 + $0x598] sm:$0xff]  }
  0x71   : > { %9835 = vmatprep.mubr.msk.bf16.mxu0 %vm1989_vm2, %v10362_v54  ;;  %10091 = vmatprep.mubr.msk.bf16.mxu1 %vm1989_vm2, %v10363_v55 }
  0x78   : > { %9836 = vmatmul.mubr.msk.bf16.gmra.mxu0 %vm1989_vm2, %v10364_v56  ;;  %10092 = vmatmul.mubr.msk.bf16.gmra.mxu1 %vm1989_vm2, %v10365_v57  ;;  %v10418_v57 = vld [vmem:[%s10626_s22 + $0x1a0] sm:$0xff]  }
  0x79   : > { %9839 = vmatprep.mubr.msk.bf16.mxu0 %vm1989_vm2, %v10366_v58  ;;  %10095 = vmatprep.mubr.msk.bf16.mxu1 %vm1989_vm2, %v10367_v59  ;;  %v10419_v58 = vld [vmem:[%s10626_s22 + $0x5a0] sm:$0xff]  }
  0x80   : > { %9840 = vmatmul.mubr.msk.bf16.gmra.mxu0 %vm1989_vm2, %v10368_v60  ;;  %10096 = vmatmul.mubr.msk.bf16.gmra.mxu1 %vm1989_vm2, %v10369_v61 }
  0x81   : > { %9843 = vmatprep.mubr.msk.bf16.mxu0 %vm1989_vm2, %v10370_v62  ;;  %10099 = vmatprep.mubr.msk.bf16.mxu1 %vm1989_vm2, %v10371_v63 }
  0x88   : > { %9844 = vmatmul.mubr.msk.bf16.gmra.mxu0 %vm1989_vm2, %v10372_v0  ;;  %10100 = vmatmul.mubr.msk.bf16.gmra.mxu1 %vm1989_vm2, %v10373_v1 }
  0x89   : > { %9847 = vmatprep.mubr.msk.bf16.mxu0 %vm1989_vm2, %v10374_v2  ;;  %10103 = vmatprep.mubr.msk.bf16.mxu1 %vm1989_vm2, %v10375_v3 }
  0x90   : > { %9848 = vmatmul.mubr.msk.bf16.gmra.mxu0 %vm1989_vm2, %v10376_v4  ;;  %10104 = vmatmul.mubr.msk.bf16.gmra.mxu1 %vm1989_vm2, %v10377_v5 }
  0x91   : > { %9851 = vmatprep.mubr.msk.bf16.mxu0 %vm1989_vm2, %v10378_v6  ;;  %10107 = vmatprep.mubr.msk.bf16.mxu1 %vm1989_vm2, %v10379_v7 }
  0x98   : > { %9852 = vmatmul.mubr.msk.bf16.gmra.mxu0 %vm1989_vm2, %v10380_v8  ;;  %10108 = vmatmul.mubr.msk.bf16.gmra.mxu1 %vm1989_vm2, %v10381_v9 }
  0x99   : > { %9855 = vmatprep.mubr.msk.bf16.mxu0 %vm1989_vm2, %v10382_v10  ;;  %10111 = vmatprep.mubr.msk.bf16.mxu1 %vm1989_vm2, %v10383_v11 }
  0xa0   : > { %9856 = vmatmul.mubr.msk.bf16.gmra.mxu0 %vm1989_vm2, %v10384_v12  ;;  %10112 = vmatmul.mubr.msk.bf16.gmra.mxu1 %vm1989_vm2, %v10385_v13 }
  0xa1   : > { %9859 = vmatprep.mubr.msk.bf16.mxu0 %vm1989_vm2, %v10386_v14  ;;  %10115 = vmatprep.mubr.msk.bf16.mxu1 %vm1989_vm2, %v10387_v15 }
  0xa8   : > { %9860 = vmatmul.mubr.msk.bf16.gmra.mxu0 %vm1989_vm2, %v10388_v16  ;;  %10116 = vmatmul.mubr.msk.bf16.gmra.mxu1 %vm1989_vm2, %v10389_v17 }
  0xa9   : > { %9863 = vmatprep.mubr.msk.bf16.mxu0 %vm1989_vm2, %v10390_v18  ;;  %10119 = vmatprep.mubr.msk.bf16.mxu1 %vm1989_vm2, %v10391_v19 }
  0xb0   : > { %9864 = vmatmul.mubr.msk.bf16.gmra.mxu0 %vm1989_vm2, %v10392_v20  ;;  %10120 = vmatmul.mubr.msk.bf16.gmra.mxu1 %vm1989_vm2, %v10393_v21  ;;  %v10420_v21 = vld [vmem:[%s10626_s22 + $0x1a8] sm:$0xff]  }
  0xb1   : > { %9867 = vmatprep.mubr.msk.bf16.mxu0 %vm1989_vm2, %v10394_v22  ;;  %10123 = vmatprep.mubr.msk.bf16.mxu1 %vm1989_vm2, %v10395_v23  ;;  %v10421_v22 = vld [vmem:[%s10626_s22 + $0x5a8] sm:$0xff]  }
  0xb8   : > { %9868 = vmatmul.mubr.msk.bf16.gmra.mxu0 %vm1989_vm2, %v10396_v24  ;;  %10124 = vmatmul.mubr.msk.bf16.gmra.mxu1 %vm1989_vm2, %v10397_v25 }
  0xb9   : > { %9871 = vmatprep.mubr.msk.bf16.mxu0 %vm1989_vm2, %v10398_v26  ;;  %10127 = vmatprep.mubr.msk.bf16.mxu1 %vm1989_vm2, %v10399_v27  ;;  %v10422_v27 = vld [vmem:[%s10626_s22 + $0x1b0] sm:$0xff]  }
  0xc0   : > { %9872 = vmatmul.mubr.msk.bf16.gmra.mxu0 %vm1989_vm2, %v10400_v28  ;;  %10128 = vmatmul.mubr.msk.bf16.gmra.mxu1 %vm1989_vm2, %v10401_v29  ;;  %v10423_v28 = vld [vmem:[%s10626_s22 + $0x5b0] sm:$0xff]  }
  0xc1   : > { %9875 = vmatprep.mubr.msk.bf16.mxu0 %vm1989_vm2, %v10402_v30  ;;  %10131 = vmatprep.mubr.msk.bf16.mxu1 %vm1989_vm2, %v10403_v31 }
  0xc8   : > { %9876 = vmatmul.mubr.msk.bf16.gmra.mxu0 %vm1989_vm2, %v10404_v32  ;;  %10132 = vmatmul.mubr.msk.bf16.gmra.mxu1 %vm1989_vm2, %v10405_v33 }
  0xc9   : > { %9879 = vmatprep.mubr.msk.bf16.mxu0 %vm1989_vm2, %v10406_v34  ;;  %10135 = vmatprep.mubr.msk.bf16.mxu1 %vm1989_vm2, %v10407_v35 }
  0xd0   : > { %9880 = vmatmul.mubr.msk.bf16.gmra.mxu0 %vm1989_vm2, %v10408_v36  ;;  %10136 = vmatmul.mubr.msk.bf16.gmra.mxu1 %vm1989_vm2, %v10409_v37 }
  0xd1   : > { %9883 = vmatprep.mubr.msk.bf16.mxu0 %vm1989_vm2, %v10410_v38  ;;  %10139 = vmatprep.mubr.msk.bf16.mxu1 %vm1989_vm2, %v10411_v39 }
  0xd8   : > { %v9789_v45 = vpop.f32.mrf.mxu0  ;;  %9884 = vmatmul.mubr.msk.bf16.gmra.mxu0 %vm1989_vm2, %v10412_v40  ;;  %v10045_v46 = vpop.f32.mrf.mxu1  ;;  %10140 = vmatmul.mubr.msk.bf16.gmra.mxu1 %vm1989_vm2, %v10413_v41 }
  0xd9   : > { %v2808_v47 = vadd.f32 %v9789_v45, %v10831_v44  ;;  %v3832_v48 = vadd.f32 %v10045_v46, %v10831_v44  ;;  %9887 = vmatprep.mubr.msk.bf16.mxu0 %vm1989_vm2, %v10414_v42  ;;  %10143 = vmatprep.mubr.msk.bf16.mxu1 %vm1989_vm2, %v10415_v43 }
  0xda   : > { %v2799_v49 = vpop.f32.mrf.mxu0  ;;  %v3823_v50 = vpop.f32.mrf.mxu1 }
  0xdb   : > { %v4848_v53 = vmax.f32 %v2808_v47, 0.0  ;;  %v5104_v54 = vmax.f32 %v3832_v48, 0.0  ;;  %v2800_v55 = vadd.f32 %v10831_v44, %v2799_v49  ;;  %v3824_v56 = vadd.f32 %v10831_v44, %v3823_v50 }
  0xdc   : > { %v9790_v59 = vpop.f32.mrf.mxu0  ;;  %v10046_v60 = vpop.f32.mrf.mxu1 }
  0xdd   : > { %v9015_v61 = vpack.c.bf16 %v4848_v53, %v4848_v53  ;;  %v9271_v62 = vpack.c.bf16 %v5104_v54, %v5104_v54  ;;  %v4846_v63 = vmax.f32 %v2800_v55, 0.0  ;;  %v5102_v0 = vmax.f32 %v3824_v56, 0.0 }
  0xde   : > { %v2811_v1 = vadd.f32 %v9790_v59, %v10831_v44  ;;  %v3835_v2 = vadd.f32 %v10046_v60, %v10831_v44  ;;  %v2802_v3 = vpop.f32.mrf.mxu0  ;;  %v3826_v4 = vpop.f32.mrf.mxu1  ;;  %v10425_v59 = vld [vmem:[%s10626_s22 + $0x5b8] sm:$0xff]  }
  0xdf   : > { %7409 = vst.msk [vmem:[%s10850_s27 + $0x8] sm:$0xf] %vm7406_vm3, %v9015_v61  ;;  %7665 = vst.msk [vmem:[%s10850_s27 + $0x408] sm:$0xf] %vm7406_vm3, %v9271_v62  ;;  %v9013_v5 = vpack.c.bf16 %v4846_v63, %v4846_v63  ;;  %v9269_v6 = vpack.c.bf16 %v5102_v0, %v5102_v0  ;;  %v2803_v7 = vadd.f32 %v10831_v44, %v2802_v3  ;;  %v10426_v0 = vld [vmem:[%s10626_s22 + $0x1c0] sm:$0xff]  }
  0xe0   : > { %v3827_v8 = vadd.f32 %v10831_v44, %v3826_v4  ;;  %v4849_v9 = vmax.f32 %v2811_v1, 0.0  ;;  %v5105_v10 = vmax.f32 %v3835_v2, 0.0  ;;  %v9793_v11 = vpop.f32.mrf.mxu0  ;;  %9888 = vmatmul.mubr.msk.bf16.gmra.mxu0 %vm1989_vm2, %v10416_v51  ;;  %v10049_v12 = vpop.f32.mrf.mxu1  ;;  %10144 = vmatmul.mubr.msk.bf16.gmra.mxu1 %vm1989_vm2, %v10417_v52 }
  0xe1   : > { %7407 = vst.msk [vmem:[%s10850_s27] sm:$0xf] %vm7406_vm3, %v9013_v5  ;;  %7663 = vst.msk [vmem:[%s10850_s27 + $0x400] sm:$0xf] %vm7406_vm3, %v9269_v6  ;;  %v4847_v13 = vmax.f32 %v2803_v7, 0.0  ;;  %v2824_v15 = vadd.f32 %v9793_v11, %v10831_v44  ;;  %v3848_v16 = vadd.f32 %v10049_v12, %v10831_v44  ;;  %9891 = vmatprep.mubr.msk.bf16.mxu0 %vm1989_vm2, %v10418_v57  ;;  %10147 = vmatprep.mubr.msk.bf16.mxu1 %vm1989_vm2, %v10419_v58  ;;  %v10424_v58 = vld [vmem:[%s10626_s22 + $0x1b8] sm:$0xff]  }
  0xe2   : > { %v5103_v14 = vmax.f32 %v3827_v8, 0.0  ;;  %v9016_v17 = vpack.c.bf16 %v4849_v9, %v4849_v9  ;;  %v9272_v18 = vpack.c.bf16 %v5105_v10, %v5105_v10  ;;  %v2815_v19 = vpop.f32.mrf.mxu0  ;;  %v3839_v20 = vpop.f32.mrf.mxu1 }
  0xe3   : > { %v9014_v23 = vpack.c.bf16 %v4847_v13, %v4847_v13  ;;  %v4852_v25 = vmax.f32 %v2824_v15, 0.0  ;;  %v5108_v26 = vmax.f32 %v3848_v16, 0.0  ;;  %v2816_v29 = vadd.f32 %v10831_v44, %v2815_v19  ;;  %v10427_v13 = vld [vmem:[%s10626_s22 + $0x5c0] sm:$0xff]  }
  0xe4   : > { %v9270_v24 = vpack.c.bf16 %v5103_v14, %v5103_v14  ;;  %7410 = vst.msk [vmem:[%s10850_s27 + $0xc] sm:$0xf] %vm7406_vm3, %v9016_v17  ;;  %7666 = vst.msk [vmem:[%s10850_s27 + $0x40c] sm:$0xf] %vm7406_vm3, %v9272_v18  ;;  %v3840_v30 = vadd.f32 %v10831_v44, %v3839_v20  ;;  %v9794_v31 = vpop.f32.mrf.mxu0  ;;  %v10050_v32 = vpop.f32.mrf.mxu1 }
  0xe5   : > { %7408 = vst.msk [vmem:[%s10850_s27 + $0x4] sm:$0xf] %vm7406_vm3, %v9014_v23  ;;  %v9019_v33 = vpack.c.bf16 %v4852_v25, %v4852_v25  ;;  %v9275_v34 = vpack.c.bf16 %v5108_v26, %v5108_v26  ;;  %v2827_v35 = vadd.f32 %v9794_v31, %v10831_v44  ;;  %v3851_v36 = vadd.f32 %v10050_v32, %v10831_v44  ;;  %v10429_v31 = vld [vmem:[%s10626_s22 + $0x5c8] sm:$0xff]  }
  0xe6   : > { %7664 = vst.msk [vmem:[%s10850_s27 + $0x404] sm:$0xf] %vm7406_vm3, %v9270_v24  ;;  %v4850_v37 = vmax.f32 %v2816_v29, 0.0  ;;  %v5106_v38 = vmax.f32 %v3840_v30, 0.0  ;;  %v2818_v39 = vpop.f32.mrf.mxu0  ;;  %v3842_v40 = vpop.f32.mrf.mxu1  ;;  %v10428_v30 = vld [vmem:[%s10626_s22 + $0x1c8] sm:$0xff]  }
  0xe7   : > { %7413 = vst.msk [vmem:[%s10850_s27 + $0x18] sm:$0xf] %vm7406_vm3, %v9019_v33  ;;  %7669 = vst.msk [vmem:[%s10850_s27 + $0x418] sm:$0xf] %vm7406_vm3, %v9275_v34  ;;  %v4853_v41 = vmax.f32 %v2827_v35, 0.0  ;;  %v5109_v42 = vmax.f32 %v3851_v36, 0.0  ;;  %v2819_v43 = vadd.f32 %v10831_v44, %v2818_v39  ;;  %v3843_v45 = vadd.f32 %v10831_v44, %v3842_v40 }
  0xe8   : > { %v9017_v46 = vpack.c.bf16 %v4850_v37, %v4850_v37  ;;  %v9273_v47 = vpack.c.bf16 %v5106_v38, %v5106_v38  ;;  %v9797_v48 = vpop.f32.mrf.mxu0  ;;  %9892 = vmatmul.mubr.msk.bf16.gmra.mxu0 %vm1989_vm2, %v10420_v21  ;;  %v10053_v49 = vpop.f32.mrf.mxu1  ;;  %10148 = vmatmul.mubr.msk.bf16.gmra.mxu1 %vm1989_vm2, %v10421_v22  ;;  %v10430_v36 = vld [vmem:[%s10626_s22 + $0x1d0] sm:$0xff]  }
  0xe9   : > { %v9020_v50 = vpack.c.bf16 %v4853_v41, %v4853_v41  ;;  %v9276_v51 = vpack.c.bf16 %v5109_v42, %v5109_v42  ;;  %v4851_v52 = vmax.f32 %v2819_v43, 0.0  ;;  %v5107_v53 = vmax.f32 %v3843_v45, 0.0  ;;  %9895 = vmatprep.mubr.msk.bf16.mxu0 %vm1989_vm2, %v10422_v27  ;;  %10151 = vmatprep.mubr.msk.bf16.mxu1 %vm1989_vm2, %v10423_v28  ;;  %v10431_v37 = vld [vmem:[%s10626_s22 + $0x5d0] sm:$0xff]  }
  0xea   : > { %7411 = vst.msk [vmem:[%s10850_s27 + $0x10] sm:$0xf] %vm7406_vm3, %v9017_v46  ;;  %7667 = vst.msk [vmem:[%s10850_s27 + $0x410] sm:$0xf] %vm7406_vm3, %v9273_v47  ;;  %v2840_v54 = vadd.f32 %v9797_v48, %v10831_v44  ;;  %v3864_v55 = vadd.f32 %v10053_v49, %v10831_v44  ;;  %v2831_v56 = vpop.f32.mrf.mxu0  ;;  %v3855_v57 = vpop.f32.mrf.mxu1 }
  0xeb   : > { %7414 = vst.msk [vmem:[%s10850_s27 + $0x1c] sm:$0xf] %vm7406_vm3, %v9020_v50  ;;  %7670 = vst.msk [vmem:[%s10850_s27 + $0x41c] sm:$0xf] %vm7406_vm3, %v9276_v51  ;;  %v9018_v60 = vpack.c.bf16 %v4851_v52, %v4851_v52  ;;  %v9274_v61 = vpack.c.bf16 %v5107_v53, %v5107_v53  ;;  %v2832_v62 = vadd.f32 %v10831_v44, %v2831_v56 }
  0xec   : > { %v3856_v63 = vadd.f32 %v10831_v44, %v3855_v57  ;;  %v4856_v1 = vmax.f32 %v2840_v54, 0.0  ;;  %v5112_v2 = vmax.f32 %v3864_v55, 0.0  ;;  %v9798_v3 = vpop.f32.mrf.mxu0  ;;  %v10054_v4 = vpop.f32.mrf.mxu1 }
  0xed   : > { %7412 = vst.msk [vmem:[%s10850_s27 + $0x14] sm:$0xf] %vm7406_vm3, %v9018_v60  ;;  %7668 = vst.msk [vmem:[%s10850_s27 + $0x414] sm:$0xf] %vm7406_vm3, %v9274_v61  ;;  %v4854_v5 = vmax.f32 %v2832_v62, 0.0  ;;  %v2843_v7 = vadd.f32 %v9798_v3, %v10831_v44  ;;  %v3867_v8 = vadd.f32 %v10054_v4, %v10831_v44  ;;  %v10432_v3 = vld [vmem:[%s10626_s22 + $0x1d8] sm:$0xff]  }
  0xee   : > { %v5110_v6 = vmax.f32 %v3856_v63, 0.0  ;;  %v9023_v9 = vpack.c.bf16 %v4856_v1, %v4856_v1  ;;  %v9279_v10 = vpack.c.bf16 %v5112_v2, %v5112_v2  ;;  %v2834_v11 = vpop.f32.mrf.mxu0  ;;  %v3858_v12 = vpop.f32.mrf.mxu1  ;;  %v10433_v4 = vld [vmem:[%s10626_s22 + $0x5d8] sm:$0xff]  }
  0xef   : > { %v9021_v14 = vpack.c.bf16 %v4854_v5, %v4854_v5  ;;  %v4857_v16 = vmax.f32 %v2843_v7, 0.0  ;;  %v5113_v17 = vmax.f32 %v3867_v8, 0.0  ;;  %v2835_v18 = vadd.f32 %v10831_v44, %v2834_v11 }
  0xf0   : > { %v9277_v15 = vpack.c.bf16 %v5110_v6, %v5110_v6  ;;  %7417 = vst.msk [vmem:[%s10850_s27 + $0x28] sm:$0xf] %vm7406_vm3, %v9023_v9  ;;  %7673 = vst.msk [vmem:[%s10850_s27 + $0x428] sm:$0xf] %vm7406_vm3, %v9279_v10  ;;  %v3859_v19 = vadd.f32 %v10831_v44, %v3858_v12  ;;  %v9801_v20 = vpop.f32.mrf.mxu0  ;;  %9896 = vmatmul.mubr.msk.bf16.gmra.mxu0 %vm1989_vm2, %v10424_v58  ;;  %v10057_v21 = vpop.f32.mrf.mxu1  ;;  %10152 = vmatmul.mubr.msk.bf16.gmra.mxu1 %vm1989_vm2, %v10425_v59  ;;  %v10434_v9 = vld [vmem:[%s10626_s22 + $0x1e0] sm:$0xff]  }
  0xf1   : > { %7415 = vst.msk [vmem:[%s10850_s27 + $0x20] sm:$0xf] %vm7406_vm3, %v9021_v14  ;;  %v9024_v22 = vpack.c.bf16 %v4857_v16, %v4857_v16  ;;  %v9280_v23 = vpack.c.bf16 %v5113_v17, %v5113_v17  ;;  %v2856_v24 = vadd.f32 %v9801_v20, %v10831_v44  ;;  %v3880_v25 = vadd.f32 %v10057_v21, %v10831_v44  ;;  %v10435_v10 = vld [vmem:[%s10626_s22 + $0x5e0] sm:$0xff]  }
  0xf2   : > { %7671 = vst.msk [vmem:[%s10850_s27 + $0x420] sm:$0xf] %vm7406_vm3, %v9277_v15  ;;  %9899 = vmatprep.mubr.msk.bf16.mxu0 %vm1989_vm2, %v10426_v0  ;;  %v4855_v26 = vmax.f32 %v2835_v18, 0.0  ;;  %v5111_v27 = vmax.f32 %v3859_v19, 0.0  ;;  %v2847_v28 = vpop.f32.mrf.mxu0  ;;  %v3871_v29 = vpop.f32.mrf.mxu1  ;;  %10155 = vmatprep.mubr.msk.bf16.mxu1 %vm1989_vm2, %v10427_v13 }
  0xf3   : > { %7418 = vst.msk [vmem:[%s10850_s27 + $0x2c] sm:$0xf] %vm7406_vm3, %v9024_v22  ;;  %7674 = vst.msk [vmem:[%s10850_s27 + $0x42c] sm:$0xf] %vm7406_vm3, %v9280_v23  ;;  %v4860_v32 = vmax.f32 %v2856_v24, 0.0  ;;  %v5116_v33 = vmax.f32 %v3880_v25, 0.0  ;;  %v2848_v34 = vadd.f32 %v10831_v44, %v2847_v28  ;;  %v3872_v35 = vadd.f32 %v10831_v44, %v3871_v29 }
  0xf4   : > { %v9022_v38 = vpack.c.bf16 %v4855_v26, %v4855_v26  ;;  %v9278_v39 = vpack.c.bf16 %v5111_v27, %v5111_v27  ;;  %v9802_v40 = vpop.f32.mrf.mxu0  ;;  %v10058_v41 = vpop.f32.mrf.mxu1 }
  0xf5   : > { %v9027_v42 = vpack.c.bf16 %v4860_v32, %v4860_v32  ;;  %v9283_v43 = vpack.c.bf16 %v5116_v33, %v5116_v33  ;;  %v4858_v45 = vmax.f32 %v2848_v34, 0.0  ;;  %v5114_v46 = vmax.f32 %v3872_v35, 0.0 }
  0xf6   : > { %7416 = vst.msk [vmem:[%s10850_s27 + $0x24] sm:$0xf] %vm7406_vm3, %v9022_v38  ;;  %7672 = vst.msk [vmem:[%s10850_s27 + $0x424] sm:$0xf] %vm7406_vm3, %v9278_v39  ;;  %v2859_v47 = vadd.f32 %v9802_v40, %v10831_v44  ;;  %v3883_v48 = vadd.f32 %v10058_v41, %v10831_v44  ;;  %v2850_v49 = vpop.f32.mrf.mxu0  ;;  %v3874_v50 = vpop.f32.mrf.mxu1 }
  0xf7   : > { %7421 = vst.msk [vmem:[%s10850_s27 + $0x38] sm:$0xf] %vm7406_vm3, %v9027_v42  ;;  %7677 = vst.msk [vmem:[%s10850_s27 + $0x438] sm:$0xf] %vm7406_vm3, %v9283_v43  ;;  %v9025_v51 = vpack.c.bf16 %v4858_v45, %v4858_v45  ;;  %v9281_v52 = vpack.c.bf16 %v5114_v46, %v5114_v46  ;;  %v2851_v53 = vadd.f32 %v10831_v44, %v2850_v49  ;;  %v10437_v49 = vld [vmem:[%s10626_s22 + $0x5e8] sm:$0xff]  }
  0xf8   : > { %v3875_v54 = vadd.f32 %v10831_v44, %v3874_v50  ;;  %v4861_v55 = vmax.f32 %v2859_v47, 0.0  ;;  %v5117_v56 = vmax.f32 %v3883_v48, 0.0  ;;  %v9805_v57 = vpop.f32.mrf.mxu0  ;;  %9900 = vmatmul.mubr.msk.bf16.gmra.mxu0 %vm1989_vm2, %v10428_v30  ;;  %v10061_v58 = vpop.f32.mrf.mxu1  ;;  %10156 = vmatmul.mubr.msk.bf16.gmra.mxu1 %vm1989_vm2, %v10429_v31  ;;  %v10436_v48 = vld [vmem:[%s10626_s22 + $0x1e8] sm:$0xff]  }
  0xf9   : > { %7419 = vst.msk [vmem:[%s10850_s27 + $0x30] sm:$0xf] %vm7406_vm3, %v9025_v51  ;;  %7675 = vst.msk [vmem:[%s10850_s27 + $0x430] sm:$0xf] %vm7406_vm3, %v9281_v52  ;;  %v4859_v59 = vmax.f32 %v2851_v53, 0.0  ;;  %v2872_v61 = vadd.f32 %v9805_v57, %v10831_v44  ;;  %v3896_v62 = vadd.f32 %v10061_v58, %v10831_v44  ;;  %9903 = vmatprep.mubr.msk.bf16.mxu0 %vm1989_vm2, %v10430_v36  ;;  %10159 = vmatprep.mubr.msk.bf16.mxu1 %vm1989_vm2, %v10431_v37 }
  0xfa   : > { %v5115_v60 = vmax.f32 %v3875_v54, 0.0  ;;  %v9028_v63 = vpack.c.bf16 %v4861_v55, %v4861_v55  ;;  %v9284_v0 = vpack.c.bf16 %v5117_v56, %v5117_v56  ;;  %v2863_v1 = vpop.f32.mrf.mxu0  ;;  %v3887_v2 = vpop.f32.mrf.mxu1  ;;  %v10438_v54 = vld [vmem:[%s10626_s22 + $0x1f0] sm:$0xff]  }
  0xfb   : > { %v9026_v5 = vpack.c.bf16 %v4859_v59, %v4859_v59  ;;  %v4864_v7 = vmax.f32 %v2872_v61, 0.0  ;;  %v5120_v8 = vmax.f32 %v3896_v62, 0.0  ;;  %v2864_v11 = vadd.f32 %v10831_v44, %v2863_v1  ;;  %v10439_v59 = vld [vmem:[%s10626_s22 + $0x5f0] sm:$0xff]  }
  0xfc   : > { %v9282_v6 = vpack.c.bf16 %v5115_v60, %v5115_v60  ;;  %7422 = vst.msk [vmem:[%s10850_s27 + $0x3c] sm:$0xf] %vm7406_vm3, %v9028_v63  ;;  %7678 = vst.msk [vmem:[%s10850_s27 + $0x43c] sm:$0xf] %vm7406_vm3, %v9284_v0  ;;  %v3888_v12 = vadd.f32 %v10831_v44, %v3887_v2  ;;  %v9806_v13 = vpop.f32.mrf.mxu0  ;;  %v10062_v14 = vpop.f32.mrf.mxu1 }
  0xfd   : > { %7420 = vst.msk [vmem:[%s10850_s27 + $0x34] sm:$0xf] %vm7406_vm3, %v9026_v5  ;;  %v9031_v15 = vpack.c.bf16 %v4864_v7, %v4864_v7  ;;  %v9287_v16 = vpack.c.bf16 %v5120_v8, %v5120_v8  ;;  %v2875_v17 = vadd.f32 %v9806_v13, %v10831_v44  ;;  %v3899_v18 = vadd.f32 %v10062_v14, %v10831_v44 }
  0xfe   : > { %7676 = vst.msk [vmem:[%s10850_s27 + $0x434] sm:$0xf] %vm7406_vm3, %v9282_v6  ;;  %v4862_v19 = vmax.f32 %v2864_v11, 0.0  ;;  %v5118_v20 = vmax.f32 %v3888_v12, 0.0  ;;  %v2866_v21 = vpop.f32.mrf.mxu0  ;;  %v3890_v22 = vpop.f32.mrf.mxu1 }
  0xff   : > { %7425 = vst.msk [vmem:[%s10850_s27 + $0x48] sm:$0xf] %vm7406_vm3, %v9031_v15  ;;  %7681 = vst.msk [vmem:[%s10850_s27 + $0x448] sm:$0xf] %vm7406_vm3, %v9287_v16  ;;  %v4865_v23 = vmax.f32 %v2875_v17, 0.0  ;;  %v5121_v24 = vmax.f32 %v3899_v18, 0.0  ;;  %v2867_v25 = vadd.f32 %v10831_v44, %v2866_v21  ;;  %v3891_v26 = vadd.f32 %v10831_v44, %v3890_v22 }
 0x100   : > { %v9029_v27 = vpack.c.bf16 %v4862_v19, %v4862_v19  ;;  %v9285_v28 = vpack.c.bf16 %v5118_v20, %v5118_v20  ;;  %v9809_v29 = vpop.f32.mrf.mxu0  ;;  %9904 = vmatmul.mubr.msk.bf16.gmra.mxu0 %vm1989_vm2, %v10432_v3  ;;  %v10065_v30 = vpop.f32.mrf.mxu1  ;;  %10160 = vmatmul.mubr.msk.bf16.gmra.mxu1 %vm1989_vm2, %v10433_v4  ;;  %v10440_v20 = vld [vmem:[%s10626_s22 + $0x1f8] sm:$0xff]  }
 0x101   : > { %v9032_v31 = vpack.c.bf16 %v4865_v23, %v4865_v23  ;;  %v9288_v32 = vpack.c.bf16 %v5121_v24, %v5121_v24  ;;  %v4863_v33 = vmax.f32 %v2867_v25, 0.0  ;;  %v5119_v34 = vmax.f32 %v3891_v26, 0.0  ;;  %9907 = vmatprep.mubr.msk.bf16.mxu0 %vm1989_vm2, %v10434_v9  ;;  %10163 = vmatprep.mubr.msk.bf16.mxu1 %vm1989_vm2, %v10435_v10  ;;  %v10441_v21 = vld [vmem:[%s10626_s22 + $0x5f8] sm:$0xff]   ;;  %v10442_v26 = vld [vmem:[%s10626_s22 + $0x200] sm:$0xff]  }
 0x102   : > { %7423 = vst.msk [vmem:[%s10850_s27 + $0x40] sm:$0xf] %vm7406_vm3, %v9029_v27  ;;  %7679 = vst.msk [vmem:[%s10850_s27 + $0x440] sm:$0xf] %vm7406_vm3, %v9285_v28  ;;  %v2888_v35 = vadd.f32 %v9809_v29, %v10831_v44  ;;  %v3912_v36 = vadd.f32 %v10065_v30, %v10831_v44  ;;  %v2879_v37 = vpop.f32.mrf.mxu0  ;;  %v3903_v38 = vpop.f32.mrf.mxu1  ;;  %v10443_v27 = vld [vmem:[%s10626_s22 + $0x600] sm:$0xff]  }
 0x103   : > { %7426 = vst.msk [vmem:[%s10850_s27 + $0x4c] sm:$0xf] %vm7406_vm3, %v9032_v31  ;;  %7682 = vst.msk [vmem:[%s10850_s27 + $0x44c] sm:$0xf] %vm7406_vm3, %v9288_v32  ;;  %v9030_v39 = vpack.c.bf16 %v4863_v33, %v4863_v33  ;;  %v9286_v40 = vpack.c.bf16 %v5119_v34, %v5119_v34  ;;  %v2880_v41 = vadd.f32 %v10831_v44, %v2879_v37 }
 0x104   : > { %v3904_v42 = vadd.f32 %v10831_v44, %v3903_v38  ;;  %v4868_v43 = vmax.f32 %v2888_v35, 0.0  ;;  %v5124_v45 = vmax.f32 %v3912_v36, 0.0  ;;  %v9810_v46 = vpop.f32.mrf.mxu0  ;;  %v10066_v47 = vpop.f32.mrf.mxu1 }
 0x105   : > { %7424 = vst.msk [vmem:[%s10850_s27 + $0x44] sm:$0xf] %vm7406_vm3, %v9030_v39  ;;  %7680 = vst.msk [vmem:[%s10850_s27 + $0x444] sm:$0xf] %vm7406_vm3, %v9286_v40  ;;  %v4866_v50 = vmax.f32 %v2880_v41, 0.0  ;;  %v2891_v52 = vadd.f32 %v9810_v46, %v10831_v44  ;;  %v3915_v53 = vadd.f32 %v10066_v47, %v10831_v44 }
 0x106   : > { %v5122_v51 = vmax.f32 %v3904_v42, 0.0  ;;  %v9035_v55 = vpack.c.bf16 %v4868_v43, %v4868_v43  ;;  %v9291_v56 = vpack.c.bf16 %v5124_v45, %v5124_v45  ;;  %v2882_v57 = vpop.f32.mrf.mxu0  ;;  %v3906_v58 = vpop.f32.mrf.mxu1 }
 0x107   : > { %v9033_v60 = vpack.c.bf16 %v4866_v50, %v4866_v50  ;;  %v4869_v62 = vmax.f32 %v2891_v52, 0.0  ;;  %v5125_v63 = vmax.f32 %v3915_v53, 0.0  ;;  %v2883_v0 = vadd.f32 %v10831_v44, %v2882_v57  ;;  %v10444_v57 = vld [vmem:[%s10626_s22 + $0x208] sm:$0xff]  }
 0x108   : > { %v9289_v61 = vpack.c.bf16 %v5122_v51, %v5122_v51  ;;  %7429 = vst.msk [vmem:[%s10850_s27 + $0x58] sm:$0xf] %vm7406_vm3, %v9035_v55  ;;  %7685 = vst.msk [vmem:[%s10850_s27 + $0x458] sm:$0xf] %vm7406_vm3, %v9291_v56  ;;  %v3907_v1 = vadd.f32 %v10831_v44, %v3906_v58  ;;  %v9813_v2 = vpop.f32.mrf.mxu0  ;;  %9908 = vmatmul.mubr.msk.bf16.gmra.mxu0 %vm1989_vm2, %v10436_v48  ;;  %v10069_v3 = vpop.f32.mrf.mxu1  ;;  %10164 = vmatmul.mubr.msk.bf16.gmra.mxu1 %vm1989_vm2, %v10437_v49  ;;  %v10445_v58 = vld [vmem:[%s10626_s22 + $0x608] sm:$0xff]  }
 0x109   : > { %7427 = vst.msk [vmem:[%s10850_s27 + $0x50] sm:$0xf] %vm7406_vm3, %v9033_v60  ;;  %v9036_v4 = vpack.c.bf16 %v4869_v62, %v4869_v62  ;;  %v9292_v5 = vpack.c.bf16 %v5125_v63, %v5125_v63  ;;  %v2904_v6 = vadd.f32 %v9813_v2, %v10831_v44  ;;  %v3928_v7 = vadd.f32 %v10069_v3, %v10831_v44  ;;  %v10446_v63 = vld [vmem:[%s10626_s22 + $0x210] sm:$0xff]  }
 0x10a   : > { %7683 = vst.msk [vmem:[%s10850_s27 + $0x450] sm:$0xf] %vm7406_vm3, %v9289_v61  ;;  %9911 = vmatprep.mubr.msk.bf16.mxu0 %vm1989_vm2, %v10438_v54  ;;  %v4867_v8 = vmax.f32 %v2883_v0, 0.0  ;;  %v5123_v9 = vmax.f32 %v3907_v1, 0.0  ;;  %v2895_v10 = vpop.f32.mrf.mxu0  ;;  %v3919_v11 = vpop.f32.mrf.mxu1  ;;  %10167 = vmatprep.mubr.msk.bf16.mxu1 %vm1989_vm2, %v10439_v59  ;;  %v10447_v0 = vld [vmem:[%s10626_s22 + $0x610] sm:$0xff]  }
 0x10b   : > { %7430 = vst.msk [vmem:[%s10850_s27 + $0x5c] sm:$0xf] %vm7406_vm3, %v9036_v4  ;;  %7686 = vst.msk [vmem:[%s10850_s27 + $0x45c] sm:$0xf] %vm7406_vm3, %v9292_v5  ;;  %v4872_v12 = vmax.f32 %v2904_v6, 0.0  ;;  %v5128_v13 = vmax.f32 %v3928_v7, 0.0  ;;  %v2896_v14 = vadd.f32 %v10831_v44, %v2895_v10  ;;  %v3920_v15 = vadd.f32 %v10831_v44, %v3919_v11 }
 0x10c   : > { %v9034_v16 = vpack.c.bf16 %v4867_v8, %v4867_v8  ;;  %v9290_v17 = vpack.c.bf16 %v5123_v9, %v5123_v9  ;;  %v9814_v18 = vpop.f32.mrf.mxu0  ;;  %v10070_v19 = vpop.f32.mrf.mxu1 }
 0x10d   : > { %v9039_v22 = vpack.c.bf16 %v4872_v12, %v4872_v12  ;;  %v9295_v23 = vpack.c.bf16 %v5128_v13, %v5128_v13  ;;  %v4870_v24 = vmax.f32 %v2896_v14, 0.0  ;;  %v5126_v25 = vmax.f32 %v3920_v15, 0.0 }
 0x10e   : > { %7428 = vst.msk [vmem:[%s10850_s27 + $0x54] sm:$0xf] %vm7406_vm3, %v9034_v16  ;;  %7684 = vst.msk [vmem:[%s10850_s27 + $0x454] sm:$0xf] %vm7406_vm3, %v9290_v17  ;;  %v2907_v28 = vadd.f32 %v9814_v18, %v10831_v44  ;;  %v3931_v29 = vadd.f32 %v10070_v19, %v10831_v44  ;;  %v2898_v30 = vpop.f32.mrf.mxu0  ;;  %v3922_v31 = vpop.f32.mrf.mxu1 }
 0x10f   : > { %7433 = vst.msk [vmem:[%s10850_s27 + $0x68] sm:$0xf] %vm7406_vm3, %v9039_v22  ;;  %7689 = vst.msk [vmem:[%s10850_s27 + $0x468] sm:$0xf] %vm7406_vm3, %v9295_v23  ;;  %v9037_v32 = vpack.c.bf16 %v4870_v24, %v4870_v24  ;;  %v9293_v33 = vpack.c.bf16 %v5126_v25, %v5126_v25  ;;  %v2899_v34 = vadd.f32 %v10831_v44, %v2898_v30  ;;  %v10449_v30 = vld [vmem:[%s10626_s22 + $0x618] sm:$0xff]  }
 0x110   : > { %v3923_v35 = vadd.f32 %v10831_v44, %v3922_v31  ;;  %v4873_v36 = vmax.f32 %v2907_v28, 0.0  ;;  %v5129_v37 = vmax.f32 %v3931_v29, 0.0  ;;  %v9817_v38 = vpop.f32.mrf.mxu0  ;;  %9912 = vmatmul.mubr.msk.bf16.gmra.mxu0 %vm1989_vm2, %v10440_v20  ;;  %v10073_v39 = vpop.f32.mrf.mxu1  ;;  %10168 = vmatmul.mubr.msk.bf16.gmra.mxu1 %vm1989_vm2, %v10441_v21  ;;  %v10448_v29 = vld [vmem:[%s10626_s22 + $0x218] sm:$0xff]  }
 0x111   : > { %7431 = vst.msk [vmem:[%s10850_s27 + $0x60] sm:$0xf] %vm7406_vm3, %v9037_v32  ;;  %7687 = vst.msk [vmem:[%s10850_s27 + $0x460] sm:$0xf] %vm7406_vm3, %v9293_v33  ;;  %v4871_v40 = vmax.f32 %v2899_v34, 0.0  ;;  %v2920_v42 = vadd.f32 %v9817_v38, %v10831_v44  ;;  %v3944_v43 = vadd.f32 %v10073_v39, %v10831_v44  ;;  %9915 = vmatprep.mubr.msk.bf16.mxu0 %vm1989_vm2, %v10442_v26  ;;  %10171 = vmatprep.mubr.msk.bf16.mxu1 %vm1989_vm2, %v10443_v27 }
 0x112   : > { %v5127_v41 = vmax.f32 %v3923_v35, 0.0  ;;  %v9040_v45 = vpack.c.bf16 %v4873_v36, %v4873_v36  ;;  %v9296_v46 = vpack.c.bf16 %v5129_v37, %v5129_v37  ;;  %v2911_v47 = vpop.f32.mrf.mxu0  ;;  %v3935_v48 = vpop.f32.mrf.mxu1  ;;  %v10450_v35 = vld [vmem:[%s10626_s22 + $0x220] sm:$0xff]  }
 0x113   : > { %v9038_v49 = vpack.c.bf16 %v4871_v40, %v4871_v40  ;;  %v4876_v51 = vmax.f32 %v2920_v42, 0.0  ;;  %v5132_v52 = vmax.f32 %v3944_v43, 0.0  ;;  %v2912_v53 = vadd.f32 %v10831_v44, %v2911_v47  ;;  %v10451_v40 = vld [vmem:[%s10626_s22 + $0x620] sm:$0xff]  }
 0x114   : > { %v9294_v50 = vpack.c.bf16 %v5127_v41, %v5127_v41  ;;  %7434 = vst.msk [vmem:[%s10850_s27 + $0x6c] sm:$0xf] %vm7406_vm3, %v9040_v45  ;;  %7690 = vst.msk [vmem:[%s10850_s27 + $0x46c] sm:$0xf] %vm7406_vm3, %v9296_v46  ;;  %v3936_v54 = vadd.f32 %v10831_v44, %v3935_v48  ;;  %v9818_v55 = vpop.f32.mrf.mxu0  ;;  %v10074_v56 = vpop.f32.mrf.mxu1 }
 0x115   : > { %7432 = vst.msk [vmem:[%s10850_s27 + $0x64] sm:$0xf] %vm7406_vm3, %v9038_v49  ;;  %v9043_v59 = vpack.c.bf16 %v4876_v51, %v4876_v51  ;;  %v9299_v60 = vpack.c.bf16 %v5132_v52, %v5132_v52  ;;  %v2923_v61 = vadd.f32 %v9818_v55, %v10831_v44  ;;  %v3947_v62 = vadd.f32 %v10074_v56, %v10831_v44  ;;  %v11125_v52 = vld [vmem:[%s12718_s2] ss:$0 sm:$0xff] }
 0x116   : > { %7688 = vst.msk [vmem:[%s10850_s27 + $0x464] sm:$0xf] %vm7406_vm3, %v9294_v50  ;;  %v4874_v1 = vmax.f32 %v2912_v53, 0.0  ;;  %v5130_v2 = vmax.f32 %v3936_v54, 0.0  ;;  %v2914_v3 = vpop.f32.mrf.mxu0  ;;  %v3938_v4 = vpop.f32.mrf.mxu1 }
 0x117   : > { %7437 = vst.msk [vmem:[%s10850_s27 + $0x78] sm:$0xf] %vm7406_vm3, %v9043_v59  ;;  %7693 = vst.msk [vmem:[%s10850_s27 + $0x478] sm:$0xf] %vm7406_vm3, %v9299_v60  ;;  %v4877_v5 = vmax.f32 %v2923_v61, 0.0  ;;  %v5133_v6 = vmax.f32 %v3947_v62, 0.0  ;;  %v2915_v7 = vadd.f32 %v10831_v44, %v2914_v3  ;;  %v3939_v8 = vadd.f32 %v10831_v44, %v3938_v4 }
 0x118   : > { %v9041_v9 = vpack.c.bf16 %v4874_v1, %v4874_v1  ;;  %v9297_v10 = vpack.c.bf16 %v5130_v2, %v5130_v2  ;;  %v9821_v11 = vpop.f32.mrf.mxu0  ;;  %9916 = vmatmul.mubr.msk.bf16.gmra.mxu0 %vm1989_vm2, %v10444_v57  ;;  %v10077_v12 = vpop.f32.mrf.mxu1  ;;  %10172 = vmatmul.mubr.msk.bf16.gmra.mxu1 %vm1989_vm2, %v10445_v58  ;;  %v10452_v2 = vld [vmem:[%s10626_s22 + $0x228] sm:$0xff]  }
 0x119   : > { %v9044_v13 = vpack.c.bf16 %v4877_v5, %v4877_v5  ;;  %v9300_v14 = vpack.c.bf16 %v5133_v6, %v5133_v6  ;;  %v4875_v15 = vmax.f32 %v2915_v7, 0.0  ;;  %v5131_v16 = vmax.f32 %v3939_v8, 0.0  ;;  %9919 = vmatprep.mubr.msk.bf16.mxu0 %vm1989_vm2, %v10446_v63  ;;  %10175 = vmatprep.mubr.msk.bf16.mxu1 %vm1989_vm2, %v10447_v0  ;;  %v10453_v3 = vld [vmem:[%s10626_s22 + $0x628] sm:$0xff]   ;;  %v10454_v8 = vld [vmem:[%s10626_s22 + $0x230] sm:$0xff]  }
 0x11a   : > { %7435 = vst.msk [vmem:[%s10850_s27 + $0x70] sm:$0xf] %vm7406_vm3, %v9041_v9  ;;  %7691 = vst.msk [vmem:[%s10850_s27 + $0x470] sm:$0xf] %vm7406_vm3, %v9297_v10  ;;  %v2936_v17 = vadd.f32 %v9821_v11, %v10831_v44  ;;  %v3960_v18 = vadd.f32 %v10077_v12, %v10831_v44  ;;  %v2927_v19 = vpop.f32.mrf.mxu0  ;;  %v3951_v20 = vpop.f32.mrf.mxu1  ;;  %v10455_v9 = vld [vmem:[%s10626_s22 + $0x630] sm:$0xff]  }
 0x11b   : > { %7438 = vst.msk [vmem:[%s10850_s27 + $0x7c] sm:$0xf] %vm7406_vm3, %v9044_v13  ;;  %7694 = vst.msk [vmem:[%s10850_s27 + $0x47c] sm:$0xf] %vm7406_vm3, %v9300_v14  ;;  %v9042_v21 = vpack.c.bf16 %v4875_v15, %v4875_v15  ;;  %v9298_v22 = vpack.c.bf16 %v5131_v16, %v5131_v16  ;;  %v2928_v23 = vadd.f32 %v10831_v44, %v2927_v19 }
 0x11c   : > { %v3952_v24 = vadd.f32 %v10831_v44, %v3951_v20  ;;  %v4880_v25 = vmax.f32 %v2936_v17, 0.0  ;;  %v5136_v26 = vmax.f32 %v3960_v18, 0.0  ;;  %v9822_v27 = vpop.f32.mrf.mxu0  ;;  %v10078_v28 = vpop.f32.mrf.mxu1 }
 0x11d   : > { %7436 = vst.msk [vmem:[%s10850_s27 + $0x74] sm:$0xf] %vm7406_vm3, %v9042_v21  ;;  %7692 = vst.msk [vmem:[%s10850_s27 + $0x474] sm:$0xf] %vm7406_vm3, %v9298_v22  ;;  %v4878_v31 = vmax.f32 %v2928_v23, 0.0  ;;  %v2939_v33 = vadd.f32 %v9822_v27, %v10831_v44  ;;  %v3963_v34 = vadd.f32 %v10078_v28, %v10831_v44 }
 0x11e   : > { %v5134_v32 = vmax.f32 %v3952_v24, 0.0  ;;  %v9047_v36 = vpack.c.bf16 %v4880_v25, %v4880_v25  ;;  %v9303_v37 = vpack.c.bf16 %v5136_v26, %v5136_v26  ;;  %v2930_v38 = vpop.f32.mrf.mxu0  ;;  %v3954_v39 = vpop.f32.mrf.mxu1 }
 0x11f   : > { %v9045_v41 = vpack.c.bf16 %v4878_v31, %v4878_v31  ;;  %v4881_v43 = vmax.f32 %v2939_v33, 0.0  ;;  %v5137_v45 = vmax.f32 %v3963_v34, 0.0  ;;  %v2931_v46 = vadd.f32 %v10831_v44, %v2930_v38  ;;  %v10456_v38 = vld [vmem:[%s10626_s22 + $0x238] sm:$0xff]  }
 0x120   : > { %v9301_v42 = vpack.c.bf16 %v5134_v32, %v5134_v32  ;;  %7441 = vst.msk [vmem:[%s10850_s27 + $0x88] sm:$0xf] %vm7406_vm3, %v9047_v36  ;;  %7697 = vst.msk [vmem:[%s10850_s27 + $0x488] sm:$0xf] %vm7406_vm3, %v9303_v37  ;;  %v3955_v47 = vadd.f32 %v10831_v44, %v3954_v39  ;;  %v9825_v48 = vpop.f32.mrf.mxu0  ;;  %9920 = vmatmul.mubr.msk.bf16.gmra.mxu0 %vm1989_vm2, %v10448_v29  ;;  %v10081_v49 = vpop.f32.mrf.mxu1  ;;  %10176 = vmatmul.mubr.msk.bf16.gmra.mxu1 %vm1989_vm2, %v10449_v30  ;;  %v10457_v39 = vld [vmem:[%s10626_s22 + $0x638] sm:$0xff]  }
 0x121   : > { %7439 = vst.msk [vmem:[%s10850_s27 + $0x80] sm:$0xf] %vm7406_vm3, %v9045_v41  ;;  %v9048_v50 = vpack.c.bf16 %v4881_v43, %v4881_v43  ;;  %v9304_v51 = vpack.c.bf16 %v5137_v45, %v5137_v45  ;;  %v2952_v44 = vadd.f32 %v11125_v52, %v9825_v48  ;;  %v3976_v53 = vadd.f32 %v11125_v52, %v10081_v49  ;;  %v10458_v45 = vld [vmem:[%s10626_s22 + $0x240] sm:$0xff]  }
 0x122   : > { %7695 = vst.msk [vmem:[%s10850_s27 + $0x480] sm:$0xf] %vm7406_vm3, %v9301_v42  ;;  %9923 = vmatprep.mubr.msk.bf16.mxu0 %vm1989_vm2, %v10450_v35  ;;  %v4879_v54 = vmax.f32 %v2931_v46, 0.0  ;;  %v5135_v55 = vmax.f32 %v3955_v47, 0.0  ;;  %v2943_v56 = vpop.f32.mrf.mxu0  ;;  %v3967_v57 = vpop.f32.mrf.mxu1  ;;  %10179 = vmatprep.mubr.msk.bf16.mxu1 %vm1989_vm2, %v10451_v40  ;;  %v10459_v46 = vld [vmem:[%s10626_s22 + $0x640] sm:$0xff]  }
 0x123   : > { %7442 = vst.msk [vmem:[%s10850_s27 + $0x8c] sm:$0xf] %vm7406_vm3, %v9048_v50  ;;  %7698 = vst.msk [vmem:[%s10850_s27 + $0x48c] sm:$0xf] %vm7406_vm3, %v9304_v51  ;;  %v4884_v58 = vmax.f32 %v2952_v44, 0.0  ;;  %v5140_v59 = vmax.f32 %v3976_v53, 0.0  ;;  %v2944_v60 = vadd.f32 %v11125_v52, %v2943_v56  ;;  %v3968_v61 = vadd.f32 %v11125_v52, %v3967_v57 }
 0x124   : > { %v9046_v62 = vpack.c.bf16 %v4879_v54, %v4879_v54  ;;  %v9302_v63 = vpack.c.bf16 %v5135_v55, %v5135_v55  ;;  %v9826_v0 = vpop.f32.mrf.mxu0  ;;  %v10082_v1 = vpop.f32.mrf.mxu1 }
 0x125   : > { %v9051_v4 = vpack.c.bf16 %v4884_v58, %v4884_v58  ;;  %v9307_v5 = vpack.c.bf16 %v5140_v59, %v5140_v59  ;;  %v4882_v6 = vmax.f32 %v2944_v60, 0.0  ;;  %v5138_v7 = vmax.f32 %v3968_v61, 0.0 }
 0x126   : > { %7440 = vst.msk [vmem:[%s10850_s27 + $0x84] sm:$0xf] %vm7406_vm3, %v9046_v62  ;;  %7696 = vst.msk [vmem:[%s10850_s27 + $0x484] sm:$0xf] %vm7406_vm3, %v9302_v63  ;;  %v2955_v10 = vadd.f32 %v11125_v52, %v9826_v0  ;;  %v3979_v11 = vadd.f32 %v11125_v52, %v10082_v1  ;;  %v2946_v12 = vpop.f32.mrf.mxu0  ;;  %v3970_v13 = vpop.f32.mrf.mxu1 }
 0x127   : > { %7445 = vst.msk [vmem:[%s10850_s27 + $0x98] sm:$0xf] %vm7406_vm3, %v9051_v4  ;;  %7701 = vst.msk [vmem:[%s10850_s27 + $0x498] sm:$0xf] %vm7406_vm3, %v9307_v5  ;;  %v9049_v14 = vpack.c.bf16 %v4882_v6, %v4882_v6  ;;  %v9305_v15 = vpack.c.bf16 %v5138_v7, %v5138_v7  ;;  %v2947_v16 = vadd.f32 %v11125_v52, %v2946_v12  ;;  %v10461_v12 = vld [vmem:[%s10626_s22 + $0x648] sm:$0xff]  }
 0x128   : > { %v3971_v17 = vadd.f32 %v11125_v52, %v3970_v13  ;;  %v4885_v18 = vmax.f32 %v2955_v10, 0.0  ;;  %v5141_v19 = vmax.f32 %v3979_v11, 0.0  ;;  %v9829_v20 = vpop.f32.mrf.mxu0  ;;  %9924 = vmatmul.mubr.msk.bf16.gmra.mxu0 %vm1989_vm2, %v10452_v2  ;;  %v10085_v21 = vpop.f32.mrf.mxu1  ;;  %10180 = vmatmul.mubr.msk.bf16.gmra.mxu1 %vm1989_vm2, %v10453_v3  ;;  %v10460_v11 = vld [vmem:[%s10626_s22 + $0x248] sm:$0xff]  }
 0x129   : > { %7443 = vst.msk [vmem:[%s10850_s27 + $0x90] sm:$0xf] %vm7406_vm3, %v9049_v14  ;;  %7699 = vst.msk [vmem:[%s10850_s27 + $0x490] sm:$0xf] %vm7406_vm3, %v9305_v15  ;;  %v4883_v22 = vmax.f32 %v2947_v16, 0.0  ;;  %v2968_v24 = vadd.f32 %v11125_v52, %v9829_v20  ;;  %v3992_v25 = vadd.f32 %v11125_v52, %v10085_v21  ;;  %9927 = vmatprep.mubr.msk.bf16.mxu0 %vm1989_vm2, %v10454_v8  ;;  %10183 = vmatprep.mubr.msk.bf16.mxu1 %vm1989_vm2, %v10455_v9 }
 0x12a   : > { %v5139_v23 = vmax.f32 %v3971_v17, 0.0  ;;  %v9052_v26 = vpack.c.bf16 %v4885_v18, %v4885_v18  ;;  %v9308_v27 = vpack.c.bf16 %v5141_v19, %v5141_v19  ;;  %v2959_v28 = vpop.f32.mrf.mxu0  ;;  %v3983_v29 = vpop.f32.mrf.mxu1  ;;  %v10462_v17 = vld [vmem:[%s10626_s22 + $0x250] sm:$0xff]  }
 0x12b   : > { %v9050_v30 = vpack.c.bf16 %v4883_v22, %v4883_v22  ;;  %v4888_v32 = vmax.f32 %v2968_v24, 0.0  ;;  %v5144_v33 = vmax.f32 %v3992_v25, 0.0  ;;  %v2960_v34 = vadd.f32 %v11125_v52, %v2959_v28  ;;  %v10463_v22 = vld [vmem:[%s10626_s22 + $0x650] sm:$0xff]  }
 0x12c   : > { %v9306_v31 = vpack.c.bf16 %v5139_v23, %v5139_v23  ;;  %7446 = vst.msk [vmem:[%s10850_s27 + $0x9c] sm:$0xf] %vm7406_vm3, %v9052_v26  ;;  %7702 = vst.msk [vmem:[%s10850_s27 + $0x49c] sm:$0xf] %vm7406_vm3, %v9308_v27  ;;  %v3984_v35 = vadd.f32 %v11125_v52, %v3983_v29  ;;  %v9830_v36 = vpop.f32.mrf.mxu0  ;;  %v10086_v37 = vpop.f32.mrf.mxu1 }
 0x12d   : > { %7444 = vst.msk [vmem:[%s10850_s27 + $0x94] sm:$0xf] %vm7406_vm3, %v9050_v30  ;;  %v9055_v40 = vpack.c.bf16 %v4888_v32, %v4888_v32  ;;  %v9311_v41 = vpack.c.bf16 %v5144_v33, %v5144_v33  ;;  %v2971_v42 = vadd.f32 %v11125_v52, %v9830_v36  ;;  %v3995_v43 = vadd.f32 %v11125_v52, %v10086_v37 }
 0x12e   : > { %7700 = vst.msk [vmem:[%s10850_s27 + $0x494] sm:$0xf] %vm7406_vm3, %v9306_v31  ;;  %v4886_v47 = vmax.f32 %v2960_v34, 0.0  ;;  %v5142_v48 = vmax.f32 %v3984_v35, 0.0  ;;  %v2962_v49 = vpop.f32.mrf.mxu0  ;;  %v3986_v50 = vpop.f32.mrf.mxu1 }
 0x12f   : > { %7449 = vst.msk [vmem:[%s10850_s27 + $0xa8] sm:$0xf] %vm7406_vm3, %v9055_v40  ;;  %7705 = vst.msk [vmem:[%s10850_s27 + $0x4a8] sm:$0xf] %vm7406_vm3, %v9311_v41  ;;  %v4889_v51 = vmax.f32 %v2971_v42, 0.0  ;;  %v5145_v44 = vmax.f32 %v3995_v43, 0.0  ;;  %v2963_v53 = vadd.f32 %v11125_v52, %v2962_v49  ;;  %v3987_v54 = vadd.f32 %v11125_v52, %v3986_v50 }
 0x130   : > { %v9053_v55 = vpack.c.bf16 %v4886_v47, %v4886_v47  ;;  %v9309_v56 = vpack.c.bf16 %v5142_v48, %v5142_v48  ;;  %v9833_v57 = vpop.f32.mrf.mxu0  ;;  %9928 = vmatmul.mubr.msk.bf16.gmra.mxu0 %vm1989_vm2, %v10456_v38  ;;  %v10089_v58 = vpop.f32.mrf.mxu1  ;;  %10184 = vmatmul.mubr.msk.bf16.gmra.mxu1 %vm1989_vm2, %v10457_v39  ;;  %v10464_v48 = vld [vmem:[%s10626_s22 + $0x258] sm:$0xff]  }
 0x131   : > { %v9056_v59 = vpack.c.bf16 %v4889_v51, %v4889_v51  ;;  %v9312_v60 = vpack.c.bf16 %v5145_v44, %v5145_v44  ;;  %v4887_v61 = vmax.f32 %v2963_v53, 0.0  ;;  %v5143_v62 = vmax.f32 %v3987_v54, 0.0  ;;  %9931 = vmatprep.mubr.msk.bf16.mxu0 %vm1989_vm2, %v10458_v45  ;;  %10187 = vmatprep.mubr.msk.bf16.mxu1 %vm1989_vm2, %v10459_v46  ;;  %v10465_v49 = vld [vmem:[%s10626_s22 + $0x658] sm:$0xff]   ;;  %v10466_v54 = vld [vmem:[%s10626_s22 + $0x260] sm:$0xff]  }
 0x132   : > { %7447 = vst.msk [vmem:[%s10850_s27 + $0xa0] sm:$0xf] %vm7406_vm3, %v9053_v55  ;;  %7703 = vst.msk [vmem:[%s10850_s27 + $0x4a0] sm:$0xf] %vm7406_vm3, %v9309_v56  ;;  %v2984_v63 = vadd.f32 %v11125_v52, %v9833_v57  ;;  %v4008_v0 = vadd.f32 %v11125_v52, %v10089_v58  ;;  %v2975_v1 = vpop.f32.mrf.mxu0  ;;  %v3999_v2 = vpop.f32.mrf.mxu1  ;;  %v10467_v55 = vld [vmem:[%s10626_s22 + $0x660] sm:$0xff]  }
 0x133   : > { %7450 = vst.msk [vmem:[%s10850_s27 + $0xac] sm:$0xf] %vm7406_vm3, %v9056_v59  ;;  %7706 = vst.msk [vmem:[%s10850_s27 + $0x4ac] sm:$0xf] %vm7406_vm3, %v9312_v60  ;;  %v9054_v3 = vpack.c.bf16 %v4887_v61, %v4887_v61  ;;  %v9310_v4 = vpack.c.bf16 %v5143_v62, %v5143_v62  ;;  %v2976_v5 = vadd.f32 %v11125_v52, %v2975_v1 }
 0x134   : > { %v4000_v6 = vadd.f32 %v11125_v52, %v3999_v2  ;;  %v4892_v7 = vmax.f32 %v2984_v63, 0.0  ;;  %v5148_v8 = vmax.f32 %v4008_v0, 0.0  ;;  %v9834_v9 = vpop.f32.mrf.mxu0  ;;  %v10090_v10 = vpop.f32.mrf.mxu1 }
 0x135   : > { %7448 = vst.msk [vmem:[%s10850_s27 + $0xa4] sm:$0xf] %vm7406_vm3, %v9054_v3  ;;  %7704 = vst.msk [vmem:[%s10850_s27 + $0x4a4] sm:$0xf] %vm7406_vm3, %v9310_v4  ;;  %v4890_v13 = vmax.f32 %v2976_v5, 0.0  ;;  %v2987_v15 = vadd.f32 %v11125_v52, %v9834_v9  ;;  %v4011_v16 = vadd.f32 %v11125_v52, %v10090_v10 }
 0x136   : > { %v5146_v14 = vmax.f32 %v4000_v6, 0.0  ;;  %v9059_v18 = vpack.c.bf16 %v4892_v7, %v4892_v7  ;;  %v9315_v19 = vpack.c.bf16 %v5148_v8, %v5148_v8  ;;  %v2978_v20 = vpop.f32.mrf.mxu0  ;;  %v4002_v21 = vpop.f32.mrf.mxu1 }
 0x137   : > { %v9057_v23 = vpack.c.bf16 %v4890_v13, %v4890_v13  ;;  %v4893_v25 = vmax.f32 %v2987_v15, 0.0  ;;  %v5149_v26 = vmax.f32 %v4011_v16, 0.0  ;;  %v2979_v27 = vadd.f32 %v11125_v52, %v2978_v20  ;;  %v10468_v20 = vld [vmem:[%s10626_s22 + $0x268] sm:$0xff]  }
 0x138   : > { %v9313_v24 = vpack.c.bf16 %v5146_v14, %v5146_v14  ;;  %7453 = vst.msk [vmem:[%s10850_s27 + $0xb8] sm:$0xf] %vm7406_vm3, %v9059_v18  ;;  %7709 = vst.msk [vmem:[%s10850_s27 + $0x4b8] sm:$0xf] %vm7406_vm3, %v9315_v19  ;;  %v4003_v28 = vadd.f32 %v11125_v52, %v4002_v21  ;;  %v9837_v29 = vpop.f32.mrf.mxu0  ;;  %9932 = vmatmul.mubr.msk.bf16.gmra.mxu0 %vm1989_vm2, %v10460_v11  ;;  %v10093_v30 = vpop.f32.mrf.mxu1  ;;  %10188 = vmatmul.mubr.msk.bf16.gmra.mxu1 %vm1989_vm2, %v10461_v12  ;;  %v10469_v21 = vld [vmem:[%s10626_s22 + $0x668] sm:$0xff]  }
 0x139   : > { %7451 = vst.msk [vmem:[%s10850_s27 + $0xb0] sm:$0xf] %vm7406_vm3, %v9057_v23  ;;  %v9060_v31 = vpack.c.bf16 %v4893_v25, %v4893_v25  ;;  %v9316_v32 = vpack.c.bf16 %v5149_v26, %v5149_v26  ;;  %v3000_v33 = vadd.f32 %v11125_v52, %v9837_v29  ;;  %v4024_v34 = vadd.f32 %v11125_v52, %v10093_v30  ;;  %v10470_v26 = vld [vmem:[%s10626_s22 + $0x270] sm:$0xff]  }
 0x13a   : > { %7707 = vst.msk [vmem:[%s10850_s27 + $0x4b0] sm:$0xf] %vm7406_vm3, %v9313_v24  ;;  %9935 = vmatprep.mubr.msk.bf16.mxu0 %vm1989_vm2, %v10462_v17  ;;  %v4891_v35 = vmax.f32 %v2979_v27, 0.0  ;;  %v5147_v36 = vmax.f32 %v4003_v28, 0.0  ;;  %v2991_v37 = vpop.f32.mrf.mxu0  ;;  %v4015_v38 = vpop.f32.mrf.mxu1  ;;  %10191 = vmatprep.mubr.msk.bf16.mxu1 %vm1989_vm2, %v10463_v22  ;;  %v10471_v27 = vld [vmem:[%s10626_s22 + $0x670] sm:$0xff]  }
 0x13b   : > { %7454 = vst.msk [vmem:[%s10850_s27 + $0xbc] sm:$0xf] %vm7406_vm3, %v9060_v31  ;;  %7710 = vst.msk [vmem:[%s10850_s27 + $0x4bc] sm:$0xf] %vm7406_vm3, %v9316_v32  ;;  %v4896_v39 = vmax.f32 %v3000_v33, 0.0  ;;  %v5152_v40 = vmax.f32 %v4024_v34, 0.0  ;;  %v2992_v41 = vadd.f32 %v11125_v52, %v2991_v37  ;;  %v4016_v42 = vadd.f32 %v11125_v52, %v4015_v38 }
 0x13c   : > { %v9058_v43 = vpack.c.bf16 %v4891_v35, %v4891_v35  ;;  %v9314_v45 = vpack.c.bf16 %v5147_v36, %v5147_v36  ;;  %v9838_v46 = vpop.f32.mrf.mxu0  ;;  %v10094_v47 = vpop.f32.mrf.mxu1 }
 0x13d   : > { %v9063_v50 = vpack.c.bf16 %v4896_v39, %v4896_v39  ;;  %v9319_v51 = vpack.c.bf16 %v5152_v40, %v5152_v40  ;;  %v4894_v44 = vmax.f32 %v2992_v41, 0.0  ;;  %v5150_v53 = vmax.f32 %v4016_v42, 0.0 }
 0x13e   : > { %7452 = vst.msk [vmem:[%s10850_s27 + $0xb4] sm:$0xf] %vm7406_vm3, %v9058_v43  ;;  %7708 = vst.msk [vmem:[%s10850_s27 + $0x4b4] sm:$0xf] %vm7406_vm3, %v9314_v45  ;;  %v3003_v56 = vadd.f32 %v11125_v52, %v9838_v46  ;;  %v4027_v57 = vadd.f32 %v11125_v52, %v10094_v47  ;;  %v2994_v58 = vpop.f32.mrf.mxu0  ;;  %v4018_v59 = vpop.f32.mrf.mxu1 }
 0x13f   : > { %7457 = vst.msk [vmem:[%s10850_s27 + $0xc8] sm:$0xf] %vm7406_vm3, %v9063_v50  ;;  %7713 = vst.msk [vmem:[%s10850_s27 + $0x4c8] sm:$0xf] %vm7406_vm3, %v9319_v51  ;;  %v9061_v60 = vpack.c.bf16 %v4894_v44, %v4894_v44  ;;  %v9317_v61 = vpack.c.bf16 %v5150_v53, %v5150_v53  ;;  %v2995_v62 = vadd.f32 %v11125_v52, %v2994_v58  ;;  %v10473_v58 = vld [vmem:[%s10626_s22 + $0x678] sm:$0xff]  }
 0x140   : > { %v4019_v63 = vadd.f32 %v11125_v52, %v4018_v59  ;;  %v4897_v0 = vmax.f32 %v3003_v56, 0.0  ;;  %v5153_v1 = vmax.f32 %v4027_v57, 0.0  ;;  %v9841_v2 = vpop.f32.mrf.mxu0  ;;  %9936 = vmatmul.mubr.msk.bf16.gmra.mxu0 %vm1989_vm2, %v10464_v48  ;;  %v10097_v3 = vpop.f32.mrf.mxu1  ;;  %10192 = vmatmul.mubr.msk.bf16.gmra.mxu1 %vm1989_vm2, %v10465_v49  ;;  %v10472_v57 = vld [vmem:[%s10626_s22 + $0x278] sm:$0xff]  }
 0x141   : > { %7455 = vst.msk [vmem:[%s10850_s27 + $0xc0] sm:$0xf] %vm7406_vm3, %v9061_v60  ;;  %7711 = vst.msk [vmem:[%s10850_s27 + $0x4c0] sm:$0xf] %vm7406_vm3, %v9317_v61  ;;  %v4895_v4 = vmax.f32 %v2995_v62, 0.0  ;;  %v3016_v6 = vadd.f32 %v11125_v52, %v9841_v2  ;;  %v4040_v7 = vadd.f32 %v11125_v52, %v10097_v3  ;;  %9939 = vmatprep.mubr.msk.bf16.mxu0 %vm1989_vm2, %v10466_v54  ;;  %10195 = vmatprep.mubr.msk.bf16.mxu1 %vm1989_vm2, %v10467_v55 }
 0x142   : > { %v5151_v5 = vmax.f32 %v4019_v63, 0.0  ;;  %v9064_v8 = vpack.c.bf16 %v4897_v0, %v4897_v0  ;;  %v9320_v9 = vpack.c.bf16 %v5153_v1, %v5153_v1  ;;  %v3007_v10 = vpop.f32.mrf.mxu0  ;;  %v4031_v11 = vpop.f32.mrf.mxu1  ;;  %v10474_v63 = vld [vmem:[%s10626_s22 + $0x280] sm:$0xff]  }
 0x143   : > { %v9062_v12 = vpack.c.bf16 %v4895_v4, %v4895_v4  ;;  %v4900_v14 = vmax.f32 %v3016_v6, 0.0  ;;  %v5156_v15 = vmax.f32 %v4040_v7, 0.0  ;;  %v3008_v16 = vadd.f32 %v11125_v52, %v3007_v10  ;;  %v10475_v4 = vld [vmem:[%s10626_s22 + $0x680] sm:$0xff]  }
 0x144   : > { %v9318_v13 = vpack.c.bf16 %v5151_v5, %v5151_v5  ;;  %7458 = vst.msk [vmem:[%s10850_s27 + $0xcc] sm:$0xf] %vm7406_vm3, %v9064_v8  ;;  %7714 = vst.msk [vmem:[%s10850_s27 + $0x4cc] sm:$0xf] %vm7406_vm3, %v9320_v9  ;;  %v4032_v17 = vadd.f32 %v11125_v52, %v4031_v11  ;;  %v9842_v18 = vpop.f32.mrf.mxu0  ;;  %v10098_v19 = vpop.f32.mrf.mxu1 }
 0x145   : > { %7456 = vst.msk [vmem:[%s10850_s27 + $0xc4] sm:$0xf] %vm7406_vm3, %v9062_v12  ;;  %v9067_v22 = vpack.c.bf16 %v4900_v14, %v4900_v14  ;;  %v9323_v23 = vpack.c.bf16 %v5156_v15, %v5156_v15  ;;  %v3019_v24 = vadd.f32 %v11125_v52, %v9842_v18  ;;  %v4043_v25 = vadd.f32 %v11125_v52, %v10098_v19 }
 0x146   : > { %7712 = vst.msk [vmem:[%s10850_s27 + $0x4c4] sm:$0xf] %vm7406_vm3, %v9318_v13  ;;  %v4898_v28 = vmax.f32 %v3008_v16, 0.0  ;;  %v5154_v29 = vmax.f32 %v4032_v17, 0.0  ;;  %v3010_v30 = vpop.f32.mrf.mxu0  ;;  %v4034_v31 = vpop.f32.mrf.mxu1 }
 0x147   : > { %7461 = vst.msk [vmem:[%s10850_s27 + $0xd8] sm:$0xf] %vm7406_vm3, %v9067_v22  ;;  %7717 = vst.msk [vmem:[%s10850_s27 + $0x4d8] sm:$0xf] %vm7406_vm3, %v9323_v23  ;;  %v4901_v32 = vmax.f32 %v3019_v24, 0.0  ;;  %v5157_v33 = vmax.f32 %v4043_v25, 0.0  ;;  %v3011_v34 = vadd.f32 %v11125_v52, %v3010_v30  ;;  %v4035_v35 = vadd.f32 %v11125_v52, %v4034_v31 }
 0x148   : > { %v9065_v36 = vpack.c.bf16 %v4898_v28, %v4898_v28  ;;  %v9321_v37 = vpack.c.bf16 %v5154_v29, %v5154_v29  ;;  %v9845_v38 = vpop.f32.mrf.mxu0  ;;  %9940 = vmatmul.mubr.msk.bf16.gmra.mxu0 %vm1989_vm2, %v10468_v20  ;;  %v10101_v39 = vpop.f32.mrf.mxu1  ;;  %10196 = vmatmul.mubr.msk.bf16.gmra.mxu1 %vm1989_vm2, %v10469_v21  ;;  %v10476_v29 = vld [vmem:[%s10626_s22 + $0x288] sm:$0xff]  }
 0x149   : > { %v9068_v40 = vpack.c.bf16 %v4901_v32, %v4901_v32  ;;  %v9324_v41 = vpack.c.bf16 %v5157_v33, %v5157_v33  ;;  %v4899_v42 = vmax.f32 %v3011_v34, 0.0  ;;  %v5155_v43 = vmax.f32 %v4035_v35, 0.0  ;;  %9943 = vmatprep.mubr.msk.bf16.mxu0 %vm1989_vm2, %v10470_v26  ;;  %10199 = vmatprep.mubr.msk.bf16.mxu1 %vm1989_vm2, %v10471_v27  ;;  %v10477_v30 = vld [vmem:[%s10626_s22 + $0x688] sm:$0xff]   ;;  %v10478_v35 = vld [vmem:[%s10626_s22 + $0x290] sm:$0xff]  }
 0x14a   : > { %7459 = vst.msk [vmem:[%s10850_s27 + $0xd0] sm:$0xf] %vm7406_vm3, %v9065_v36  ;;  %7715 = vst.msk [vmem:[%s10850_s27 + $0x4d0] sm:$0xf] %vm7406_vm3, %v9321_v37  ;;  %v3032_v45 = vadd.f32 %v11125_v52, %v9845_v38  ;;  %v4056_v46 = vadd.f32 %v11125_v52, %v10101_v39  ;;  %v3023_v47 = vpop.f32.mrf.mxu0  ;;  %v4047_v48 = vpop.f32.mrf.mxu1  ;;  %v10479_v36 = vld [vmem:[%s10626_s22 + $0x690] sm:$0xff]  }
 0x14b   : > { %7462 = vst.msk [vmem:[%s10850_s27 + $0xdc] sm:$0xf] %vm7406_vm3, %v9068_v40  ;;  %7718 = vst.msk [vmem:[%s10850_s27 + $0x4dc] sm:$0xf] %vm7406_vm3, %v9324_v41  ;;  %v9066_v49 = vpack.c.bf16 %v4899_v42, %v4899_v42  ;;  %v9322_v50 = vpack.c.bf16 %v5155_v43, %v5155_v43  ;;  %v3024_v51 = vadd.f32 %v11125_v52, %v3023_v47 }
 0x14c   : > { %v4048_v44 = vadd.f32 %v11125_v52, %v4047_v48  ;;  %v4904_v53 = vmax.f32 %v3032_v45, 0.0  ;;  %v5160_v54 = vmax.f32 %v4056_v46, 0.0  ;;  %v9846_v55 = vpop.f32.mrf.mxu0  ;;  %v10102_v56 = vpop.f32.mrf.mxu1 }
 0x14d   : > { %7460 = vst.msk [vmem:[%s10850_s27 + $0xd4] sm:$0xf] %vm7406_vm3, %v9066_v49  ;;  %7716 = vst.msk [vmem:[%s10850_s27 + $0x4d4] sm:$0xf] %vm7406_vm3, %v9322_v50  ;;  %v4902_v59 = vmax.f32 %v3024_v51, 0.0  ;;  %v3035_v61 = vadd.f32 %v11125_v52, %v9846_v55  ;;  %v4059_v62 = vadd.f32 %v11125_v52, %v10102_v56 }
 0x14e   : > { %v5158_v60 = vmax.f32 %v4048_v44, 0.0  ;;  %v9071_v0 = vpack.c.bf16 %v4904_v53, %v4904_v53  ;;  %v9327_v1 = vpack.c.bf16 %v5160_v54, %v5160_v54  ;;  %v3026_v2 = vpop.f32.mrf.mxu0  ;;  %v4050_v3 = vpop.f32.mrf.mxu1 }
 0x14f   : > { %v9069_v5 = vpack.c.bf16 %v4902_v59, %v4902_v59  ;;  %v4905_v7 = vmax.f32 %v3035_v61, 0.0  ;;  %v5161_v8 = vmax.f32 %v4059_v62, 0.0  ;;  %v3027_v9 = vadd.f32 %v11125_v52, %v3026_v2  ;;  %v10480_v2 = vld [vmem:[%s10626_s22 + $0x298] sm:$0xff]  }
 0x150   : > { %v9325_v6 = vpack.c.bf16 %v5158_v60, %v5158_v60  ;;  %7465 = vst.msk [vmem:[%s10850_s27 + $0xe8] sm:$0xf] %vm7406_vm3, %v9071_v0  ;;  %7721 = vst.msk [vmem:[%s10850_s27 + $0x4e8] sm:$0xf] %vm7406_vm3, %v9327_v1  ;;  %v4051_v10 = vadd.f32 %v11125_v52, %v4050_v3  ;;  %v9849_v11 = vpop.f32.mrf.mxu0  ;;  %9944 = vmatmul.mubr.msk.bf16.gmra.mxu0 %vm1989_vm2, %v10472_v57  ;;  %v10105_v12 = vpop.f32.mrf.mxu1  ;;  %10200 = vmatmul.mubr.msk.bf16.gmra.mxu1 %vm1989_vm2, %v10473_v58  ;;  %v10481_v3 = vld [vmem:[%s10626_s22 + $0x698] sm:$0xff]  }
 0x151   : > { %7463 = vst.msk [vmem:[%s10850_s27 + $0xe0] sm:$0xf] %vm7406_vm3, %v9069_v5  ;;  %v9072_v13 = vpack.c.bf16 %v4905_v7, %v4905_v7  ;;  %v9328_v14 = vpack.c.bf16 %v5161_v8, %v5161_v8  ;;  %v3048_v15 = vadd.f32 %v11125_v52, %v9849_v11  ;;  %v4072_v16 = vadd.f32 %v11125_v52, %v10105_v12  ;;  %v10482_v8 = vld [vmem:[%s10626_s22 + $0x2a0] sm:$0xff]  }
 0x152   : > { %7719 = vst.msk [vmem:[%s10850_s27 + $0x4e0] sm:$0xf] %vm7406_vm3, %v9325_v6  ;;  %9947 = vmatprep.mubr.msk.bf16.mxu0 %vm1989_vm2, %v10474_v63  ;;  %v4903_v17 = vmax.f32 %v3027_v9, 0.0  ;;  %v5159_v18 = vmax.f32 %v4051_v10, 0.0  ;;  %v3039_v19 = vpop.f32.mrf.mxu0  ;;  %v4063_v20 = vpop.f32.mrf.mxu1  ;;  %10203 = vmatprep.mubr.msk.bf16.mxu1 %vm1989_vm2, %v10475_v4  ;;  %v10483_v9 = vld [vmem:[%s10626_s22 + $0x6a0] sm:$0xff]  }
 0x153   : > { %7466 = vst.msk [vmem:[%s10850_s27 + $0xec] sm:$0xf] %vm7406_vm3, %v9072_v13  ;;  %7722 = vst.msk [vmem:[%s10850_s27 + $0x4ec] sm:$0xf] %vm7406_vm3, %v9328_v14  ;;  %v4908_v21 = vmax.f32 %v3048_v15, 0.0  ;;  %v5164_v22 = vmax.f32 %v4072_v16, 0.0  ;;  %v3040_v23 = vadd.f32 %v11125_v52, %v3039_v19  ;;  %v4064_v24 = vadd.f32 %v11125_v52, %v4063_v20 }
 0x154   : > { %v9070_v25 = vpack.c.bf16 %v4903_v17, %v4903_v17  ;;  %v9326_v26 = vpack.c.bf16 %v5159_v18, %v5159_v18  ;;  %v9850_v27 = vpop.f32.mrf.mxu0  ;;  %v10106_v28 = vpop.f32.mrf.mxu1 }
 0x155   : > { %v9075_v31 = vpack.c.bf16 %v4908_v21, %v4908_v21  ;;  %v9331_v32 = vpack.c.bf16 %v5164_v22, %v5164_v22  ;;  %v4906_v33 = vmax.f32 %v3040_v23, 0.0  ;;  %v5162_v34 = vmax.f32 %v4064_v24, 0.0 }
 0x156   : > { %7464 = vst.msk [vmem:[%s10850_s27 + $0xe4] sm:$0xf] %vm7406_vm3, %v9070_v25  ;;  %7720 = vst.msk [vmem:[%s10850_s27 + $0x4e4] sm:$0xf] %vm7406_vm3, %v9326_v26  ;;  %v3051_v37 = vadd.f32 %v11125_v52, %v9850_v27  ;;  %v4075_v38 = vadd.f32 %v11125_v52, %v10106_v28  ;;  %v3042_v39 = vpop.f32.mrf.mxu0  ;;  %v4066_v40 = vpop.f32.mrf.mxu1 }
 0x157   : > { %7469 = vst.msk [vmem:[%s10850_s27 + $0xf8] sm:$0xf] %vm7406_vm3, %v9075_v31  ;;  %7725 = vst.msk [vmem:[%s10850_s27 + $0x4f8] sm:$0xf] %vm7406_vm3, %v9331_v32  ;;  %v9073_v41 = vpack.c.bf16 %v4906_v33, %v4906_v33  ;;  %v9329_v42 = vpack.c.bf16 %v5162_v34, %v5162_v34  ;;  %v3043_v43 = vadd.f32 %v11125_v52, %v3042_v39  ;;  %v10485_v39 = vld [vmem:[%s10626_s22 + $0x6a8] sm:$0xff]  }
 0x158   : > { %v4067_v45 = vadd.f32 %v11125_v52, %v4066_v40  ;;  %v4909_v46 = vmax.f32 %v3051_v37, 0.0  ;;  %v5165_v47 = vmax.f32 %v4075_v38, 0.0  ;;  %v9853_v48 = vpop.f32.mrf.mxu0  ;;  %9948 = vmatmul.mubr.msk.bf16.gmra.mxu0 %vm1989_vm2, %v10476_v29  ;;  %v10109_v49 = vpop.f32.mrf.mxu1  ;;  %10204 = vmatmul.mubr.msk.bf16.gmra.mxu1 %vm1989_vm2, %v10477_v30  ;;  %v10484_v38 = vld [vmem:[%s10626_s22 + $0x2a8] sm:$0xff]  }
 0x159   : > { %7467 = vst.msk [vmem:[%s10850_s27 + $0xf0] sm:$0xf] %vm7406_vm3, %v9073_v41  ;;  %7723 = vst.msk [vmem:[%s10850_s27 + $0x4f0] sm:$0xf] %vm7406_vm3, %v9329_v42  ;;  %v4907_v50 = vmax.f32 %v3043_v43, 0.0  ;;  %v3064_v44 = vadd.f32 %v11125_v52, %v9853_v48  ;;  %v4088_v53 = vadd.f32 %v11125_v52, %v10109_v49  ;;  %9951 = vmatprep.mubr.msk.bf16.mxu0 %vm1989_vm2, %v10478_v35  ;;  %10207 = vmatprep.mubr.msk.bf16.mxu1 %vm1989_vm2, %v10479_v36 }
 0x15a   : > { %v5163_v51 = vmax.f32 %v4067_v45, 0.0  ;;  %v9076_v54 = vpack.c.bf16 %v4909_v46, %v4909_v46  ;;  %v9332_v55 = vpack.c.bf16 %v5165_v47, %v5165_v47  ;;  %v3055_v56 = vpop.f32.mrf.mxu0  ;;  %v4079_v57 = vpop.f32.mrf.mxu1  ;;  %v10486_v45 = vld [vmem:[%s10626_s22 + $0x2b0] sm:$0xff]  }
 0x15b   : > { %v9074_v58 = vpack.c.bf16 %v4907_v50, %v4907_v50  ;;  %v4912_v60 = vmax.f32 %v3064_v44, 0.0  ;;  %v5168_v61 = vmax.f32 %v4088_v53, 0.0  ;;  %v3056_v62 = vadd.f32 %v11125_v52, %v3055_v56  ;;  %v10487_v50 = vld [vmem:[%s10626_s22 + $0x6b0] sm:$0xff]  }
 0x15c   : > { %v9330_v59 = vpack.c.bf16 %v5163_v51, %v5163_v51  ;;  %7470 = vst.msk [vmem:[%s10850_s27 + $0xfc] sm:$0xf] %vm7406_vm3, %v9076_v54  ;;  %7726 = vst.msk [vmem:[%s10850_s27 + $0x4fc] sm:$0xf] %vm7406_vm3, %v9332_v55  ;;  %v4080_v63 = vadd.f32 %v11125_v52, %v4079_v57  ;;  %v9854_v0 = vpop.f32.mrf.mxu0  ;;  %v10110_v1 = vpop.f32.mrf.mxu1 }
 0x15d   : > { %7468 = vst.msk [vmem:[%s10850_s27 + $0xf4] sm:$0xf] %vm7406_vm3, %v9074_v58  ;;  %v9079_v4 = vpack.c.bf16 %v4912_v60, %v4912_v60  ;;  %v9335_v5 = vpack.c.bf16 %v5168_v61, %v5168_v61  ;;  %v3067_v6 = vadd.f32 %v11125_v52, %v9854_v0  ;;  %v4091_v7 = vadd.f32 %v11125_v52, %v10110_v1 }
 0x15e   : > { %7724 = vst.msk [vmem:[%s10850_s27 + $0x4f4] sm:$0xf] %vm7406_vm3, %v9330_v59  ;;  %v4910_v10 = vmax.f32 %v3056_v62, 0.0  ;;  %v5166_v11 = vmax.f32 %v4080_v63, 0.0  ;;  %v3058_v12 = vpop.f32.mrf.mxu0  ;;  %v4082_v13 = vpop.f32.mrf.mxu1 }
 0x15f   : > { %7473 = vst.msk [vmem:[%s10850_s27 + $0x108] sm:$0xf] %vm7406_vm3, %v9079_v4  ;;  %7729 = vst.msk [vmem:[%s10850_s27 + $0x508] sm:$0xf] %vm7406_vm3, %v9335_v5  ;;  %v4913_v14 = vmax.f32 %v3067_v6, 0.0  ;;  %v5169_v15 = vmax.f32 %v4091_v7, 0.0  ;;  %v3059_v16 = vadd.f32 %v11125_v52, %v3058_v12  ;;  %v4083_v17 = vadd.f32 %v11125_v52, %v4082_v13 }
 0x160   : > { %v9077_v18 = vpack.c.bf16 %v4910_v10, %v4910_v10  ;;  %v9333_v19 = vpack.c.bf16 %v5166_v11, %v5166_v11  ;;  %v9857_v20 = vpop.f32.mrf.mxu0  ;;  %9952 = vmatmul.mubr.msk.bf16.gmra.mxu0 %vm1989_vm2, %v10480_v2  ;;  %v10113_v21 = vpop.f32.mrf.mxu1  ;;  %10208 = vmatmul.mubr.msk.bf16.gmra.mxu1 %vm1989_vm2, %v10481_v3  ;;  %v10488_v11 = vld [vmem:[%s10626_s22 + $0x2b8] sm:$0xff]  }
 0x161   : > { %v9080_v22 = vpack.c.bf16 %v4913_v14, %v4913_v14  ;;  %v9336_v23 = vpack.c.bf16 %v5169_v15, %v5169_v15  ;;  %v4911_v24 = vmax.f32 %v3059_v16, 0.0  ;;  %v5167_v25 = vmax.f32 %v4083_v17, 0.0  ;;  %9955 = vmatprep.mubr.msk.bf16.mxu0 %vm1989_vm2, %v10482_v8  ;;  %10211 = vmatprep.mubr.msk.bf16.mxu1 %vm1989_vm2, %v10483_v9  ;;  %v10489_v12 = vld [vmem:[%s10626_s22 + $0x6b8] sm:$0xff]   ;;  %v10490_v17 = vld [vmem:[%s10626_s22 + $0x2c0] sm:$0xff]  }
 0x162   : > { %7471 = vst.msk [vmem:[%s10850_s27 + $0x100] sm:$0xf] %vm7406_vm3, %v9077_v18  ;;  %7727 = vst.msk [vmem:[%s10850_s27 + $0x500] sm:$0xf] %vm7406_vm3, %v9333_v19  ;;  %v3080_v26 = vadd.f32 %v11125_v52, %v9857_v20  ;;  %v4104_v27 = vadd.f32 %v11125_v52, %v10113_v21  ;;  %v3071_v28 = vpop.f32.mrf.mxu0  ;;  %v4095_v29 = vpop.f32.mrf.mxu1  ;;  %v10491_v18 = vld [vmem:[%s10626_s22 + $0x6c0] sm:$0xff]  }
 0x163   : > { %7474 = vst.msk [vmem:[%s10850_s27 + $0x10c] sm:$0xf] %vm7406_vm3, %v9080_v22  ;;  %7730 = vst.msk [vmem:[%s10850_s27 + $0x50c] sm:$0xf] %vm7406_vm3, %v9336_v23  ;;  %v9078_v30 = vpack.c.bf16 %v4911_v24, %v4911_v24  ;;  %v9334_v31 = vpack.c.bf16 %v5167_v25, %v5167_v25  ;;  %v3072_v32 = vadd.f32 %v11125_v52, %v3071_v28 }
 0x164   : > { %v4096_v33 = vadd.f32 %v11125_v52, %v4095_v29  ;;  %v4916_v34 = vmax.f32 %v3080_v26, 0.0  ;;  %v5172_v35 = vmax.f32 %v4104_v27, 0.0  ;;  %v9858_v36 = vpop.f32.mrf.mxu0  ;;  %v10114_v37 = vpop.f32.mrf.mxu1 }
 0x165   : > { %7472 = vst.msk [vmem:[%s10850_s27 + $0x104] sm:$0xf] %vm7406_vm3, %v9078_v30  ;;  %7728 = vst.msk [vmem:[%s10850_s27 + $0x504] sm:$0xf] %vm7406_vm3, %v9334_v31  ;;  %v4914_v40 = vmax.f32 %v3072_v32, 0.0  ;;  %v3083_v42 = vadd.f32 %v11125_v52, %v9858_v36  ;;  %v4107_v43 = vadd.f32 %v11125_v52, %v10114_v37 }
 0x166   : > { %v5170_v41 = vmax.f32 %v4096_v33, 0.0  ;;  %v9083_v46 = vpack.c.bf16 %v4916_v34, %v4916_v34  ;;  %v9339_v47 = vpack.c.bf16 %v5172_v35, %v5172_v35  ;;  %v3074_v48 = vpop.f32.mrf.mxu0  ;;  %v4098_v49 = vpop.f32.mrf.mxu1 }
 0x167   : > { %v9081_v51 = vpack.c.bf16 %v4914_v40, %v4914_v40  ;;  %v4917_v53 = vmax.f32 %v3083_v42, 0.0  ;;  %v5173_v54 = vmax.f32 %v4107_v43, 0.0  ;;  %v3075_v55 = vadd.f32 %v11125_v52, %v3074_v48  ;;  %v10492_v48 = vld [vmem:[%s10626_s22 + $0x2c8] sm:$0xff]  }
 0x168   : > { %v9337_v44 = vpack.c.bf16 %v5170_v41, %v5170_v41  ;;  %7477 = vst.msk [vmem:[%s10850_s27 + $0x118] sm:$0xf] %vm7406_vm3, %v9083_v46  ;;  %7733 = vst.msk [vmem:[%s10850_s27 + $0x518] sm:$0xf] %vm7406_vm3, %v9339_v47  ;;  %v4099_v56 = vadd.f32 %v11125_v52, %v4098_v49  ;;  %v9861_v57 = vpop.f32.mrf.mxu0  ;;  %9956 = vmatmul.mubr.msk.bf16.gmra.mxu0 %vm1989_vm2, %v10484_v38  ;;  %v10117_v58 = vpop.f32.mrf.mxu1  ;;  %10212 = vmatmul.mubr.msk.bf16.gmra.mxu1 %vm1989_vm2, %v10485_v39  ;;  %v10493_v49 = vld [vmem:[%s10626_s22 + $0x6c8] sm:$0xff]  }
 0x169   : > { %7475 = vst.msk [vmem:[%s10850_s27 + $0x110] sm:$0xf] %vm7406_vm3, %v9081_v51  ;;  %v9084_v59 = vpack.c.bf16 %v4917_v53, %v4917_v53  ;;  %v9340_v60 = vpack.c.bf16 %v5173_v54, %v5173_v54  ;;  %v3096_v61 = vadd.f32 %v11125_v52, %v9861_v57  ;;  %v4120_v62 = vadd.f32 %v11125_v52, %v10117_v58  ;;  %v10494_v54 = vld [vmem:[%s10626_s22 + $0x2d0] sm:$0xff]  }
 0x16a   : > { %7731 = vst.msk [vmem:[%s10850_s27 + $0x510] sm:$0xf] %vm7406_vm3, %v9337_v44  ;;  %9959 = vmatprep.mubr.msk.bf16.mxu0 %vm1989_vm2, %v10486_v45  ;;  %v4915_v63 = vmax.f32 %v3075_v55, 0.0  ;;  %v5171_v0 = vmax.f32 %v4099_v56, 0.0  ;;  %v3087_v1 = vpop.f32.mrf.mxu0  ;;  %v4111_v2 = vpop.f32.mrf.mxu1  ;;  %10215 = vmatprep.mubr.msk.bf16.mxu1 %vm1989_vm2, %v10487_v50  ;;  %v10495_v55 = vld [vmem:[%s10626_s22 + $0x6d0] sm:$0xff]  }
 0x16b   : > { %7478 = vst.msk [vmem:[%s10850_s27 + $0x11c] sm:$0xf] %vm7406_vm3, %v9084_v59  ;;  %7734 = vst.msk [vmem:[%s10850_s27 + $0x51c] sm:$0xf] %vm7406_vm3, %v9340_v60  ;;  %v4920_v3 = vmax.f32 %v3096_v61, 0.0  ;;  %v5176_v4 = vmax.f32 %v4120_v62, 0.0  ;;  %v3088_v5 = vadd.f32 %v11125_v52, %v3087_v1  ;;  %v4112_v6 = vadd.f32 %v11125_v52, %v4111_v2 }
 0x16c   : > { %v9082_v7 = vpack.c.bf16 %v4915_v63, %v4915_v63  ;;  %v9338_v8 = vpack.c.bf16 %v5171_v0, %v5171_v0  ;;  %v9862_v9 = vpop.f32.mrf.mxu0  ;;  %v10118_v10 = vpop.f32.mrf.mxu1  ;;  %v11474_v62 = vld [vmem:[%s12718_s2] ss:$0 sm:$0xff] }
 0x16d   : > { %v9087_v13 = vpack.c.bf16 %v4920_v3, %v4920_v3  ;;  %v9343_v14 = vpack.c.bf16 %v5176_v4, %v5176_v4  ;;  %v4918_v15 = vmax.f32 %v3088_v5, 0.0  ;;  %v5174_v16 = vmax.f32 %v4112_v6, 0.0 }
 0x16e   : > { %7476 = vst.msk [vmem:[%s10850_s27 + $0x114] sm:$0xf] %vm7406_vm3, %v9082_v7  ;;  %7732 = vst.msk [vmem:[%s10850_s27 + $0x514] sm:$0xf] %vm7406_vm3, %v9338_v8  ;;  %v3099_v19 = vadd.f32 %v11125_v52, %v9862_v9  ;;  %v4123_v20 = vadd.f32 %v11125_v52, %v10118_v10  ;;  %v3090_v21 = vpop.f32.mrf.mxu0  ;;  %v4114_v22 = vpop.f32.mrf.mxu1 }
 0x16f   : > { %7481 = vst.msk [vmem:[%s10850_s27 + $0x128] sm:$0xf] %vm7406_vm3, %v9087_v13  ;;  %7737 = vst.msk [vmem:[%s10850_s27 + $0x528] sm:$0xf] %vm7406_vm3, %v9343_v14  ;;  %v9085_v23 = vpack.c.bf16 %v4918_v15, %v4918_v15  ;;  %v9341_v24 = vpack.c.bf16 %v5174_v16, %v5174_v16  ;;  %v3091_v25 = vadd.f32 %v11125_v52, %v3090_v21  ;;  %v10497_v21 = vld [vmem:[%s10626_s22 + $0x6d8] sm:$0xff]  }
 0x170   : > { %v4115_v26 = vadd.f32 %v11125_v52, %v4114_v22  ;;  %v4921_v27 = vmax.f32 %v3099_v19, 0.0  ;;  %v5177_v28 = vmax.f32 %v4123_v20, 0.0  ;;  %v9865_v29 = vpop.f32.mrf.mxu0  ;;  %9960 = vmatmul.mubr.msk.bf16.gmra.mxu0 %vm1989_vm2, %v10488_v11  ;;  %v10121_v30 = vpop.f32.mrf.mxu1  ;;  %10216 = vmatmul.mubr.msk.bf16.gmra.mxu1 %vm1989_vm2, %v10489_v12  ;;  %v10496_v20 = vld [vmem:[%s10626_s22 + $0x2d8] sm:$0xff]  }
 0x171   : > { %7479 = vst.msk [vmem:[%s10850_s27 + $0x120] sm:$0xf] %vm7406_vm3, %v9085_v23  ;;  %7735 = vst.msk [vmem:[%s10850_s27 + $0x520] sm:$0xf] %vm7406_vm3, %v9341_v24  ;;  %v4919_v31 = vmax.f32 %v3091_v25, 0.0  ;;  %v3112_v33 = vadd.f32 %v11125_v52, %v9865_v29  ;;  %v4136_v34 = vadd.f32 %v11125_v52, %v10121_v30  ;;  %9963 = vmatprep.mubr.msk.bf16.mxu0 %vm1989_vm2, %v10490_v17  ;;  %10219 = vmatprep.mubr.msk.bf16.mxu1 %vm1989_vm2, %v10491_v18 }
 0x172   : > { %v5175_v32 = vmax.f32 %v4115_v26, 0.0  ;;  %v9088_v35 = vpack.c.bf16 %v4921_v27, %v4921_v27  ;;  %v9344_v36 = vpack.c.bf16 %v5177_v28, %v5177_v28  ;;  %v3103_v37 = vpop.f32.mrf.mxu0  ;;  %v4127_v38 = vpop.f32.mrf.mxu1  ;;  %v10498_v26 = vld [vmem:[%s10626_s22 + $0x2e0] sm:$0xff]  }
 0x173   : > { %v9086_v39 = vpack.c.bf16 %v4919_v31, %v4919_v31  ;;  %v4924_v41 = vmax.f32 %v3112_v33, 0.0  ;;  %v5180_v42 = vmax.f32 %v4136_v34, 0.0  ;;  %v3104_v43 = vadd.f32 %v11125_v52, %v3103_v37  ;;  %v10499_v31 = vld [vmem:[%s10626_s22 + $0x6e0] sm:$0xff]  }
 0x174   : > { %v9342_v40 = vpack.c.bf16 %v5175_v32, %v5175_v32  ;;  %7482 = vst.msk [vmem:[%s10850_s27 + $0x12c] sm:$0xf] %vm7406_vm3, %v9088_v35  ;;  %7738 = vst.msk [vmem:[%s10850_s27 + $0x52c] sm:$0xf] %vm7406_vm3, %v9344_v36  ;;  %v4128_v45 = vadd.f32 %v11125_v52, %v4127_v38  ;;  %v9866_v46 = vpop.f32.mrf.mxu0  ;;  %v10122_v47 = vpop.f32.mrf.mxu1 }
 0x175   : > { %7480 = vst.msk [vmem:[%s10850_s27 + $0x124] sm:$0xf] %vm7406_vm3, %v9086_v39  ;;  %v9091_v50 = vpack.c.bf16 %v4924_v41, %v4924_v41  ;;  %v9347_v51 = vpack.c.bf16 %v5180_v42, %v5180_v42  ;;  %v3115_v44 = vadd.f32 %v11125_v52, %v9866_v46  ;;  %v4139_v53 = vadd.f32 %v11125_v52, %v10122_v47 }
 0x176   : > { %7736 = vst.msk [vmem:[%s10850_s27 + $0x524] sm:$0xf] %vm7406_vm3, %v9342_v40  ;;  %v4922_v56 = vmax.f32 %v3104_v43, 0.0  ;;  %v5178_v57 = vmax.f32 %v4128_v45, 0.0  ;;  %v3106_v58 = vpop.f32.mrf.mxu0  ;;  %v4130_v59 = vpop.f32.mrf.mxu1 }
 0x177   : > { %7485 = vst.msk [vmem:[%s10850_s27 + $0x138] sm:$0xf] %vm7406_vm3, %v9091_v50  ;;  %7741 = vst.msk [vmem:[%s10850_s27 + $0x538] sm:$0xf] %vm7406_vm3, %v9347_v51  ;;  %v4925_v60 = vmax.f32 %v3115_v44, 0.0  ;;  %v5181_v61 = vmax.f32 %v4139_v53, 0.0  ;;  %v3107_v52 = vadd.f32 %v11474_v62, %v3106_v58  ;;  %v4131_v63 = vadd.f32 %v11474_v62, %v4130_v59 }
 0x178   : > { %v9089_v0 = vpack.c.bf16 %v4922_v56, %v4922_v56  ;;  %v9345_v1 = vpack.c.bf16 %v5178_v57, %v5178_v57  ;;  %v9869_v2 = vpop.f32.mrf.mxu0  ;;  %9964 = vmatmul.mubr.msk.bf16.gmra.mxu0 %vm1989_vm2, %v10492_v48  ;;  %v10125_v3 = vpop.f32.mrf.mxu1  ;;  %10220 = vmatmul.mubr.msk.bf16.gmra.mxu1 %vm1989_vm2, %v10493_v49  ;;  %v10500_v57 = vld [vmem:[%s10626_s22 + $0x2e8] sm:$0xff]  }
 0x179   : > { %v9092_v4 = vpack.c.bf16 %v4925_v60, %v4925_v60  ;;  %v9348_v5 = vpack.c.bf16 %v5181_v61, %v5181_v61  ;;  %v4923_v6 = vmax.f32 %v3107_v52, 0.0  ;;  %v5179_v7 = vmax.f32 %v4131_v63, 0.0  ;;  %9967 = vmatprep.mubr.msk.bf16.mxu0 %vm1989_vm2, %v10494_v54  ;;  %10223 = vmatprep.mubr.msk.bf16.mxu1 %vm1989_vm2, %v10495_v55  ;;  %v10501_v58 = vld [vmem:[%s10626_s22 + $0x6e8] sm:$0xff]   ;;  %v10502_v63 = vld [vmem:[%s10626_s22 + $0x2f0] sm:$0xff]  }
 0x17a   : > { %7483 = vst.msk [vmem:[%s10850_s27 + $0x130] sm:$0xf] %vm7406_vm3, %v9089_v0  ;;  %7739 = vst.msk [vmem:[%s10850_s27 + $0x530] sm:$0xf] %vm7406_vm3, %v9345_v1  ;;  %v3128_v8 = vadd.f32 %v11474_v62, %v9869_v2  ;;  %v4152_v9 = vadd.f32 %v11474_v62, %v10125_v3  ;;  %v3119_v10 = vpop.f32.mrf.mxu0  ;;  %v4143_v11 = vpop.f32.mrf.mxu1  ;;  %v10503_v0 = vld [vmem:[%s10626_s22 + $0x6f0] sm:$0xff]  }
 0x17b   : > { %7486 = vst.msk [vmem:[%s10850_s27 + $0x13c] sm:$0xf] %vm7406_vm3, %v9092_v4  ;;  %7742 = vst.msk [vmem:[%s10850_s27 + $0x53c] sm:$0xf] %vm7406_vm3, %v9348_v5  ;;  %v9090_v12 = vpack.c.bf16 %v4923_v6, %v4923_v6  ;;  %v9346_v13 = vpack.c.bf16 %v5179_v7, %v5179_v7  ;;  %v3120_v14 = vadd.f32 %v11474_v62, %v3119_v10 }
 0x17c   : > { %v4144_v15 = vadd.f32 %v11474_v62, %v4143_v11  ;;  %v4928_v16 = vmax.f32 %v3128_v8, 0.0  ;;  %v5184_v17 = vmax.f32 %v4152_v9, 0.0  ;;  %v9870_v18 = vpop.f32.mrf.mxu0  ;;  %v10126_v19 = vpop.f32.mrf.mxu1 }
 0x17d   : > { %7484 = vst.msk [vmem:[%s10850_s27 + $0x134] sm:$0xf] %vm7406_vm3, %v9090_v12  ;;  %7740 = vst.msk [vmem:[%s10850_s27 + $0x534] sm:$0xf] %vm7406_vm3, %v9346_v13  ;;  %v4926_v22 = vmax.f32 %v3120_v14, 0.0  ;;  %v3131_v24 = vadd.f32 %v11474_v62, %v9870_v18  ;;  %v4155_v25 = vadd.f32 %v11474_v62, %v10126_v19 }
 0x17e   : > { %v5182_v23 = vmax.f32 %v4144_v15, 0.0  ;;  %v9095_v27 = vpack.c.bf16 %v4928_v16, %v4928_v16  ;;  %v9351_v28 = vpack.c.bf16 %v5184_v17, %v5184_v17  ;;  %v3122_v29 = vpop.f32.mrf.mxu0  ;;  %v4146_v30 = vpop.f32.mrf.mxu1 }
 0x17f   : > { %v9093_v32 = vpack.c.bf16 %v4926_v22, %v4926_v22  ;;  %v4929_v34 = vmax.f32 %v3131_v24, 0.0  ;;  %v5185_v35 = vmax.f32 %v4155_v25, 0.0  ;;  %v3123_v36 = vadd.f32 %v11474_v62, %v3122_v29  ;;  %v10504_v29 = vld [vmem:[%s10626_s22 + $0x2f8] sm:$0xff]  }
 0x180   : > { %v9349_v33 = vpack.c.bf16 %v5182_v23, %v5182_v23  ;;  %7489 = vst.msk [vmem:[%s10850_s27 + $0x148] sm:$0xf] %vm7406_vm3, %v9095_v27  ;;  %7745 = vst.msk [vmem:[%s10850_s27 + $0x548] sm:$0xf] %vm7406_vm3, %v9351_v28  ;;  %v4147_v37 = vadd.f32 %v11474_v62, %v4146_v30  ;;  %v9873_v38 = vpop.f32.mrf.mxu0  ;;  %9968 = vmatmul.mubr.msk.bf16.gmra.mxu0 %vm1989_vm2, %v10496_v20  ;;  %v10129_v39 = vpop.f32.mrf.mxu1  ;;  %10224 = vmatmul.mubr.msk.bf16.gmra.mxu1 %vm1989_vm2, %v10497_v21  ;;  %v10505_v30 = vld [vmem:[%s10626_s22 + $0x6f8] sm:$0xff]  }
 0x181   : > { %7487 = vst.msk [vmem:[%s10850_s27 + $0x140] sm:$0xf] %vm7406_vm3, %v9093_v32  ;;  %v9096_v40 = vpack.c.bf16 %v4929_v34, %v4929_v34  ;;  %v9352_v41 = vpack.c.bf16 %v5185_v35, %v5185_v35  ;;  %v3144_v42 = vadd.f32 %v11474_v62, %v9873_v38  ;;  %v4168_v43 = vadd.f32 %v11474_v62, %v10129_v39  ;;  %v10506_v35 = vld [vmem:[%s10626_s22 + $0x300] sm:$0xff]  }
 0x182   : > { %7743 = vst.msk [vmem:[%s10850_s27 + $0x540] sm:$0xf] %vm7406_vm3, %v9349_v33  ;;  %9971 = vmatprep.mubr.msk.bf16.mxu0 %vm1989_vm2, %v10498_v26  ;;  %v4927_v45 = vmax.f32 %v3123_v36, 0.0  ;;  %v5183_v46 = vmax.f32 %v4147_v37, 0.0  ;;  %v3135_v47 = vpop.f32.mrf.mxu0  ;;  %v4159_v48 = vpop.f32.mrf.mxu1  ;;  %10227 = vmatprep.mubr.msk.bf16.mxu1 %vm1989_vm2, %v10499_v31  ;;  %v10507_v36 = vld [vmem:[%s10626_s22 + $0x700] sm:$0xff]  }
 0x183   : > { %7490 = vst.msk [vmem:[%s10850_s27 + $0x14c] sm:$0xf] %vm7406_vm3, %v9096_v40  ;;  %7746 = vst.msk [vmem:[%s10850_s27 + $0x54c] sm:$0xf] %vm7406_vm3, %v9352_v41  ;;  %v4932_v49 = vmax.f32 %v3144_v42, 0.0  ;;  %v5188_v50 = vmax.f32 %v4168_v43, 0.0  ;;  %v3136_v51 = vadd.f32 %v11474_v62, %v3135_v47  ;;  %v4160_v44 = vadd.f32 %v11474_v62, %v4159_v48 }
 0x184   : > { %v9094_v53 = vpack.c.bf16 %v4927_v45, %v4927_v45  ;;  %v9350_v54 = vpack.c.bf16 %v5183_v46, %v5183_v46  ;;  %v9874_v55 = vpop.f32.mrf.mxu0  ;;  %v10130_v56 = vpop.f32.mrf.mxu1 }
 0x185   : > { %v9099_v59 = vpack.c.bf16 %v4932_v49, %v4932_v49  ;;  %v9355_v60 = vpack.c.bf16 %v5188_v50, %v5188_v50  ;;  %v4930_v61 = vmax.f32 %v3136_v51, 0.0  ;;  %v5186_v52 = vmax.f32 %v4160_v44, 0.0 }
 0x186   : > { %7488 = vst.msk [vmem:[%s10850_s27 + $0x144] sm:$0xf] %vm7406_vm3, %v9094_v53  ;;  %7744 = vst.msk [vmem:[%s10850_s27 + $0x544] sm:$0xf] %vm7406_vm3, %v9350_v54  ;;  %v3147_v1 = vadd.f32 %v11474_v62, %v9874_v55  ;;  %v4171_v2 = vadd.f32 %v11474_v62, %v10130_v56  ;;  %v3138_v3 = vpop.f32.mrf.mxu0  ;;  %v4162_v4 = vpop.f32.mrf.mxu1 }
 0x187   : > { %7493 = vst.msk [vmem:[%s10850_s27 + $0x158] sm:$0xf] %vm7406_vm3, %v9099_v59  ;;  %7749 = vst.msk [vmem:[%s10850_s27 + $0x558] sm:$0xf] %vm7406_vm3, %v9355_v60  ;;  %v9097_v5 = vpack.c.bf16 %v4930_v61, %v4930_v61  ;;  %v9353_v6 = vpack.c.bf16 %v5186_v52, %v5186_v52  ;;  %v3139_v7 = vadd.f32 %v11474_v62, %v3138_v3  ;;  %v10509_v3 = vld [vmem:[%s10626_s22 + $0x708] sm:$0xff]  }
 0x188   : > { %v4163_v8 = vadd.f32 %v11474_v62, %v4162_v4  ;;  %v4933_v9 = vmax.f32 %v3147_v1, 0.0  ;;  %v5189_v10 = vmax.f32 %v4171_v2, 0.0  ;;  %v9877_v11 = vpop.f32.mrf.mxu0  ;;  %9972 = vmatmul.mubr.msk.bf16.gmra.mxu0 %vm1989_vm2, %v10500_v57  ;;  %v10133_v12 = vpop.f32.mrf.mxu1  ;;  %10228 = vmatmul.mubr.msk.bf16.gmra.mxu1 %vm1989_vm2, %v10501_v58  ;;  %v10508_v2 = vld [vmem:[%s10626_s22 + $0x308] sm:$0xff]  }
 0x189   : > { %7491 = vst.msk [vmem:[%s10850_s27 + $0x150] sm:$0xf] %vm7406_vm3, %v9097_v5  ;;  %7747 = vst.msk [vmem:[%s10850_s27 + $0x550] sm:$0xf] %vm7406_vm3, %v9353_v6  ;;  %v4931_v13 = vmax.f32 %v3139_v7, 0.0  ;;  %v3160_v15 = vadd.f32 %v11474_v62, %v9877_v11  ;;  %v4184_v16 = vadd.f32 %v11474_v62, %v10133_v12  ;;  %9975 = vmatprep.mubr.msk.bf16.mxu0 %vm1989_vm2, %v10502_v63  ;;  %10231 = vmatprep.mubr.msk.bf16.mxu1 %vm1989_vm2, %v10503_v0 }
 0x18a   : > { %v5187_v14 = vmax.f32 %v4163_v8, 0.0  ;;  %v9100_v17 = vpack.c.bf16 %v4933_v9, %v4933_v9  ;;  %v9356_v18 = vpack.c.bf16 %v5189_v10, %v5189_v10  ;;  %v3151_v19 = vpop.f32.mrf.mxu0  ;;  %v4175_v20 = vpop.f32.mrf.mxu1  ;;  %v10510_v8 = vld [vmem:[%s10626_s22 + $0x310] sm:$0xff]  }
 0x18b   : > { %v9098_v21 = vpack.c.bf16 %v4931_v13, %v4931_v13  ;;  %v4936_v23 = vmax.f32 %v3160_v15, 0.0  ;;  %v5192_v24 = vmax.f32 %v4184_v16, 0.0  ;;  %v3152_v25 = vadd.f32 %v11474_v62, %v3151_v19  ;;  %v10511_v13 = vld [vmem:[%s10626_s22 + $0x710] sm:$0xff]  }
 0x18c   : > { %v9354_v22 = vpack.c.bf16 %v5187_v14, %v5187_v14  ;;  %7494 = vst.msk [vmem:[%s10850_s27 + $0x15c] sm:$0xf] %vm7406_vm3, %v9100_v17  ;;  %7750 = vst.msk [vmem:[%s10850_s27 + $0x55c] sm:$0xf] %vm7406_vm3, %v9356_v18  ;;  %v4176_v26 = vadd.f32 %v11474_v62, %v4175_v20  ;;  %v9878_v27 = vpop.f32.mrf.mxu0  ;;  %v10134_v28 = vpop.f32.mrf.mxu1 }
 0x18d   : > { %7492 = vst.msk [vmem:[%s10850_s27 + $0x154] sm:$0xf] %vm7406_vm3, %v9098_v21  ;;  %v9103_v31 = vpack.c.bf16 %v4936_v23, %v4936_v23  ;;  %v9359_v32 = vpack.c.bf16 %v5192_v24, %v5192_v24  ;;  %v3163_v33 = vadd.f32 %v11474_v62, %v9878_v27  ;;  %v4187_v34 = vadd.f32 %v11474_v62, %v10134_v28 }
 0x18e   : > { %7748 = vst.msk [vmem:[%s10850_s27 + $0x554] sm:$0xf] %vm7406_vm3, %v9354_v22  ;;  %v4934_v37 = vmax.f32 %v3152_v25, 0.0  ;;  %v5190_v38 = vmax.f32 %v4176_v26, 0.0  ;;  %v3154_v39 = vpop.f32.mrf.mxu0  ;;  %v4178_v40 = vpop.f32.mrf.mxu1 }
 0x18f   : > { %7497 = vst.msk [vmem:[%s10850_s27 + $0x168] sm:$0xf] %vm7406_vm3, %v9103_v31  ;;  %7753 = vst.msk [vmem:[%s10850_s27 + $0x568] sm:$0xf] %vm7406_vm3, %v9359_v32  ;;  %v4937_v41 = vmax.f32 %v3163_v33, 0.0  ;;  %v5193_v42 = vmax.f32 %v4187_v34, 0.0  ;;  %v3155_v43 = vadd.f32 %v11474_v62, %v3154_v39  ;;  %v4179_v45 = vadd.f32 %v11474_v62, %v4178_v40 }
 0x190   : > { %v9101_v46 = vpack.c.bf16 %v4934_v37, %v4934_v37  ;;  %v9357_v47 = vpack.c.bf16 %v5190_v38, %v5190_v38  ;;  %v9881_v48 = vpop.f32.mrf.mxu0  ;;  %9976 = vmatmul.mubr.msk.bf16.gmra.mxu0 %vm1989_vm2, %v10504_v29  ;;  %v10137_v49 = vpop.f32.mrf.mxu1  ;;  %10232 = vmatmul.mubr.msk.bf16.gmra.mxu1 %vm1989_vm2, %v10505_v30  ;;  %v10512_v38 = vld [vmem:[%s10626_s22 + $0x318] sm:$0xff]  }
 0x191   : > { %v9104_v50 = vpack.c.bf16 %v4937_v41, %v4937_v41  ;;  %v9360_v51 = vpack.c.bf16 %v5193_v42, %v5193_v42  ;;  %v4935_v44 = vmax.f32 %v3155_v43, 0.0  ;;  %v5191_v53 = vmax.f32 %v4179_v45, 0.0  ;;  %9979 = vmatprep.mubr.msk.bf16.mxu0 %vm1989_vm2, %v10506_v35  ;;  %10235 = vmatprep.mubr.msk.bf16.mxu1 %vm1989_vm2, %v10507_v36  ;;  %v10513_v39 = vld [vmem:[%s10626_s22 + $0x718] sm:$0xff]   ;;  %v10514_v45 = vld [vmem:[%s10626_s22 + $0x320] sm:$0xff]  }
 0x192   : > { %7495 = vst.msk [vmem:[%s10850_s27 + $0x160] sm:$0xf] %vm7406_vm3, %v9101_v46  ;;  %7751 = vst.msk [vmem:[%s10850_s27 + $0x560] sm:$0xf] %vm7406_vm3, %v9357_v47  ;;  %v3176_v54 = vadd.f32 %v11474_v62, %v9881_v48  ;;  %v4200_v55 = vadd.f32 %v11474_v62, %v10137_v49  ;;  %v3167_v56 = vpop.f32.mrf.mxu0  ;;  %v4191_v57 = vpop.f32.mrf.mxu1  ;;  %v10515_v46 = vld [vmem:[%s10626_s22 + $0x720] sm:$0xff]  }
 0x193   : > { %7498 = vst.msk [vmem:[%s10850_s27 + $0x16c] sm:$0xf] %vm7406_vm3, %v9104_v50  ;;  %7754 = vst.msk [vmem:[%s10850_s27 + $0x56c] sm:$0xf] %vm7406_vm3, %v9360_v51  ;;  %v9102_v58 = vpack.c.bf16 %v4935_v44, %v4935_v44  ;;  %v9358_v59 = vpack.c.bf16 %v5191_v53, %v5191_v53  ;;  %v3168_v60 = vadd.f32 %v11474_v62, %v3167_v56 }
 0x194   : > { %v4192_v61 = vadd.f32 %v11474_v62, %v4191_v57  ;;  %v4940_v52 = vmax.f32 %v3176_v54, 0.0  ;;  %v5196_v63 = vmax.f32 %v4200_v55, 0.0  ;;  %v9882_v0 = vpop.f32.mrf.mxu0  ;;  %v10138_v1 = vpop.f32.mrf.mxu1 }
 0x195   : > { %7496 = vst.msk [vmem:[%s10850_s27 + $0x164] sm:$0xf] %vm7406_vm3, %v9102_v58  ;;  %7752 = vst.msk [vmem:[%s10850_s27 + $0x564] sm:$0xf] %vm7406_vm3, %v9358_v59  ;;  %v4938_v4 = vmax.f32 %v3168_v60, 0.0  ;;  %v3179_v6 = vadd.f32 %v11474_v62, %v9882_v0  ;;  %v4203_v7 = vadd.f32 %v11474_v62, %v10138_v1 }
 0x196   : > { %v5194_v5 = vmax.f32 %v4192_v61, 0.0  ;;  %v9107_v9 = vpack.c.bf16 %v4940_v52, %v4940_v52  ;;  %v9363_v10 = vpack.c.bf16 %v5196_v63, %v5196_v63  ;;  %v3170_v11 = vpop.f32.mrf.mxu0  ;;  %v4194_v12 = vpop.f32.mrf.mxu1 }
 0x197   : > { %v9105_v14 = vpack.c.bf16 %v4938_v4, %v4938_v4  ;;  %v4941_v16 = vmax.f32 %v3179_v6, 0.0  ;;  %v5197_v17 = vmax.f32 %v4203_v7, 0.0  ;;  %v3171_v18 = vadd.f32 %v11474_v62, %v3170_v11  ;;  %v10516_v11 = vld [vmem:[%s10626_s22 + $0x328] sm:$0xff]  }
 0x198   : > { %v9361_v15 = vpack.c.bf16 %v5194_v5, %v5194_v5  ;;  %7501 = vst.msk [vmem:[%s10850_s27 + $0x178] sm:$0xf] %vm7406_vm3, %v9107_v9  ;;  %7757 = vst.msk [vmem:[%s10850_s27 + $0x578] sm:$0xf] %vm7406_vm3, %v9363_v10  ;;  %v4195_v19 = vadd.f32 %v11474_v62, %v4194_v12  ;;  %v9885_v20 = vpop.f32.mrf.mxu0  ;;  %9980 = vmatmul.mubr.msk.bf16.gmra.mxu0 %vm1989_vm2, %v10508_v2  ;;  %v10141_v21 = vpop.f32.mrf.mxu1  ;;  %10236 = vmatmul.mubr.msk.bf16.gmra.mxu1 %vm1989_vm2, %v10509_v3  ;;  %v10517_v12 = vld [vmem:[%s10626_s22 + $0x728] sm:$0xff]  }
 0x199   : > { %7499 = vst.msk [vmem:[%s10850_s27 + $0x170] sm:$0xf] %vm7406_vm3, %v9105_v14  ;;  %v9108_v22 = vpack.c.bf16 %v4941_v16, %v4941_v16  ;;  %v9364_v23 = vpack.c.bf16 %v5197_v17, %v5197_v17  ;;  %v3192_v24 = vadd.f32 %v11474_v62, %v9885_v20  ;;  %v4216_v25 = vadd.f32 %v11474_v62, %v10141_v21  ;;  %v10518_v17 = vld [vmem:[%s10626_s22 + $0x330] sm:$0xff]  }
 0x19a   : > { %7755 = vst.msk [vmem:[%s10850_s27 + $0x570] sm:$0xf] %vm7406_vm3, %v9361_v15  ;;  %9983 = vmatprep.mubr.msk.bf16.mxu0 %vm1989_vm2, %v10510_v8  ;;  %v4939_v26 = vmax.f32 %v3171_v18, 0.0  ;;  %v5195_v27 = vmax.f32 %v4195_v19, 0.0  ;;  %v3183_v28 = vpop.f32.mrf.mxu0  ;;  %v4207_v29 = vpop.f32.mrf.mxu1  ;;  %10239 = vmatprep.mubr.msk.bf16.mxu1 %vm1989_vm2, %v10511_v13  ;;  %v10519_v18 = vld [vmem:[%s10626_s22 + $0x730] sm:$0xff]  }
 0x19b   : > { %7502 = vst.msk [vmem:[%s10850_s27 + $0x17c] sm:$0xf] %vm7406_vm3, %v9108_v22  ;;  %7758 = vst.msk [vmem:[%s10850_s27 + $0x57c] sm:$0xf] %vm7406_vm3, %v9364_v23  ;;  %v4944_v30 = vmax.f32 %v3192_v24, 0.0  ;;  %v5200_v31 = vmax.f32 %v4216_v25, 0.0  ;;  %v3184_v32 = vadd.f32 %v11474_v62, %v3183_v28  ;;  %v4208_v33 = vadd.f32 %v11474_v62, %v4207_v29 }
 0x19c   : > { %v9106_v34 = vpack.c.bf16 %v4939_v26, %v4939_v26  ;;  %v9362_v35 = vpack.c.bf16 %v5195_v27, %v5195_v27  ;;  %v9886_v36 = vpop.f32.mrf.mxu0  ;;  %v10142_v37 = vpop.f32.mrf.mxu1 }
 0x19d   : > { %v9111_v40 = vpack.c.bf16 %v4944_v30, %v4944_v30  ;;  %v9367_v41 = vpack.c.bf16 %v5200_v31, %v5200_v31  ;;  %v4942_v42 = vmax.f32 %v3184_v32, 0.0  ;;  %v5198_v43 = vmax.f32 %v4208_v33, 0.0 }
 0x19e   : > { %7500 = vst.msk [vmem:[%s10850_s27 + $0x174] sm:$0xf] %vm7406_vm3, %v9106_v34  ;;  %7756 = vst.msk [vmem:[%s10850_s27 + $0x574] sm:$0xf] %vm7406_vm3, %v9362_v35  ;;  %v3195_v47 = vadd.f32 %v11474_v62, %v9886_v36  ;;  %v4219_v48 = vadd.f32 %v11474_v62, %v10142_v37  ;;  %v3186_v49 = vpop.f32.mrf.mxu0  ;;  %v4210_v50 = vpop.f32.mrf.mxu1 }
 0x19f   : > { %7505 = vst.msk [vmem:[%s10850_s27 + $0x188] sm:$0xf] %vm7406_vm3, %v9111_v40  ;;  %7761 = vst.msk [vmem:[%s10850_s27 + $0x588] sm:$0xf] %vm7406_vm3, %v9367_v41  ;;  %v9109_v51 = vpack.c.bf16 %v4942_v42, %v4942_v42  ;;  %v9365_v44 = vpack.c.bf16 %v5198_v43, %v5198_v43  ;;  %v3187_v53 = vadd.f32 %v11474_v62, %v3186_v49  ;;  %v10521_v49 = vld [vmem:[%s10626_s22 + $0x738] sm:$0xff]  }
 0x1a0   : > { %v4211_v54 = vadd.f32 %v11474_v62, %v4210_v50  ;;  %v4945_v55 = vmax.f32 %v3195_v47, 0.0  ;;  %v5201_v56 = vmax.f32 %v4219_v48, 0.0  ;;  %v9889_v57 = vpop.f32.mrf.mxu0  ;;  %9984 = vmatmul.mubr.msk.bf16.gmra.mxu0 %vm1989_vm2, %v10512_v38  ;;  %v10145_v58 = vpop.f32.mrf.mxu1  ;;  %10240 = vmatmul.mubr.msk.bf16.gmra.mxu1 %vm1989_vm2, %v10513_v39  ;;  %v10520_v48 = vld [vmem:[%s10626_s22 + $0x338] sm:$0xff]  }
 0x1a1   : > { %7503 = vst.msk [vmem:[%s10850_s27 + $0x180] sm:$0xf] %vm7406_vm3, %v9109_v51  ;;  %7759 = vst.msk [vmem:[%s10850_s27 + $0x580] sm:$0xf] %vm7406_vm3, %v9365_v44  ;;  %v4943_v59 = vmax.f32 %v3187_v53, 0.0  ;;  %v3208_v61 = vadd.f32 %v11474_v62, %v9889_v57  ;;  %v4232_v52 = vadd.f32 %v11474_v62, %v10145_v58  ;;  %9987 = vmatprep.mubr.msk.bf16.mxu0 %vm1989_vm2, %v10514_v45  ;;  %10243 = vmatprep.mubr.msk.bf16.mxu1 %vm1989_vm2, %v10515_v46 }
 0x1a2   : > { %v5199_v60 = vmax.f32 %v4211_v54, 0.0  ;;  %v9112_v63 = vpack.c.bf16 %v4945_v55, %v4945_v55  ;;  %v9368_v0 = vpack.c.bf16 %v5201_v56, %v5201_v56  ;;  %v3199_v1 = vpop.f32.mrf.mxu0  ;;  %v4223_v2 = vpop.f32.mrf.mxu1  ;;  %v10522_v54 = vld [vmem:[%s10626_s22 + $0x340] sm:$0xff]  }
 0x1a3   : > { %v9110_v3 = vpack.c.bf16 %v4943_v59, %v4943_v59  ;;  %v4948_v5 = vmax.f32 %v3208_v61, 0.0  ;;  %v5204_v6 = vmax.f32 %v4232_v52, 0.0  ;;  %v3200_v7 = vadd.f32 %v11474_v62, %v3199_v1  ;;  %v10523_v59 = vld [vmem:[%s10626_s22 + $0x740] sm:$0xff]  }
 0x1a4   : > { %v9366_v4 = vpack.c.bf16 %v5199_v60, %v5199_v60  ;;  %7506 = vst.msk [vmem:[%s10850_s27 + $0x18c] sm:$0xf] %vm7406_vm3, %v9112_v63  ;;  %7762 = vst.msk [vmem:[%s10850_s27 + $0x58c] sm:$0xf] %vm7406_vm3, %v9368_v0  ;;  %v4224_v8 = vadd.f32 %v11474_v62, %v4223_v2  ;;  %v9890_v9 = vpop.f32.mrf.mxu0  ;;  %v10146_v10 = vpop.f32.mrf.mxu1 }
 0x1a5   : > { %7504 = vst.msk [vmem:[%s10850_s27 + $0x184] sm:$0xf] %vm7406_vm3, %v9110_v3  ;;  %v9115_v13 = vpack.c.bf16 %v4948_v5, %v4948_v5  ;;  %v9371_v14 = vpack.c.bf16 %v5204_v6, %v5204_v6  ;;  %v3211_v15 = vadd.f32 %v11474_v62, %v9890_v9  ;;  %v4235_v16 = vadd.f32 %v11474_v62, %v10146_v10 }
 0x1a6   : > { %7760 = vst.msk [vmem:[%s10850_s27 + $0x584] sm:$0xf] %vm7406_vm3, %v9366_v4  ;;  %v4946_v19 = vmax.f32 %v3200_v7, 0.0  ;;  %v5202_v20 = vmax.f32 %v4224_v8, 0.0  ;;  %v3202_v21 = vpop.f32.mrf.mxu0  ;;  %v4226_v22 = vpop.f32.mrf.mxu1 }
 0x1a7   : > { %7509 = vst.msk [vmem:[%s10850_s27 + $0x198] sm:$0xf] %vm7406_vm3, %v9115_v13  ;;  %7765 = vst.msk [vmem:[%s10850_s27 + $0x598] sm:$0xf] %vm7406_vm3, %v9371_v14  ;;  %v4949_v23 = vmax.f32 %v3211_v15, 0.0  ;;  %v5205_v24 = vmax.f32 %v4235_v16, 0.0  ;;  %v3203_v25 = vadd.f32 %v11474_v62, %v3202_v21  ;;  %v4227_v26 = vadd.f32 %v11474_v62, %v4226_v22 }
 0x1a8   : > { %v9113_v27 = vpack.c.bf16 %v4946_v19, %v4946_v19  ;;  %v9369_v28 = vpack.c.bf16 %v5202_v20, %v5202_v20  ;;  %v9893_v29 = vpop.f32.mrf.mxu0  ;;  %9988 = vmatmul.mubr.msk.bf16.gmra.mxu0 %vm1989_vm2, %v10516_v11  ;;  %v10149_v30 = vpop.f32.mrf.mxu1  ;;  %10244 = vmatmul.mubr.msk.bf16.gmra.mxu1 %vm1989_vm2, %v10517_v12  ;;  %v10524_v20 = vld [vmem:[%s10626_s22 + $0x348] sm:$0xff]  }
 0x1a9   : > { %v9116_v31 = vpack.c.bf16 %v4949_v23, %v4949_v23  ;;  %v9372_v32 = vpack.c.bf16 %v5205_v24, %v5205_v24  ;;  %v4947_v33 = vmax.f32 %v3203_v25, 0.0  ;;  %v5203_v34 = vmax.f32 %v4227_v26, 0.0  ;;  %9991 = vmatprep.mubr.msk.bf16.mxu0 %vm1989_vm2, %v10518_v17  ;;  %10247 = vmatprep.mubr.msk.bf16.mxu1 %vm1989_vm2, %v10519_v18  ;;  %v10525_v21 = vld [vmem:[%s10626_s22 + $0x748] sm:$0xff]   ;;  %v10526_v26 = vld [vmem:[%s10626_s22 + $0x350] sm:$0xff]  }
 0x1aa   : > { %7507 = vst.msk [vmem:[%s10850_s27 + $0x190] sm:$0xf] %vm7406_vm3, %v9113_v27  ;;  %7763 = vst.msk [vmem:[%s10850_s27 + $0x590] sm:$0xf] %vm7406_vm3, %v9369_v28  ;;  %v3224_v35 = vadd.f32 %v11474_v62, %v9893_v29  ;;  %v4248_v36 = vadd.f32 %v11474_v62, %v10149_v30  ;;  %v3215_v37 = vpop.f32.mrf.mxu0  ;;  %v4239_v38 = vpop.f32.mrf.mxu1  ;;  %v10527_v27 = vld [vmem:[%s10626_s22 + $0x750] sm:$0xff]  }
 0x1ab   : > { %7510 = vst.msk [vmem:[%s10850_s27 + $0x19c] sm:$0xf] %vm7406_vm3, %v9116_v31  ;;  %7766 = vst.msk [vmem:[%s10850_s27 + $0x59c] sm:$0xf] %vm7406_vm3, %v9372_v32  ;;  %v9114_v39 = vpack.c.bf16 %v4947_v33, %v4947_v33  ;;  %v9370_v40 = vpack.c.bf16 %v5203_v34, %v5203_v34  ;;  %v3216_v41 = vadd.f32 %v11474_v62, %v3215_v37 }
 0x1ac   : > { %v4240_v42 = vadd.f32 %v11474_v62, %v4239_v38  ;;  %v4952_v43 = vmax.f32 %v3224_v35, 0.0  ;;  %v5208_v45 = vmax.f32 %v4248_v36, 0.0  ;;  %v9894_v46 = vpop.f32.mrf.mxu0  ;;  %v10150_v47 = vpop.f32.mrf.mxu1 }
 0x1ad   : > { %7508 = vst.msk [vmem:[%s10850_s27 + $0x194] sm:$0xf] %vm7406_vm3, %v9114_v39  ;;  %7764 = vst.msk [vmem:[%s10850_s27 + $0x594] sm:$0xf] %vm7406_vm3, %v9370_v40  ;;  %v4950_v50 = vmax.f32 %v3216_v41, 0.0  ;;  %v3227_v44 = vadd.f32 %v11474_v62, %v9894_v46  ;;  %v4251_v53 = vadd.f32 %v11474_v62, %v10150_v47 }
 0x1ae   : > { %v5206_v51 = vmax.f32 %v4240_v42, 0.0  ;;  %v9119_v55 = vpack.c.bf16 %v4952_v43, %v4952_v43  ;;  %v9375_v56 = vpack.c.bf16 %v5208_v45, %v5208_v45  ;;  %v3218_v57 = vpop.f32.mrf.mxu0  ;;  %v4242_v58 = vpop.f32.mrf.mxu1 }
 0x1af   : > { %v9117_v60 = vpack.c.bf16 %v4950_v50, %v4950_v50  ;;  %v4953_v52 = vmax.f32 %v3227_v44, 0.0  ;;  %v5209_v63 = vmax.f32 %v4251_v53, 0.0  ;;  %v3219_v0 = vadd.f32 %v11474_v62, %v3218_v57  ;;  %v10528_v57 = vld [vmem:[%s10626_s22 + $0x358] sm:$0xff]  }
 0x1b0   : > { %v9373_v61 = vpack.c.bf16 %v5206_v51, %v5206_v51  ;;  %7513 = vst.msk [vmem:[%s10850_s27 + $0x1a8] sm:$0xf] %vm7406_vm3, %v9119_v55  ;;  %7769 = vst.msk [vmem:[%s10850_s27 + $0x5a8] sm:$0xf] %vm7406_vm3, %v9375_v56  ;;  %v4243_v1 = vadd.f32 %v11474_v62, %v4242_v58  ;;  %v9897_v2 = vpop.f32.mrf.mxu0  ;;  %9992 = vmatmul.mubr.msk.bf16.gmra.mxu0 %vm1989_vm2, %v10520_v48  ;;  %v10153_v3 = vpop.f32.mrf.mxu1  ;;  %10248 = vmatmul.mubr.msk.bf16.gmra.mxu1 %vm1989_vm2, %v10521_v49  ;;  %v10529_v58 = vld [vmem:[%s10626_s22 + $0x758] sm:$0xff]  }
 0x1b1   : > { %7511 = vst.msk [vmem:[%s10850_s27 + $0x1a0] sm:$0xf] %vm7406_vm3, %v9117_v60  ;;  %v9120_v4 = vpack.c.bf16 %v4953_v52, %v4953_v52  ;;  %v9376_v5 = vpack.c.bf16 %v5209_v63, %v5209_v63  ;;  %v3240_v6 = vadd.f32 %v11474_v62, %v9897_v2  ;;  %v4264_v7 = vadd.f32 %v11474_v62, %v10153_v3  ;;  %v10530_v63 = vld [vmem:[%s10626_s22 + $0x360] sm:$0xff]  }
 0x1b2   : > { %7767 = vst.msk [vmem:[%s10850_s27 + $0x5a0] sm:$0xf] %vm7406_vm3, %v9373_v61  ;;  %9995 = vmatprep.mubr.msk.bf16.mxu0 %vm1989_vm2, %v10522_v54  ;;  %v4951_v8 = vmax.f32 %v3219_v0, 0.0  ;;  %v5207_v9 = vmax.f32 %v4243_v1, 0.0  ;;  %v3231_v10 = vpop.f32.mrf.mxu0  ;;  %v4255_v11 = vpop.f32.mrf.mxu1  ;;  %10251 = vmatprep.mubr.msk.bf16.mxu1 %vm1989_vm2, %v10523_v59  ;;  %v10531_v0 = vld [vmem:[%s10626_s22 + $0x760] sm:$0xff]  }
 0x1b3   : > { %7514 = vst.msk [vmem:[%s10850_s27 + $0x1ac] sm:$0xf] %vm7406_vm3, %v9120_v4  ;;  %7770 = vst.msk [vmem:[%s10850_s27 + $0x5ac] sm:$0xf] %vm7406_vm3, %v9376_v5  ;;  %v4956_v12 = vmax.f32 %v3240_v6, 0.0  ;;  %v5212_v13 = vmax.f32 %v4264_v7, 0.0  ;;  %v3232_v14 = vadd.f32 %v11474_v62, %v3231_v10  ;;  %v4256_v15 = vadd.f32 %v11474_v62, %v4255_v11 }
 0x1b4   : > { %v9118_v16 = vpack.c.bf16 %v4951_v8, %v4951_v8  ;;  %v9374_v17 = vpack.c.bf16 %v5207_v9, %v5207_v9  ;;  %v9898_v18 = vpop.f32.mrf.mxu0  ;;  %v10154_v19 = vpop.f32.mrf.mxu1 }
 0x1b5   : > { %v9123_v22 = vpack.c.bf16 %v4956_v12, %v4956_v12  ;;  %v9379_v23 = vpack.c.bf16 %v5212_v13, %v5212_v13  ;;  %v4954_v24 = vmax.f32 %v3232_v14, 0.0  ;;  %v5210_v25 = vmax.f32 %v4256_v15, 0.0 }
 0x1b6   : > { %7512 = vst.msk [vmem:[%s10850_s27 + $0x1a4] sm:$0xf] %vm7406_vm3, %v9118_v16  ;;  %7768 = vst.msk [vmem:[%s10850_s27 + $0x5a4] sm:$0xf] %vm7406_vm3, %v9374_v17  ;;  %v3243_v28 = vadd.f32 %v11474_v62, %v9898_v18  ;;  %v4267_v29 = vadd.f32 %v11474_v62, %v10154_v19  ;;  %v3234_v30 = vpop.f32.mrf.mxu0  ;;  %v4258_v31 = vpop.f32.mrf.mxu1 }
 0x1b7   : > { %7517 = vst.msk [vmem:[%s10850_s27 + $0x1b8] sm:$0xf] %vm7406_vm3, %v9123_v22  ;;  %7773 = vst.msk [vmem:[%s10850_s27 + $0x5b8] sm:$0xf] %vm7406_vm3, %v9379_v23  ;;  %v9121_v32 = vpack.c.bf16 %v4954_v24, %v4954_v24  ;;  %v9377_v33 = vpack.c.bf16 %v5210_v25, %v5210_v25  ;;  %v3235_v34 = vadd.f32 %v11474_v62, %v3234_v30  ;;  %v10533_v30 = vld [vmem:[%s10626_s22 + $0x768] sm:$0xff]  }
 0x1b8   : > { %v4259_v35 = vadd.f32 %v11474_v62, %v4258_v31  ;;  %v4957_v36 = vmax.f32 %v3243_v28, 0.0  ;;  %v5213_v37 = vmax.f32 %v4267_v29, 0.0  ;;  %v9901_v38 = vpop.f32.mrf.mxu0  ;;  %9996 = vmatmul.mubr.msk.bf16.gmra.mxu0 %vm1989_vm2, %v10524_v20  ;;  %v10157_v39 = vpop.f32.mrf.mxu1  ;;  %10252 = vmatmul.mubr.msk.bf16.gmra.mxu1 %vm1989_vm2, %v10525_v21  ;;  %v10532_v29 = vld [vmem:[%s10626_s22 + $0x368] sm:$0xff]  }
 0x1b9   : > { %7515 = vst.msk [vmem:[%s10850_s27 + $0x1b0] sm:$0xf] %vm7406_vm3, %v9121_v32  ;;  %7771 = vst.msk [vmem:[%s10850_s27 + $0x5b0] sm:$0xf] %vm7406_vm3, %v9377_v33  ;;  %v4955_v40 = vmax.f32 %v3235_v34, 0.0  ;;  %v3256_v42 = vadd.f32 %v11474_v62, %v9901_v38  ;;  %v4280_v43 = vadd.f32 %v11474_v62, %v10157_v39  ;;  %9999 = vmatprep.mubr.msk.bf16.mxu0 %vm1989_vm2, %v10526_v26  ;;  %10255 = vmatprep.mubr.msk.bf16.mxu1 %vm1989_vm2, %v10527_v27 }
 0x1ba   : > { %v5211_v41 = vmax.f32 %v4259_v35, 0.0  ;;  %v9124_v45 = vpack.c.bf16 %v4957_v36, %v4957_v36  ;;  %v9380_v46 = vpack.c.bf16 %v5213_v37, %v5213_v37  ;;  %v3247_v47 = vpop.f32.mrf.mxu0  ;;  %v4271_v48 = vpop.f32.mrf.mxu1  ;;  %v10534_v35 = vld [vmem:[%s10626_s22 + $0x370] sm:$0xff]  }
 0x1bb   : > { %v9122_v49 = vpack.c.bf16 %v4955_v40, %v4955_v40  ;;  %v4960_v51 = vmax.f32 %v3256_v42, 0.0  ;;  %v5216_v44 = vmax.f32 %v4280_v43, 0.0  ;;  %v3248_v53 = vadd.f32 %v11474_v62, %v3247_v47  ;;  %v10535_v40 = vld [vmem:[%s10626_s22 + $0x770] sm:$0xff]  }
 0x1bc   : > { %v9378_v50 = vpack.c.bf16 %v5211_v41, %v5211_v41  ;;  %7518 = vst.msk [vmem:[%s10850_s27 + $0x1bc] sm:$0xf] %vm7406_vm3, %v9124_v45  ;;  %7774 = vst.msk [vmem:[%s10850_s27 + $0x5bc] sm:$0xf] %vm7406_vm3, %v9380_v46  ;;  %v4272_v54 = vadd.f32 %v11474_v62, %v4271_v48  ;;  %v9902_v55 = vpop.f32.mrf.mxu0  ;;  %v10158_v56 = vpop.f32.mrf.mxu1 }
 0x1bd   : > { %7516 = vst.msk [vmem:[%s10850_s27 + $0x1b4] sm:$0xf] %vm7406_vm3, %v9122_v49  ;;  %v9127_v59 = vpack.c.bf16 %v4960_v51, %v4960_v51  ;;  %v9383_v60 = vpack.c.bf16 %v5216_v44, %v5216_v44  ;;  %v3259_v61 = vadd.f32 %v11474_v62, %v9902_v55  ;;  %v4283_v52 = vadd.f32 %v11474_v62, %v10158_v56 }
 0x1be   : > { %7772 = vst.msk [vmem:[%s10850_s27 + $0x5b4] sm:$0xf] %vm7406_vm3, %v9378_v50  ;;  %v4958_v1 = vmax.f32 %v3248_v53, 0.0  ;;  %v5214_v2 = vmax.f32 %v4272_v54, 0.0  ;;  %v3250_v3 = vpop.f32.mrf.mxu0  ;;  %v4274_v4 = vpop.f32.mrf.mxu1 }
 0x1bf   : > { %7521 = vst.msk [vmem:[%s10850_s27 + $0x1c8] sm:$0xf] %vm7406_vm3, %v9127_v59  ;;  %7777 = vst.msk [vmem:[%s10850_s27 + $0x5c8] sm:$0xf] %vm7406_vm3, %v9383_v60  ;;  %v4961_v5 = vmax.f32 %v3259_v61, 0.0  ;;  %v5217_v6 = vmax.f32 %v4283_v52, 0.0  ;;  %v3251_v7 = vadd.f32 %v11474_v62, %v3250_v3  ;;  %v4275_v8 = vadd.f32 %v11474_v62, %v4274_v4 }
 0x1c0   : > { %v9125_v9 = vpack.c.bf16 %v4958_v1, %v4958_v1  ;;  %v9381_v10 = vpack.c.bf16 %v5214_v2, %v5214_v2  ;;  %v9905_v11 = vpop.f32.mrf.mxu0  ;;  %10000 = vmatmul.mubr.msk.bf16.gmra.mxu0 %vm1989_vm2, %v10528_v57  ;;  %v10161_v12 = vpop.f32.mrf.mxu1  ;;  %10256 = vmatmul.mubr.msk.bf16.gmra.mxu1 %vm1989_vm2, %v10529_v58  ;;  %v10536_v2 = vld [vmem:[%s10626_s22 + $0x378] sm:$0xff]  }
 0x1c1   : > { %v9128_v13 = vpack.c.bf16 %v4961_v5, %v4961_v5  ;;  %v9384_v14 = vpack.c.bf16 %v5217_v6, %v5217_v6  ;;  %v4959_v15 = vmax.f32 %v3251_v7, 0.0  ;;  %v5215_v16 = vmax.f32 %v4275_v8, 0.0  ;;  %10003 = vmatprep.mubr.msk.bf16.mxu0 %vm1989_vm2, %v10530_v63  ;;  %10259 = vmatprep.mubr.msk.bf16.mxu1 %vm1989_vm2, %v10531_v0  ;;  %v10537_v3 = vld [vmem:[%s10626_s22 + $0x778] sm:$0xff]   ;;  %v10538_v8 = vld [vmem:[%s10626_s22 + $0x380] sm:$0xff]  }
 0x1c2   : > { %7519 = vst.msk [vmem:[%s10850_s27 + $0x1c0] sm:$0xf] %vm7406_vm3, %v9125_v9  ;;  %7775 = vst.msk [vmem:[%s10850_s27 + $0x5c0] sm:$0xf] %vm7406_vm3, %v9381_v10  ;;  %v3272_v17 = vadd.f32 %v11474_v62, %v9905_v11  ;;  %v4296_v18 = vadd.f32 %v11474_v62, %v10161_v12  ;;  %v3263_v19 = vpop.f32.mrf.mxu0  ;;  %v4287_v20 = vpop.f32.mrf.mxu1  ;;  %v10539_v9 = vld [vmem:[%s10626_s22 + $0x780] sm:$0xff]  }
 0x1c3   : > { %7522 = vst.msk [vmem:[%s10850_s27 + $0x1cc] sm:$0xf] %vm7406_vm3, %v9128_v13  ;;  %7778 = vst.msk [vmem:[%s10850_s27 + $0x5cc] sm:$0xf] %vm7406_vm3, %v9384_v14  ;;  %v9126_v21 = vpack.c.bf16 %v4959_v15, %v4959_v15  ;;  %v9382_v22 = vpack.c.bf16 %v5215_v16, %v5215_v16  ;;  %v3264_v23 = vadd.f32 %v11474_v62, %v3263_v19 }
 0x1c4   : > { %v4288_v24 = vadd.f32 %v11474_v62, %v4287_v20  ;;  %v4964_v25 = vmax.f32 %v3272_v17, 0.0  ;;  %v5220_v26 = vmax.f32 %v4296_v18, 0.0  ;;  %v9906_v27 = vpop.f32.mrf.mxu0  ;;  %v10162_v28 = vpop.f32.mrf.mxu1 }
 0x1c5   : > { %7520 = vst.msk [vmem:[%s10850_s27 + $0x1c4] sm:$0xf] %vm7406_vm3, %v9126_v21  ;;  %7776 = vst.msk [vmem:[%s10850_s27 + $0x5c4] sm:$0xf] %vm7406_vm3, %v9382_v22  ;;  %v4962_v31 = vmax.f32 %v3264_v23, 0.0  ;;  %v3275_v33 = vadd.f32 %v11474_v62, %v9906_v27  ;;  %v4299_v34 = vadd.f32 %v11474_v62, %v10162_v28 }
 0x1c6   : > { %v5218_v32 = vmax.f32 %v4288_v24, 0.0  ;;  %v9131_v36 = vpack.c.bf16 %v4964_v25, %v4964_v25  ;;  %v9387_v37 = vpack.c.bf16 %v5220_v26, %v5220_v26  ;;  %v3266_v38 = vpop.f32.mrf.mxu0  ;;  %v4290_v39 = vpop.f32.mrf.mxu1 }
 0x1c7   : > { %v9129_v41 = vpack.c.bf16 %v4962_v31, %v4962_v31  ;;  %v4965_v43 = vmax.f32 %v3275_v33, 0.0  ;;  %v5221_v45 = vmax.f32 %v4299_v34, 0.0  ;;  %v3267_v46 = vadd.f32 %v11474_v62, %v3266_v38  ;;  %v10540_v38 = vld [vmem:[%s10626_s22 + $0x388] sm:$0xff]  }
 0x1c8   : > { %v9385_v42 = vpack.c.bf16 %v5218_v32, %v5218_v32  ;;  %7525 = vst.msk [vmem:[%s10850_s27 + $0x1d8] sm:$0xf] %vm7406_vm3, %v9131_v36  ;;  %7781 = vst.msk [vmem:[%s10850_s27 + $0x5d8] sm:$0xf] %vm7406_vm3, %v9387_v37  ;;  %v4291_v47 = vadd.f32 %v11474_v62, %v4290_v39  ;;  %v9909_v48 = vpop.f32.mrf.mxu0  ;;  %10004 = vmatmul.mubr.msk.bf16.gmra.mxu0 %vm1989_vm2, %v10532_v29  ;;  %v10165_v49 = vpop.f32.mrf.mxu1  ;;  %10260 = vmatmul.mubr.msk.bf16.gmra.mxu1 %vm1989_vm2, %v10533_v30  ;;  %v10541_v39 = vld [vmem:[%s10626_s22 + $0x788] sm:$0xff]  }
 0x1c9   : > { %7523 = vst.msk [vmem:[%s10850_s27 + $0x1d0] sm:$0xf] %vm7406_vm3, %v9129_v41  ;;  %v9132_v50 = vpack.c.bf16 %v4965_v43, %v4965_v43  ;;  %v9388_v51 = vpack.c.bf16 %v5221_v45, %v5221_v45  ;;  %v3288_v44 = vadd.f32 %v11474_v62, %v9909_v48  ;;  %v4312_v53 = vadd.f32 %v11474_v62, %v10165_v49  ;;  %v10542_v45 = vld [vmem:[%s10626_s22 + $0x390] sm:$0xff]  }
 0x1ca   : > { %7779 = vst.msk [vmem:[%s10850_s27 + $0x5d0] sm:$0xf] %vm7406_vm3, %v9385_v42  ;;  %10007 = vmatprep.mubr.msk.bf16.mxu0 %vm1989_vm2, %v10534_v35  ;;  %v4963_v54 = vmax.f32 %v3267_v46, 0.0  ;;  %v5219_v55 = vmax.f32 %v4291_v47, 0.0  ;;  %v3279_v56 = vpop.f32.mrf.mxu0  ;;  %v4303_v57 = vpop.f32.mrf.mxu1  ;;  %10263 = vmatprep.mubr.msk.bf16.mxu1 %vm1989_vm2, %v10535_v40  ;;  %v10543_v46 = vld [vmem:[%s10626_s22 + $0x790] sm:$0xff]  }
 0x1cb   : > { %7526 = vst.msk [vmem:[%s10850_s27 + $0x1dc] sm:$0xf] %vm7406_vm3, %v9132_v50  ;;  %7782 = vst.msk [vmem:[%s10850_s27 + $0x5dc] sm:$0xf] %vm7406_vm3, %v9388_v51  ;;  %v4968_v58 = vmax.f32 %v3288_v44, 0.0  ;;  %v5224_v59 = vmax.f32 %v4312_v53, 0.0  ;;  %v3280_v60 = vadd.f32 %v11474_v62, %v3279_v56  ;;  %v4304_v61 = vadd.f32 %v11474_v62, %v4303_v57 }
 0x1cc   : > { %v9130_v52 = vpack.c.bf16 %v4963_v54, %v4963_v54  ;;  %v9386_v63 = vpack.c.bf16 %v5219_v55, %v5219_v55  ;;  %v9910_v0 = vpop.f32.mrf.mxu0  ;;  %v10166_v1 = vpop.f32.mrf.mxu1  ;;  %v11825_v62 = vld [vmem:[%s12718_s2] ss:$0 sm:$0xff] }
 0x1cd   : > { %v9135_v4 = vpack.c.bf16 %v4968_v58, %v4968_v58  ;;  %v9391_v5 = vpack.c.bf16 %v5224_v59, %v5224_v59  ;;  %v4966_v6 = vmax.f32 %v3280_v60, 0.0  ;;  %v5222_v7 = vmax.f32 %v4304_v61, 0.0 }
 0x1ce   : > { %7524 = vst.msk [vmem:[%s10850_s27 + $0x1d4] sm:$0xf] %vm7406_vm3, %v9130_v52  ;;  %7780 = vst.msk [vmem:[%s10850_s27 + $0x5d4] sm:$0xf] %vm7406_vm3, %v9386_v63  ;;  %v3291_v10 = vadd.f32 %v11825_v62, %v9910_v0  ;;  %v4315_v11 = vadd.f32 %v11825_v62, %v10166_v1  ;;  %v3282_v12 = vpop.f32.mrf.mxu0  ;;  %v4306_v13 = vpop.f32.mrf.mxu1 }
 0x1cf   : > { %7529 = vst.msk [vmem:[%s10850_s27 + $0x1e8] sm:$0xf] %vm7406_vm3, %v9135_v4  ;;  %7785 = vst.msk [vmem:[%s10850_s27 + $0x5e8] sm:$0xf] %vm7406_vm3, %v9391_v5  ;;  %v9133_v14 = vpack.c.bf16 %v4966_v6, %v4966_v6  ;;  %v9389_v15 = vpack.c.bf16 %v5222_v7, %v5222_v7  ;;  %v3283_v16 = vadd.f32 %v11825_v62, %v3282_v12  ;;  %v10545_v12 = vld [vmem:[%s10626_s22 + $0x798] sm:$0xff]  }
 0x1d0   : > { %v4307_v17 = vadd.f32 %v11825_v62, %v4306_v13  ;;  %v4969_v18 = vmax.f32 %v3291_v10, 0.0  ;;  %v5225_v19 = vmax.f32 %v4315_v11, 0.0  ;;  %v9913_v20 = vpop.f32.mrf.mxu0  ;;  %10008 = vmatmul.mubr.msk.bf16.gmra.mxu0 %vm1989_vm2, %v10536_v2  ;;  %v10169_v21 = vpop.f32.mrf.mxu1  ;;  %10264 = vmatmul.mubr.msk.bf16.gmra.mxu1 %vm1989_vm2, %v10537_v3  ;;  %v10544_v11 = vld [vmem:[%s10626_s22 + $0x398] sm:$0xff]  }
 0x1d1   : > { %7527 = vst.msk [vmem:[%s10850_s27 + $0x1e0] sm:$0xf] %vm7406_vm3, %v9133_v14  ;;  %7783 = vst.msk [vmem:[%s10850_s27 + $0x5e0] sm:$0xf] %vm7406_vm3, %v9389_v15  ;;  %v4967_v22 = vmax.f32 %v3283_v16, 0.0  ;;  %v3304_v24 = vadd.f32 %v11825_v62, %v9913_v20  ;;  %v4328_v25 = vadd.f32 %v11825_v62, %v10169_v21  ;;  %10011 = vmatprep.mubr.msk.bf16.mxu0 %vm1989_vm2, %v10538_v8  ;;  %10267 = vmatprep.mubr.msk.bf16.mxu1 %vm1989_vm2, %v10539_v9 }
 0x1d2   : > { %v5223_v23 = vmax.f32 %v4307_v17, 0.0  ;;  %v9136_v26 = vpack.c.bf16 %v4969_v18, %v4969_v18  ;;  %v9392_v27 = vpack.c.bf16 %v5225_v19, %v5225_v19  ;;  %v3295_v28 = vpop.f32.mrf.mxu0  ;;  %v4319_v29 = vpop.f32.mrf.mxu1  ;;  %v10546_v17 = vld [vmem:[%s10626_s22 + $0x3a0] sm:$0xff]  }
 0x1d3   : > { %v9134_v30 = vpack.c.bf16 %v4967_v22, %v4967_v22  ;;  %v4972_v32 = vmax.f32 %v3304_v24, 0.0  ;;  %v5228_v33 = vmax.f32 %v4328_v25, 0.0  ;;  %v3296_v34 = vadd.f32 %v11825_v62, %v3295_v28  ;;  %v10547_v22 = vld [vmem:[%s10626_s22 + $0x7a0] sm:$0xff]  }
 0x1d4   : > { %v9390_v31 = vpack.c.bf16 %v5223_v23, %v5223_v23  ;;  %7530 = vst.msk [vmem:[%s10850_s27 + $0x1ec] sm:$0xf] %vm7406_vm3, %v9136_v26  ;;  %7786 = vst.msk [vmem:[%s10850_s27 + $0x5ec] sm:$0xf] %vm7406_vm3, %v9392_v27  ;;  %v4320_v35 = vadd.f32 %v11825_v62, %v4319_v29  ;;  %v9914_v36 = vpop.f32.mrf.mxu0  ;;  %v10170_v37 = vpop.f32.mrf.mxu1 }
 0x1d5   : > { %7528 = vst.msk [vmem:[%s10850_s27 + $0x1e4] sm:$0xf] %vm7406_vm3, %v9134_v30  ;;  %v9139_v40 = vpack.c.bf16 %v4972_v32, %v4972_v32  ;;  %v9395_v41 = vpack.c.bf16 %v5228_v33, %v5228_v33  ;;  %v3307_v42 = vadd.f32 %v11825_v62, %v9914_v36  ;;  %v4331_v43 = vadd.f32 %v11825_v62, %v10170_v37 }
 0x1d6   : > { %7784 = vst.msk [vmem:[%s10850_s27 + $0x5e4] sm:$0xf] %vm7406_vm3, %v9390_v31  ;;  %v4970_v47 = vmax.f32 %v3296_v34, 0.0  ;;  %v5226_v48 = vmax.f32 %v4320_v35, 0.0  ;;  %v3298_v49 = vpop.f32.mrf.mxu0  ;;  %v4322_v50 = vpop.f32.mrf.mxu1 }
 0x1d7   : > { %7533 = vst.msk [vmem:[%s10850_s27 + $0x1f8] sm:$0xf] %vm7406_vm3, %v9139_v40  ;;  %7789 = vst.msk [vmem:[%s10850_s27 + $0x5f8] sm:$0xf] %vm7406_vm3, %v9395_v41  ;;  %v4973_v51 = vmax.f32 %v3307_v42, 0.0  ;;  %v5229_v44 = vmax.f32 %v4331_v43, 0.0  ;;  %v3299_v53 = vadd.f32 %v11825_v62, %v3298_v49  ;;  %v4323_v54 = vadd.f32 %v11825_v62, %v4322_v50 }
 0x1d8   : > { %v9137_v55 = vpack.c.bf16 %v4970_v47, %v4970_v47  ;;  %v9393_v56 = vpack.c.bf16 %v5226_v48, %v5226_v48  ;;  %v9917_v57 = vpop.f32.mrf.mxu0  ;;  %10012 = vmatmul.mubr.msk.bf16.gmra.mxu0 %vm1989_vm2, %v10540_v38  ;;  %v10173_v58 = vpop.f32.mrf.mxu1  ;;  %10268 = vmatmul.mubr.msk.bf16.gmra.mxu1 %vm1989_vm2, %v10541_v39  ;;  %v10548_v48 = vld [vmem:[%s10626_s22 + $0x3a8] sm:$0xff]  }
 0x1d9   : > { %v9140_v59 = vpack.c.bf16 %v4973_v51, %v4973_v51  ;;  %v9396_v60 = vpack.c.bf16 %v5229_v44, %v5229_v44  ;;  %v4971_v61 = vmax.f32 %v3299_v53, 0.0  ;;  %v5227_v52 = vmax.f32 %v4323_v54, 0.0  ;;  %10015 = vmatprep.mubr.msk.bf16.mxu0 %vm1989_vm2, %v10542_v45  ;;  %10271 = vmatprep.mubr.msk.bf16.mxu1 %vm1989_vm2, %v10543_v46  ;;  %v10549_v49 = vld [vmem:[%s10626_s22 + $0x7a8] sm:$0xff]   ;;  %v10550_v54 = vld [vmem:[%s10626_s22 + $0x3b0] sm:$0xff]  }
 0x1da   : > { %7531 = vst.msk [vmem:[%s10850_s27 + $0x1f0] sm:$0xf] %vm7406_vm3, %v9137_v55  ;;  %7787 = vst.msk [vmem:[%s10850_s27 + $0x5f0] sm:$0xf] %vm7406_vm3, %v9393_v56  ;;  %v3320_v63 = vadd.f32 %v11825_v62, %v9917_v57  ;;  %v4344_v0 = vadd.f32 %v11825_v62, %v10173_v58  ;;  %v3311_v1 = vpop.f32.mrf.mxu0  ;;  %v4335_v2 = vpop.f32.mrf.mxu1  ;;  %v10551_v55 = vld [vmem:[%s10626_s22 + $0x7b0] sm:$0xff]  }
 0x1db   : > { %7534 = vst.msk [vmem:[%s10850_s27 + $0x1fc] sm:$0xf] %vm7406_vm3, %v9140_v59  ;;  %7790 = vst.msk [vmem:[%s10850_s27 + $0x5fc] sm:$0xf] %vm7406_vm3, %v9396_v60  ;;  %v9138_v3 = vpack.c.bf16 %v4971_v61, %v4971_v61  ;;  %v9394_v4 = vpack.c.bf16 %v5227_v52, %v5227_v52  ;;  %v3312_v5 = vadd.f32 %v11825_v62, %v3311_v1 }
 0x1dc   : > { %v4336_v6 = vadd.f32 %v11825_v62, %v4335_v2  ;;  %v4976_v7 = vmax.f32 %v3320_v63, 0.0  ;;  %v5232_v8 = vmax.f32 %v4344_v0, 0.0  ;;  %v9918_v9 = vpop.f32.mrf.mxu0  ;;  %v10174_v10 = vpop.f32.mrf.mxu1 }
 0x1dd   : > { %7532 = vst.msk [vmem:[%s10850_s27 + $0x1f4] sm:$0xf] %vm7406_vm3, %v9138_v3  ;;  %7788 = vst.msk [vmem:[%s10850_s27 + $0x5f4] sm:$0xf] %vm7406_vm3, %v9394_v4  ;;  %v4974_v13 = vmax.f32 %v3312_v5, 0.0  ;;  %v3323_v15 = vadd.f32 %v11825_v62, %v9918_v9  ;;  %v4347_v16 = vadd.f32 %v11825_v62, %v10174_v10 }
 0x1de   : > { %v5230_v14 = vmax.f32 %v4336_v6, 0.0  ;;  %v9143_v18 = vpack.c.bf16 %v4976_v7, %v4976_v7  ;;  %v9399_v19 = vpack.c.bf16 %v5232_v8, %v5232_v8  ;;  %v3314_v20 = vpop.f32.mrf.mxu0  ;;  %v4338_v21 = vpop.f32.mrf.mxu1 }
 0x1df   : > { %v9141_v23 = vpack.c.bf16 %v4974_v13, %v4974_v13  ;;  %v4977_v25 = vmax.f32 %v3323_v15, 0.0  ;;  %v5233_v26 = vmax.f32 %v4347_v16, 0.0  ;;  %v3315_v27 = vadd.f32 %v11825_v62, %v3314_v20  ;;  %v10552_v20 = vld [vmem:[%s10626_s22 + $0x3b8] sm:$0xff]  }
 0x1e0   : > { %v9397_v24 = vpack.c.bf16 %v5230_v14, %v5230_v14  ;;  %7537 = vst.msk [vmem:[%s10850_s27 + $0x208] sm:$0xf] %vm7406_vm3, %v9143_v18  ;;  %7793 = vst.msk [vmem:[%s10850_s27 + $0x608] sm:$0xf] %vm7406_vm3, %v9399_v19  ;;  %v4339_v28 = vadd.f32 %v11825_v62, %v4338_v21  ;;  %v9921_v29 = vpop.f32.mrf.mxu0  ;;  %10016 = vmatmul.mubr.msk.bf16.gmra.mxu0 %vm1989_vm2, %v10544_v11  ;;  %v10177_v30 = vpop.f32.mrf.mxu1  ;;  %10272 = vmatmul.mubr.msk.bf16.gmra.mxu1 %vm1989_vm2, %v10545_v12  ;;  %v10553_v21 = vld [vmem:[%s10626_s22 + $0x7b8] sm:$0xff]  }
 0x1e1   : > { %7535 = vst.msk [vmem:[%s10850_s27 + $0x200] sm:$0xf] %vm7406_vm3, %v9141_v23  ;;  %v9144_v31 = vpack.c.bf16 %v4977_v25, %v4977_v25  ;;  %v9400_v32 = vpack.c.bf16 %v5233_v26, %v5233_v26  ;;  %v3336_v33 = vadd.f32 %v11825_v62, %v9921_v29  ;;  %v4360_v34 = vadd.f32 %v11825_v62, %v10177_v30  ;;  %v10554_v26 = vld [vmem:[%s10626_s22 + $0x3c0] sm:$0xff]  }
 0x1e2   : > { %7791 = vst.msk [vmem:[%s10850_s27 + $0x600] sm:$0xf] %vm7406_vm3, %v9397_v24  ;;  %10019 = vmatprep.mubr.msk.bf16.mxu0 %vm1989_vm2, %v10546_v17  ;;  %v4975_v35 = vmax.f32 %v3315_v27, 0.0  ;;  %v5231_v36 = vmax.f32 %v4339_v28, 0.0  ;;  %v3327_v37 = vpop.f32.mrf.mxu0  ;;  %v4351_v38 = vpop.f32.mrf.mxu1  ;;  %10275 = vmatprep.mubr.msk.bf16.mxu1 %vm1989_vm2, %v10547_v22  ;;  %v10555_v27 = vld [vmem:[%s10626_s22 + $0x7c0] sm:$0xff]  }
 0x1e3   : > { %7538 = vst.msk [vmem:[%s10850_s27 + $0x20c] sm:$0xf] %vm7406_vm3, %v9144_v31  ;;  %7794 = vst.msk [vmem:[%s10850_s27 + $0x60c] sm:$0xf] %vm7406_vm3, %v9400_v32  ;;  %v4980_v39 = vmax.f32 %v3336_v33, 0.0  ;;  %v5236_v40 = vmax.f32 %v4360_v34, 0.0  ;;  %v3328_v41 = vadd.f32 %v11825_v62, %v3327_v37  ;;  %v4352_v42 = vadd.f32 %v11825_v62, %v4351_v38 }
 0x1e4   : > { %v9142_v43 = vpack.c.bf16 %v4975_v35, %v4975_v35  ;;  %v9398_v45 = vpack.c.bf16 %v5231_v36, %v5231_v36  ;;  %v9922_v46 = vpop.f32.mrf.mxu0  ;;  %v10178_v47 = vpop.f32.mrf.mxu1 }
 0x1e5   : > { %v9147_v50 = vpack.c.bf16 %v4980_v39, %v4980_v39  ;;  %v9403_v51 = vpack.c.bf16 %v5236_v40, %v5236_v40  ;;  %v4978_v44 = vmax.f32 %v3328_v41, 0.0  ;;  %v5234_v53 = vmax.f32 %v4352_v42, 0.0 }
 0x1e6   : > { %7536 = vst.msk [vmem:[%s10850_s27 + $0x204] sm:$0xf] %vm7406_vm3, %v9142_v43  ;;  %7792 = vst.msk [vmem:[%s10850_s27 + $0x604] sm:$0xf] %vm7406_vm3, %v9398_v45  ;;  %v3339_v56 = vadd.f32 %v11825_v62, %v9922_v46  ;;  %v4363_v57 = vadd.f32 %v11825_v62, %v10178_v47  ;;  %v3330_v58 = vpop.f32.mrf.mxu0  ;;  %v4354_v59 = vpop.f32.mrf.mxu1 }
 0x1e7   : > { %7541 = vst.msk [vmem:[%s10850_s27 + $0x218] sm:$0xf] %vm7406_vm3, %v9147_v50  ;;  %7797 = vst.msk [vmem:[%s10850_s27 + $0x618] sm:$0xf] %vm7406_vm3, %v9403_v51  ;;  %v9145_v60 = vpack.c.bf16 %v4978_v44, %v4978_v44  ;;  %v9401_v61 = vpack.c.bf16 %v5234_v53, %v5234_v53  ;;  %v3331_v52 = vadd.f32 %v11825_v62, %v3330_v58  ;;  %v10557_v58 = vld [vmem:[%s10626_s22 + $0x7c8] sm:$0xff]  }
 0x1e8   : > { %v4355_v63 = vadd.f32 %v11825_v62, %v4354_v59  ;;  %v4981_v0 = vmax.f32 %v3339_v56, 0.0  ;;  %v5237_v1 = vmax.f32 %v4363_v57, 0.0  ;;  %v9925_v2 = vpop.f32.mrf.mxu0  ;;  %10020 = vmatmul.mubr.msk.bf16.gmra.mxu0 %vm1989_vm2, %v10548_v48  ;;  %v10181_v3 = vpop.f32.mrf.mxu1  ;;  %10276 = vmatmul.mubr.msk.bf16.gmra.mxu1 %vm1989_vm2, %v10549_v49  ;;  %v10556_v57 = vld [vmem:[%s10626_s22 + $0x3c8] sm:$0xff]  }
 0x1e9   : > { %7539 = vst.msk [vmem:[%s10850_s27 + $0x210] sm:$0xf] %vm7406_vm3, %v9145_v60  ;;  %7795 = vst.msk [vmem:[%s10850_s27 + $0x610] sm:$0xf] %vm7406_vm3, %v9401_v61  ;;  %v4979_v4 = vmax.f32 %v3331_v52, 0.0  ;;  %v3352_v6 = vadd.f32 %v11825_v62, %v9925_v2  ;;  %v4376_v7 = vadd.f32 %v11825_v62, %v10181_v3  ;;  %10023 = vmatprep.mubr.msk.bf16.mxu0 %vm1989_vm2, %v10550_v54  ;;  %10279 = vmatprep.mubr.msk.bf16.mxu1 %vm1989_vm2, %v10551_v55 }
 0x1ea   : > { %v5235_v5 = vmax.f32 %v4355_v63, 0.0  ;;  %v9148_v8 = vpack.c.bf16 %v4981_v0, %v4981_v0  ;;  %v9404_v9 = vpack.c.bf16 %v5237_v1, %v5237_v1  ;;  %v3343_v10 = vpop.f32.mrf.mxu0  ;;  %v4367_v11 = vpop.f32.mrf.mxu1  ;;  %v10558_v63 = vld [vmem:[%s10626_s22 + $0x3d0] sm:$0xff]  }
 0x1eb   : > { %v9146_v12 = vpack.c.bf16 %v4979_v4, %v4979_v4  ;;  %v4984_v14 = vmax.f32 %v3352_v6, 0.0  ;;  %v5240_v15 = vmax.f32 %v4376_v7, 0.0  ;;  %v3344_v16 = vadd.f32 %v11825_v62, %v3343_v10  ;;  %v10559_v4 = vld [vmem:[%s10626_s22 + $0x7d0] sm:$0xff]  }
 0x1ec   : > { %v9402_v13 = vpack.c.bf16 %v5235_v5, %v5235_v5  ;;  %7542 = vst.msk [vmem:[%s10850_s27 + $0x21c] sm:$0xf] %vm7406_vm3, %v9148_v8  ;;  %7798 = vst.msk [vmem:[%s10850_s27 + $0x61c] sm:$0xf] %vm7406_vm3, %v9404_v9  ;;  %v4368_v17 = vadd.f32 %v11825_v62, %v4367_v11  ;;  %v9926_v18 = vpop.f32.mrf.mxu0  ;;  %v10182_v19 = vpop.f32.mrf.mxu1 }
 0x1ed   : > { %7540 = vst.msk [vmem:[%s10850_s27 + $0x214] sm:$0xf] %vm7406_vm3, %v9146_v12  ;;  %v9151_v22 = vpack.c.bf16 %v4984_v14, %v4984_v14  ;;  %v9407_v23 = vpack.c.bf16 %v5240_v15, %v5240_v15  ;;  %v3355_v24 = vadd.f32 %v11825_v62, %v9926_v18  ;;  %v4379_v25 = vadd.f32 %v11825_v62, %v10182_v19 }
 0x1ee   : > { %7796 = vst.msk [vmem:[%s10850_s27 + $0x614] sm:$0xf] %vm7406_vm3, %v9402_v13  ;;  %v4982_v28 = vmax.f32 %v3344_v16, 0.0  ;;  %v5238_v29 = vmax.f32 %v4368_v17, 0.0  ;;  %v3346_v30 = vpop.f32.mrf.mxu0  ;;  %v4370_v31 = vpop.f32.mrf.mxu1 }
 0x1ef   : > { %7545 = vst.msk [vmem:[%s10850_s27 + $0x228] sm:$0xf] %vm7406_vm3, %v9151_v22  ;;  %7801 = vst.msk [vmem:[%s10850_s27 + $0x628] sm:$0xf] %vm7406_vm3, %v9407_v23  ;;  %v4985_v32 = vmax.f32 %v3355_v24, 0.0  ;;  %v5241_v33 = vmax.f32 %v4379_v25, 0.0  ;;  %v3347_v34 = vadd.f32 %v11825_v62, %v3346_v30  ;;  %v4371_v35 = vadd.f32 %v11825_v62, %v4370_v31 }
 0x1f0   : > { %v9149_v36 = vpack.c.bf16 %v4982_v28, %v4982_v28  ;;  %v9405_v37 = vpack.c.bf16 %v5238_v29, %v5238_v29  ;;  %v9929_v38 = vpop.f32.mrf.mxu0  ;;  %10024 = vmatmul.mubr.msk.bf16.gmra.mxu0 %vm1989_vm2, %v10552_v20  ;;  %v10185_v39 = vpop.f32.mrf.mxu1  ;;  %10280 = vmatmul.mubr.msk.bf16.gmra.mxu1 %vm1989_vm2, %v10553_v21  ;;  %v10560_v29 = vld [vmem:[%s10626_s22 + $0x3d8] sm:$0xff]  }
 0x1f1   : > { %v9152_v40 = vpack.c.bf16 %v4985_v32, %v4985_v32  ;;  %v9408_v41 = vpack.c.bf16 %v5241_v33, %v5241_v33  ;;  %v4983_v42 = vmax.f32 %v3347_v34, 0.0  ;;  %v5239_v43 = vmax.f32 %v4371_v35, 0.0  ;;  %10027 = vmatprep.mubr.msk.bf16.mxu0 %vm1989_vm2, %v10554_v26  ;;  %10283 = vmatprep.mubr.msk.bf16.mxu1 %vm1989_vm2, %v10555_v27  ;;  %v10561_v30 = vld [vmem:[%s10626_s22 + $0x7d8] sm:$0xff]   ;;  %v10562_v35 = vld [vmem:[%s10626_s22 + $0x3e0] sm:$0xff]  }
 0x1f2   : > { %7543 = vst.msk [vmem:[%s10850_s27 + $0x220] sm:$0xf] %vm7406_vm3, %v9149_v36  ;;  %7799 = vst.msk [vmem:[%s10850_s27 + $0x620] sm:$0xf] %vm7406_vm3, %v9405_v37  ;;  %v3368_v45 = vadd.f32 %v11825_v62, %v9929_v38  ;;  %v4392_v46 = vadd.f32 %v11825_v62, %v10185_v39  ;;  %v3359_v47 = vpop.f32.mrf.mxu0  ;;  %v4383_v48 = vpop.f32.mrf.mxu1  ;;  %v10563_v36 = vld [vmem:[%s10626_s22 + $0x7e0] sm:$0xff]  }
 0x1f3   : > { %7546 = vst.msk [vmem:[%s10850_s27 + $0x22c] sm:$0xf] %vm7406_vm3, %v9152_v40  ;;  %7802 = vst.msk [vmem:[%s10850_s27 + $0x62c] sm:$0xf] %vm7406_vm3, %v9408_v41  ;;  %v9150_v49 = vpack.c.bf16 %v4983_v42, %v4983_v42  ;;  %v9406_v50 = vpack.c.bf16 %v5239_v43, %v5239_v43  ;;  %v3360_v51 = vadd.f32 %v11825_v62, %v3359_v47 }
 0x1f4   : > { %v4384_v44 = vadd.f32 %v11825_v62, %v4383_v48  ;;  %v4988_v53 = vmax.f32 %v3368_v45, 0.0  ;;  %v5244_v54 = vmax.f32 %v4392_v46, 0.0  ;;  %v9930_v55 = vpop.f32.mrf.mxu0  ;;  %v10186_v56 = vpop.f32.mrf.mxu1 }
 0x1f5   : > { %7544 = vst.msk [vmem:[%s10850_s27 + $0x224] sm:$0xf] %vm7406_vm3, %v9150_v49  ;;  %7800 = vst.msk [vmem:[%s10850_s27 + $0x624] sm:$0xf] %vm7406_vm3, %v9406_v50  ;;  %v4986_v59 = vmax.f32 %v3360_v51, 0.0  ;;  %v3371_v61 = vadd.f32 %v11825_v62, %v9930_v55  ;;  %v4395_v52 = vadd.f32 %v11825_v62, %v10186_v56 }
 0x1f6   : > { %v5242_v60 = vmax.f32 %v4384_v44, 0.0  ;;  %v9155_v0 = vpack.c.bf16 %v4988_v53, %v4988_v53  ;;  %v9411_v1 = vpack.c.bf16 %v5244_v54, %v5244_v54  ;;  %v3362_v2 = vpop.f32.mrf.mxu0  ;;  %v4386_v3 = vpop.f32.mrf.mxu1 }
 0x1f7   : > { %v9153_v5 = vpack.c.bf16 %v4986_v59, %v4986_v59  ;;  %v4989_v7 = vmax.f32 %v3371_v61, 0.0  ;;  %v5245_v8 = vmax.f32 %v4395_v52, 0.0  ;;  %v3363_v9 = vadd.f32 %v11825_v62, %v3362_v2  ;;  %v10564_v2 = vld [vmem:[%s10626_s22 + $0x3e8] sm:$0xff]  }
 0x1f8   : > { %v9409_v6 = vpack.c.bf16 %v5242_v60, %v5242_v60  ;;  %7549 = vst.msk [vmem:[%s10850_s27 + $0x238] sm:$0xf] %vm7406_vm3, %v9155_v0  ;;  %7805 = vst.msk [vmem:[%s10850_s27 + $0x638] sm:$0xf] %vm7406_vm3, %v9411_v1  ;;  %v4387_v10 = vadd.f32 %v11825_v62, %v4386_v3  ;;  %v9933_v11 = vpop.f32.mrf.mxu0  ;;  %10028 = vmatmul.mubr.msk.bf16.gmra.mxu0 %vm1989_vm2, %v10556_v57  ;;  %v10189_v12 = vpop.f32.mrf.mxu1  ;;  %10284 = vmatmul.mubr.msk.bf16.gmra.mxu1 %vm1989_vm2, %v10557_v58  ;;  %v10565_v3 = vld [vmem:[%s10626_s22 + $0x7e8] sm:$0xff]  }
 0x1f9   : > { %7547 = vst.msk [vmem:[%s10850_s27 + $0x230] sm:$0xf] %vm7406_vm3, %v9153_v5  ;;  %v9156_v13 = vpack.c.bf16 %v4989_v7, %v4989_v7  ;;  %v9412_v14 = vpack.c.bf16 %v5245_v8, %v5245_v8  ;;  %v3384_v15 = vadd.f32 %v11825_v62, %v9933_v11  ;;  %v4408_v16 = vadd.f32 %v11825_v62, %v10189_v12  ;;  %v10566_v8 = vld [vmem:[%s10626_s22 + $0x3f0] sm:$0xff]  }
 0x1fa   : > { %7803 = vst.msk [vmem:[%s10850_s27 + $0x630] sm:$0xf] %vm7406_vm3, %v9409_v6  ;;  %10031 = vmatprep.mubr.msk.bf16.mxu0 %vm1989_vm2, %v10558_v63  ;;  %v4987_v17 = vmax.f32 %v3363_v9, 0.0  ;;  %v5243_v18 = vmax.f32 %v4387_v10, 0.0  ;;  %v3375_v19 = vpop.f32.mrf.mxu0  ;;  %v4399_v20 = vpop.f32.mrf.mxu1  ;;  %10287 = vmatprep.mubr.msk.bf16.mxu1 %vm1989_vm2, %v10559_v4  ;;  %v10567_v9 = vld [vmem:[%s10626_s22 + $0x7f0] sm:$0xff]  }
 0x1fb   : > { %7550 = vst.msk [vmem:[%s10850_s27 + $0x23c] sm:$0xf] %vm7406_vm3, %v9156_v13  ;;  %7806 = vst.msk [vmem:[%s10850_s27 + $0x63c] sm:$0xf] %vm7406_vm3, %v9412_v14  ;;  %v4992_v21 = vmax.f32 %v3384_v15, 0.0  ;;  %v5248_v22 = vmax.f32 %v4408_v16, 0.0  ;;  %v3376_v23 = vadd.f32 %v11825_v62, %v3375_v19  ;;  %v4400_v24 = vadd.f32 %v11825_v62, %v4399_v20 }
 0x1fc   : > { %v9154_v25 = vpack.c.bf16 %v4987_v17, %v4987_v17  ;;  %v9410_v26 = vpack.c.bf16 %v5243_v18, %v5243_v18  ;;  %v9934_v27 = vpop.f32.mrf.mxu0  ;;  %v10190_v28 = vpop.f32.mrf.mxu1 }
 0x1fd   : > { %v9159_v31 = vpack.c.bf16 %v4992_v21, %v4992_v21  ;;  %v9415_v32 = vpack.c.bf16 %v5248_v22, %v5248_v22  ;;  %v4990_v33 = vmax.f32 %v3376_v23, 0.0  ;;  %v5246_v34 = vmax.f32 %v4400_v24, 0.0 }
 0x1fe   : > { %7548 = vst.msk [vmem:[%s10850_s27 + $0x234] sm:$0xf] %vm7406_vm3, %v9154_v25  ;;  %7804 = vst.msk [vmem:[%s10850_s27 + $0x634] sm:$0xf] %vm7406_vm3, %v9410_v26  ;;  %v3387_v37 = vadd.f32 %v11825_v62, %v9934_v27  ;;  %v4411_v38 = vadd.f32 %v11825_v62, %v10190_v28  ;;  %v3378_v39 = vpop.f32.mrf.mxu0  ;;  %v4402_v40 = vpop.f32.mrf.mxu1 }
 0x1ff   : > { %7553 = vst.msk [vmem:[%s10850_s27 + $0x248] sm:$0xf] %vm7406_vm3, %v9159_v31  ;;  %7809 = vst.msk [vmem:[%s10850_s27 + $0x648] sm:$0xf] %vm7406_vm3, %v9415_v32  ;;  %v9157_v41 = vpack.c.bf16 %v4990_v33, %v4990_v33  ;;  %v9413_v42 = vpack.c.bf16 %v5246_v34, %v5246_v34  ;;  %v3379_v43 = vadd.f32 %v11825_v62, %v3378_v39  ;;  %v10569_v39 = vld [vmem:[%s10626_s22 + $0x7f8] sm:$0xff]  }
 0x200   : > { %v4403_v45 = vadd.f32 %v11825_v62, %v4402_v40  ;;  %v4993_v46 = vmax.f32 %v3387_v37, 0.0  ;;  %v5249_v47 = vmax.f32 %v4411_v38, 0.0  ;;  %v9937_v48 = vpop.f32.mrf.mxu0  ;;  %10032 = vmatmul.mubr.msk.bf16.gmra.mxu0 %vm1989_vm2, %v10560_v29  ;;  %v10193_v49 = vpop.f32.mrf.mxu1  ;;  %10288 = vmatmul.mubr.msk.bf16.gmra.mxu1 %vm1989_vm2, %v10561_v30  ;;  %v10568_v38 = vld [vmem:[%s10626_s22 + $0x3f8] sm:$0xff]  }
 0x201   : > { %7551 = vst.msk [vmem:[%s10850_s27 + $0x240] sm:$0xf] %vm7406_vm3, %v9157_v41  ;;  %7807 = vst.msk [vmem:[%s10850_s27 + $0x640] sm:$0xf] %vm7406_vm3, %v9413_v42  ;;  %v4991_v50 = vmax.f32 %v3379_v43, 0.0  ;;  %v3400_v44 = vadd.f32 %v11825_v62, %v9937_v48  ;;  %v4424_v53 = vadd.f32 %v11825_v62, %v10193_v49  ;;  %10035 = vmatprep.mubr.msk.bf16.mxu0 %vm1989_vm2, %v10562_v35  ;;  %10291 = vmatprep.mubr.msk.bf16.mxu1 %vm1989_vm2, %v10563_v36 }
 0x202   : > { %v5247_v51 = vmax.f32 %v4403_v45, 0.0  ;;  %v9160_v54 = vpack.c.bf16 %v4993_v46, %v4993_v46  ;;  %v9416_v55 = vpack.c.bf16 %v5249_v47, %v5249_v47  ;;  %v3391_v56 = vpop.f32.mrf.mxu0  ;;  %v4415_v57 = vpop.f32.mrf.mxu1 }
 0x203   : > { %v9158_v58 = vpack.c.bf16 %v4991_v50, %v4991_v50  ;;  %v4996_v60 = vmax.f32 %v3400_v44, 0.0  ;;  %v5252_v61 = vmax.f32 %v4424_v53, 0.0  ;;  %v3392_v52 = vadd.f32 %v11825_v62, %v3391_v56 }
 0x204   : > { %v9414_v59 = vpack.c.bf16 %v5247_v51, %v5247_v51  ;;  %7554 = vst.msk [vmem:[%s10850_s27 + $0x24c] sm:$0xf] %vm7406_vm3, %v9160_v54  ;;  %7810 = vst.msk [vmem:[%s10850_s27 + $0x64c] sm:$0xf] %vm7406_vm3, %v9416_v55  ;;  %v4416_v63 = vadd.f32 %v11825_v62, %v4415_v57  ;;  %v9938_v0 = vpop.f32.mrf.mxu0  ;;  %v10194_v1 = vpop.f32.mrf.mxu1 }
 0x205   : > { %7552 = vst.msk [vmem:[%s10850_s27 + $0x244] sm:$0xf] %vm7406_vm3, %v9158_v58  ;;  %v9163_v4 = vpack.c.bf16 %v4996_v60, %v4996_v60  ;;  %v9419_v5 = vpack.c.bf16 %v5252_v61, %v5252_v61  ;;  %v3403_v6 = vadd.f32 %v11825_v62, %v9938_v0  ;;  %v4427_v7 = vadd.f32 %v11825_v62, %v10194_v1 }
 0x206   : > { %7808 = vst.msk [vmem:[%s10850_s27 + $0x644] sm:$0xf] %vm7406_vm3, %v9414_v59  ;;  %v4994_v10 = vmax.f32 %v3392_v52, 0.0  ;;  %v5250_v11 = vmax.f32 %v4416_v63, 0.0  ;;  %v3394_v12 = vpop.f32.mrf.mxu0  ;;  %v4418_v13 = vpop.f32.mrf.mxu1 }
 0x207   : > { %7557 = vst.msk [vmem:[%s10850_s27 + $0x258] sm:$0xf] %vm7406_vm3, %v9163_v4  ;;  %7813 = vst.msk [vmem:[%s10850_s27 + $0x658] sm:$0xf] %vm7406_vm3, %v9419_v5  ;;  %v4997_v14 = vmax.f32 %v3403_v6, 0.0  ;;  %v5253_v15 = vmax.f32 %v4427_v7, 0.0  ;;  %v3395_v16 = vadd.f32 %v11825_v62, %v3394_v12  ;;  %v4419_v17 = vadd.f32 %v11825_v62, %v4418_v13 }
 0x208   : > { %v9161_v18 = vpack.c.bf16 %v4994_v10, %v4994_v10  ;;  %v9417_v19 = vpack.c.bf16 %v5250_v11, %v5250_v11  ;;  %v9941_v20 = vpop.f32.mrf.mxu0  ;;  %10036 = vmatmul.mubr.msk.bf16.gmra.mxu0 %vm1989_vm2, %v10564_v2  ;;  %v10197_v21 = vpop.f32.mrf.mxu1  ;;  %10292 = vmatmul.mubr.msk.bf16.gmra.mxu1 %vm1989_vm2, %v10565_v3 }
 0x209   : > { %v9164_v22 = vpack.c.bf16 %v4997_v14, %v4997_v14  ;;  %v9420_v23 = vpack.c.bf16 %v5253_v15, %v5253_v15  ;;  %v4995_v24 = vmax.f32 %v3395_v16, 0.0  ;;  %v5251_v25 = vmax.f32 %v4419_v17, 0.0  ;;  %10039 = vmatprep.mubr.msk.bf16.mxu0 %vm1989_vm2, %v10566_v8  ;;  %10295 = vmatprep.mubr.msk.bf16.mxu1 %vm1989_vm2, %v10567_v9 }
 0x20a   : > { %7555 = vst.msk [vmem:[%s10850_s27 + $0x250] sm:$0xf] %vm7406_vm3, %v9161_v18  ;;  %7811 = vst.msk [vmem:[%s10850_s27 + $0x650] sm:$0xf] %vm7406_vm3, %v9417_v19  ;;  %v3416_v26 = vadd.f32 %v11825_v62, %v9941_v20  ;;  %v4440_v27 = vadd.f32 %v11825_v62, %v10197_v21  ;;  %v3407_v28 = vpop.f32.mrf.mxu0  ;;  %v4431_v29 = vpop.f32.mrf.mxu1 }
 0x20b   : > { %7558 = vst.msk [vmem:[%s10850_s27 + $0x25c] sm:$0xf] %vm7406_vm3, %v9164_v22  ;;  %7814 = vst.msk [vmem:[%s10850_s27 + $0x65c] sm:$0xf] %vm7406_vm3, %v9420_v23  ;;  %v9162_v30 = vpack.c.bf16 %v4995_v24, %v4995_v24  ;;  %v9418_v31 = vpack.c.bf16 %v5251_v25, %v5251_v25  ;;  %v3408_v32 = vadd.f32 %v11825_v62, %v3407_v28 }
 0x20c   : > { %v4432_v33 = vadd.f32 %v11825_v62, %v4431_v29  ;;  %v5000_v34 = vmax.f32 %v3416_v26, 0.0  ;;  %v5256_v35 = vmax.f32 %v4440_v27, 0.0  ;;  %v9942_v36 = vpop.f32.mrf.mxu0  ;;  %v10198_v37 = vpop.f32.mrf.mxu1 }
 0x20d   : > { %7556 = vst.msk [vmem:[%s10850_s27 + $0x254] sm:$0xf] %vm7406_vm3, %v9162_v30  ;;  %7812 = vst.msk [vmem:[%s10850_s27 + $0x654] sm:$0xf] %vm7406_vm3, %v9418_v31  ;;  %v4998_v40 = vmax.f32 %v3408_v32, 0.0  ;;  %v3419_v42 = vadd.f32 %v11825_v62, %v9942_v36  ;;  %v4443_v43 = vadd.f32 %v11825_v62, %v10198_v37 }
 0x20e   : > { %v5254_v41 = vmax.f32 %v4432_v33, 0.0  ;;  %v9167_v45 = vpack.c.bf16 %v5000_v34, %v5000_v34  ;;  %v9423_v46 = vpack.c.bf16 %v5256_v35, %v5256_v35  ;;  %v3410_v47 = vpop.f32.mrf.mxu0  ;;  %v4434_v48 = vpop.f32.mrf.mxu1 }
 0x20f   : > { %v9165_v49 = vpack.c.bf16 %v4998_v40, %v4998_v40  ;;  %v5001_v51 = vmax.f32 %v3419_v42, 0.0  ;;  %v5257_v44 = vmax.f32 %v4443_v43, 0.0  ;;  %v3411_v53 = vadd.f32 %v11825_v62, %v3410_v47 }
 0x210   : > { %v9421_v50 = vpack.c.bf16 %v5254_v41, %v5254_v41  ;;  %7561 = vst.msk [vmem:[%s10850_s27 + $0x268] sm:$0xf] %vm7406_vm3, %v9167_v45  ;;  %7817 = vst.msk [vmem:[%s10850_s27 + $0x668] sm:$0xf] %vm7406_vm3, %v9423_v46  ;;  %v4435_v54 = vadd.f32 %v11825_v62, %v4434_v48  ;;  %v9945_v55 = vpop.f32.mrf.mxu0  ;;  %10040 = vmatmul.mubr.msk.bf16.gmra.mxu0 %vm1989_vm2, %v10568_v38  ;;  %v10201_v56 = vpop.f32.mrf.mxu1  ;;  %10296 = vmatmul.mubr.msk.bf16.gmra.mxu1 %vm1989_vm2, %v10569_v39 }
 0x211   : > { %7559 = vst.msk [vmem:[%s10850_s27 + $0x260] sm:$0xf] %vm7406_vm3, %v9165_v49  ;;  %v9168_v57 = vpack.c.bf16 %v5001_v51, %v5001_v51  ;;  %v9424_v58 = vpack.c.bf16 %v5257_v44, %v5257_v44  ;;  %v3432_v59 = vadd.f32 %v11825_v62, %v9945_v55  ;;  %v4456_v60 = vadd.f32 %v11825_v62, %v10201_v56 }
 0x212   : > { %7815 = vst.msk [vmem:[%s10850_s27 + $0x660] sm:$0xf] %vm7406_vm3, %v9421_v50  ;;  %v4999_v61 = vmax.f32 %v3411_v53, 0.0  ;;  %v5255_v52 = vmax.f32 %v4435_v54, 0.0  ;;  %v3423_v63 = vpop.f32.mrf.mxu0  ;;  %v4447_v0 = vpop.f32.mrf.mxu1 }
 0x213   : > { %7562 = vst.msk [vmem:[%s10850_s27 + $0x26c] sm:$0xf] %vm7406_vm3, %v9168_v57  ;;  %7818 = vst.msk [vmem:[%s10850_s27 + $0x66c] sm:$0xf] %vm7406_vm3, %v9424_v58  ;;  %v5004_v1 = vmax.f32 %v3432_v59, 0.0  ;;  %v5260_v2 = vmax.f32 %v4456_v60, 0.0  ;;  %v3424_v3 = vadd.f32 %v11825_v62, %v3423_v63  ;;  %v4448_v4 = vadd.f32 %v11825_v62, %v4447_v0 }
 0x214   : > { %v9166_v5 = vpack.c.bf16 %v4999_v61, %v4999_v61  ;;  %v9422_v6 = vpack.c.bf16 %v5255_v52, %v5255_v52  ;;  %v9946_v7 = vpop.f32.mrf.mxu0  ;;  %v10202_v8 = vpop.f32.mrf.mxu1 }
 0x215   : > { %v9171_v9 = vpack.c.bf16 %v5004_v1, %v5004_v1  ;;  %v9427_v10 = vpack.c.bf16 %v5260_v2, %v5260_v2  ;;  %v5002_v11 = vmax.f32 %v3424_v3, 0.0  ;;  %v5258_v12 = vmax.f32 %v4448_v4, 0.0 }
 0x216   : > { %7560 = vst.msk [vmem:[%s10850_s27 + $0x264] sm:$0xf] %vm7406_vm3, %v9166_v5  ;;  %7816 = vst.msk [vmem:[%s10850_s27 + $0x664] sm:$0xf] %vm7406_vm3, %v9422_v6  ;;  %v3435_v13 = vadd.f32 %v11825_v62, %v9946_v7  ;;  %v4459_v14 = vadd.f32 %v11825_v62, %v10202_v8  ;;  %v3426_v15 = vpop.f32.mrf.mxu0  ;;  %v4450_v16 = vpop.f32.mrf.mxu1 }
 0x217   : > { %7565 = vst.msk [vmem:[%s10850_s27 + $0x278] sm:$0xf] %vm7406_vm3, %v9171_v9  ;;  %7821 = vst.msk [vmem:[%s10850_s27 + $0x678] sm:$0xf] %vm7406_vm3, %v9427_v10  ;;  %v9169_v17 = vpack.c.bf16 %v5002_v11, %v5002_v11  ;;  %v9425_v18 = vpack.c.bf16 %v5258_v12, %v5258_v12  ;;  %v3427_v19 = vadd.f32 %v11825_v62, %v3426_v15 }
 0x218   : > { %v4451_v20 = vadd.f32 %v11825_v62, %v4450_v16  ;;  %v5005_v21 = vmax.f32 %v3435_v13, 0.0  ;;  %v5261_v22 = vmax.f32 %v4459_v14, 0.0  ;;  %v9949_v23 = vpop.f32.mrf.mxu0  ;;  %v10205_v24 = vpop.f32.mrf.mxu1 }
 0x219   : > { %7563 = vst.msk [vmem:[%s10850_s27 + $0x270] sm:$0xf] %vm7406_vm3, %v9169_v17  ;;  %7819 = vst.msk [vmem:[%s10850_s27 + $0x670] sm:$0xf] %vm7406_vm3, %v9425_v18  ;;  %v5003_v25 = vmax.f32 %v3427_v19, 0.0  ;;  %v3448_v27 = vadd.f32 %v11825_v62, %v9949_v23  ;;  %v4472_v28 = vadd.f32 %v11825_v62, %v10205_v24 }
 0x21a   : > { %v5259_v26 = vmax.f32 %v4451_v20, 0.0  ;;  %v9172_v29 = vpack.c.bf16 %v5005_v21, %v5005_v21  ;;  %v9428_v30 = vpack.c.bf16 %v5261_v22, %v5261_v22  ;;  %v3439_v31 = vpop.f32.mrf.mxu0  ;;  %v4463_v32 = vpop.f32.mrf.mxu1  ;;  %v12164_v22 = vld [vmem:[%s12718_s2] ss:$0 sm:$0xff] }
 0x21b   : > { %v9170_v33 = vpack.c.bf16 %v5003_v25, %v5003_v25  ;;  %v5008_v35 = vmax.f32 %v3448_v27, 0.0  ;;  %v5264_v36 = vmax.f32 %v4472_v28, 0.0  ;;  %v3440_v37 = vadd.f32 %v11825_v62, %v3439_v31 }
 0x21c   : > { %v9426_v34 = vpack.c.bf16 %v5259_v26, %v5259_v26  ;;  %7566 = vst.msk [vmem:[%s10850_s27 + $0x27c] sm:$0xf] %vm7406_vm3, %v9172_v29  ;;  %7822 = vst.msk [vmem:[%s10850_s27 + $0x67c] sm:$0xf] %vm7406_vm3, %v9428_v30  ;;  %v4464_v38 = vadd.f32 %v11825_v62, %v4463_v32  ;;  %v9950_v39 = vpop.f32.mrf.mxu0  ;;  %v10206_v40 = vpop.f32.mrf.mxu1 }
 0x21d   : > { %7564 = vst.msk [vmem:[%s10850_s27 + $0x274] sm:$0xf] %vm7406_vm3, %v9170_v33  ;;  %v9175_v41 = vpack.c.bf16 %v5008_v35, %v5008_v35  ;;  %v9431_v42 = vpack.c.bf16 %v5264_v36, %v5264_v36  ;;  %v3451_v43 = vadd.f32 %v11825_v62, %v9950_v39  ;;  %v4475_v45 = vadd.f32 %v11825_v62, %v10206_v40 }
 0x21e   : > { %7820 = vst.msk [vmem:[%s10850_s27 + $0x674] sm:$0xf] %vm7406_vm3, %v9426_v34  ;;  %v5006_v46 = vmax.f32 %v3440_v37, 0.0  ;;  %v5262_v47 = vmax.f32 %v4464_v38, 0.0  ;;  %v3442_v48 = vpop.f32.mrf.mxu0  ;;  %v4466_v49 = vpop.f32.mrf.mxu1 }
 0x21f   : > { %7569 = vst.msk [vmem:[%s10850_s27 + $0x288] sm:$0xf] %vm7406_vm3, %v9175_v41  ;;  %7825 = vst.msk [vmem:[%s10850_s27 + $0x688] sm:$0xf] %vm7406_vm3, %v9431_v42  ;;  %v5009_v50 = vmax.f32 %v3451_v43, 0.0  ;;  %v5265_v51 = vmax.f32 %v4475_v45, 0.0  ;;  %v3443_v44 = vadd.f32 %v11825_v62, %v3442_v48  ;;  %v4467_v53 = vadd.f32 %v11825_v62, %v4466_v49 }
 0x220   : > { %v9173_v54 = vpack.c.bf16 %v5006_v46, %v5006_v46  ;;  %v9429_v55 = vpack.c.bf16 %v5262_v47, %v5262_v47  ;;  %v9953_v56 = vpop.f32.mrf.mxu0  ;;  %v10209_v57 = vpop.f32.mrf.mxu1 }
 0x221   : > { %v9176_v58 = vpack.c.bf16 %v5009_v50, %v5009_v50  ;;  %v9432_v59 = vpack.c.bf16 %v5265_v51, %v5265_v51  ;;  %v5007_v60 = vmax.f32 %v3443_v44, 0.0  ;;  %v5263_v61 = vmax.f32 %v4467_v53, 0.0 }
 0x222   : > { %7567 = vst.msk [vmem:[%s10850_s27 + $0x280] sm:$0xf] %vm7406_vm3, %v9173_v54  ;;  %7823 = vst.msk [vmem:[%s10850_s27 + $0x680] sm:$0xf] %vm7406_vm3, %v9429_v55  ;;  %v3464_v52 = vadd.f32 %v11825_v62, %v9953_v56  ;;  %v4488_v63 = vadd.f32 %v11825_v62, %v10209_v57  ;;  %v3455_v0 = vpop.f32.mrf.mxu0  ;;  %v4479_v1 = vpop.f32.mrf.mxu1 }
 0x223   : > { %7570 = vst.msk [vmem:[%s10850_s27 + $0x28c] sm:$0xf] %vm7406_vm3, %v9176_v58  ;;  %7826 = vst.msk [vmem:[%s10850_s27 + $0x68c] sm:$0xf] %vm7406_vm3, %v9432_v59  ;;  %v9174_v2 = vpack.c.bf16 %v5007_v60, %v5007_v60  ;;  %v9430_v3 = vpack.c.bf16 %v5263_v61, %v5263_v61  ;;  %v3456_v4 = vadd.f32 %v11825_v62, %v3455_v0 }
 0x224   : > { %v4480_v5 = vadd.f32 %v11825_v62, %v4479_v1  ;;  %v5012_v6 = vmax.f32 %v3464_v52, 0.0  ;;  %v5268_v7 = vmax.f32 %v4488_v63, 0.0  ;;  %v9954_v8 = vpop.f32.mrf.mxu0  ;;  %v10210_v9 = vpop.f32.mrf.mxu1 }
 0x225   : > { %7568 = vst.msk [vmem:[%s10850_s27 + $0x284] sm:$0xf] %vm7406_vm3, %v9174_v2  ;;  %7824 = vst.msk [vmem:[%s10850_s27 + $0x684] sm:$0xf] %vm7406_vm3, %v9430_v3  ;;  %v5010_v10 = vmax.f32 %v3456_v4, 0.0  ;;  %v3467_v12 = vadd.f32 %v11825_v62, %v9954_v8  ;;  %v4491_v13 = vadd.f32 %v11825_v62, %v10210_v9 }
 0x226   : > { %v5266_v11 = vmax.f32 %v4480_v5, 0.0  ;;  %v9179_v14 = vpack.c.bf16 %v5012_v6, %v5012_v6  ;;  %v9435_v15 = vpack.c.bf16 %v5268_v7, %v5268_v7  ;;  %v3458_v16 = vpop.f32.mrf.mxu0  ;;  %v4482_v17 = vpop.f32.mrf.mxu1 }
 0x227   : > { %v9177_v18 = vpack.c.bf16 %v5010_v10, %v5010_v10  ;;  %v5013_v20 = vmax.f32 %v3467_v12, 0.0  ;;  %v5269_v21 = vmax.f32 %v4491_v13, 0.0  ;;  %v3459_v62 = vadd.f32 %v12164_v22, %v3458_v16 }
 0x228   : > { %v9433_v19 = vpack.c.bf16 %v5266_v11, %v5266_v11  ;;  %7573 = vst.msk [vmem:[%s10850_s27 + $0x298] sm:$0xf] %vm7406_vm3, %v9179_v14  ;;  %7829 = vst.msk [vmem:[%s10850_s27 + $0x698] sm:$0xf] %vm7406_vm3, %v9435_v15  ;;  %v4483_v23 = vadd.f32 %v12164_v22, %v4482_v17  ;;  %v9957_v24 = vpop.f32.mrf.mxu0  ;;  %v10213_v25 = vpop.f32.mrf.mxu1 }
 0x229   : > { %7571 = vst.msk [vmem:[%s10850_s27 + $0x290] sm:$0xf] %vm7406_vm3, %v9177_v18  ;;  %v9180_v26 = vpack.c.bf16 %v5013_v20, %v5013_v20  ;;  %v9436_v27 = vpack.c.bf16 %v5269_v21, %v5269_v21  ;;  %v3480_v28 = vadd.f32 %v12164_v22, %v9957_v24  ;;  %v4504_v29 = vadd.f32 %v12164_v22, %v10213_v25 }
 0x22a   : > { %7827 = vst.msk [vmem:[%s10850_s27 + $0x690] sm:$0xf] %vm7406_vm3, %v9433_v19  ;;  %v5011_v30 = vmax.f32 %v3459_v62, 0.0  ;;  %v5267_v31 = vmax.f32 %v4483_v23, 0.0  ;;  %v3471_v32 = vpop.f32.mrf.mxu0  ;;  %v4495_v33 = vpop.f32.mrf.mxu1 }
 0x22b   : > { %7574 = vst.msk [vmem:[%s10850_s27 + $0x29c] sm:$0xf] %vm7406_vm3, %v9180_v26  ;;  %7830 = vst.msk [vmem:[%s10850_s27 + $0x69c] sm:$0xf] %vm7406_vm3, %v9436_v27  ;;  %v5016_v34 = vmax.f32 %v3480_v28, 0.0  ;;  %v5272_v35 = vmax.f32 %v4504_v29, 0.0  ;;  %v3472_v36 = vadd.f32 %v12164_v22, %v3471_v32  ;;  %v4496_v37 = vadd.f32 %v12164_v22, %v4495_v33 }
 0x22c   : > { %v9178_v38 = vpack.c.bf16 %v5011_v30, %v5011_v30  ;;  %v9434_v39 = vpack.c.bf16 %v5267_v31, %v5267_v31  ;;  %v9958_v40 = vpop.f32.mrf.mxu0  ;;  %v10214_v41 = vpop.f32.mrf.mxu1 }
 0x22d   : > { %v9183_v42 = vpack.c.bf16 %v5016_v34, %v5016_v34  ;;  %v9439_v43 = vpack.c.bf16 %v5272_v35, %v5272_v35  ;;  %v5014_v45 = vmax.f32 %v3472_v36, 0.0  ;;  %v5270_v46 = vmax.f32 %v4496_v37, 0.0 }
 0x22e   : > { %7572 = vst.msk [vmem:[%s10850_s27 + $0x294] sm:$0xf] %vm7406_vm3, %v9178_v38  ;;  %7828 = vst.msk [vmem:[%s10850_s27 + $0x694] sm:$0xf] %vm7406_vm3, %v9434_v39  ;;  %v3483_v47 = vadd.f32 %v12164_v22, %v9958_v40  ;;  %v4507_v48 = vadd.f32 %v12164_v22, %v10214_v41  ;;  %v3474_v49 = vpop.f32.mrf.mxu0  ;;  %v4498_v50 = vpop.f32.mrf.mxu1 }
 0x22f   : > { %7577 = vst.msk [vmem:[%s10850_s27 + $0x2a8] sm:$0xf] %vm7406_vm3, %v9183_v42  ;;  %7833 = vst.msk [vmem:[%s10850_s27 + $0x6a8] sm:$0xf] %vm7406_vm3, %v9439_v43  ;;  %v9181_v51 = vpack.c.bf16 %v5014_v45, %v5014_v45  ;;  %v9437_v44 = vpack.c.bf16 %v5270_v46, %v5270_v46  ;;  %v3475_v53 = vadd.f32 %v12164_v22, %v3474_v49 }
 0x230   : > { %v4499_v54 = vadd.f32 %v12164_v22, %v4498_v50  ;;  %v5017_v55 = vmax.f32 %v3483_v47, 0.0  ;;  %v5273_v56 = vmax.f32 %v4507_v48, 0.0  ;;  %v9961_v57 = vpop.f32.mrf.mxu0  ;;  %v10217_v58 = vpop.f32.mrf.mxu1 }
 0x231   : > { %7575 = vst.msk [vmem:[%s10850_s27 + $0x2a0] sm:$0xf] %vm7406_vm3, %v9181_v51  ;;  %7831 = vst.msk [vmem:[%s10850_s27 + $0x6a0] sm:$0xf] %vm7406_vm3, %v9437_v44  ;;  %v5015_v59 = vmax.f32 %v3475_v53, 0.0  ;;  %v3496_v61 = vadd.f32 %v12164_v22, %v9961_v57  ;;  %v4520_v52 = vadd.f32 %v12164_v22, %v10217_v58 }
 0x232   : > { %v5271_v60 = vmax.f32 %v4499_v54, 0.0  ;;  %v9184_v63 = vpack.c.bf16 %v5017_v55, %v5017_v55  ;;  %v9440_v0 = vpack.c.bf16 %v5273_v56, %v5273_v56  ;;  %v3487_v1 = vpop.f32.mrf.mxu0  ;;  %v4511_v2 = vpop.f32.mrf.mxu1 }
 0x233   : > { %v9182_v3 = vpack.c.bf16 %v5015_v59, %v5015_v59  ;;  %v5020_v5 = vmax.f32 %v3496_v61, 0.0  ;;  %v5276_v6 = vmax.f32 %v4520_v52, 0.0  ;;  %v3488_v7 = vadd.f32 %v12164_v22, %v3487_v1 }
 0x234   : > { %v9438_v4 = vpack.c.bf16 %v5271_v60, %v5271_v60  ;;  %7578 = vst.msk [vmem:[%s10850_s27 + $0x2ac] sm:$0xf] %vm7406_vm3, %v9184_v63  ;;  %7834 = vst.msk [vmem:[%s10850_s27 + $0x6ac] sm:$0xf] %vm7406_vm3, %v9440_v0  ;;  %v4512_v8 = vadd.f32 %v12164_v22, %v4511_v2  ;;  %v9962_v9 = vpop.f32.mrf.mxu0  ;;  %v10218_v10 = vpop.f32.mrf.mxu1 }
 0x235   : > { %7576 = vst.msk [vmem:[%s10850_s27 + $0x2a4] sm:$0xf] %vm7406_vm3, %v9182_v3  ;;  %v9187_v11 = vpack.c.bf16 %v5020_v5, %v5020_v5  ;;  %v9443_v12 = vpack.c.bf16 %v5276_v6, %v5276_v6  ;;  %v3499_v13 = vadd.f32 %v12164_v22, %v9962_v9  ;;  %v4523_v14 = vadd.f32 %v12164_v22, %v10218_v10 }
 0x236   : > { %7832 = vst.msk [vmem:[%s10850_s27 + $0x6a4] sm:$0xf] %vm7406_vm3, %v9438_v4  ;;  %v5018_v15 = vmax.f32 %v3488_v7, 0.0  ;;  %v5274_v16 = vmax.f32 %v4512_v8, 0.0  ;;  %v3490_v17 = vpop.f32.mrf.mxu0  ;;  %v4514_v18 = vpop.f32.mrf.mxu1 }
 0x237   : > { %7581 = vst.msk [vmem:[%s10850_s27 + $0x2b8] sm:$0xf] %vm7406_vm3, %v9187_v11  ;;  %7837 = vst.msk [vmem:[%s10850_s27 + $0x6b8] sm:$0xf] %vm7406_vm3, %v9443_v12  ;;  %v5021_v19 = vmax.f32 %v3499_v13, 0.0  ;;  %v5277_v20 = vmax.f32 %v4523_v14, 0.0  ;;  %v3491_v21 = vadd.f32 %v12164_v22, %v3490_v17  ;;  %v4515_v62 = vadd.f32 %v12164_v22, %v4514_v18 }
 0x238   : > { %v9185_v23 = vpack.c.bf16 %v5018_v15, %v5018_v15  ;;  %v9441_v24 = vpack.c.bf16 %v5274_v16, %v5274_v16  ;;  %v9965_v25 = vpop.f32.mrf.mxu0  ;;  %v10221_v26 = vpop.f32.mrf.mxu1 }
 0x239   : > { %v9188_v27 = vpack.c.bf16 %v5021_v19, %v5021_v19  ;;  %v9444_v28 = vpack.c.bf16 %v5277_v20, %v5277_v20  ;;  %v5019_v29 = vmax.f32 %v3491_v21, 0.0  ;;  %v5275_v30 = vmax.f32 %v4515_v62, 0.0 }
 0x23a   : > { %7579 = vst.msk [vmem:[%s10850_s27 + $0x2b0] sm:$0xf] %vm7406_vm3, %v9185_v23  ;;  %7835 = vst.msk [vmem:[%s10850_s27 + $0x6b0] sm:$0xf] %vm7406_vm3, %v9441_v24  ;;  %v3512_v31 = vadd.f32 %v12164_v22, %v9965_v25  ;;  %v4536_v32 = vadd.f32 %v12164_v22, %v10221_v26  ;;  %v3503_v33 = vpop.f32.mrf.mxu0  ;;  %v4527_v34 = vpop.f32.mrf.mxu1 }
 0x23b   : > { %7582 = vst.msk [vmem:[%s10850_s27 + $0x2bc] sm:$0xf] %vm7406_vm3, %v9188_v27  ;;  %7838 = vst.msk [vmem:[%s10850_s27 + $0x6bc] sm:$0xf] %vm7406_vm3, %v9444_v28  ;;  %v9186_v35 = vpack.c.bf16 %v5019_v29, %v5019_v29  ;;  %v9442_v36 = vpack.c.bf16 %v5275_v30, %v5275_v30  ;;  %v3504_v37 = vadd.f32 %v12164_v22, %v3503_v33 }
 0x23c   : > { %v4528_v38 = vadd.f32 %v12164_v22, %v4527_v34  ;;  %v5024_v39 = vmax.f32 %v3512_v31, 0.0  ;;  %v5280_v40 = vmax.f32 %v4536_v32, 0.0  ;;  %v9966_v41 = vpop.f32.mrf.mxu0  ;;  %v10222_v42 = vpop.f32.mrf.mxu1 }
 0x23d   : > { %7580 = vst.msk [vmem:[%s10850_s27 + $0x2b4] sm:$0xf] %vm7406_vm3, %v9186_v35  ;;  %7836 = vst.msk [vmem:[%s10850_s27 + $0x6b4] sm:$0xf] %vm7406_vm3, %v9442_v36  ;;  %v5022_v43 = vmax.f32 %v3504_v37, 0.0  ;;  %v3515_v46 = vadd.f32 %v12164_v22, %v9966_v41  ;;  %v4539_v47 = vadd.f32 %v12164_v22, %v10222_v42 }
 0x23e   : > { %v5278_v45 = vmax.f32 %v4528_v38, 0.0  ;;  %v9191_v48 = vpack.c.bf16 %v5024_v39, %v5024_v39  ;;  %v9447_v49 = vpack.c.bf16 %v5280_v40, %v5280_v40  ;;  %v3506_v50 = vpop.f32.mrf.mxu0  ;;  %v4530_v51 = vpop.f32.mrf.mxu1 }
 0x23f   : > { %v9189_v44 = vpack.c.bf16 %v5022_v43, %v5022_v43  ;;  %v5025_v54 = vmax.f32 %v3515_v46, 0.0  ;;  %v5281_v55 = vmax.f32 %v4539_v47, 0.0  ;;  %v3507_v56 = vadd.f32 %v12164_v22, %v3506_v50 }
 0x240   : > { %v9445_v53 = vpack.c.bf16 %v5278_v45, %v5278_v45  ;;  %7585 = vst.msk [vmem:[%s10850_s27 + $0x2c8] sm:$0xf] %vm7406_vm3, %v9191_v48  ;;  %7841 = vst.msk [vmem:[%s10850_s27 + $0x6c8] sm:$0xf] %vm7406_vm3, %v9447_v49  ;;  %v4531_v57 = vadd.f32 %v12164_v22, %v4530_v51  ;;  %v9969_v58 = vpop.f32.mrf.mxu0  ;;  %v10225_v59 = vpop.f32.mrf.mxu1 }
 0x241   : > { %7583 = vst.msk [vmem:[%s10850_s27 + $0x2c0] sm:$0xf] %vm7406_vm3, %v9189_v44  ;;  %v9192_v60 = vpack.c.bf16 %v5025_v54, %v5025_v54  ;;  %v9448_v61 = vpack.c.bf16 %v5281_v55, %v5281_v55  ;;  %v3528_v52 = vadd.f32 %v12164_v22, %v9969_v58  ;;  %v4552_v63 = vadd.f32 %v12164_v22, %v10225_v59 }
 0x242   : > { %7839 = vst.msk [vmem:[%s10850_s27 + $0x6c0] sm:$0xf] %vm7406_vm3, %v9445_v53  ;;  %v5023_v0 = vmax.f32 %v3507_v56, 0.0  ;;  %v5279_v1 = vmax.f32 %v4531_v57, 0.0  ;;  %v3519_v2 = vpop.f32.mrf.mxu0  ;;  %v4543_v3 = vpop.f32.mrf.mxu1 }
 0x243   : > { %7586 = vst.msk [vmem:[%s10850_s27 + $0x2cc] sm:$0xf] %vm7406_vm3, %v9192_v60  ;;  %7842 = vst.msk [vmem:[%s10850_s27 + $0x6cc] sm:$0xf] %vm7406_vm3, %v9448_v61  ;;  %v5028_v4 = vmax.f32 %v3528_v52, 0.0  ;;  %v5284_v5 = vmax.f32 %v4552_v63, 0.0  ;;  %v3520_v6 = vadd.f32 %v12164_v22, %v3519_v2  ;;  %v4544_v7 = vadd.f32 %v12164_v22, %v4543_v3 }
 0x244   : > { %v9190_v8 = vpack.c.bf16 %v5023_v0, %v5023_v0  ;;  %v9446_v9 = vpack.c.bf16 %v5279_v1, %v5279_v1  ;;  %v9970_v10 = vpop.f32.mrf.mxu0  ;;  %v10226_v11 = vpop.f32.mrf.mxu1 }
 0x245   : > { %v9195_v12 = vpack.c.bf16 %v5028_v4, %v5028_v4  ;;  %v9451_v13 = vpack.c.bf16 %v5284_v5, %v5284_v5  ;;  %v5026_v14 = vmax.f32 %v3520_v6, 0.0  ;;  %v5282_v15 = vmax.f32 %v4544_v7, 0.0 }
 0x246   : > { %7584 = vst.msk [vmem:[%s10850_s27 + $0x2c4] sm:$0xf] %vm7406_vm3, %v9190_v8  ;;  %7840 = vst.msk [vmem:[%s10850_s27 + $0x6c4] sm:$0xf] %vm7406_vm3, %v9446_v9  ;;  %v3531_v16 = vadd.f32 %v12164_v22, %v9970_v10  ;;  %v4555_v17 = vadd.f32 %v12164_v22, %v10226_v11  ;;  %v3522_v18 = vpop.f32.mrf.mxu0  ;;  %v4546_v19 = vpop.f32.mrf.mxu1 }
 0x247   : > { %7589 = vst.msk [vmem:[%s10850_s27 + $0x2d8] sm:$0xf] %vm7406_vm3, %v9195_v12  ;;  %7845 = vst.msk [vmem:[%s10850_s27 + $0x6d8] sm:$0xf] %vm7406_vm3, %v9451_v13  ;;  %v9193_v20 = vpack.c.bf16 %v5026_v14, %v5026_v14  ;;  %v9449_v21 = vpack.c.bf16 %v5282_v15, %v5282_v15  ;;  %v3523_v62 = vadd.f32 %v12164_v22, %v3522_v18 }
 0x248   : > { %v4547_v23 = vadd.f32 %v12164_v22, %v4546_v19  ;;  %v5029_v24 = vmax.f32 %v3531_v16, 0.0  ;;  %v5285_v25 = vmax.f32 %v4555_v17, 0.0  ;;  %v9973_v26 = vpop.f32.mrf.mxu0  ;;  %v10229_v27 = vpop.f32.mrf.mxu1 }
 0x249   : > { %7587 = vst.msk [vmem:[%s10850_s27 + $0x2d0] sm:$0xf] %vm7406_vm3, %v9193_v20  ;;  %7843 = vst.msk [vmem:[%s10850_s27 + $0x6d0] sm:$0xf] %vm7406_vm3, %v9449_v21  ;;  %v5027_v28 = vmax.f32 %v3523_v62, 0.0  ;;  %v3544_v30 = vadd.f32 %v12164_v22, %v9973_v26  ;;  %v4568_v31 = vadd.f32 %v12164_v22, %v10229_v27 }
 0x24a   : > { %v5283_v29 = vmax.f32 %v4547_v23, 0.0  ;;  %v9196_v32 = vpack.c.bf16 %v5029_v24, %v5029_v24  ;;  %v9452_v33 = vpack.c.bf16 %v5285_v25, %v5285_v25  ;;  %v3535_v34 = vpop.f32.mrf.mxu0  ;;  %v4559_v35 = vpop.f32.mrf.mxu1 }
 0x24b   : > { %v9194_v36 = vpack.c.bf16 %v5027_v28, %v5027_v28  ;;  %v5032_v38 = vmax.f32 %v3544_v30, 0.0  ;;  %v5288_v39 = vmax.f32 %v4568_v31, 0.0  ;;  %v3536_v40 = vadd.f32 %v12164_v22, %v3535_v34 }
 0x24c   : > { %v9450_v37 = vpack.c.bf16 %v5283_v29, %v5283_v29  ;;  %7590 = vst.msk [vmem:[%s10850_s27 + $0x2dc] sm:$0xf] %vm7406_vm3, %v9196_v32  ;;  %7846 = vst.msk [vmem:[%s10850_s27 + $0x6dc] sm:$0xf] %vm7406_vm3, %v9452_v33  ;;  %v4560_v41 = vadd.f32 %v12164_v22, %v4559_v35  ;;  %v9974_v42 = vpop.f32.mrf.mxu0  ;;  %v10230_v43 = vpop.f32.mrf.mxu1 }
 0x24d   : > { %7588 = vst.msk [vmem:[%s10850_s27 + $0x2d4] sm:$0xf] %vm7406_vm3, %v9194_v36  ;;  %v9199_v45 = vpack.c.bf16 %v5032_v38, %v5032_v38  ;;  %v9455_v46 = vpack.c.bf16 %v5288_v39, %v5288_v39  ;;  %v3547_v47 = vadd.f32 %v12164_v22, %v9974_v42  ;;  %v4571_v48 = vadd.f32 %v12164_v22, %v10230_v43 }
 0x24e   : > { %7844 = vst.msk [vmem:[%s10850_s27 + $0x6d4] sm:$0xf] %vm7406_vm3, %v9450_v37  ;;  %v5030_v49 = vmax.f32 %v3536_v40, 0.0  ;;  %v5286_v50 = vmax.f32 %v4560_v41, 0.0  ;;  %v3538_v51 = vpop.f32.mrf.mxu0  ;;  %v4562_v44 = vpop.f32.mrf.mxu1 }
 0x24f   : > { %7593 = vst.msk [vmem:[%s10850_s27 + $0x2e8] sm:$0xf] %vm7406_vm3, %v9199_v45  ;;  %7849 = vst.msk [vmem:[%s10850_s27 + $0x6e8] sm:$0xf] %vm7406_vm3, %v9455_v46  ;;  %v5033_v53 = vmax.f32 %v3547_v47, 0.0  ;;  %v5289_v54 = vmax.f32 %v4571_v48, 0.0  ;;  %v3539_v55 = vadd.f32 %v12164_v22, %v3538_v51  ;;  %v4563_v56 = vadd.f32 %v12164_v22, %v4562_v44 }
 0x250   : > { %v9197_v57 = vpack.c.bf16 %v5030_v49, %v5030_v49  ;;  %v9453_v58 = vpack.c.bf16 %v5286_v50, %v5286_v50  ;;  %v9977_v59 = vpop.f32.mrf.mxu0  ;;  %v10233_v60 = vpop.f32.mrf.mxu1 }
 0x251   : > { %v9200_v61 = vpack.c.bf16 %v5033_v53, %v5033_v53  ;;  %v9456_v52 = vpack.c.bf16 %v5289_v54, %v5289_v54  ;;  %v5031_v63 = vmax.f32 %v3539_v55, 0.0  ;;  %v5287_v0 = vmax.f32 %v4563_v56, 0.0 }
 0x252   : > { %7591 = vst.msk [vmem:[%s10850_s27 + $0x2e0] sm:$0xf] %vm7406_vm3, %v9197_v57  ;;  %7847 = vst.msk [vmem:[%s10850_s27 + $0x6e0] sm:$0xf] %vm7406_vm3, %v9453_v58  ;;  %v3560_v1 = vadd.f32 %v12164_v22, %v9977_v59  ;;  %v4584_v2 = vadd.f32 %v12164_v22, %v10233_v60  ;;  %v3551_v3 = vpop.f32.mrf.mxu0  ;;  %v4575_v4 = vpop.f32.mrf.mxu1 }
 0x253   : > { %7594 = vst.msk [vmem:[%s10850_s27 + $0x2ec] sm:$0xf] %vm7406_vm3, %v9200_v61  ;;  %7850 = vst.msk [vmem:[%s10850_s27 + $0x6ec] sm:$0xf] %vm7406_vm3, %v9456_v52  ;;  %v9198_v5 = vpack.c.bf16 %v5031_v63, %v5031_v63  ;;  %v9454_v6 = vpack.c.bf16 %v5287_v0, %v5287_v0  ;;  %v3552_v7 = vadd.f32 %v12164_v22, %v3551_v3 }
 0x254   : > { %v4576_v8 = vadd.f32 %v12164_v22, %v4575_v4  ;;  %v5036_v9 = vmax.f32 %v3560_v1, 0.0  ;;  %v5292_v10 = vmax.f32 %v4584_v2, 0.0  ;;  %v9978_v11 = vpop.f32.mrf.mxu0  ;;  %v10234_v12 = vpop.f32.mrf.mxu1 }
 0x255   : > { %7592 = vst.msk [vmem:[%s10850_s27 + $0x2e4] sm:$0xf] %vm7406_vm3, %v9198_v5  ;;  %7848 = vst.msk [vmem:[%s10850_s27 + $0x6e4] sm:$0xf] %vm7406_vm3, %v9454_v6  ;;  %v5034_v13 = vmax.f32 %v3552_v7, 0.0  ;;  %v3563_v15 = vadd.f32 %v12164_v22, %v9978_v11  ;;  %v4587_v16 = vadd.f32 %v12164_v22, %v10234_v12 }
 0x256   : > { %v5290_v14 = vmax.f32 %v4576_v8, 0.0  ;;  %v9203_v17 = vpack.c.bf16 %v5036_v9, %v5036_v9  ;;  %v9459_v18 = vpack.c.bf16 %v5292_v10, %v5292_v10  ;;  %v3554_v19 = vpop.f32.mrf.mxu0  ;;  %v4578_v20 = vpop.f32.mrf.mxu1 }
 0x257   : > { %v9201_v21 = vpack.c.bf16 %v5034_v13, %v5034_v13  ;;  %v5037_v23 = vmax.f32 %v3563_v15, 0.0  ;;  %v5293_v24 = vmax.f32 %v4587_v16, 0.0  ;;  %v3555_v25 = vadd.f32 %v12164_v22, %v3554_v19 }
 0x258   : > { %v9457_v62 = vpack.c.bf16 %v5290_v14, %v5290_v14  ;;  %7597 = vst.msk [vmem:[%s10850_s27 + $0x2f8] sm:$0xf] %vm7406_vm3, %v9203_v17  ;;  %7853 = vst.msk [vmem:[%s10850_s27 + $0x6f8] sm:$0xf] %vm7406_vm3, %v9459_v18  ;;  %v4579_v26 = vadd.f32 %v12164_v22, %v4578_v20  ;;  %v9981_v27 = vpop.f32.mrf.mxu0  ;;  %v10237_v28 = vpop.f32.mrf.mxu1 }
 0x259   : > { %7595 = vst.msk [vmem:[%s10850_s27 + $0x2f0] sm:$0xf] %vm7406_vm3, %v9201_v21  ;;  %v9204_v29 = vpack.c.bf16 %v5037_v23, %v5037_v23  ;;  %v9460_v30 = vpack.c.bf16 %v5293_v24, %v5293_v24  ;;  %v3576_v31 = vadd.f32 %v12164_v22, %v9981_v27  ;;  %v4600_v32 = vadd.f32 %v12164_v22, %v10237_v28 }
 0x25a   : > { %7851 = vst.msk [vmem:[%s10850_s27 + $0x6f0] sm:$0xf] %vm7406_vm3, %v9457_v62  ;;  %v5035_v33 = vmax.f32 %v3555_v25, 0.0  ;;  %v5291_v34 = vmax.f32 %v4579_v26, 0.0  ;;  %v3567_v35 = vpop.f32.mrf.mxu0  ;;  %v4591_v36 = vpop.f32.mrf.mxu1 }
 0x25b   : > { %7598 = vst.msk [vmem:[%s10850_s27 + $0x2fc] sm:$0xf] %vm7406_vm3, %v9204_v29  ;;  %7854 = vst.msk [vmem:[%s10850_s27 + $0x6fc] sm:$0xf] %vm7406_vm3, %v9460_v30  ;;  %v5040_v37 = vmax.f32 %v3576_v31, 0.0  ;;  %v5296_v38 = vmax.f32 %v4600_v32, 0.0  ;;  %v3568_v39 = vadd.f32 %v12164_v22, %v3567_v35  ;;  %v4592_v40 = vadd.f32 %v12164_v22, %v4591_v36 }
 0x25c   : > { %v9202_v41 = vpack.c.bf16 %v5035_v33, %v5035_v33  ;;  %v9458_v42 = vpack.c.bf16 %v5291_v34, %v5291_v34  ;;  %v9982_v43 = vpop.f32.mrf.mxu0  ;;  %v10238_v45 = vpop.f32.mrf.mxu1 }
 0x25d   : > { %v9207_v46 = vpack.c.bf16 %v5040_v37, %v5040_v37  ;;  %v9463_v47 = vpack.c.bf16 %v5296_v38, %v5296_v38  ;;  %v5038_v48 = vmax.f32 %v3568_v39, 0.0  ;;  %v5294_v49 = vmax.f32 %v4592_v40, 0.0 }
 0x25e   : > { %7596 = vst.msk [vmem:[%s10850_s27 + $0x2f4] sm:$0xf] %vm7406_vm3, %v9202_v41  ;;  %7852 = vst.msk [vmem:[%s10850_s27 + $0x6f4] sm:$0xf] %vm7406_vm3, %v9458_v42  ;;  %v3579_v50 = vadd.f32 %v12164_v22, %v9982_v43  ;;  %v4603_v51 = vadd.f32 %v12164_v22, %v10238_v45  ;;  %v3570_v44 = vpop.f32.mrf.mxu0  ;;  %v4594_v53 = vpop.f32.mrf.mxu1 }
 0x25f   : > { %7601 = vst.msk [vmem:[%s10850_s27 + $0x308] sm:$0xf] %vm7406_vm3, %v9207_v46  ;;  %7857 = vst.msk [vmem:[%s10850_s27 + $0x708] sm:$0xf] %vm7406_vm3, %v9463_v47  ;;  %v9205_v54 = vpack.c.bf16 %v5038_v48, %v5038_v48  ;;  %v9461_v55 = vpack.c.bf16 %v5294_v49, %v5294_v49  ;;  %v3571_v56 = vadd.f32 %v12164_v22, %v3570_v44 }
 0x260   : > { %v4595_v57 = vadd.f32 %v12164_v22, %v4594_v53  ;;  %v5041_v58 = vmax.f32 %v3579_v50, 0.0  ;;  %v5297_v59 = vmax.f32 %v4603_v51, 0.0  ;;  %v9985_v60 = vpop.f32.mrf.mxu0  ;;  %v10241_v61 = vpop.f32.mrf.mxu1 }
 0x261   : > { %7599 = vst.msk [vmem:[%s10850_s27 + $0x300] sm:$0xf] %vm7406_vm3, %v9205_v54  ;;  %7855 = vst.msk [vmem:[%s10850_s27 + $0x700] sm:$0xf] %vm7406_vm3, %v9461_v55  ;;  %v5039_v52 = vmax.f32 %v3571_v56, 0.0  ;;  %v3592_v0 = vadd.f32 %v12164_v22, %v9985_v60  ;;  %v4616_v1 = vadd.f32 %v12164_v22, %v10241_v61 }
 0x262   : > { %v5295_v63 = vmax.f32 %v4595_v57, 0.0  ;;  %v9208_v2 = vpack.c.bf16 %v5041_v58, %v5041_v58  ;;  %v9464_v3 = vpack.c.bf16 %v5297_v59, %v5297_v59  ;;  %v3583_v4 = vpop.f32.mrf.mxu0  ;;  %v4607_v5 = vpop.f32.mrf.mxu1 }
 0x263   : > { %v9206_v6 = vpack.c.bf16 %v5039_v52, %v5039_v52  ;;  %v5044_v8 = vmax.f32 %v3592_v0, 0.0  ;;  %v5300_v9 = vmax.f32 %v4616_v1, 0.0  ;;  %v3584_v10 = vadd.f32 %v12164_v22, %v3583_v4 }
 0x264   : > { %v9462_v7 = vpack.c.bf16 %v5295_v63, %v5295_v63  ;;  %7602 = vst.msk [vmem:[%s10850_s27 + $0x30c] sm:$0xf] %vm7406_vm3, %v9208_v2  ;;  %7858 = vst.msk [vmem:[%s10850_s27 + $0x70c] sm:$0xf] %vm7406_vm3, %v9464_v3  ;;  %v4608_v11 = vadd.f32 %v12164_v22, %v4607_v5  ;;  %v9986_v12 = vpop.f32.mrf.mxu0  ;;  %v10242_v13 = vpop.f32.mrf.mxu1 }
 0x265   : > { %7600 = vst.msk [vmem:[%s10850_s27 + $0x304] sm:$0xf] %vm7406_vm3, %v9206_v6  ;;  %v9211_v14 = vpack.c.bf16 %v5044_v8, %v5044_v8  ;;  %v9467_v15 = vpack.c.bf16 %v5300_v9, %v5300_v9  ;;  %v3595_v16 = vadd.f32 %v12164_v22, %v9986_v12  ;;  %v4619_v17 = vadd.f32 %v12164_v22, %v10242_v13 }
 0x266   : > { %7856 = vst.msk [vmem:[%s10850_s27 + $0x704] sm:$0xf] %vm7406_vm3, %v9462_v7  ;;  %v5042_v18 = vmax.f32 %v3584_v10, 0.0  ;;  %v5298_v19 = vmax.f32 %v4608_v11, 0.0  ;;  %v3586_v20 = vpop.f32.mrf.mxu0  ;;  %v4610_v21 = vpop.f32.mrf.mxu1 }
 0x267   : > { %7605 = vst.msk [vmem:[%s10850_s27 + $0x318] sm:$0xf] %vm7406_vm3, %v9211_v14  ;;  %7861 = vst.msk [vmem:[%s10850_s27 + $0x718] sm:$0xf] %vm7406_vm3, %v9467_v15  ;;  %v5045_v62 = vmax.f32 %v3595_v16, 0.0  ;;  %v5301_v23 = vmax.f32 %v4619_v17, 0.0  ;;  %v3587_v24 = vadd.f32 %v12164_v22, %v3586_v20  ;;  %v4611_v25 = vadd.f32 %v12164_v22, %v4610_v21 }
 0x268   : > { %v9209_v26 = vpack.c.bf16 %v5042_v18, %v5042_v18  ;;  %v9465_v27 = vpack.c.bf16 %v5298_v19, %v5298_v19  ;;  %v9989_v28 = vpop.f32.mrf.mxu0  ;;  %v10245_v29 = vpop.f32.mrf.mxu1 }
 0x269   : > { %v9212_v30 = vpack.c.bf16 %v5045_v62, %v5045_v62  ;;  %v9468_v31 = vpack.c.bf16 %v5301_v23, %v5301_v23  ;;  %v5043_v32 = vmax.f32 %v3587_v24, 0.0  ;;  %v5299_v33 = vmax.f32 %v4611_v25, 0.0 }
 0x26a   : > { %7603 = vst.msk [vmem:[%s10850_s27 + $0x310] sm:$0xf] %vm7406_vm3, %v9209_v26  ;;  %7859 = vst.msk [vmem:[%s10850_s27 + $0x710] sm:$0xf] %vm7406_vm3, %v9465_v27  ;;  %v3608_v34 = vadd.f32 %v12164_v22, %v9989_v28  ;;  %v4632_v35 = vadd.f32 %v12164_v22, %v10245_v29  ;;  %v3599_v36 = vpop.f32.mrf.mxu0  ;;  %v4623_v37 = vpop.f32.mrf.mxu1 }
 0x26b   : > { %7606 = vst.msk [vmem:[%s10850_s27 + $0x31c] sm:$0xf] %vm7406_vm3, %v9212_v30  ;;  %7862 = vst.msk [vmem:[%s10850_s27 + $0x71c] sm:$0xf] %vm7406_vm3, %v9468_v31  ;;  %v9210_v38 = vpack.c.bf16 %v5043_v32, %v5043_v32  ;;  %v9466_v39 = vpack.c.bf16 %v5299_v33, %v5299_v33  ;;  %v3600_v40 = vadd.f32 %v12164_v22, %v3599_v36 }
 0x26c   : > { %v4624_v41 = vadd.f32 %v12164_v22, %v4623_v37  ;;  %v5048_v42 = vmax.f32 %v3608_v34, 0.0  ;;  %v5304_v43 = vmax.f32 %v4632_v35, 0.0  ;;  %v9990_v45 = vpop.f32.mrf.mxu0  ;;  %v10246_v46 = vpop.f32.mrf.mxu1 }
 0x26d   : > { %7604 = vst.msk [vmem:[%s10850_s27 + $0x314] sm:$0xf] %vm7406_vm3, %v9210_v38  ;;  %7860 = vst.msk [vmem:[%s10850_s27 + $0x714] sm:$0xf] %vm7406_vm3, %v9466_v39  ;;  %v5046_v47 = vmax.f32 %v3600_v40, 0.0  ;;  %v3611_v49 = vadd.f32 %v12164_v22, %v9990_v45  ;;  %v4635_v50 = vadd.f32 %v12164_v22, %v10246_v46 }
 0x26e   : > { %v5302_v48 = vmax.f32 %v4624_v41, 0.0  ;;  %v9215_v51 = vpack.c.bf16 %v5048_v42, %v5048_v42  ;;  %v9471_v44 = vpack.c.bf16 %v5304_v43, %v5304_v43  ;;  %v3602_v53 = vpop.f32.mrf.mxu0  ;;  %v4626_v54 = vpop.f32.mrf.mxu1 }
 0x26f   : > { %v9213_v55 = vpack.c.bf16 %v5046_v47, %v5046_v47  ;;  %v5049_v57 = vmax.f32 %v3611_v49, 0.0  ;;  %v5305_v58 = vmax.f32 %v4635_v50, 0.0  ;;  %v3603_v59 = vadd.f32 %v12164_v22, %v3602_v53 }
 0x270   : > { %v9469_v56 = vpack.c.bf16 %v5302_v48, %v5302_v48  ;;  %7609 = vst.msk [vmem:[%s10850_s27 + $0x328] sm:$0xf] %vm7406_vm3, %v9215_v51  ;;  %7865 = vst.msk [vmem:[%s10850_s27 + $0x728] sm:$0xf] %vm7406_vm3, %v9471_v44  ;;  %v4627_v60 = vadd.f32 %v12164_v22, %v4626_v54  ;;  %v9993_v61 = vpop.f32.mrf.mxu0  ;;  %v10249_v52 = vpop.f32.mrf.mxu1 }
 0x271   : > { %7607 = vst.msk [vmem:[%s10850_s27 + $0x320] sm:$0xf] %vm7406_vm3, %v9213_v55  ;;  %v9216_v63 = vpack.c.bf16 %v5049_v57, %v5049_v57  ;;  %v9472_v0 = vpack.c.bf16 %v5305_v58, %v5305_v58  ;;  %v3624_v1 = vadd.f32 %v12164_v22, %v9993_v61  ;;  %v4648_v2 = vadd.f32 %v12164_v22, %v10249_v52 }
 0x272   : > { %7863 = vst.msk [vmem:[%s10850_s27 + $0x720] sm:$0xf] %vm7406_vm3, %v9469_v56  ;;  %v5047_v3 = vmax.f32 %v3603_v59, 0.0  ;;  %v5303_v4 = vmax.f32 %v4627_v60, 0.0  ;;  %v3615_v5 = vpop.f32.mrf.mxu0  ;;  %v4639_v6 = vpop.f32.mrf.mxu1 }
 0x273   : > { %7610 = vst.msk [vmem:[%s10850_s27 + $0x32c] sm:$0xf] %vm7406_vm3, %v9216_v63  ;;  %7866 = vst.msk [vmem:[%s10850_s27 + $0x72c] sm:$0xf] %vm7406_vm3, %v9472_v0  ;;  %v5052_v7 = vmax.f32 %v3624_v1, 0.0  ;;  %v5308_v8 = vmax.f32 %v4648_v2, 0.0  ;;  %v3616_v9 = vadd.f32 %v12164_v22, %v3615_v5  ;;  %v4640_v10 = vadd.f32 %v12164_v22, %v4639_v6 }
 0x274   : > { %v9214_v11 = vpack.c.bf16 %v5047_v3, %v5047_v3  ;;  %v9470_v12 = vpack.c.bf16 %v5303_v4, %v5303_v4  ;;  %v9994_v13 = vpop.f32.mrf.mxu0  ;;  %v10250_v14 = vpop.f32.mrf.mxu1 }
 0x275   : > { %v9219_v15 = vpack.c.bf16 %v5052_v7, %v5052_v7  ;;  %v9475_v16 = vpack.c.bf16 %v5308_v8, %v5308_v8  ;;  %v5050_v17 = vmax.f32 %v3616_v9, 0.0  ;;  %v5306_v18 = vmax.f32 %v4640_v10, 0.0 }
 0x276   : > { %7608 = vst.msk [vmem:[%s10850_s27 + $0x324] sm:$0xf] %vm7406_vm3, %v9214_v11  ;;  %7864 = vst.msk [vmem:[%s10850_s27 + $0x724] sm:$0xf] %vm7406_vm3, %v9470_v12  ;;  %v3627_v19 = vadd.f32 %v12164_v22, %v9994_v13  ;;  %v4651_v20 = vadd.f32 %v12164_v22, %v10250_v14  ;;  %v3618_v21 = vpop.f32.mrf.mxu0  ;;  %v4642_v62 = vpop.f32.mrf.mxu1 }
 0x277   : > { %7613 = vst.msk [vmem:[%s10850_s27 + $0x338] sm:$0xf] %vm7406_vm3, %v9219_v15  ;;  %7869 = vst.msk [vmem:[%s10850_s27 + $0x738] sm:$0xf] %vm7406_vm3, %v9475_v16  ;;  %v9217_v23 = vpack.c.bf16 %v5050_v17, %v5050_v17  ;;  %v9473_v24 = vpack.c.bf16 %v5306_v18, %v5306_v18  ;;  %v3619_v25 = vadd.f32 %v12164_v22, %v3618_v21 }
 0x278   : > { %v4643_v26 = vadd.f32 %v12164_v22, %v4642_v62  ;;  %v5053_v27 = vmax.f32 %v3627_v19, 0.0  ;;  %v5309_v28 = vmax.f32 %v4651_v20, 0.0  ;;  %v9997_v29 = vpop.f32.mrf.mxu0  ;;  %v10253_v30 = vpop.f32.mrf.mxu1 }
 0x279   : > { %7611 = vst.msk [vmem:[%s10850_s27 + $0x330] sm:$0xf] %vm7406_vm3, %v9217_v23  ;;  %7867 = vst.msk [vmem:[%s10850_s27 + $0x730] sm:$0xf] %vm7406_vm3, %v9473_v24  ;;  %v5051_v31 = vmax.f32 %v3619_v25, 0.0  ;;  %v3640_v33 = vadd.f32 %v12164_v22, %v9997_v29  ;;  %v4664_v34 = vadd.f32 %v12164_v22, %v10253_v30 }
 0x27a   : > { %v5307_v32 = vmax.f32 %v4643_v26, 0.0  ;;  %v9220_v35 = vpack.c.bf16 %v5053_v27, %v5053_v27  ;;  %v9476_v36 = vpack.c.bf16 %v5309_v28, %v5309_v28  ;;  %v3631_v37 = vpop.f32.mrf.mxu0  ;;  %v4655_v38 = vpop.f32.mrf.mxu1 }
 0x27b   : > { %v9218_v39 = vpack.c.bf16 %v5051_v31, %v5051_v31  ;;  %v5056_v41 = vmax.f32 %v3640_v33, 0.0  ;;  %v5312_v42 = vmax.f32 %v4664_v34, 0.0  ;;  %v3632_v43 = vadd.f32 %v12164_v22, %v3631_v37 }
 0x27c   : > { %v9474_v40 = vpack.c.bf16 %v5307_v32, %v5307_v32  ;;  %7614 = vst.msk [vmem:[%s10850_s27 + $0x33c] sm:$0xf] %vm7406_vm3, %v9220_v35  ;;  %7870 = vst.msk [vmem:[%s10850_s27 + $0x73c] sm:$0xf] %vm7406_vm3, %v9476_v36  ;;  %v4656_v45 = vadd.f32 %v12164_v22, %v4655_v38  ;;  %v9998_v46 = vpop.f32.mrf.mxu0  ;;  %v10254_v47 = vpop.f32.mrf.mxu1 }
 0x27d   : > { %7612 = vst.msk [vmem:[%s10850_s27 + $0x334] sm:$0xf] %vm7406_vm3, %v9218_v39  ;;  %v9223_v48 = vpack.c.bf16 %v5056_v41, %v5056_v41  ;;  %v9479_v49 = vpack.c.bf16 %v5312_v42, %v5312_v42  ;;  %v3643_v50 = vadd.f32 %v12164_v22, %v9998_v46  ;;  %v4667_v51 = vadd.f32 %v12164_v22, %v10254_v47 }
 0x27e   : > { %7868 = vst.msk [vmem:[%s10850_s27 + $0x734] sm:$0xf] %vm7406_vm3, %v9474_v40  ;;  %v5054_v44 = vmax.f32 %v3632_v43, 0.0  ;;  %v5310_v53 = vmax.f32 %v4656_v45, 0.0  ;;  %v3634_v54 = vpop.f32.mrf.mxu0  ;;  %v4658_v55 = vpop.f32.mrf.mxu1 }
 0x27f   : > { %7617 = vst.msk [vmem:[%s10850_s27 + $0x348] sm:$0xf] %vm7406_vm3, %v9223_v48  ;;  %7873 = vst.msk [vmem:[%s10850_s27 + $0x748] sm:$0xf] %vm7406_vm3, %v9479_v49  ;;  %v5057_v56 = vmax.f32 %v3643_v50, 0.0  ;;  %v5313_v57 = vmax.f32 %v4667_v51, 0.0  ;;  %v3635_v58 = vadd.f32 %v12164_v22, %v3634_v54  ;;  %v4659_v59 = vadd.f32 %v12164_v22, %v4658_v55 }
 0x280   : > { %v9221_v60 = vpack.c.bf16 %v5054_v44, %v5054_v44  ;;  %v9477_v61 = vpack.c.bf16 %v5310_v53, %v5310_v53  ;;  %v10001_v52 = vpop.f32.mrf.mxu0  ;;  %v10257_v63 = vpop.f32.mrf.mxu1 }
 0x281   : > { %v9224_v0 = vpack.c.bf16 %v5057_v56, %v5057_v56  ;;  %v9480_v1 = vpack.c.bf16 %v5313_v57, %v5313_v57  ;;  %v5055_v2 = vmax.f32 %v3635_v58, 0.0  ;;  %v5311_v3 = vmax.f32 %v4659_v59, 0.0  ;;  %v12481_v59 = vld [vmem:[%s12718_s2] ss:$0 sm:$0xff] }
 0x282   : > { %7615 = vst.msk [vmem:[%s10850_s27 + $0x340] sm:$0xf] %vm7406_vm3, %v9221_v60  ;;  %7871 = vst.msk [vmem:[%s10850_s27 + $0x740] sm:$0xf] %vm7406_vm3, %v9477_v61  ;;  %v3656_v4 = vadd.f32 %v12164_v22, %v10001_v52  ;;  %v4680_v5 = vadd.f32 %v12164_v22, %v10257_v63  ;;  %v3647_v6 = vpop.f32.mrf.mxu0  ;;  %v4671_v7 = vpop.f32.mrf.mxu1 }
 0x283   : > { %7618 = vst.msk [vmem:[%s10850_s27 + $0x34c] sm:$0xf] %vm7406_vm3, %v9224_v0  ;;  %7874 = vst.msk [vmem:[%s10850_s27 + $0x74c] sm:$0xf] %vm7406_vm3, %v9480_v1  ;;  %v9222_v8 = vpack.c.bf16 %v5055_v2, %v5055_v2  ;;  %v9478_v9 = vpack.c.bf16 %v5311_v3, %v5311_v3  ;;  %v3648_v10 = vadd.f32 %v12164_v22, %v3647_v6 }
 0x284   : > { %v4672_v11 = vadd.f32 %v12164_v22, %v4671_v7  ;;  %v5060_v12 = vmax.f32 %v3656_v4, 0.0  ;;  %v5316_v13 = vmax.f32 %v4680_v5, 0.0  ;;  %v10002_v14 = vpop.f32.mrf.mxu0  ;;  %v10258_v15 = vpop.f32.mrf.mxu1 }
 0x285   : > { %7616 = vst.msk [vmem:[%s10850_s27 + $0x344] sm:$0xf] %vm7406_vm3, %v9222_v8  ;;  %7872 = vst.msk [vmem:[%s10850_s27 + $0x744] sm:$0xf] %vm7406_vm3, %v9478_v9  ;;  %v5058_v16 = vmax.f32 %v3648_v10, 0.0  ;;  %v3659_v18 = vadd.f32 %v12164_v22, %v10002_v14  ;;  %v4683_v19 = vadd.f32 %v12164_v22, %v10258_v15 }
 0x286   : > { %v5314_v17 = vmax.f32 %v4672_v11, 0.0  ;;  %v9227_v20 = vpack.c.bf16 %v5060_v12, %v5060_v12  ;;  %v9483_v21 = vpack.c.bf16 %v5316_v13, %v5316_v13  ;;  %v3650_v62 = vpop.f32.mrf.mxu0  ;;  %v4674_v23 = vpop.f32.mrf.mxu1 }
 0x287   : > { %v9225_v24 = vpack.c.bf16 %v5058_v16, %v5058_v16  ;;  %v5061_v26 = vmax.f32 %v3659_v18, 0.0  ;;  %v5317_v27 = vmax.f32 %v4683_v19, 0.0  ;;  %v3651_v28 = vadd.f32 %v12164_v22, %v3650_v62 }
 0x288   : > { %v9481_v25 = vpack.c.bf16 %v5314_v17, %v5314_v17  ;;  %7621 = vst.msk [vmem:[%s10850_s27 + $0x358] sm:$0xf] %vm7406_vm3, %v9227_v20  ;;  %7877 = vst.msk [vmem:[%s10850_s27 + $0x758] sm:$0xf] %vm7406_vm3, %v9483_v21  ;;  %v4675_v29 = vadd.f32 %v12164_v22, %v4674_v23  ;;  %v10005_v30 = vpop.f32.mrf.mxu0  ;;  %v10261_v31 = vpop.f32.mrf.mxu1 }
 0x289   : > { %7619 = vst.msk [vmem:[%s10850_s27 + $0x350] sm:$0xf] %vm7406_vm3, %v9225_v24  ;;  %v9228_v32 = vpack.c.bf16 %v5061_v26, %v5061_v26  ;;  %v9484_v33 = vpack.c.bf16 %v5317_v27, %v5317_v27  ;;  %v3672_v34 = vadd.f32 %v12164_v22, %v10005_v30  ;;  %v4696_v35 = vadd.f32 %v12164_v22, %v10261_v31 }
 0x28a   : > { %7875 = vst.msk [vmem:[%s10850_s27 + $0x750] sm:$0xf] %vm7406_vm3, %v9481_v25  ;;  %v5059_v36 = vmax.f32 %v3651_v28, 0.0  ;;  %v5315_v37 = vmax.f32 %v4675_v29, 0.0  ;;  %v3663_v38 = vpop.f32.mrf.mxu0  ;;  %v4687_v39 = vpop.f32.mrf.mxu1 }
 0x28b   : > { %7622 = vst.msk [vmem:[%s10850_s27 + $0x35c] sm:$0xf] %vm7406_vm3, %v9228_v32  ;;  %7878 = vst.msk [vmem:[%s10850_s27 + $0x75c] sm:$0xf] %vm7406_vm3, %v9484_v33  ;;  %v5064_v40 = vmax.f32 %v3672_v34, 0.0  ;;  %v5320_v41 = vmax.f32 %v4696_v35, 0.0  ;;  %v3664_v42 = vadd.f32 %v12164_v22, %v3663_v38  ;;  %v4688_v43 = vadd.f32 %v12164_v22, %v4687_v39 }
 0x28c   : > { %v9226_v45 = vpack.c.bf16 %v5059_v36, %v5059_v36  ;;  %v9482_v46 = vpack.c.bf16 %v5315_v37, %v5315_v37  ;;  %v10006_v47 = vpop.f32.mrf.mxu0  ;;  %v10262_v48 = vpop.f32.mrf.mxu1 }
 0x28d   : > { %v9231_v49 = vpack.c.bf16 %v5064_v40, %v5064_v40  ;;  %v9487_v50 = vpack.c.bf16 %v5320_v41, %v5320_v41  ;;  %v5062_v51 = vmax.f32 %v3664_v42, 0.0  ;;  %v5318_v44 = vmax.f32 %v4688_v43, 0.0 }
 0x28e   : > { %7620 = vst.msk [vmem:[%s10850_s27 + $0x354] sm:$0xf] %vm7406_vm3, %v9226_v45  ;;  %7876 = vst.msk [vmem:[%s10850_s27 + $0x754] sm:$0xf] %vm7406_vm3, %v9482_v46  ;;  %v3675_v53 = vadd.f32 %v12164_v22, %v10006_v47  ;;  %v4699_v54 = vadd.f32 %v12164_v22, %v10262_v48  ;;  %v3666_v55 = vpop.f32.mrf.mxu0  ;;  %v4690_v56 = vpop.f32.mrf.mxu1 }
 0x28f   : > { %7625 = vst.msk [vmem:[%s10850_s27 + $0x368] sm:$0xf] %vm7406_vm3, %v9231_v49  ;;  %7881 = vst.msk [vmem:[%s10850_s27 + $0x768] sm:$0xf] %vm7406_vm3, %v9487_v50  ;;  %v9229_v57 = vpack.c.bf16 %v5062_v51, %v5062_v51  ;;  %v9485_v58 = vpack.c.bf16 %v5318_v44, %v5318_v44  ;;  %v3667_v60 = vadd.f32 %v12481_v59, %v3666_v55 }
 0x290   : > { %v4691_v61 = vadd.f32 %v12481_v59, %v4690_v56  ;;  %v5065_v52 = vmax.f32 %v3675_v53, 0.0  ;;  %v5321_v63 = vmax.f32 %v4699_v54, 0.0  ;;  %v10009_v22 = vpop.f32.mrf.mxu0  ;;  %v10265_v0 = vpop.f32.mrf.mxu1 }
 0x291   : > { %7623 = vst.msk [vmem:[%s10850_s27 + $0x360] sm:$0xf] %vm7406_vm3, %v9229_v57  ;;  %7879 = vst.msk [vmem:[%s10850_s27 + $0x760] sm:$0xf] %vm7406_vm3, %v9485_v58  ;;  %v5063_v1 = vmax.f32 %v3667_v60, 0.0  ;;  %v3688_v3 = vadd.f32 %v12481_v59, %v10009_v22  ;;  %v4712_v4 = vadd.f32 %v12481_v59, %v10265_v0 }
 0x292   : > { %v5319_v2 = vmax.f32 %v4691_v61, 0.0  ;;  %v9232_v5 = vpack.c.bf16 %v5065_v52, %v5065_v52  ;;  %v9488_v6 = vpack.c.bf16 %v5321_v63, %v5321_v63  ;;  %v3679_v7 = vpop.f32.mrf.mxu0  ;;  %v4703_v8 = vpop.f32.mrf.mxu1 }
 0x293   : > { %v9230_v9 = vpack.c.bf16 %v5063_v1, %v5063_v1  ;;  %v5068_v11 = vmax.f32 %v3688_v3, 0.0  ;;  %v5324_v12 = vmax.f32 %v4712_v4, 0.0  ;;  %v3680_v13 = vadd.f32 %v12481_v59, %v3679_v7 }
 0x294   : > { %v9486_v10 = vpack.c.bf16 %v5319_v2, %v5319_v2  ;;  %7626 = vst.msk [vmem:[%s10850_s27 + $0x36c] sm:$0xf] %vm7406_vm3, %v9232_v5  ;;  %7882 = vst.msk [vmem:[%s10850_s27 + $0x76c] sm:$0xf] %vm7406_vm3, %v9488_v6  ;;  %v4704_v14 = vadd.f32 %v12481_v59, %v4703_v8  ;;  %v10010_v15 = vpop.f32.mrf.mxu0  ;;  %v10266_v16 = vpop.f32.mrf.mxu1 }
 0x295   : > { %7624 = vst.msk [vmem:[%s10850_s27 + $0x364] sm:$0xf] %vm7406_vm3, %v9230_v9  ;;  %v9235_v17 = vpack.c.bf16 %v5068_v11, %v5068_v11  ;;  %v9491_v18 = vpack.c.bf16 %v5324_v12, %v5324_v12  ;;  %v3691_v19 = vadd.f32 %v12481_v59, %v10010_v15  ;;  %v4715_v20 = vadd.f32 %v12481_v59, %v10266_v16 }
 0x296   : > { %7880 = vst.msk [vmem:[%s10850_s27 + $0x764] sm:$0xf] %vm7406_vm3, %v9486_v10  ;;  %v5066_v21 = vmax.f32 %v3680_v13, 0.0  ;;  %v5322_v62 = vmax.f32 %v4704_v14, 0.0  ;;  %v3682_v23 = vpop.f32.mrf.mxu0  ;;  %v4706_v24 = vpop.f32.mrf.mxu1 }
 0x297   : > { %7629 = vst.msk [vmem:[%s10850_s27 + $0x378] sm:$0xf] %vm7406_vm3, %v9235_v17  ;;  %7885 = vst.msk [vmem:[%s10850_s27 + $0x778] sm:$0xf] %vm7406_vm3, %v9491_v18  ;;  %v5069_v25 = vmax.f32 %v3691_v19, 0.0  ;;  %v5325_v26 = vmax.f32 %v4715_v20, 0.0  ;;  %v3683_v27 = vadd.f32 %v12481_v59, %v3682_v23  ;;  %v4707_v28 = vadd.f32 %v12481_v59, %v4706_v24 }
 0x298   : > { %v9233_v29 = vpack.c.bf16 %v5066_v21, %v5066_v21  ;;  %v9489_v30 = vpack.c.bf16 %v5322_v62, %v5322_v62  ;;  %v10013_v31 = vpop.f32.mrf.mxu0  ;;  %v10269_v32 = vpop.f32.mrf.mxu1 }
 0x299   : > { %v9236_v33 = vpack.c.bf16 %v5069_v25, %v5069_v25  ;;  %v9492_v34 = vpack.c.bf16 %v5325_v26, %v5325_v26  ;;  %v5067_v35 = vmax.f32 %v3683_v27, 0.0  ;;  %v5323_v36 = vmax.f32 %v4707_v28, 0.0 }
 0x29a   : > { %7627 = vst.msk [vmem:[%s10850_s27 + $0x370] sm:$0xf] %vm7406_vm3, %v9233_v29  ;;  %7883 = vst.msk [vmem:[%s10850_s27 + $0x770] sm:$0xf] %vm7406_vm3, %v9489_v30  ;;  %v3704_v37 = vadd.f32 %v12481_v59, %v10013_v31  ;;  %v4728_v38 = vadd.f32 %v12481_v59, %v10269_v32  ;;  %v3695_v39 = vpop.f32.mrf.mxu0  ;;  %v4719_v40 = vpop.f32.mrf.mxu1 }
 0x29b   : > { %7630 = vst.msk [vmem:[%s10850_s27 + $0x37c] sm:$0xf] %vm7406_vm3, %v9236_v33  ;;  %7886 = vst.msk [vmem:[%s10850_s27 + $0x77c] sm:$0xf] %vm7406_vm3, %v9492_v34  ;;  %v9234_v41 = vpack.c.bf16 %v5067_v35, %v5067_v35  ;;  %v9490_v42 = vpack.c.bf16 %v5323_v36, %v5323_v36  ;;  %v3696_v43 = vadd.f32 %v12481_v59, %v3695_v39 }
 0x29c   : > { %v4720_v45 = vadd.f32 %v12481_v59, %v4719_v40  ;;  %v5072_v46 = vmax.f32 %v3704_v37, 0.0  ;;  %v5328_v47 = vmax.f32 %v4728_v38, 0.0  ;;  %v10014_v48 = vpop.f32.mrf.mxu0  ;;  %v10270_v49 = vpop.f32.mrf.mxu1 }
 0x29d   : > { %7628 = vst.msk [vmem:[%s10850_s27 + $0x374] sm:$0xf] %vm7406_vm3, %v9234_v41  ;;  %7884 = vst.msk [vmem:[%s10850_s27 + $0x774] sm:$0xf] %vm7406_vm3, %v9490_v42  ;;  %v5070_v50 = vmax.f32 %v3696_v43, 0.0  ;;  %v3707_v44 = vadd.f32 %v12481_v59, %v10014_v48  ;;  %v4731_v53 = vadd.f32 %v12481_v59, %v10270_v49 }
 0x29e   : > { %v5326_v51 = vmax.f32 %v4720_v45, 0.0  ;;  %v9239_v54 = vpack.c.bf16 %v5072_v46, %v5072_v46  ;;  %v9495_v55 = vpack.c.bf16 %v5328_v47, %v5328_v47  ;;  %v3698_v56 = vpop.f32.mrf.mxu0  ;;  %v4722_v57 = vpop.f32.mrf.mxu1 }
 0x29f   : > { %v9237_v58 = vpack.c.bf16 %v5070_v50, %v5070_v50  ;;  %v5073_v61 = vmax.f32 %v3707_v44, 0.0  ;;  %v5329_v52 = vmax.f32 %v4731_v53, 0.0  ;;  %v3699_v63 = vadd.f32 %v12481_v59, %v3698_v56 }
 0x2a0   : > { %v9493_v60 = vpack.c.bf16 %v5326_v51, %v5326_v51  ;;  %7633 = vst.msk [vmem:[%s10850_s27 + $0x388] sm:$0xf] %vm7406_vm3, %v9239_v54  ;;  %7889 = vst.msk [vmem:[%s10850_s27 + $0x788] sm:$0xf] %vm7406_vm3, %v9495_v55  ;;  %v4723_v22 = vadd.f32 %v12481_v59, %v4722_v57  ;;  %v10017_v0 = vpop.f32.mrf.mxu0  ;;  %v10273_v1 = vpop.f32.mrf.mxu1 }
 0x2a1   : > { %7631 = vst.msk [vmem:[%s10850_s27 + $0x380] sm:$0xf] %vm7406_vm3, %v9237_v58  ;;  %v9240_v2 = vpack.c.bf16 %v5073_v61, %v5073_v61  ;;  %v9496_v3 = vpack.c.bf16 %v5329_v52, %v5329_v52  ;;  %v3720_v4 = vadd.f32 %v12481_v59, %v10017_v0  ;;  %v4744_v5 = vadd.f32 %v12481_v59, %v10273_v1 }
 0x2a2   : > { %7887 = vst.msk [vmem:[%s10850_s27 + $0x780] sm:$0xf] %vm7406_vm3, %v9493_v60  ;;  %v5071_v6 = vmax.f32 %v3699_v63, 0.0  ;;  %v5327_v7 = vmax.f32 %v4723_v22, 0.0  ;;  %v3711_v8 = vpop.f32.mrf.mxu0  ;;  %v4735_v9 = vpop.f32.mrf.mxu1 }
 0x2a3   : > { %7634 = vst.msk [vmem:[%s10850_s27 + $0x38c] sm:$0xf] %vm7406_vm3, %v9240_v2  ;;  %7890 = vst.msk [vmem:[%s10850_s27 + $0x78c] sm:$0xf] %vm7406_vm3, %v9496_v3  ;;  %v5076_v10 = vmax.f32 %v3720_v4, 0.0  ;;  %v5332_v11 = vmax.f32 %v4744_v5, 0.0  ;;  %v3712_v12 = vadd.f32 %v12481_v59, %v3711_v8  ;;  %v4736_v13 = vadd.f32 %v12481_v59, %v4735_v9 }
 0x2a4   : > { %v9238_v14 = vpack.c.bf16 %v5071_v6, %v5071_v6  ;;  %v9494_v15 = vpack.c.bf16 %v5327_v7, %v5327_v7  ;;  %v10018_v16 = vpop.f32.mrf.mxu0  ;;  %v10274_v17 = vpop.f32.mrf.mxu1 }
 0x2a5   : > { %v9243_v18 = vpack.c.bf16 %v5076_v10, %v5076_v10  ;;  %v9499_v19 = vpack.c.bf16 %v5332_v11, %v5332_v11  ;;  %v5074_v20 = vmax.f32 %v3712_v12, 0.0  ;;  %v5330_v21 = vmax.f32 %v4736_v13, 0.0 }
 0x2a6   : > { %7632 = vst.msk [vmem:[%s10850_s27 + $0x384] sm:$0xf] %vm7406_vm3, %v9238_v14  ;;  %7888 = vst.msk [vmem:[%s10850_s27 + $0x784] sm:$0xf] %vm7406_vm3, %v9494_v15  ;;  %v3723_v62 = vadd.f32 %v12481_v59, %v10018_v16  ;;  %v4747_v23 = vadd.f32 %v12481_v59, %v10274_v17  ;;  %v3714_v24 = vpop.f32.mrf.mxu0  ;;  %v4738_v25 = vpop.f32.mrf.mxu1 }
 0x2a7   : > { %7637 = vst.msk [vmem:[%s10850_s27 + $0x398] sm:$0xf] %vm7406_vm3, %v9243_v18  ;;  %7893 = vst.msk [vmem:[%s10850_s27 + $0x798] sm:$0xf] %vm7406_vm3, %v9499_v19  ;;  %v9241_v26 = vpack.c.bf16 %v5074_v20, %v5074_v20  ;;  %v9497_v27 = vpack.c.bf16 %v5330_v21, %v5330_v21  ;;  %v3715_v28 = vadd.f32 %v12481_v59, %v3714_v24 }
 0x2a8   : > { %v4739_v29 = vadd.f32 %v12481_v59, %v4738_v25  ;;  %v5077_v30 = vmax.f32 %v3723_v62, 0.0  ;;  %v5333_v31 = vmax.f32 %v4747_v23, 0.0  ;;  %v10021_v32 = vpop.f32.mrf.mxu0  ;;  %v10277_v33 = vpop.f32.mrf.mxu1 }
 0x2a9   : > { %7635 = vst.msk [vmem:[%s10850_s27 + $0x390] sm:$0xf] %vm7406_vm3, %v9241_v26  ;;  %7891 = vst.msk [vmem:[%s10850_s27 + $0x790] sm:$0xf] %vm7406_vm3, %v9497_v27  ;;  %v5075_v34 = vmax.f32 %v3715_v28, 0.0  ;;  %v3736_v36 = vadd.f32 %v12481_v59, %v10021_v32  ;;  %v4760_v37 = vadd.f32 %v12481_v59, %v10277_v33 }
 0x2aa   : > { %v5331_v35 = vmax.f32 %v4739_v29, 0.0  ;;  %v9244_v38 = vpack.c.bf16 %v5077_v30, %v5077_v30  ;;  %v9500_v39 = vpack.c.bf16 %v5333_v31, %v5333_v31  ;;  %v3727_v40 = vpop.f32.mrf.mxu0  ;;  %v4751_v41 = vpop.f32.mrf.mxu1 }
 0x2ab   : > { %v9242_v42 = vpack.c.bf16 %v5075_v34, %v5075_v34  ;;  %v5080_v45 = vmax.f32 %v3736_v36, 0.0  ;;  %v5336_v46 = vmax.f32 %v4760_v37, 0.0  ;;  %v3728_v47 = vadd.f32 %v12481_v59, %v3727_v40 }
 0x2ac   : > { %v9498_v43 = vpack.c.bf16 %v5331_v35, %v5331_v35  ;;  %7638 = vst.msk [vmem:[%s10850_s27 + $0x39c] sm:$0xf] %vm7406_vm3, %v9244_v38  ;;  %7894 = vst.msk [vmem:[%s10850_s27 + $0x79c] sm:$0xf] %vm7406_vm3, %v9500_v39  ;;  %v4752_v48 = vadd.f32 %v12481_v59, %v4751_v41  ;;  %v10022_v49 = vpop.f32.mrf.mxu0  ;;  %v10278_v50 = vpop.f32.mrf.mxu1 }
 0x2ad   : > { %7636 = vst.msk [vmem:[%s10850_s27 + $0x394] sm:$0xf] %vm7406_vm3, %v9242_v42  ;;  %v9247_v51 = vpack.c.bf16 %v5080_v45, %v5080_v45  ;;  %v9503_v44 = vpack.c.bf16 %v5336_v46, %v5336_v46  ;;  %v3739_v53 = vadd.f32 %v12481_v59, %v10022_v49  ;;  %v4763_v54 = vadd.f32 %v12481_v59, %v10278_v50 }
 0x2ae   : > { %7892 = vst.msk [vmem:[%s10850_s27 + $0x794] sm:$0xf] %vm7406_vm3, %v9498_v43  ;;  %v5078_v55 = vmax.f32 %v3728_v47, 0.0  ;;  %v5334_v56 = vmax.f32 %v4752_v48, 0.0  ;;  %v3730_v57 = vpop.f32.mrf.mxu0  ;;  %v4754_v58 = vpop.f32.mrf.mxu1 }
 0x2af   : > { %7641 = vst.msk [vmem:[%s10850_s27 + $0x3a8] sm:$0xf] %vm7406_vm3, %v9247_v51  ;;  %7897 = vst.msk [vmem:[%s10850_s27 + $0x7a8] sm:$0xf] %vm7406_vm3, %v9503_v44  ;;  %v5081_v60 = vmax.f32 %v3739_v53, 0.0  ;;  %v5337_v61 = vmax.f32 %v4763_v54, 0.0  ;;  %v3731_v52 = vadd.f32 %v12481_v59, %v3730_v57  ;;  %v4755_v63 = vadd.f32 %v12481_v59, %v4754_v58 }
 0x2b0   : > { %v9245_v22 = vpack.c.bf16 %v5078_v55, %v5078_v55  ;;  %v9501_v0 = vpack.c.bf16 %v5334_v56, %v5334_v56  ;;  %v10025_v1 = vpop.f32.mrf.mxu0  ;;  %v10281_v2 = vpop.f32.mrf.mxu1 }
 0x2b1   : > { %v9248_v3 = vpack.c.bf16 %v5081_v60, %v5081_v60  ;;  %v9504_v4 = vpack.c.bf16 %v5337_v61, %v5337_v61  ;;  %v5079_v5 = vmax.f32 %v3731_v52, 0.0  ;;  %v5335_v6 = vmax.f32 %v4755_v63, 0.0 }
 0x2b2   : > { %7639 = vst.msk [vmem:[%s10850_s27 + $0x3a0] sm:$0xf] %vm7406_vm3, %v9245_v22  ;;  %7895 = vst.msk [vmem:[%s10850_s27 + $0x7a0] sm:$0xf] %vm7406_vm3, %v9501_v0  ;;  %v3752_v7 = vadd.f32 %v12481_v59, %v10025_v1  ;;  %v4776_v8 = vadd.f32 %v12481_v59, %v10281_v2  ;;  %v3743_v9 = vpop.f32.mrf.mxu0  ;;  %v4767_v10 = vpop.f32.mrf.mxu1 }
 0x2b3   : > { %7642 = vst.msk [vmem:[%s10850_s27 + $0x3ac] sm:$0xf] %vm7406_vm3, %v9248_v3  ;;  %7898 = vst.msk [vmem:[%s10850_s27 + $0x7ac] sm:$0xf] %vm7406_vm3, %v9504_v4  ;;  %v9246_v11 = vpack.c.bf16 %v5079_v5, %v5079_v5  ;;  %v9502_v12 = vpack.c.bf16 %v5335_v6, %v5335_v6  ;;  %v3744_v13 = vadd.f32 %v12481_v59, %v3743_v9 }
 0x2b4   : > { %v4768_v14 = vadd.f32 %v12481_v59, %v4767_v10  ;;  %v5084_v15 = vmax.f32 %v3752_v7, 0.0  ;;  %v5340_v16 = vmax.f32 %v4776_v8, 0.0  ;;  %v10026_v17 = vpop.f32.mrf.mxu0  ;;  %v10282_v18 = vpop.f32.mrf.mxu1 }
 0x2b5   : > { %7640 = vst.msk [vmem:[%s10850_s27 + $0x3a4] sm:$0xf] %vm7406_vm3, %v9246_v11  ;;  %7896 = vst.msk [vmem:[%s10850_s27 + $0x7a4] sm:$0xf] %vm7406_vm3, %v9502_v12  ;;  %v5082_v19 = vmax.f32 %v3744_v13, 0.0  ;;  %v3755_v21 = vadd.f32 %v12481_v59, %v10026_v17  ;;  %v4779_v62 = vadd.f32 %v12481_v59, %v10282_v18 }
 0x2b6   : > { %v5338_v20 = vmax.f32 %v4768_v14, 0.0  ;;  %v9251_v23 = vpack.c.bf16 %v5084_v15, %v5084_v15  ;;  %v9507_v24 = vpack.c.bf16 %v5340_v16, %v5340_v16  ;;  %v3746_v25 = vpop.f32.mrf.mxu0  ;;  %v4770_v26 = vpop.f32.mrf.mxu1 }
 0x2b7   : > { %v9249_v27 = vpack.c.bf16 %v5082_v19, %v5082_v19  ;;  %v5085_v29 = vmax.f32 %v3755_v21, 0.0  ;;  %v5341_v30 = vmax.f32 %v4779_v62, 0.0  ;;  %v3747_v31 = vadd.f32 %v12481_v59, %v3746_v25 }
 0x2b8   : > { %v9505_v28 = vpack.c.bf16 %v5338_v20, %v5338_v20  ;;  %7645 = vst.msk [vmem:[%s10850_s27 + $0x3b8] sm:$0xf] %vm7406_vm3, %v9251_v23  ;;  %7901 = vst.msk [vmem:[%s10850_s27 + $0x7b8] sm:$0xf] %vm7406_vm3, %v9507_v24  ;;  %v4771_v32 = vadd.f32 %v12481_v59, %v4770_v26  ;;  %v10029_v33 = vpop.f32.mrf.mxu0  ;;  %v10285_v34 = vpop.f32.mrf.mxu1 }
 0x2b9   : > { %7643 = vst.msk [vmem:[%s10850_s27 + $0x3b0] sm:$0xf] %vm7406_vm3, %v9249_v27  ;;  %v9252_v35 = vpack.c.bf16 %v5085_v29, %v5085_v29  ;;  %v9508_v36 = vpack.c.bf16 %v5341_v30, %v5341_v30  ;;  %v3768_v37 = vadd.f32 %v12481_v59, %v10029_v33  ;;  %v4792_v38 = vadd.f32 %v12481_v59, %v10285_v34 }
 0x2ba   : > { %7899 = vst.msk [vmem:[%s10850_s27 + $0x7b0] sm:$0xf] %vm7406_vm3, %v9505_v28  ;;  %v5083_v39 = vmax.f32 %v3747_v31, 0.0  ;;  %v5339_v40 = vmax.f32 %v4771_v32, 0.0  ;;  %v3759_v41 = vpop.f32.mrf.mxu0  ;;  %v4783_v42 = vpop.f32.mrf.mxu1 }
 0x2bb   : > { %7646 = vst.msk [vmem:[%s10850_s27 + $0x3bc] sm:$0xf] %vm7406_vm3, %v9252_v35  ;;  %7902 = vst.msk [vmem:[%s10850_s27 + $0x7bc] sm:$0xf] %vm7406_vm3, %v9508_v36  ;;  %v5088_v43 = vmax.f32 %v3768_v37, 0.0  ;;  %v5344_v45 = vmax.f32 %v4792_v38, 0.0  ;;  %v3760_v46 = vadd.f32 %v12481_v59, %v3759_v41  ;;  %v4784_v47 = vadd.f32 %v12481_v59, %v4783_v42 }
 0x2bc   : > { %v9250_v48 = vpack.c.bf16 %v5083_v39, %v5083_v39  ;;  %v9506_v49 = vpack.c.bf16 %v5339_v40, %v5339_v40  ;;  %v10030_v50 = vpop.f32.mrf.mxu0  ;;  %v10286_v51 = vpop.f32.mrf.mxu1 }
 0x2bd   : > { %v9255_v44 = vpack.c.bf16 %v5088_v43, %v5088_v43  ;;  %v9511_v53 = vpack.c.bf16 %v5344_v45, %v5344_v45  ;;  %v5086_v54 = vmax.f32 %v3760_v46, 0.0  ;;  %v5342_v55 = vmax.f32 %v4784_v47, 0.0 }
 0x2be   : > { %7644 = vst.msk [vmem:[%s10850_s27 + $0x3b4] sm:$0xf] %vm7406_vm3, %v9250_v48  ;;  %7900 = vst.msk [vmem:[%s10850_s27 + $0x7b4] sm:$0xf] %vm7406_vm3, %v9506_v49  ;;  %v3771_v56 = vadd.f32 %v12481_v59, %v10030_v50  ;;  %v4795_v57 = vadd.f32 %v12481_v59, %v10286_v51  ;;  %v3762_v58 = vpop.f32.mrf.mxu0  ;;  %v4786_v60 = vpop.f32.mrf.mxu1 }
 0x2bf   : > { %7649 = vst.msk [vmem:[%s10850_s27 + $0x3c8] sm:$0xf] %vm7406_vm3, %v9255_v44  ;;  %7905 = vst.msk [vmem:[%s10850_s27 + $0x7c8] sm:$0xf] %vm7406_vm3, %v9511_v53  ;;  %v9253_v61 = vpack.c.bf16 %v5086_v54, %v5086_v54  ;;  %v9509_v52 = vpack.c.bf16 %v5342_v55, %v5342_v55  ;;  %v3763_v63 = vadd.f32 %v12481_v59, %v3762_v58 }
 0x2c0   : > { %v4787_v22 = vadd.f32 %v12481_v59, %v4786_v60  ;;  %v5089_v0 = vmax.f32 %v3771_v56, 0.0  ;;  %v5345_v1 = vmax.f32 %v4795_v57, 0.0  ;;  %v10033_v2 = vpop.f32.mrf.mxu0  ;;  %v10289_v3 = vpop.f32.mrf.mxu1 }
 0x2c1   : > { %7647 = vst.msk [vmem:[%s10850_s27 + $0x3c0] sm:$0xf] %vm7406_vm3, %v9253_v61  ;;  %7903 = vst.msk [vmem:[%s10850_s27 + $0x7c0] sm:$0xf] %vm7406_vm3, %v9509_v52  ;;  %v5087_v4 = vmax.f32 %v3763_v63, 0.0  ;;  %v3784_v6 = vadd.f32 %v12481_v59, %v10033_v2  ;;  %v4808_v7 = vadd.f32 %v12481_v59, %v10289_v3 }
 0x2c2   : > { %v5343_v5 = vmax.f32 %v4787_v22, 0.0  ;;  %v9256_v8 = vpack.c.bf16 %v5089_v0, %v5089_v0  ;;  %v9512_v9 = vpack.c.bf16 %v5345_v1, %v5345_v1  ;;  %v3775_v10 = vpop.f32.mrf.mxu0  ;;  %v4799_v11 = vpop.f32.mrf.mxu1 }
 0x2c3   : > { %v9254_v12 = vpack.c.bf16 %v5087_v4, %v5087_v4  ;;  %v5092_v14 = vmax.f32 %v3784_v6, 0.0  ;;  %v5348_v15 = vmax.f32 %v4808_v7, 0.0  ;;  %v3776_v16 = vadd.f32 %v12481_v59, %v3775_v10 }
 0x2c4   : > { %v9510_v13 = vpack.c.bf16 %v5343_v5, %v5343_v5  ;;  %7650 = vst.msk [vmem:[%s10850_s27 + $0x3cc] sm:$0xf] %vm7406_vm3, %v9256_v8  ;;  %7906 = vst.msk [vmem:[%s10850_s27 + $0x7cc] sm:$0xf] %vm7406_vm3, %v9512_v9  ;;  %v4800_v17 = vadd.f32 %v12481_v59, %v4799_v11  ;;  %v10034_v18 = vpop.f32.mrf.mxu0  ;;  %v10290_v19 = vpop.f32.mrf.mxu1 }
 0x2c5   : > { %7648 = vst.msk [vmem:[%s10850_s27 + $0x3c4] sm:$0xf] %vm7406_vm3, %v9254_v12  ;;  %v9259_v20 = vpack.c.bf16 %v5092_v14, %v5092_v14  ;;  %v9515_v21 = vpack.c.bf16 %v5348_v15, %v5348_v15  ;;  %v3787_v62 = vadd.f32 %v12481_v59, %v10034_v18  ;;  %v4811_v23 = vadd.f32 %v12481_v59, %v10290_v19 }
 0x2c6   : > { %7904 = vst.msk [vmem:[%s10850_s27 + $0x7c4] sm:$0xf] %vm7406_vm3, %v9510_v13  ;;  %v5090_v24 = vmax.f32 %v3776_v16, 0.0  ;;  %v5346_v25 = vmax.f32 %v4800_v17, 0.0  ;;  %v3778_v26 = vpop.f32.mrf.mxu0  ;;  %v4802_v27 = vpop.f32.mrf.mxu1 }
 0x2c7   : > { %7653 = vst.msk [vmem:[%s10850_s27 + $0x3d8] sm:$0xf] %vm7406_vm3, %v9259_v20  ;;  %7909 = vst.msk [vmem:[%s10850_s27 + $0x7d8] sm:$0xf] %vm7406_vm3, %v9515_v21  ;;  %v5093_v28 = vmax.f32 %v3787_v62, 0.0  ;;  %v5349_v29 = vmax.f32 %v4811_v23, 0.0  ;;  %v3779_v30 = vadd.f32 %v12481_v59, %v3778_v26  ;;  %v4803_v31 = vadd.f32 %v12481_v59, %v4802_v27 }
 0x2c8   : > { %v9257_v32 = vpack.c.bf16 %v5090_v24, %v5090_v24  ;;  %v9513_v33 = vpack.c.bf16 %v5346_v25, %v5346_v25  ;;  %v10037_v34 = vpop.f32.mrf.mxu0  ;;  %v10293_v35 = vpop.f32.mrf.mxu1 }
 0x2c9   : > { %v9260_v36 = vpack.c.bf16 %v5093_v28, %v5093_v28  ;;  %v9516_v37 = vpack.c.bf16 %v5349_v29, %v5349_v29  ;;  %v5091_v38 = vmax.f32 %v3779_v30, 0.0  ;;  %v5347_v39 = vmax.f32 %v4803_v31, 0.0 }
 0x2ca   : > { %7651 = vst.msk [vmem:[%s10850_s27 + $0x3d0] sm:$0xf] %vm7406_vm3, %v9257_v32  ;;  %7907 = vst.msk [vmem:[%s10850_s27 + $0x7d0] sm:$0xf] %vm7406_vm3, %v9513_v33  ;;  %v3800_v40 = vadd.f32 %v12481_v59, %v10037_v34  ;;  %v4824_v41 = vadd.f32 %v12481_v59, %v10293_v35  ;;  %v3791_v42 = vpop.f32.mrf.mxu0  ;;  %v4815_v43 = vpop.f32.mrf.mxu1 }
 0x2cb   : > { %7654 = vst.msk [vmem:[%s10850_s27 + $0x3dc] sm:$0xf] %vm7406_vm3, %v9260_v36  ;;  %7910 = vst.msk [vmem:[%s10850_s27 + $0x7dc] sm:$0xf] %vm7406_vm3, %v9516_v37  ;;  %v9258_v45 = vpack.c.bf16 %v5091_v38, %v5091_v38  ;;  %v9514_v46 = vpack.c.bf16 %v5347_v39, %v5347_v39  ;;  %v3792_v47 = vadd.f32 %v12481_v59, %v3791_v42 }
 0x2cc   : > { %v4816_v48 = vadd.f32 %v12481_v59, %v4815_v43  ;;  %v5096_v49 = vmax.f32 %v3800_v40, 0.0  ;;  %v5352_v50 = vmax.f32 %v4824_v41, 0.0  ;;  %v10038_v51 = vpop.f32.mrf.mxu0  ;;  %v10294_v44 = vpop.f32.mrf.mxu1 }
 0x2cd   : > { %7652 = vst.msk [vmem:[%s10850_s27 + $0x3d4] sm:$0xf] %vm7406_vm3, %v9258_v45  ;;  %7908 = vst.msk [vmem:[%s10850_s27 + $0x7d4] sm:$0xf] %vm7406_vm3, %v9514_v46  ;;  %v5094_v53 = vmax.f32 %v3792_v47, 0.0  ;;  %v3803_v55 = vadd.f32 %v12481_v59, %v10038_v51  ;;  %v4827_v56 = vadd.f32 %v12481_v59, %v10294_v44 }
 0x2ce   : > { %v5350_v54 = vmax.f32 %v4816_v48, 0.0  ;;  %v9263_v57 = vpack.c.bf16 %v5096_v49, %v5096_v49  ;;  %v9519_v58 = vpack.c.bf16 %v5352_v50, %v5352_v50  ;;  %v3794_v60 = vpop.f32.mrf.mxu0  ;;  %v4818_v61 = vpop.f32.mrf.mxu1 }
 0x2cf   : > { %v9261_v52 = vpack.c.bf16 %v5094_v53, %v5094_v53  ;;  %v5097_v22 = vmax.f32 %v3803_v55, 0.0  ;;  %v5353_v0 = vmax.f32 %v4827_v56, 0.0  ;;  %v3795_v1 = vadd.f32 %v12481_v59, %v3794_v60 }
 0x2d0   : > { %v9517_v63 = vpack.c.bf16 %v5350_v54, %v5350_v54  ;;  %7657 = vst.msk [vmem:[%s10850_s27 + $0x3e8] sm:$0xf] %vm7406_vm3, %v9263_v57  ;;  %7913 = vst.msk [vmem:[%s10850_s27 + $0x7e8] sm:$0xf] %vm7406_vm3, %v9519_v58  ;;  %v4819_v2 = vadd.f32 %v12481_v59, %v4818_v61  ;;  %v10041_v3 = vpop.f32.mrf.mxu0  ;;  %v10297_v4 = vpop.f32.mrf.mxu1 }
 0x2d1   : > { %7655 = vst.msk [vmem:[%s10850_s27 + $0x3e0] sm:$0xf] %vm7406_vm3, %v9261_v52  ;;  %v9264_v5 = vpack.c.bf16 %v5097_v22, %v5097_v22  ;;  %v9520_v6 = vpack.c.bf16 %v5353_v0, %v5353_v0  ;;  %v3816_v7 = vadd.f32 %v12481_v59, %v10041_v3  ;;  %v4840_v8 = vadd.f32 %v12481_v59, %v10297_v4 }
 0x2d2   : > { %7911 = vst.msk [vmem:[%s10850_s27 + $0x7e0] sm:$0xf] %vm7406_vm3, %v9517_v63  ;;  %v5095_v9 = vmax.f32 %v3795_v1, 0.0  ;;  %v5351_v10 = vmax.f32 %v4819_v2, 0.0  ;;  %v3807_v11 = vpop.f32.mrf.mxu0  ;;  %v4831_v12 = vpop.f32.mrf.mxu1 }
 0x2d3   : > { %7658 = vst.msk [vmem:[%s10850_s27 + $0x3ec] sm:$0xf] %vm7406_vm3, %v9264_v5  ;;  %7914 = vst.msk [vmem:[%s10850_s27 + $0x7ec] sm:$0xf] %vm7406_vm3, %v9520_v6  ;;  %v5100_v13 = vmax.f32 %v3816_v7, 0.0  ;;  %v5356_v14 = vmax.f32 %v4840_v8, 0.0  ;;  %v3808_v15 = vadd.f32 %v12481_v59, %v3807_v11  ;;  %v4832_v16 = vadd.f32 %v12481_v59, %v4831_v12 }
 0x2d4   : > { %v9262_v17 = vpack.c.bf16 %v5095_v9, %v5095_v9  ;;  %v9518_v18 = vpack.c.bf16 %v5351_v10, %v5351_v10  ;;  %v10042_v19 = vpop.f32.mrf.mxu0  ;;  %v10298_v20 = vpop.f32.mrf.mxu1 }
 0x2d5   : > { %v9267_v21 = vpack.c.bf16 %v5100_v13, %v5100_v13  ;;  %v9523_v62 = vpack.c.bf16 %v5356_v14, %v5356_v14  ;;  %v5098_v23 = vmax.f32 %v3808_v15, 0.0  ;;  %v5354_v24 = vmax.f32 %v4832_v16, 0.0 }
 0x2d6   : > { %7656 = vst.msk [vmem:[%s10850_s27 + $0x3e4] sm:$0xf] %vm7406_vm3, %v9262_v17  ;;  %7912 = vst.msk [vmem:[%s10850_s27 + $0x7e4] sm:$0xf] %vm7406_vm3, %v9518_v18  ;;  %v3819_v25 = vadd.f32 %v12481_v59, %v10042_v19  ;;  %v4843_v26 = vadd.f32 %v12481_v59, %v10298_v20  ;;  %v3810_v27 = vpop.f32.mrf.mxu0  ;;  %v4834_v28 = vpop.f32.mrf.mxu1 }
 0x2d7   : > { %7661 = vst.msk [vmem:[%s10850_s27 + $0x3f8] sm:$0xf] %vm7406_vm3, %v9267_v21  ;;  %7917 = vst.msk [vmem:[%s10850_s27 + $0x7f8] sm:$0xf] %vm7406_vm3, %v9523_v62  ;;  %v9265_v29 = vpack.c.bf16 %v5098_v23, %v5098_v23  ;;  %v9521_v30 = vpack.c.bf16 %v5354_v24, %v5354_v24  ;;  %v3811_v31 = vadd.f32 %v12481_v59, %v3810_v27 }
 0x2d8   : > { %v4835_v32 = vadd.f32 %v12481_v59, %v4834_v28  ;;  %v5101_v33 = vmax.f32 %v3819_v25, 0.0  ;;  %v5357_v34 = vmax.f32 %v4843_v26, 0.0 }
 0x2d9   : > { %7659 = vst.msk [vmem:[%s10850_s27 + $0x3f0] sm:$0xf] %vm7406_vm3, %v9265_v29  ;;  %7915 = vst.msk [vmem:[%s10850_s27 + $0x7f0] sm:$0xf] %vm7406_vm3, %v9521_v30  ;;  %v5099_v35 = vmax.f32 %v3811_v31, 0.0 }
 0x2da   : > { %v5355_v36 = vmax.f32 %v4835_v32, 0.0  ;;  %v9268_v37 = vpack.c.bf16 %v5101_v33, %v5101_v33  ;;  %v9524_v38 = vpack.c.bf16 %v5357_v34, %v5357_v34 }
 0x2db   : > { %v9266_v39 = vpack.c.bf16 %v5099_v35, %v5099_v35 }
 0x2dc   : > { %v9522_v40 = vpack.c.bf16 %v5355_v36, %v5355_v36  ;;  %7662 = vst.msk [vmem:[%s10850_s27 + $0x3fc] sm:$0xf] %vm7406_vm3, %v9268_v37  ;;  %7918 = vst.msk [vmem:[%s10850_s27 + $0x7fc] sm:$0xf] %vm7406_vm3, %v9524_v38 }
 0x2dd   : > { %7660 = vst.msk [vmem:[%s10850_s27 + $0x3f4] sm:$0xf] %vm7406_vm3, %v9266_v39 }
 0x2de   : > { %7916 = vst.msk [vmem:[%s10850_s27 + $0x7f4] sm:$0xf] %vm7406_vm3, %v9522_v40 }
 0x2df PF: > { %s13_s12 = sadd.s32 1, %s10581_s12  }
 0x2e0   : > { %p10_p4 = scmp.ge.s32.totalorder %s13_s12, 4  }
 0x2e2   :  { %12 = sbr.rel (!%p10_p4) target bundleno = 1 (0x1), region = 62 }

// kernel: encoder_conv_only_forward.8
= control target key start
LH: loop header
LB: loop body
LE: loop exit
PB: predicated region body
PF: predicated region fallthrough
CT: control target
= control target key end

     0   :  { %s1904_s12 = smov 0   ;;  %s2292_s0 = inlined_call_operand.vmem [shape: bf16[1024,216], index: 0, kind: input, shape index: {}]   ;;  %s2293_s1 = inlined_call_operand.vmem [shape: bf16[216,16], index: 1, kind: input, shape index: {}]   ;;  %s2294_s2 = inlined_call_operand.vmem [shape: f32[1,16], index: 2, kind: input, shape index: {}]   ;;  %s2295_s3 = inlined_call_operand.vmem [shape: bf16[1024,16], index: 3, kind: output, shape index: {}]  }
   0x1 LB: > { %s1476_s13 = sadd.s32 4294967295, %s1881_s12   ;;  %p1480_p0 = scmp.ge.s32.totalorder %s1881_s12, 1  ;;  %s1881_s12 = sphi %s1904_s12, %s13_s12  }
   0x2   : > { %p139_p1 = scmp.lt.s32.totalorder %s1881_s12, 3 }
   0x4   : > { %p140_p2 = pnand %p1480_p0, %p139_p1 }
   0x5   : > { %s1481_s18 = sshll.u32 (!%p140_p2), %s1476_s13, 6 }
   0x6   : > { %143 = sbr.rel (%p140_p2) target bundleno = 392 (0x188), region = 32  ;;  %p165_p3 = scmp.lt.s32.totalorder (!%p140_p2), %s1481_s18, 127 }
   0xb   : > { %v1765_v0 = vld [vmem:[%s2293_s1 + $0x38] sm:$0xff]   ;;  %v1883_v1 = vmov 0   ;;  %v1766_v2 = vld [vmem:[%s2293_s1 + $0x30] sm:$0xff]   ;;  %s2297_s18 = smov (!%p165_p3, %s1481_s18), 127  ;;  %v1767_v3 = vld [vmem:[%s2293_s1 + $0x28] sm:$0xff]   ;;  %vm645_vm0 = vcmask 719872  }
   0xc   : > { %746 = vmatprep.subr.bf16.mxu0 %v1883_v1  ;;  %1728 = vmatprep.subr.bf16.mxu1 %v1883_v1  ;;  %s1663_s21 = sshll.u32 %s2297_s18, 3  ;;  %v1768_v4 = vld [vmem:[%s2293_s1 + $0x20] sm:$0xff]   ;;  %v1769_v5 = vld [vmem:[%s2293_s1 + $0x18] sm:$0xff]   ;;  %v1770_v8 = vld [vmem:[%s2293_s1 + $0x10] sm:$0xff]   ;;  %vm742_vm1 = vcmask 1043456   ;;  %s1485_s24 = sshll.u32 %s2297_s18, 2 }
   0xd   : > { %747 = vmatpush1.bf16.msra.mxu0 %v1765_v0  ;;  %1742 = vmatpush1.bf16.msra.mxu1 %v1765_v0  ;;  %s1938_s26 = scalar_lea.vmem %s2292_s0, %s1663_s21  ;;  %v1771_v9 = vld [vmem:[%s2293_s1 + $0x8] sm:$0xff]   ;;  %v1772_v10 = vld [vmem:[%s2293_s1] sm:$0xff]   ;;  %v1775_v14 = vld [vmem:[%s2293_s1 + $0x58] sm:$0xff]   ;;  %s2097_s27 = scalar_lea.vmem %s2295_s3, %s1485_s24  ;;  %vm1355_vm2 = vcmask 125952  }
   0xe   : > { %748 = vmatprep.subr.bf16.mxu0 %v1883_v1  ;;  %1729 = vmatprep.subr.bf16.mxu1 %v1883_v1  ;;  %v1781_v6 = vld [vmem:[%s1938_s26 + $0x4] ss:$8 sps:$4 sm:$0xff]   ;;  %v1773_v11 = vld [vmem:[%s2293_s1 + $0x68] ss:$0 sps:$4 sm:$0xff]   ;;  %v1776_v15 = vld [vmem:[%s2293_s1 + $0x50] sm:$0xff]  }
   0xf   : > { %1565 = vmatprep.mubr.msk.bf16.mxu0 %vm645_vm0, %v1781_v6  ;;  %v1784_v7 = vld [vmem:[%s1938_s26 + $0x104] ss:$8 sps:$4 sm:$0xff]   ;;  %v744_v12 = vsel %vm742_vm1, %v1773_v11, 0  ;;  %v1779_v18 = vld [vmem:[%s1938_s26] ss:$8 sps:$4 sm:$0xff]  }
  0x10   : > { %1581 = vmatprep.mubr.msk.bf16.mxu1 %vm645_vm0, %v1784_v7  ;;  %v1774_v13 = vld [vmem:[%s2293_s1 + $0x60] sm:$0xff]   ;;  %v1777_v16 = vld [vmem:[%s2293_s1 + $0x48] sm:$0xff]   ;;  %v1785_v20 = vld [vmem:[%s1938_s26 + $0x14] ss:$8 sps:$4 sm:$0xff]  }
  0x11   : > { %749 = vmatpush1.bf16.msra.mxu0 %v1766_v2  ;;  %1743 = vmatpush1.bf16.msra.mxu1 %v1766_v2  ;;  %v1778_v17 = vld [vmem:[%s2293_s1 + $0x40] sm:$0xff]   ;;  %v1787_v21 = vld [vmem:[%s1938_s26 + $0x114] ss:$8 sps:$4 sm:$0xff]   ;;  %v1789_v22 = vld [vmem:[%s1938_s26 + $0x10] ss:$8 sps:$4 sm:$0xff]  }
  0x12   : > { %750 = vmatprep.subr.bf16.mxu0 %v1883_v1  ;;  %1730 = vmatprep.subr.bf16.mxu1 %v1883_v1  ;;  %v1782_v19 = vld [vmem:[%s1938_s26 + $0x100] ss:$8 sps:$4 sm:$0xff]   ;;  %v1790_v23 = vld [vmem:[%s1938_s26 + $0x110] ss:$8 sps:$4 sm:$0xff]   ;;  %v1791_v24 = vld [vmem:[%s1938_s26 + $0x24] ss:$8 sps:$4 sm:$0xff]  }
  0x13   : > { %v1793_v25 = vld [vmem:[%s1938_s26 + $0x124] ss:$8 sps:$4 sm:$0xff]   ;;  %v1795_v26 = vld [vmem:[%s1938_s26 + $0x20] ss:$8 sps:$4 sm:$0xff]   ;;  %v1797_v28 = vld [vmem:[%s1938_s26 + $0x34] ss:$8 sps:$4 sm:$0xff]  }
  0x14   : > { %v1796_v27 = vld [vmem:[%s1938_s26 + $0x120] ss:$8 sps:$4 sm:$0xff]   ;;  %v1799_v29 = vld [vmem:[%s1938_s26 + $0x134] ss:$8 sps:$4 sm:$0xff]   ;;  %v1801_v30 = vld [vmem:[%s1938_s26 + $0x30] ss:$8 sps:$4 sm:$0xff]  }
  0x15   : > { %751 = vmatpush1.bf16.msra.mxu0 %v1767_v3  ;;  %1744 = vmatpush1.bf16.msra.mxu1 %v1767_v3  ;;  %v1802_v31 = vld [vmem:[%s1938_s26 + $0x130] ss:$8 sps:$4 sm:$0xff]   ;;  %v1803_v32 = vld [vmem:[%s1938_s26 + $0x44] ss:$8 sps:$4 sm:$0xff]   ;;  %v1807_v34 = vld [vmem:[%s1938_s26 + $0x40] ss:$8 sps:$4 sm:$0xff]  }
  0x16   : > { %752 = vmatprep.subr.bf16.mxu0 %v1883_v1  ;;  %1731 = vmatprep.subr.bf16.mxu1 %v1883_v1  ;;  %v1805_v33 = vld [vmem:[%s1938_s26 + $0x144] ss:$8 sps:$4 sm:$0xff]   ;;  %v1808_v35 = vld [vmem:[%s1938_s26 + $0x140] ss:$8 sps:$4 sm:$0xff]   ;;  %v1809_v36 = vld [vmem:[%s1938_s26 + $0x54] ss:$8 sps:$4 sm:$0xff]  }
  0x17   : > { %v1811_v37 = vld [vmem:[%s1938_s26 + $0x154] ss:$8 sps:$4 sm:$0xff]   ;;  %v1813_v38 = vld [vmem:[%s1938_s26 + $0x50] ss:$8 sps:$4 sm:$0xff]   ;;  %v1815_v40 = vld [vmem:[%s1938_s26 + $0x64] ss:$8 sps:$4 sm:$0xff]  }
  0x18   : > { %v1814_v39 = vld [vmem:[%s1938_s26 + $0x150] ss:$8 sps:$4 sm:$0xff]   ;;  %v1817_v41 = vld [vmem:[%s1938_s26 + $0x164] ss:$8 sps:$4 sm:$0xff]   ;;  %v1819_v42 = vld [vmem:[%s1938_s26 + $0x60] ss:$8 sps:$4 sm:$0xff]  }
  0x19   : > { %753 = vmatpush1.bf16.msra.mxu0 %v1768_v4  ;;  %1745 = vmatpush1.bf16.msra.mxu1 %v1768_v4  ;;  %v1820_v43 = vld [vmem:[%s1938_s26 + $0x160] ss:$8 sps:$4 sm:$0xff]   ;;  %v1821_v44 = vld [vmem:[%s1938_s26 + $0x74] ss:$8 sps:$4 sm:$0xff]   ;;  %v1825_v46 = vld [vmem:[%s1938_s26 + $0x70] ss:$8 sps:$4 sm:$0xff]  }
  0x1a   : > { %754 = vmatprep.subr.bf16.mxu0 %v1883_v1  ;;  %1732 = vmatprep.subr.bf16.mxu1 %v1883_v1  ;;  %v1823_v45 = vld [vmem:[%s1938_s26 + $0x174] ss:$8 sps:$4 sm:$0xff]   ;;  %v1826_v47 = vld [vmem:[%s1938_s26 + $0x170] ss:$8 sps:$4 sm:$0xff]   ;;  %v1827_v48 = vld [vmem:[%s1938_s26 + $0x84] ss:$8 sps:$4 sm:$0xff]  }
  0x1b   : > { %v1829_v49 = vld [vmem:[%s1938_s26 + $0x184] ss:$8 sps:$4 sm:$0xff]   ;;  %v1831_v50 = vld [vmem:[%s1938_s26 + $0x80] ss:$8 sps:$4 sm:$0xff]   ;;  %v1833_v52 = vld [vmem:[%s1938_s26 + $0x94] ss:$8 sps:$4 sm:$0xff]  }
  0x1c   : > { %v1832_v51 = vld [vmem:[%s1938_s26 + $0x180] ss:$8 sps:$4 sm:$0xff]   ;;  %v1835_v53 = vld [vmem:[%s1938_s26 + $0x194] ss:$8 sps:$4 sm:$0xff]   ;;  %v1837_v54 = vld [vmem:[%s1938_s26 + $0x90] ss:$8 sps:$4 sm:$0xff]  }
  0x1d   : > { %755 = vmatpush1.bf16.msra.mxu0 %v1769_v5  ;;  %1746 = vmatpush1.bf16.msra.mxu1 %v1769_v5  ;;  %v1838_v55 = vld [vmem:[%s1938_s26 + $0x190] ss:$8 sps:$4 sm:$0xff]   ;;  %v1839_v56 = vld [vmem:[%s1938_s26 + $0xa4] ss:$8 sps:$4 sm:$0xff]   ;;  %v1843_v58 = vld [vmem:[%s1938_s26 + $0xa0] ss:$8 sps:$4 sm:$0xff]  }
  0x1e   : > { %756 = vmatprep.subr.bf16.mxu0 %v1883_v1  ;;  %1733 = vmatprep.subr.bf16.mxu1 %v1883_v1  ;;  %v1841_v57 = vld [vmem:[%s1938_s26 + $0x1a4] ss:$8 sps:$4 sm:$0xff]   ;;  %v1844_v59 = vld [vmem:[%s1938_s26 + $0x1a0] ss:$8 sps:$4 sm:$0xff]   ;;  %v1845_v60 = vld [vmem:[%s1938_s26 + $0xb4] ss:$8 sps:$4 sm:$0xff]  }
  0x1f   : > { %v1847_v61 = vld [vmem:[%s1938_s26 + $0x1b4] ss:$8 sps:$4 sm:$0xff]   ;;  %v1849_v62 = vld [vmem:[%s1938_s26 + $0xb0] ss:$8 sps:$4 sm:$0xff]   ;;  %v1851_v0 = vld [vmem:[%s1938_s26 + $0xc4] ss:$8 sps:$4 sm:$0xff]  }
  0x20   : > { %v1850_v63 = vld [vmem:[%s1938_s26 + $0x1b0] ss:$8 sps:$4 sm:$0xff]   ;;  %v1855_v2 = vld [vmem:[%s1938_s26 + $0xc0] ss:$8 sps:$4 sm:$0xff]   ;;  %v1857_v4 = vld [vmem:[%s1938_s26 + $0xd4] ss:$8 sps:$4 sm:$0xff]  }
  0x21   : > { %757 = vmatpush1.bf16.msra.mxu0 %v1770_v8  ;;  %1747 = vmatpush1.bf16.msra.mxu1 %v1770_v8  ;;  %v1856_v3 = vld [vmem:[%s1938_s26 + $0x1c0] ss:$8 sps:$4 sm:$0xff]   ;;  %v1859_v5 = vld [vmem:[%s1938_s26 + $0x1d4] ss:$8 sps:$4 sm:$0xff]   ;;  %v1861_v6 = vld [vmem:[%s1938_s26 + $0xd0] ss:$8 sps:$4 sm:$0xff]  }
  0x22   : > { %758 = vmatprep.subr.bf16.mxu0 %v1883_v1  ;;  %1734 = vmatprep.subr.bf16.mxu1 %v1883_v1  ;;  %v1862_v7 = vld [vmem:[%s1938_s26 + $0x1d0] ss:$8 sps:$4 sm:$0xff]   ;;  %v1863_v8 = vld [vmem:[%s1938_s26 + $0xe4] ss:$8 sps:$4 sm:$0xff]   ;;  %v1868_v11 = vld [vmem:[%s1938_s26 + $0x1e0] ss:$8 sps:$4 sm:$0xff]  }
  0x25   : > { %759 = vmatpush1.bf16.msra.mxu0 %v1771_v9  ;;  %1748 = vmatpush1.bf16.msra.mxu1 %v1771_v9  ;;  %v1865_v9 = vld [vmem:[%s1938_s26 + $0x1e4] ss:$8 sps:$4 sm:$0xff]  }
  0x26   : > { %760 = vmatprep.subr.bf16.mxu0 %v1883_v1  ;;  %1735 = vmatprep.subr.bf16.mxu1 %v1883_v1 }
  0x29   : > { %761 = vmatpush1.bf16.msra.mxu0 %v1772_v10  ;;  %1749 = vmatpush1.bf16.msra.mxu1 %v1772_v10  ;;  %v1867_v10 = vld [vmem:[%s1938_s26 + $0xe0] ss:$8 sps:$4 sm:$0xff]  }
  0x2a   : > { %766 = vmatprep.subr.bf16.mxu0 %v1883_v1  ;;  %1736 = vmatprep.subr.bf16.mxu1 %v1883_v1 }
  0x2d   : > { %767 = vmatpush2.bf16.msra.mxu0 %v744_v12  ;;  %1750 = vmatpush2.bf16.msra.mxu1 %v744_v12  ;;  %v1869_v12 = vld [vmem:[%s1938_s26 + $0xf4] ss:$8 sps:$4 sm:$0xff]  }
  0x2e   : > { %768 = vmatprep.subr.bf16.mxu0 %v1883_v1  ;;  %1737 = vmatprep.subr.bf16.mxu1 %v1883_v1 }
  0x31   : > { %769 = vmatpush2.bf16.msra.mxu0 %v1774_v13  ;;  %1751 = vmatpush2.bf16.msra.mxu1 %v1774_v13  ;;  %v1871_v13 = vld [vmem:[%s1938_s26 + $0x1f4] ss:$8 sps:$4 sm:$0xff]  }
  0x32   : > { %770 = vmatprep.subr.bf16.mxu0 %v1883_v1  ;;  %1738 = vmatprep.subr.bf16.mxu1 %v1883_v1 }
  0x35   : > { %771 = vmatpush2.bf16.msra.mxu0 %v1775_v14  ;;  %1752 = vmatpush2.bf16.msra.mxu1 %v1775_v14  ;;  %v1873_v14 = vld [vmem:[%s1938_s26 + $0xf0] ss:$8 sps:$4 sm:$0xff]  }
  0x36   : > { %772 = vmatprep.subr.bf16.mxu0 %v1883_v1  ;;  %1739 = vmatprep.subr.bf16.mxu1 %v1883_v1 }
  0x39   : > { %773 = vmatpush2.bf16.msra.mxu0 %v1776_v15  ;;  %1753 = vmatpush2.bf16.msra.mxu1 %v1776_v15  ;;  %v1874_v15 = vld [vmem:[%s1938_s26 + $0x1f0] ss:$8 sps:$4 sm:$0xff]  }
  0x3a   : > { %774 = vmatprep.subr.bf16.mxu0 %v1883_v1  ;;  %1740 = vmatprep.subr.bf16.mxu1 %v1883_v1 }
  0x3d   : > { %775 = vmatpush2.bf16.msra.mxu0 %v1777_v16  ;;  %1754 = vmatpush2.bf16.msra.mxu1 %v1777_v16  ;;  %v2089_v16 = vld [vmem:[%s2294_s2] ss:$0 sm:$0xff] }
  0x3e   : > { %776 = vmatprep.subr.bf16.mxu0 %v1883_v1  ;;  %1741 = vmatprep.subr.bf16.mxu1 %v1883_v1  ;;  %v1853_v1 = vld [vmem:[%s1938_s26 + $0x1c4] ss:$8 sps:$4 sm:$0xff]  }
  0x41   : > { %777 = vmatpush2.bf16.msra.mxu0 %v1778_v17  ;;  %1755 = vmatpush2.bf16.msra.mxu1 %v1778_v17 }
  0x44   : > { %779 = vmatmul.mubr.bf16.vlgmr.msra.gmra.mxu0 %v1779_v18  ;;  %907 = vmatmul.mubr.bf16.vlgmr.msra.gmra.mxu1 %v1782_v19 }
  0x45   : > { %1566 = vmatprep.mubr.msk.bf16.mxu0 %vm645_vm0, %v1785_v20  ;;  %1582 = vmatprep.mubr.msk.bf16.mxu1 %vm645_vm0, %v1787_v21 }
  0x4c   : > { %787 = vmatmul.mubr.bf16.gmra.mxu0 %v1789_v22  ;;  %915 = vmatmul.mubr.bf16.gmra.mxu1 %v1790_v23 }
  0x4d   : > { %1567 = vmatprep.mubr.msk.bf16.mxu0 %vm645_vm0, %v1791_v24  ;;  %1583 = vmatprep.mubr.msk.bf16.mxu1 %vm645_vm0, %v1793_v25 }
  0x54   : > { %795 = vmatmul.mubr.bf16.gmra.mxu0 %v1795_v26  ;;  %923 = vmatmul.mubr.bf16.gmra.mxu1 %v1796_v27 }
  0x55   : > { %1568 = vmatprep.mubr.msk.bf16.mxu0 %vm645_vm0, %v1797_v28  ;;  %1584 = vmatprep.mubr.msk.bf16.mxu1 %vm645_vm0, %v1799_v29 }
  0x5c   : > { %803 = vmatmul.mubr.bf16.gmra.mxu0 %v1801_v30  ;;  %931 = vmatmul.mubr.bf16.gmra.mxu1 %v1802_v31 }
  0x5d   : > { %1569 = vmatprep.mubr.msk.bf16.mxu0 %vm645_vm0, %v1803_v32  ;;  %1585 = vmatprep.mubr.msk.bf16.mxu1 %vm645_vm0, %v1805_v33 }
  0x64   : > { %811 = vmatmul.mubr.bf16.gmra.mxu0 %v1807_v34  ;;  %939 = vmatmul.mubr.bf16.gmra.mxu1 %v1808_v35 }
  0x65   : > { %1570 = vmatprep.mubr.msk.bf16.mxu0 %vm645_vm0, %v1809_v36  ;;  %1586 = vmatprep.mubr.msk.bf16.mxu1 %vm645_vm0, %v1811_v37 }
  0x6c   : > { %819 = vmatmul.mubr.bf16.gmra.mxu0 %v1813_v38  ;;  %947 = vmatmul.mubr.bf16.gmra.mxu1 %v1814_v39 }
  0x6d   : > { %1571 = vmatprep.mubr.msk.bf16.mxu0 %vm645_vm0, %v1815_v40  ;;  %1587 = vmatprep.mubr.msk.bf16.mxu1 %vm645_vm0, %v1817_v41 }
  0x74   : > { %827 = vmatmul.mubr.bf16.gmra.mxu0 %v1819_v42  ;;  %955 = vmatmul.mubr.bf16.gmra.mxu1 %v1820_v43 }
  0x75   : > { %1572 = vmatprep.mubr.msk.bf16.mxu0 %vm645_vm0, %v1821_v44  ;;  %1588 = vmatprep.mubr.msk.bf16.mxu1 %vm645_vm0, %v1823_v45 }
  0x7c   : > { %835 = vmatmul.mubr.bf16.gmra.mxu0 %v1825_v46  ;;  %963 = vmatmul.mubr.bf16.gmra.mxu1 %v1826_v47 }
  0x7d   : > { %1573 = vmatprep.mubr.msk.bf16.mxu0 %vm645_vm0, %v1827_v48  ;;  %1589 = vmatprep.mubr.msk.bf16.mxu1 %vm645_vm0, %v1829_v49 }
  0x84   : > { %843 = vmatmul.mubr.bf16.gmra.mxu0 %v1831_v50  ;;  %971 = vmatmul.mubr.bf16.gmra.mxu1 %v1832_v51 }
  0x85   : > { %1574 = vmatprep.mubr.msk.bf16.mxu0 %vm645_vm0, %v1833_v52  ;;  %1590 = vmatprep.mubr.msk.bf16.mxu1 %vm645_vm0, %v1835_v53 }
  0x8c   : > { %851 = vmatmul.mubr.bf16.gmra.mxu0 %v1837_v54  ;;  %979 = vmatmul.mubr.bf16.gmra.mxu1 %v1838_v55 }
  0x8d   : > { %1575 = vmatprep.mubr.msk.bf16.mxu0 %vm645_vm0, %v1839_v56  ;;  %1591 = vmatprep.mubr.msk.bf16.mxu1 %vm645_vm0, %v1841_v57 }
  0x94   : > { %859 = vmatmul.mubr.bf16.gmra.mxu0 %v1843_v58  ;;  %987 = vmatmul.mubr.bf16.gmra.mxu1 %v1844_v59 }
  0x95   : > { %1576 = vmatprep.mubr.msk.bf16.mxu0 %vm645_vm0, %v1845_v60  ;;  %1592 = vmatprep.mubr.msk.bf16.mxu1 %vm645_vm0, %v1847_v61 }
  0x9c   : > { %867 = vmatmul.mubr.bf16.gmra.mxu0 %v1849_v62  ;;  %995 = vmatmul.mubr.bf16.gmra.mxu1 %v1850_v63 }
  0x9d   : > { %1577 = vmatprep.mubr.msk.bf16.mxu0 %vm645_vm0, %v1851_v0  ;;  %1593 = vmatprep.mubr.msk.bf16.mxu1 %vm645_vm0, %v1853_v1 }
  0xa4   : > { %875 = vmatmul.mubr.bf16.gmra.mxu0 %v1855_v2  ;;  %1003 = vmatmul.mubr.bf16.gmra.mxu1 %v1856_v3 }
  0xa5   : > { %1578 = vmatprep.mubr.msk.bf16.mxu0 %vm645_vm0, %v1857_v4  ;;  %1594 = vmatprep.mubr.msk.bf16.mxu1 %vm645_vm0, %v1859_v5 }
  0xac   : > { %883 = vmatmul.mubr.bf16.gmra.mxu0 %v1861_v6  ;;  %1011 = vmatmul.mubr.bf16.gmra.mxu1 %v1862_v7 }
  0xad   : > { %1579 = vmatprep.mubr.msk.bf16.mxu0 %vm645_vm0, %v1863_v8  ;;  %1595 = vmatprep.mubr.msk.bf16.mxu1 %vm645_vm0, %v1865_v9 }
  0xb4   : > { %891 = vmatmul.mubr.bf16.gmra.mxu0 %v1867_v10  ;;  %1019 = vmatmul.mubr.bf16.gmra.mxu1 %v1868_v11 }
  0xb5   : > { %1580 = vmatprep.mubr.msk.bf16.mxu0 %vm645_vm0, %v1869_v12  ;;  %1596 = vmatprep.mubr.msk.bf16.mxu1 %vm645_vm0, %v1871_v13 }
  0xbc   : > { %899 = vmatmul.mubr.bf16.gmra.mxu0 %v1873_v14  ;;  %1027 = vmatmul.mubr.bf16.gmra.mxu1 %v1874_v15 }
 0x104   : > { %v780_v17 = vpop.f32.mrf.mxu0  ;;  %v908_v18 = vpop.f32.mrf.mxu1 }
 0x105   : > { %v781_v19 = vadd.f32 %v2089_v16, %v780_v17  ;;  %v909_v20 = vadd.f32 %v2089_v16, %v908_v18 }
 0x106   : > { %v782_v21 = vpop.f32.mrf.mxu0  ;;  %v910_v22 = vpop.f32.mrf.mxu1 }
 0x107   : > { %v1035_v23 = vmax.f32 %v781_v19, 0.0  ;;  %v1067_v24 = vmax.f32 %v909_v20, 0.0 }
 0x108   : > { %v783_v25 = vpop.f32.mrf.mxu0  ;;  %v911_v26 = vpop.f32.mrf.mxu1 }
 0x109   : > { %v1664_v27 = vpack.c.bf16 %v1035_v23, %v1035_v23  ;;  %v1696_v28 = vpack.c.bf16 %v1067_v24, %v1067_v24  ;;  %v784_v29 = vadd.f32 %v2089_v16, %v783_v25  ;;  %v912_v30 = vadd.f32 %v2089_v16, %v911_v26 }
 0x10a   : > { %v785_v31 = vpop.f32.mrf.mxu0  ;;  %v913_v32 = vpop.f32.mrf.mxu1 }
 0x10b   : > { %1356 = vst.msk [vmem:[%s2097_s27] sm:$0xf] %vm1355_vm2, %v1664_v27  ;;  %1388 = vst.msk [vmem:[%s2097_s27 + $0x80] sm:$0xf] %vm1355_vm2, %v1696_v28  ;;  %v1036_v33 = vmax.f32 %v784_v29, 0.0  ;;  %v1068_v34 = vmax.f32 %v912_v30, 0.0 }
 0x10c   : > { %v788_v35 = vpop.f32.mrf.mxu0  ;;  %v916_v36 = vpop.f32.mrf.mxu1 }
 0x10d   : > { %v1665_v37 = vpack.c.bf16 %v1036_v33, %v1036_v33  ;;  %v1697_v38 = vpack.c.bf16 %v1068_v34, %v1068_v34  ;;  %v789_v39 = vadd.f32 %v2089_v16, %v788_v35  ;;  %v917_v40 = vadd.f32 %v2089_v16, %v916_v36 }
 0x10e   : > { %v790_v41 = vpop.f32.mrf.mxu0  ;;  %v918_v42 = vpop.f32.mrf.mxu1 }
 0x10f   : > { %1357 = vst.msk [vmem:[%s2097_s27 + $0x4] sm:$0xf] %vm1355_vm2, %v1665_v37  ;;  %1389 = vst.msk [vmem:[%s2097_s27 + $0x84] sm:$0xf] %vm1355_vm2, %v1697_v38  ;;  %v1037_v43 = vmax.f32 %v789_v39, 0.0  ;;  %v1069_v44 = vmax.f32 %v917_v40, 0.0 }
 0x110   : > { %v791_v45 = vpop.f32.mrf.mxu0  ;;  %v919_v46 = vpop.f32.mrf.mxu1 }
 0x111   : > { %v1666_v47 = vpack.c.bf16 %v1037_v43, %v1037_v43  ;;  %v1698_v48 = vpack.c.bf16 %v1069_v44, %v1069_v44  ;;  %v792_v49 = vadd.f32 %v2089_v16, %v791_v45  ;;  %v920_v50 = vadd.f32 %v2089_v16, %v919_v46 }
 0x112   : > { %v793_v51 = vpop.f32.mrf.mxu0  ;;  %v921_v52 = vpop.f32.mrf.mxu1 }
 0x113   : > { %1358 = vst.msk [vmem:[%s2097_s27 + $0x8] sm:$0xf] %vm1355_vm2, %v1666_v47  ;;  %1390 = vst.msk [vmem:[%s2097_s27 + $0x88] sm:$0xf] %vm1355_vm2, %v1698_v48  ;;  %v1038_v53 = vmax.f32 %v792_v49, 0.0  ;;  %v1070_v54 = vmax.f32 %v920_v50, 0.0 }
 0x114   : > { %v796_v55 = vpop.f32.mrf.mxu0  ;;  %v924_v56 = vpop.f32.mrf.mxu1 }
 0x115   : > { %v1667_v57 = vpack.c.bf16 %v1038_v53, %v1038_v53  ;;  %v1699_v58 = vpack.c.bf16 %v1070_v54, %v1070_v54  ;;  %v797_v59 = vadd.f32 %v2089_v16, %v796_v55  ;;  %v925_v60 = vadd.f32 %v2089_v16, %v924_v56 }
 0x116   : > { %v798_v61 = vpop.f32.mrf.mxu0  ;;  %v926_v62 = vpop.f32.mrf.mxu1 }
 0x117   : > { %1359 = vst.msk [vmem:[%s2097_s27 + $0xc] sm:$0xf] %vm1355_vm2, %v1667_v57  ;;  %1391 = vst.msk [vmem:[%s2097_s27 + $0x8c] sm:$0xf] %vm1355_vm2, %v1699_v58  ;;  %v1039_v63 = vmax.f32 %v797_v59, 0.0  ;;  %v1071_v0 = vmax.f32 %v925_v60, 0.0 }
 0x118   : > { %v799_v1 = vpop.f32.mrf.mxu0  ;;  %v927_v2 = vpop.f32.mrf.mxu1 }
 0x119   : > { %v1668_v3 = vpack.c.bf16 %v1039_v63, %v1039_v63  ;;  %v1700_v4 = vpack.c.bf16 %v1071_v0, %v1071_v0  ;;  %v800_v5 = vadd.f32 %v2089_v16, %v799_v1  ;;  %v928_v6 = vadd.f32 %v2089_v16, %v927_v2 }
 0x11a   : > { %v801_v7 = vpop.f32.mrf.mxu0  ;;  %v929_v8 = vpop.f32.mrf.mxu1 }
 0x11b   : > { %1360 = vst.msk [vmem:[%s2097_s27 + $0x10] sm:$0xf] %vm1355_vm2, %v1668_v3  ;;  %1392 = vst.msk [vmem:[%s2097_s27 + $0x90] sm:$0xf] %vm1355_vm2, %v1700_v4  ;;  %v1040_v9 = vmax.f32 %v800_v5, 0.0  ;;  %v1072_v10 = vmax.f32 %v928_v6, 0.0 }
 0x11c   : > { %v804_v11 = vpop.f32.mrf.mxu0  ;;  %v932_v12 = vpop.f32.mrf.mxu1 }
 0x11d   : > { %v1669_v13 = vpack.c.bf16 %v1040_v9, %v1040_v9  ;;  %v1701_v14 = vpack.c.bf16 %v1072_v10, %v1072_v10  ;;  %v805_v15 = vadd.f32 %v2089_v16, %v804_v11  ;;  %v933_v17 = vadd.f32 %v2089_v16, %v932_v12 }
 0x11e   : > { %v806_v18 = vpop.f32.mrf.mxu0  ;;  %v934_v19 = vpop.f32.mrf.mxu1 }
 0x11f   : > { %1361 = vst.msk [vmem:[%s2097_s27 + $0x14] sm:$0xf] %vm1355_vm2, %v1669_v13  ;;  %1393 = vst.msk [vmem:[%s2097_s27 + $0x94] sm:$0xf] %vm1355_vm2, %v1701_v14  ;;  %v1041_v20 = vmax.f32 %v805_v15, 0.0  ;;  %v1073_v21 = vmax.f32 %v933_v17, 0.0 }
 0x120   : > { %v807_v22 = vpop.f32.mrf.mxu0  ;;  %v935_v23 = vpop.f32.mrf.mxu1 }
 0x121   : > { %v1670_v24 = vpack.c.bf16 %v1041_v20, %v1041_v20  ;;  %v1702_v25 = vpack.c.bf16 %v1073_v21, %v1073_v21  ;;  %v808_v26 = vadd.f32 %v2089_v16, %v807_v22  ;;  %v936_v27 = vadd.f32 %v2089_v16, %v935_v23 }
 0x122   : > { %v809_v28 = vpop.f32.mrf.mxu0  ;;  %v937_v29 = vpop.f32.mrf.mxu1 }
 0x123   : > { %1362 = vst.msk [vmem:[%s2097_s27 + $0x18] sm:$0xf] %vm1355_vm2, %v1670_v24  ;;  %1394 = vst.msk [vmem:[%s2097_s27 + $0x98] sm:$0xf] %vm1355_vm2, %v1702_v25  ;;  %v1042_v30 = vmax.f32 %v808_v26, 0.0  ;;  %v1074_v31 = vmax.f32 %v936_v27, 0.0 }
 0x124   : > { %v812_v32 = vpop.f32.mrf.mxu0  ;;  %v940_v33 = vpop.f32.mrf.mxu1 }
 0x125   : > { %v1671_v34 = vpack.c.bf16 %v1042_v30, %v1042_v30  ;;  %v1703_v35 = vpack.c.bf16 %v1074_v31, %v1074_v31  ;;  %v813_v36 = vadd.f32 %v2089_v16, %v812_v32  ;;  %v941_v37 = vadd.f32 %v2089_v16, %v940_v33 }
 0x126   : > { %v814_v38 = vpop.f32.mrf.mxu0  ;;  %v942_v39 = vpop.f32.mrf.mxu1 }
 0x127   : > { %1363 = vst.msk [vmem:[%s2097_s27 + $0x1c] sm:$0xf] %vm1355_vm2, %v1671_v34  ;;  %1395 = vst.msk [vmem:[%s2097_s27 + $0x9c] sm:$0xf] %vm1355_vm2, %v1703_v35  ;;  %v1043_v40 = vmax.f32 %v813_v36, 0.0  ;;  %v1075_v41 = vmax.f32 %v941_v37, 0.0 }
 0x128   : > { %v815_v42 = vpop.f32.mrf.mxu0  ;;  %v943_v43 = vpop.f32.mrf.mxu1 }
 0x129   : > { %v1672_v44 = vpack.c.bf16 %v1043_v40, %v1043_v40  ;;  %v1704_v45 = vpack.c.bf16 %v1075_v41, %v1075_v41  ;;  %v816_v46 = vadd.f32 %v2089_v16, %v815_v42  ;;  %v944_v47 = vadd.f32 %v2089_v16, %v943_v43 }
 0x12a   : > { %v817_v48 = vpop.f32.mrf.mxu0  ;;  %v945_v49 = vpop.f32.mrf.mxu1 }
 0x12b   : > { %1364 = vst.msk [vmem:[%s2097_s27 + $0x20] sm:$0xf] %vm1355_vm2, %v1672_v44  ;;  %1396 = vst.msk [vmem:[%s2097_s27 + $0xa0] sm:$0xf] %vm1355_vm2, %v1704_v45  ;;  %v1044_v50 = vmax.f32 %v816_v46, 0.0  ;;  %v1076_v51 = vmax.f32 %v944_v47, 0.0 }
 0x12c   : > { %v820_v52 = vpop.f32.mrf.mxu0  ;;  %v948_v53 = vpop.f32.mrf.mxu1 }
 0x12d   : > { %v1673_v54 = vpack.c.bf16 %v1044_v50, %v1044_v50  ;;  %v1705_v55 = vpack.c.bf16 %v1076_v51, %v1076_v51  ;;  %v821_v56 = vadd.f32 %v2089_v16, %v820_v52  ;;  %v949_v57 = vadd.f32 %v2089_v16, %v948_v53 }
 0x12e   : > { %v822_v58 = vpop.f32.mrf.mxu0  ;;  %v950_v59 = vpop.f32.mrf.mxu1 }
 0x12f   : > { %1365 = vst.msk [vmem:[%s2097_s27 + $0x24] sm:$0xf] %vm1355_vm2, %v1673_v54  ;;  %1397 = vst.msk [vmem:[%s2097_s27 + $0xa4] sm:$0xf] %vm1355_vm2, %v1705_v55  ;;  %v1045_v60 = vmax.f32 %v821_v56, 0.0  ;;  %v1077_v61 = vmax.f32 %v949_v57, 0.0 }
 0x130   : > { %v823_v62 = vpop.f32.mrf.mxu0  ;;  %v951_v63 = vpop.f32.mrf.mxu1 }
 0x131   : > { %v1674_v0 = vpack.c.bf16 %v1045_v60, %v1045_v60  ;;  %v1706_v1 = vpack.c.bf16 %v1077_v61, %v1077_v61  ;;  %v824_v2 = vadd.f32 %v2089_v16, %v823_v62  ;;  %v952_v3 = vadd.f32 %v2089_v16, %v951_v63 }
 0x132   : > { %v825_v4 = vpop.f32.mrf.mxu0  ;;  %v953_v5 = vpop.f32.mrf.mxu1 }
 0x133   : > { %1366 = vst.msk [vmem:[%s2097_s27 + $0x28] sm:$0xf] %vm1355_vm2, %v1674_v0  ;;  %1398 = vst.msk [vmem:[%s2097_s27 + $0xa8] sm:$0xf] %vm1355_vm2, %v1706_v1  ;;  %v1046_v6 = vmax.f32 %v824_v2, 0.0  ;;  %v1078_v7 = vmax.f32 %v952_v3, 0.0 }
 0x134   : > { %v828_v8 = vpop.f32.mrf.mxu0  ;;  %v956_v9 = vpop.f32.mrf.mxu1 }
 0x135   : > { %v1675_v10 = vpack.c.bf16 %v1046_v6, %v1046_v6  ;;  %v1707_v11 = vpack.c.bf16 %v1078_v7, %v1078_v7  ;;  %v829_v12 = vadd.f32 %v2089_v16, %v828_v8  ;;  %v957_v13 = vadd.f32 %v2089_v16, %v956_v9 }
 0x136   : > { %v830_v14 = vpop.f32.mrf.mxu0  ;;  %v958_v15 = vpop.f32.mrf.mxu1 }
 0x137   : > { %1367 = vst.msk [vmem:[%s2097_s27 + $0x2c] sm:$0xf] %vm1355_vm2, %v1675_v10  ;;  %1399 = vst.msk [vmem:[%s2097_s27 + $0xac] sm:$0xf] %vm1355_vm2, %v1707_v11  ;;  %v1047_v17 = vmax.f32 %v829_v12, 0.0  ;;  %v1079_v18 = vmax.f32 %v957_v13, 0.0 }
 0x138   : > { %v831_v19 = vpop.f32.mrf.mxu0  ;;  %v959_v20 = vpop.f32.mrf.mxu1 }
 0x139   : > { %v1676_v21 = vpack.c.bf16 %v1047_v17, %v1047_v17  ;;  %v1708_v22 = vpack.c.bf16 %v1079_v18, %v1079_v18  ;;  %v832_v23 = vadd.f32 %v2089_v16, %v831_v19  ;;  %v960_v24 = vadd.f32 %v2089_v16, %v959_v20 }
 0x13a   : > { %v833_v25 = vpop.f32.mrf.mxu0  ;;  %v961_v26 = vpop.f32.mrf.mxu1 }
 0x13b   : > { %1368 = vst.msk [vmem:[%s2097_s27 + $0x30] sm:$0xf] %vm1355_vm2, %v1676_v21  ;;  %1400 = vst.msk [vmem:[%s2097_s27 + $0xb0] sm:$0xf] %vm1355_vm2, %v1708_v22  ;;  %v1048_v27 = vmax.f32 %v832_v23, 0.0  ;;  %v1080_v28 = vmax.f32 %v960_v24, 0.0 }
 0x13c   : > { %v836_v29 = vpop.f32.mrf.mxu0  ;;  %v964_v30 = vpop.f32.mrf.mxu1 }
 0x13d   : > { %v1677_v31 = vpack.c.bf16 %v1048_v27, %v1048_v27  ;;  %v1709_v32 = vpack.c.bf16 %v1080_v28, %v1080_v28  ;;  %v837_v33 = vadd.f32 %v2089_v16, %v836_v29  ;;  %v965_v34 = vadd.f32 %v2089_v16, %v964_v30 }
 0x13e   : > { %v838_v35 = vpop.f32.mrf.mxu0  ;;  %v966_v36 = vpop.f32.mrf.mxu1 }
 0x13f   : > { %1369 = vst.msk [vmem:[%s2097_s27 + $0x34] sm:$0xf] %vm1355_vm2, %v1677_v31  ;;  %1401 = vst.msk [vmem:[%s2097_s27 + $0xb4] sm:$0xf] %vm1355_vm2, %v1709_v32  ;;  %v1049_v37 = vmax.f32 %v837_v33, 0.0  ;;  %v1081_v38 = vmax.f32 %v965_v34, 0.0 }
 0x140   : > { %v839_v39 = vpop.f32.mrf.mxu0  ;;  %v967_v40 = vpop.f32.mrf.mxu1 }
 0x141   : > { %v1678_v41 = vpack.c.bf16 %v1049_v37, %v1049_v37  ;;  %v1710_v42 = vpack.c.bf16 %v1081_v38, %v1081_v38  ;;  %v840_v43 = vadd.f32 %v2089_v16, %v839_v39  ;;  %v968_v44 = vadd.f32 %v2089_v16, %v967_v40 }
 0x142   : > { %v841_v45 = vpop.f32.mrf.mxu0  ;;  %v969_v46 = vpop.f32.mrf.mxu1 }
 0x143   : > { %1370 = vst.msk [vmem:[%s2097_s27 + $0x38] sm:$0xf] %vm1355_vm2, %v1678_v41  ;;  %1402 = vst.msk [vmem:[%s2097_s27 + $0xb8] sm:$0xf] %vm1355_vm2, %v1710_v42  ;;  %v1050_v47 = vmax.f32 %v840_v43, 0.0  ;;  %v1082_v48 = vmax.f32 %v968_v44, 0.0 }
 0x144   : > { %v844_v49 = vpop.f32.mrf.mxu0  ;;  %v972_v50 = vpop.f32.mrf.mxu1 }
 0x145   : > { %v1679_v51 = vpack.c.bf16 %v1050_v47, %v1050_v47  ;;  %v1711_v52 = vpack.c.bf16 %v1082_v48, %v1082_v48  ;;  %v845_v53 = vadd.f32 %v2089_v16, %v844_v49  ;;  %v973_v54 = vadd.f32 %v2089_v16, %v972_v50 }
 0x146   : > { %v846_v55 = vpop.f32.mrf.mxu0  ;;  %v974_v56 = vpop.f32.mrf.mxu1 }
 0x147   : > { %1371 = vst.msk [vmem:[%s2097_s27 + $0x3c] sm:$0xf] %vm1355_vm2, %v1679_v51  ;;  %1403 = vst.msk [vmem:[%s2097_s27 + $0xbc] sm:$0xf] %vm1355_vm2, %v1711_v52  ;;  %v1051_v57 = vmax.f32 %v845_v53, 0.0  ;;  %v1083_v58 = vmax.f32 %v973_v54, 0.0 }
 0x148   : > { %v847_v59 = vpop.f32.mrf.mxu0  ;;  %v975_v60 = vpop.f32.mrf.mxu1 }
 0x149   : > { %v1680_v61 = vpack.c.bf16 %v1051_v57, %v1051_v57  ;;  %v1712_v62 = vpack.c.bf16 %v1083_v58, %v1083_v58  ;;  %v848_v63 = vadd.f32 %v2089_v16, %v847_v59  ;;  %v976_v0 = vadd.f32 %v2089_v16, %v975_v60 }
 0x14a   : > { %v849_v1 = vpop.f32.mrf.mxu0  ;;  %v977_v2 = vpop.f32.mrf.mxu1 }
 0x14b   : > { %1372 = vst.msk [vmem:[%s2097_s27 + $0x40] sm:$0xf] %vm1355_vm2, %v1680_v61  ;;  %1404 = vst.msk [vmem:[%s2097_s27 + $0xc0] sm:$0xf] %vm1355_vm2, %v1712_v62  ;;  %v1052_v3 = vmax.f32 %v848_v63, 0.0  ;;  %v1084_v4 = vmax.f32 %v976_v0, 0.0 }
 0x14c   : > { %v852_v5 = vpop.f32.mrf.mxu0  ;;  %v980_v6 = vpop.f32.mrf.mxu1 }
 0x14d   : > { %v1681_v7 = vpack.c.bf16 %v1052_v3, %v1052_v3  ;;  %v1713_v8 = vpack.c.bf16 %v1084_v4, %v1084_v4  ;;  %v853_v9 = vadd.f32 %v2089_v16, %v852_v5  ;;  %v981_v10 = vadd.f32 %v2089_v16, %v980_v6 }
 0x14e   : > { %v854_v11 = vpop.f32.mrf.mxu0  ;;  %v982_v12 = vpop.f32.mrf.mxu1 }
 0x14f   : > { %1373 = vst.msk [vmem:[%s2097_s27 + $0x44] sm:$0xf] %vm1355_vm2, %v1681_v7  ;;  %1405 = vst.msk [vmem:[%s2097_s27 + $0xc4] sm:$0xf] %vm1355_vm2, %v1713_v8  ;;  %v1053_v13 = vmax.f32 %v853_v9, 0.0  ;;  %v1085_v14 = vmax.f32 %v981_v10, 0.0 }
 0x150   : > { %v855_v15 = vpop.f32.mrf.mxu0  ;;  %v983_v17 = vpop.f32.mrf.mxu1 }
 0x151   : > { %v1682_v18 = vpack.c.bf16 %v1053_v13, %v1053_v13  ;;  %v1714_v19 = vpack.c.bf16 %v1085_v14, %v1085_v14  ;;  %v856_v20 = vadd.f32 %v2089_v16, %v855_v15  ;;  %v984_v21 = vadd.f32 %v2089_v16, %v983_v17 }
 0x152   : > { %v857_v22 = vpop.f32.mrf.mxu0  ;;  %v985_v23 = vpop.f32.mrf.mxu1 }
 0x153   : > { %1374 = vst.msk [vmem:[%s2097_s27 + $0x48] sm:$0xf] %vm1355_vm2, %v1682_v18  ;;  %1406 = vst.msk [vmem:[%s2097_s27 + $0xc8] sm:$0xf] %vm1355_vm2, %v1714_v19  ;;  %v1054_v24 = vmax.f32 %v856_v20, 0.0  ;;  %v1086_v25 = vmax.f32 %v984_v21, 0.0 }
 0x154   : > { %v860_v26 = vpop.f32.mrf.mxu0  ;;  %v988_v27 = vpop.f32.mrf.mxu1 }
 0x155   : > { %v1683_v28 = vpack.c.bf16 %v1054_v24, %v1054_v24  ;;  %v1715_v29 = vpack.c.bf16 %v1086_v25, %v1086_v25  ;;  %v861_v30 = vadd.f32 %v2089_v16, %v860_v26  ;;  %v989_v31 = vadd.f32 %v2089_v16, %v988_v27 }
 0x156   : > { %v862_v32 = vpop.f32.mrf.mxu0  ;;  %v990_v33 = vpop.f32.mrf.mxu1 }
 0x157   : > { %1375 = vst.msk [vmem:[%s2097_s27 + $0x4c] sm:$0xf] %vm1355_vm2, %v1683_v28  ;;  %1407 = vst.msk [vmem:[%s2097_s27 + $0xcc] sm:$0xf] %vm1355_vm2, %v1715_v29  ;;  %v1055_v34 = vmax.f32 %v861_v30, 0.0  ;;  %v1087_v35 = vmax.f32 %v989_v31, 0.0 }
 0x158   : > { %v863_v36 = vpop.f32.mrf.mxu0  ;;  %v991_v37 = vpop.f32.mrf.mxu1 }
 0x159   : > { %v1684_v38 = vpack.c.bf16 %v1055_v34, %v1055_v34  ;;  %v1716_v39 = vpack.c.bf16 %v1087_v35, %v1087_v35  ;;  %v864_v40 = vadd.f32 %v2089_v16, %v863_v36  ;;  %v992_v41 = vadd.f32 %v2089_v16, %v991_v37 }
 0x15a   : > { %v865_v42 = vpop.f32.mrf.mxu0  ;;  %v993_v43 = vpop.f32.mrf.mxu1 }
 0x15b   : > { %1376 = vst.msk [vmem:[%s2097_s27 + $0x50] sm:$0xf] %vm1355_vm2, %v1684_v38  ;;  %1408 = vst.msk [vmem:[%s2097_s27 + $0xd0] sm:$0xf] %vm1355_vm2, %v1716_v39  ;;  %v1056_v44 = vmax.f32 %v864_v40, 0.0  ;;  %v1088_v45 = vmax.f32 %v992_v41, 0.0 }
 0x15c   : > { %v868_v46 = vpop.f32.mrf.mxu0  ;;  %v996_v47 = vpop.f32.mrf.mxu1 }
 0x15d   : > { %v1685_v48 = vpack.c.bf16 %v1056_v44, %v1056_v44  ;;  %v1717_v49 = vpack.c.bf16 %v1088_v45, %v1088_v45  ;;  %v869_v50 = vadd.f32 %v2089_v16, %v868_v46  ;;  %v997_v51 = vadd.f32 %v2089_v16, %v996_v47 }
 0x15e   : > { %v870_v52 = vpop.f32.mrf.mxu0  ;;  %v998_v53 = vpop.f32.mrf.mxu1 }
 0x15f   : > { %1377 = vst.msk [vmem:[%s2097_s27 + $0x54] sm:$0xf] %vm1355_vm2, %v1685_v48  ;;  %1409 = vst.msk [vmem:[%s2097_s27 + $0xd4] sm:$0xf] %vm1355_vm2, %v1717_v49  ;;  %v1057_v54 = vmax.f32 %v869_v50, 0.0  ;;  %v1089_v55 = vmax.f32 %v997_v51, 0.0 }
 0x160   : > { %v871_v56 = vpop.f32.mrf.mxu0  ;;  %v999_v57 = vpop.f32.mrf.mxu1 }
 0x161   : > { %v1686_v58 = vpack.c.bf16 %v1057_v54, %v1057_v54  ;;  %v1718_v59 = vpack.c.bf16 %v1089_v55, %v1089_v55  ;;  %v872_v60 = vadd.f32 %v2089_v16, %v871_v56  ;;  %v1000_v61 = vadd.f32 %v2089_v16, %v999_v57 }
 0x162   : > { %v873_v62 = vpop.f32.mrf.mxu0  ;;  %v1001_v63 = vpop.f32.mrf.mxu1 }
 0x163   : > { %1378 = vst.msk [vmem:[%s2097_s27 + $0x58] sm:$0xf] %vm1355_vm2, %v1686_v58  ;;  %1410 = vst.msk [vmem:[%s2097_s27 + $0xd8] sm:$0xf] %vm1355_vm2, %v1718_v59  ;;  %v1058_v0 = vmax.f32 %v872_v60, 0.0  ;;  %v1090_v1 = vmax.f32 %v1000_v61, 0.0 }
 0x164   : > { %v876_v2 = vpop.f32.mrf.mxu0  ;;  %v1004_v3 = vpop.f32.mrf.mxu1 }
 0x165   : > { %v1687_v4 = vpack.c.bf16 %v1058_v0, %v1058_v0  ;;  %v1719_v5 = vpack.c.bf16 %v1090_v1, %v1090_v1  ;;  %v877_v6 = vadd.f32 %v2089_v16, %v876_v2  ;;  %v1005_v7 = vadd.f32 %v2089_v16, %v1004_v3 }
 0x166   : > { %v878_v8 = vpop.f32.mrf.mxu0  ;;  %v1006_v9 = vpop.f32.mrf.mxu1 }
 0x167   : > { %1379 = vst.msk [vmem:[%s2097_s27 + $0x5c] sm:$0xf] %vm1355_vm2, %v1687_v4  ;;  %1411 = vst.msk [vmem:[%s2097_s27 + $0xdc] sm:$0xf] %vm1355_vm2, %v1719_v5  ;;  %v1059_v10 = vmax.f32 %v877_v6, 0.0  ;;  %v1091_v11 = vmax.f32 %v1005_v7, 0.0 }
 0x168   : > { %v879_v12 = vpop.f32.mrf.mxu0  ;;  %v1007_v13 = vpop.f32.mrf.mxu1 }
 0x169   : > { %v1688_v14 = vpack.c.bf16 %v1059_v10, %v1059_v10  ;;  %v1720_v15 = vpack.c.bf16 %v1091_v11, %v1091_v11  ;;  %v880_v17 = vadd.f32 %v2089_v16, %v879_v12  ;;  %v1008_v18 = vadd.f32 %v2089_v16, %v1007_v13 }
 0x16a   : > { %v881_v19 = vpop.f32.mrf.mxu0  ;;  %v1009_v20 = vpop.f32.mrf.mxu1 }
 0x16b   : > { %1380 = vst.msk [vmem:[%s2097_s27 + $0x60] sm:$0xf] %vm1355_vm2, %v1688_v14  ;;  %1412 = vst.msk [vmem:[%s2097_s27 + $0xe0] sm:$0xf] %vm1355_vm2, %v1720_v15  ;;  %v1060_v21 = vmax.f32 %v880_v17, 0.0  ;;  %v1092_v22 = vmax.f32 %v1008_v18, 0.0 }
 0x16c   : > { %v884_v23 = vpop.f32.mrf.mxu0  ;;  %v1012_v24 = vpop.f32.mrf.mxu1 }
 0x16d   : > { %v1689_v25 = vpack.c.bf16 %v1060_v21, %v1060_v21  ;;  %v1721_v26 = vpack.c.bf16 %v1092_v22, %v1092_v22  ;;  %v885_v27 = vadd.f32 %v2089_v16, %v884_v23  ;;  %v1013_v28 = vadd.f32 %v2089_v16, %v1012_v24 }
 0x16e   : > { %v886_v29 = vpop.f32.mrf.mxu0  ;;  %v1014_v30 = vpop.f32.mrf.mxu1 }
 0x16f   : > { %1381 = vst.msk [vmem:[%s2097_s27 + $0x64] sm:$0xf] %vm1355_vm2, %v1689_v25  ;;  %1413 = vst.msk [vmem:[%s2097_s27 + $0xe4] sm:$0xf] %vm1355_vm2, %v1721_v26  ;;  %v1061_v31 = vmax.f32 %v885_v27, 0.0  ;;  %v1093_v32 = vmax.f32 %v1013_v28, 0.0 }
 0x170   : > { %v887_v33 = vpop.f32.mrf.mxu0  ;;  %v1015_v34 = vpop.f32.mrf.mxu1 }
 0x171   : > { %v1690_v35 = vpack.c.bf16 %v1061_v31, %v1061_v31  ;;  %v1722_v36 = vpack.c.bf16 %v1093_v32, %v1093_v32  ;;  %v888_v37 = vadd.f32 %v2089_v16, %v887_v33  ;;  %v1016_v38 = vadd.f32 %v2089_v16, %v1015_v34 }
 0x172   : > { %v889_v39 = vpop.f32.mrf.mxu0  ;;  %v1017_v40 = vpop.f32.mrf.mxu1 }
 0x173   : > { %1382 = vst.msk [vmem:[%s2097_s27 + $0x68] sm:$0xf] %vm1355_vm2, %v1690_v35  ;;  %1414 = vst.msk [vmem:[%s2097_s27 + $0xe8] sm:$0xf] %vm1355_vm2, %v1722_v36  ;;  %v1062_v41 = vmax.f32 %v888_v37, 0.0  ;;  %v1094_v42 = vmax.f32 %v1016_v38, 0.0 }
 0x174   : > { %v892_v43 = vpop.f32.mrf.mxu0  ;;  %v1020_v44 = vpop.f32.mrf.mxu1 }
 0x175   : > { %v1691_v45 = vpack.c.bf16 %v1062_v41, %v1062_v41  ;;  %v1723_v46 = vpack.c.bf16 %v1094_v42, %v1094_v42  ;;  %v893_v47 = vadd.f32 %v2089_v16, %v892_v43  ;;  %v1021_v48 = vadd.f32 %v2089_v16, %v1020_v44 }
 0x176   : > { %v894_v49 = vpop.f32.mrf.mxu0  ;;  %v1022_v50 = vpop.f32.mrf.mxu1 }
 0x177   : > { %1383 = vst.msk [vmem:[%s2097_s27 + $0x6c] sm:$0xf] %vm1355_vm2, %v1691_v45  ;;  %1415 = vst.msk [vmem:[%s2097_s27 + $0xec] sm:$0xf] %vm1355_vm2, %v1723_v46  ;;  %v1063_v51 = vmax.f32 %v893_v47, 0.0  ;;  %v1095_v52 = vmax.f32 %v1021_v48, 0.0 }
 0x178   : > { %v895_v53 = vpop.f32.mrf.mxu0  ;;  %v1023_v54 = vpop.f32.mrf.mxu1 }
 0x179   : > { %v1692_v55 = vpack.c.bf16 %v1063_v51, %v1063_v51  ;;  %v1724_v56 = vpack.c.bf16 %v1095_v52, %v1095_v52  ;;  %v896_v57 = vadd.f32 %v2089_v16, %v895_v53  ;;  %v1024_v58 = vadd.f32 %v2089_v16, %v1023_v54 }
 0x17a   : > { %v897_v59 = vpop.f32.mrf.mxu0  ;;  %v1025_v60 = vpop.f32.mrf.mxu1 }
 0x17b   : > { %1384 = vst.msk [vmem:[%s2097_s27 + $0x70] sm:$0xf] %vm1355_vm2, %v1692_v55  ;;  %1416 = vst.msk [vmem:[%s2097_s27 + $0xf0] sm:$0xf] %vm1355_vm2, %v1724_v56  ;;  %v1064_v61 = vmax.f32 %v896_v57, 0.0  ;;  %v1096_v62 = vmax.f32 %v1024_v58, 0.0 }
 0x17c   : > { %v900_v63 = vpop.f32.mrf.mxu0  ;;  %v1028_v0 = vpop.f32.mrf.mxu1 }
 0x17d   : > { %v1693_v1 = vpack.c.bf16 %v1064_v61, %v1064_v61  ;;  %v1725_v2 = vpack.c.bf16 %v1096_v62, %v1096_v62  ;;  %v901_v3 = vadd.f32 %v2089_v16, %v900_v63  ;;  %v1029_v4 = vadd.f32 %v2089_v16, %v1028_v0 }
 0x17e   : > { %v902_v5 = vpop.f32.mrf.mxu0  ;;  %v1030_v6 = vpop.f32.mrf.mxu1 }
 0x17f   : > { %1385 = vst.msk [vmem:[%s2097_s27 + $0x74] sm:$0xf] %vm1355_vm2, %v1693_v1  ;;  %1417 = vst.msk [vmem:[%s2097_s27 + $0xf4] sm:$0xf] %vm1355_vm2, %v1725_v2  ;;  %v1065_v7 = vmax.f32 %v901_v3, 0.0  ;;  %v1097_v8 = vmax.f32 %v1029_v4, 0.0 }
 0x180   : > { %v903_v9 = vpop.f32.mrf.mxu0  ;;  %v1031_v10 = vpop.f32.mrf.mxu1 }
 0x181   : > { %v1694_v11 = vpack.c.bf16 %v1065_v7, %v1065_v7  ;;  %v1726_v12 = vpack.c.bf16 %v1097_v8, %v1097_v8  ;;  %v904_v13 = vadd.f32 %v2089_v16, %v903_v9  ;;  %v1032_v14 = vadd.f32 %v2089_v16, %v1031_v10 }
 0x182   : > { %v905_v15 = vpop.f32.mrf.mxu0  ;;  %v1033_v17 = vpop.f32.mrf.mxu1 }
 0x183   : > { %1386 = vst.msk [vmem:[%s2097_s27 + $0x78] sm:$0xf] %vm1355_vm2, %v1694_v11  ;;  %1418 = vst.msk [vmem:[%s2097_s27 + $0xf8] sm:$0xf] %vm1355_vm2, %v1726_v12  ;;  %v1066_v18 = vmax.f32 %v904_v13, 0.0  ;;  %v1098_v19 = vmax.f32 %v1032_v14, 0.0 }
 0x185   : > { %v1695_v20 = vpack.c.bf16 %v1066_v18, %v1066_v18  ;;  %v1727_v21 = vpack.c.bf16 %v1098_v19, %v1098_v19 }
 0x187   : > { %1387 = vst.msk [vmem:[%s2097_s27 + $0x7c] sm:$0xf] %vm1355_vm2, %v1695_v20  ;;  %1419 = vst.msk [vmem:[%s2097_s27 + $0xfc] sm:$0xf] %vm1355_vm2, %v1727_v21 }
 0x188 PF: > { %s13_s12 = sadd.s32 1, %s1881_s12  }
 0x189   : > { %p10_p4 = scmp.ge.s32.totalorder %s13_s12, 4  }
 0x18b   :  { %12 = sbr.rel (!%p10_p4) target bundleno = 1 (0x1), region = 62 }

// kernel: encoder_conv_only_forward.9
= control target key start
LH: loop header
LB: loop body
LE: loop exit
PB: predicated region body
PF: predicated region fallthrough
CT: control target
= control target key end

     0   :  { %v982_v0 = vmov 0   ;;  %vm422_vm0 = vcmask 392192   ;;  %vm721_vm1 = vcmask 257024   ;;  %s1284_s1 = inlined_call_operand.vmem [shape: bf16[432,32], index: 1, kind: input, shape index: {}]   ;;  %s1285_s0 = inlined_call_operand.vmem [shape: bf16[128,432], index: 0, kind: input, shape index: {}]   ;;  %s1286_s2 = inlined_call_operand.vmem [shape: f32[1,32], index: 2, kind: input, shape index: {}]   ;;  %s1287_s3 = inlined_call_operand.vmem [shape: bf16[128,32], index: 3, kind: output, shape index: {}]  }
   0x1   :  { %544 = vmatprep.subr.bf16.mxu1 %v982_v0  ;;  %v907_v1 = vld [vmem:[%s1284_s1 + $0x78] sm:$0xff]   ;;  %v910_v4 = vld [vmem:[%s1284_s1 + $0x70] sm:$0xff]   ;;  %v913_v7 = vld [vmem:[%s1284_s1 + $0x68] sm:$0xff]  }
   0x2   :  { %v908_v2 = vld [vmem:[%s1284_s1 + $0xb8] sm:$0xff]   ;;  %842 = vmatprep.subr.bf16.mxu0 %v907_v1  ;;  %v911_v5 = vld [vmem:[%s1284_s1 + $0xb0] sm:$0xff]   ;;  %v914_v8 = vld [vmem:[%s1284_s1 + $0xa8] sm:$0xff]  }
   0x3   :  { %v909_v3 = vld [vmem:[%s1284_s1 + $0x38] sm:$0xff]   ;;  %545 = vmatpush1.bf16.msra.mxu1 %v908_v2  ;;  %v912_v6 = vld [vmem:[%s1284_s1 + $0x30] sm:$0xff]   ;;  %v915_v9 = vld [vmem:[%s1284_s1 + $0x28] sm:$0xff]  }
   0x4   :  { %843 = vmatpush3.bf16.msra.mxu0 %v909_v3  ;;  %546 = vmatprep.subr.bf16.mxu1 %v982_v0  ;;  %v916_v10 = vld [vmem:[%s1284_s1 + $0x60] sm:$0xff]   ;;  %v919_v13 = vld [vmem:[%s1284_s1 + $0x58] sm:$0xff]   ;;  %v922_v16 = vld [vmem:[%s1284_s1 + $0x50] sm:$0xff]  }
   0x5   :  { %844 = vmatprep.subr.bf16.mxu0 %v910_v4  ;;  %v917_v11 = vld [vmem:[%s1284_s1 + $0xa0] sm:$0xff]   ;;  %v920_v14 = vld [vmem:[%s1284_s1 + $0x98] sm:$0xff]   ;;  %v923_v17 = vld [vmem:[%s1284_s1 + $0x90] sm:$0xff]  }
   0x6   :  { %v918_v12 = vld [vmem:[%s1284_s1 + $0x20] sm:$0xff]   ;;  %v921_v15 = vld [vmem:[%s1284_s1 + $0x18] sm:$0xff]   ;;  %v924_v18 = vld [vmem:[%s1284_s1 + $0x10] sm:$0xff]  }
   0x7   :  { %547 = vmatpush1.bf16.msra.mxu1 %v911_v5  ;;  %v925_v19 = vld [vmem:[%s1284_s1 + $0x48] sm:$0xff]   ;;  %v928_v22 = vld [vmem:[%s1284_s1 + $0x40] sm:$0xff]   ;;  %v934_v28 = vld [vmem:[%s1284_s1 + $0xd0] sm:$0xff]  }
   0x8   :  { %845 = vmatpush3.bf16.msra.mxu0 %v912_v6  ;;  %548 = vmatprep.subr.bf16.mxu1 %v982_v0  ;;  %v926_v20 = vld [vmem:[%s1284_s1 + $0x88] sm:$0xff]   ;;  %v933_v23 = vld [vmem:[%s1285_s0 + $0x4] ss:$16 sps:$4 sm:$0xff]   ;;  %v931_v26 = vld [vmem:[%s1285_s0] ss:$16 sps:$4 sm:$0xff]  }
   0x9   :  { %846 = vmatprep.subr.bf16.mxu0 %v913_v7  ;;  %v927_v21 = vld [vmem:[%s1284_s1 + $0x8] sm:$0xff]   ;;  %v929_v24 = vld [vmem:[%s1284_s1 + $0x80] sm:$0xff]   ;;  %479 = vmatprep.mubr.bf16.mxu0 %v933_v23 }
   0xa   :  { %v930_v25 = vld [vmem:[%s1284_s1] sm:$0xff]   ;;  %v942_v27 = vld [vmem:[%s1285_s0 + $0xc] ss:$16 sps:$4 sm:$0xff]   ;;  %v940_v34 = vld [vmem:[%s1285_s0 + $0x8] ss:$16 sps:$4 sm:$0xff]  }
   0xb   :  { %549 = vmatpush1.bf16.msra.mxu1 %v914_v8  ;;  %v936_v29 = vld [vmem:[%s1285_s0 + $0x24] ss:$16 sps:$4 sm:$0xff]   ;;  %802 = vmatprep.mubr.msk.bf16.mxu1 %vm422_vm0, %v942_v27  ;;  %v935_v30 = vld [vmem:[%s1284_s1 + $0xc8] sm:$0xff]   ;;  %v938_v31 = vld [vmem:[%s1285_s0 + $0x20] ss:$16 sps:$4 sm:$0xff]  }
   0xc   :  { %847 = vmatpush3.bf16.msra.mxu0 %v915_v9  ;;  %550 = vmatprep.subr.bf16.mxu1 %v982_v0  ;;  %v939_v32 = vld [vmem:[%s1284_s1 + $0xc0] sm:$0xff]   ;;  %v946_v35 = vld [vmem:[%s1285_s0 + $0x2c] ss:$16 sps:$4 sm:$0xff]   ;;  %v948_v38 = vld [vmem:[%s1285_s0 + $0x28] ss:$16 sps:$4 sm:$0xff]  }
   0xd   :  { %848 = vmatprep.subr.bf16.mxu0 %v916_v10  ;;  %v943_v33 = vld [vmem:[%s1285_s0 + $0x44] ss:$16 sps:$4 sm:$0xff]   ;;  %v945_v36 = vld [vmem:[%s1285_s0 + $0x40] ss:$16 sps:$4 sm:$0xff]   ;;  %v952_v39 = vld [vmem:[%s1285_s0 + $0x4c] ss:$16 sps:$4 sm:$0xff]  }
   0xe   :  { %v949_v37 = vld [vmem:[%s1285_s0 + $0x64] ss:$16 sps:$4 sm:$0xff]   ;;  %v951_v40 = vld [vmem:[%s1285_s0 + $0x60] ss:$16 sps:$4 sm:$0xff]   ;;  %v954_v42 = vld [vmem:[%s1285_s0 + $0x48] ss:$16 sps:$4 sm:$0xff]  }
   0xf   :  { %551 = vmatpush1.bf16.msra.mxu1 %v917_v11  ;;  %v955_v41 = vld [vmem:[%s1285_s0 + $0x84] ss:$16 sps:$4 sm:$0xff]   ;;  %v958_v43 = vld [vmem:[%s1285_s0 + $0x6c] ss:$16 sps:$4 sm:$0xff]   ;;  %v957_v44 = vld [vmem:[%s1285_s0 + $0x80] ss:$16 sps:$4 sm:$0xff]  }
  0x10   :  { %849 = vmatpush3.bf16.msra.mxu0 %v918_v12  ;;  %552 = vmatprep.subr.bf16.mxu1 %v982_v0  ;;  %v961_v45 = vld [vmem:[%s1285_s0 + $0xa4] ss:$16 sps:$4 sm:$0xff]   ;;  %v960_v46 = vld [vmem:[%s1285_s0 + $0x68] ss:$16 sps:$4 sm:$0xff]   ;;  %v964_v47 = vld [vmem:[%s1285_s0 + $0x8c] ss:$16 sps:$4 sm:$0xff]  }
  0x11   :  { %850 = vmatprep.subr.bf16.mxu0 %v919_v13  ;;  %v963_v48 = vld [vmem:[%s1285_s0 + $0xa0] ss:$16 sps:$4 sm:$0xff]   ;;  %v967_v49 = vld [vmem:[%s1285_s0 + $0xc4] ss:$16 sps:$4 sm:$0xff]   ;;  %v966_v50 = vld [vmem:[%s1285_s0 + $0x88] ss:$16 sps:$4 sm:$0xff]  }
  0x12   :  { %v970_v51 = vld [vmem:[%s1285_s0 + $0xac] ss:$16 sps:$4 sm:$0xff]   ;;  %v969_v52 = vld [vmem:[%s1285_s0 + $0xc0] ss:$16 sps:$4 sm:$0xff]   ;;  %v973_v53 = vld [vmem:[%s1285_s0 + $0xe4] ss:$16 sps:$4 sm:$0xff]  }
  0x13   :  { %553 = vmatpush1.bf16.msra.mxu1 %v920_v14  ;;  %v972_v54 = vld [vmem:[%s1285_s0 + $0xa8] ss:$16 sps:$4 sm:$0xff]   ;;  %v976_v55 = vld [vmem:[%s1285_s0 + $0xcc] ss:$16 sps:$4 sm:$0xff]   ;;  %v975_v56 = vld [vmem:[%s1285_s0 + $0xe0] ss:$16 sps:$4 sm:$0xff]  }
  0x14   :  { %851 = vmatpush3.bf16.msra.mxu0 %v921_v15  ;;  %554 = vmatprep.subr.bf16.mxu1 %v982_v0  ;;  %v978_v57 = vld [vmem:[%s1285_s0 + $0xc8] ss:$16 sps:$4 sm:$0xff]   ;;  %v979_v58 = vld [vmem:[%s1285_s0 + $0xec] ss:$16 sps:$4 sm:$0xff]   ;;  %v1202_v1 = vld [vmem:[%s1286_s2] ss:$0 sm:$0xff] }
  0x15   :  { %852 = vmatprep.subr.bf16.mxu0 %v922_v16  ;;  %v981_v59 = vld [vmem:[%s1285_s0 + $0xe8] ss:$16 sps:$4 sm:$0xff]  }
  0x17   :  { %555 = vmatpush1.bf16.msra.mxu1 %v923_v17 }
  0x18   :  { %853 = vmatpush3.bf16.msra.mxu0 %v924_v18  ;;  %556 = vmatprep.subr.bf16.mxu1 %v982_v0 }
  0x19   :  { %854 = vmatprep.subr.bf16.mxu0 %v925_v19 }
  0x1b   :  { %557 = vmatpush1.bf16.msra.mxu1 %v926_v20 }
  0x1c   :  { %855 = vmatpush3.bf16.msra.mxu0 %v927_v21  ;;  %558 = vmatprep.subr.bf16.mxu1 %v982_v0 }
  0x1d   :  { %856 = vmatprep.subr.bf16.mxu0 %v928_v22 }
  0x1f   :  { %559 = vmatpush1.bf16.msra.mxu1 %v929_v24 }
  0x20   :  { %857 = vmatpush3.bf16.msra.mxu0 %v930_v25  ;;  %570 = vmatprep.subr.bf16.mxu1 %v982_v0 }
  0x23   :  { %480 = vmatmul.mubr.bf16.vlgmr.msra.gmra.mxu0 %v931_v26  ;;  %571 = vmatpush2.bf16.msra.mxu1 %v934_v28 }
  0x24   :  { %572 = vmatprep.subr.bf16.mxu1 %v982_v0  ;;  %487 = vmatprep.mubr.bf16.mxu0 %v936_v29 }
  0x27   :  { %573 = vmatpush2.bf16.msra.mxu1 %v935_v30 }
  0x28   :  { %574 = vmatprep.subr.bf16.mxu1 %v982_v0 }
  0x2b   :  { %488 = vmatmul.mubr.bf16.gmra.mxu0 %v938_v31  ;;  %575 = vmatpush2.bf16.msra.mxu1 %v939_v32 }
  0x2c   :  { %495 = vmatprep.mubr.bf16.mxu0 %v943_v33 }
  0x2e   :  { %577 = vmatmul.mubr.bf16.vlgmr.msra.gmra.mxu1 %v940_v34 }
  0x2f   :  { %803 = vmatprep.mubr.msk.bf16.mxu1 %vm422_vm0, %v946_v35 }
  0x33   :  { %496 = vmatmul.mubr.bf16.gmra.mxu0 %v945_v36 }
  0x34   :  { %503 = vmatprep.mubr.bf16.mxu0 %v949_v37 }
  0x36   :  { %585 = vmatmul.mubr.bf16.gmra.mxu1 %v948_v38 }
  0x37   :  { %804 = vmatprep.mubr.msk.bf16.mxu1 %vm422_vm0, %v952_v39 }
  0x3b   :  { %504 = vmatmul.mubr.bf16.gmra.mxu0 %v951_v40 }
  0x3c   :  { %511 = vmatprep.mubr.bf16.mxu0 %v955_v41 }
  0x3e   :  { %593 = vmatmul.mubr.bf16.gmra.mxu1 %v954_v42 }
  0x3f   :  { %805 = vmatprep.mubr.msk.bf16.mxu1 %vm422_vm0, %v958_v43 }
  0x43   :  { %512 = vmatmul.mubr.bf16.gmra.mxu0 %v957_v44 }
  0x44   :  { %519 = vmatprep.mubr.bf16.mxu0 %v961_v45 }
  0x46   :  { %601 = vmatmul.mubr.bf16.gmra.mxu1 %v960_v46 }
  0x47   :  { %806 = vmatprep.mubr.msk.bf16.mxu1 %vm422_vm0, %v964_v47 }
  0x4b   :  { %520 = vmatmul.mubr.bf16.gmra.mxu0 %v963_v48 }
  0x4c   :  { %527 = vmatprep.mubr.bf16.mxu0 %v967_v49 }
  0x4e   :  { %609 = vmatmul.mubr.bf16.gmra.mxu1 %v966_v50 }
  0x4f   :  { %807 = vmatprep.mubr.msk.bf16.mxu1 %vm422_vm0, %v970_v51 }
  0x53   :  { %528 = vmatmul.mubr.bf16.gmra.mxu0 %v969_v52 }
  0x54   :  { %535 = vmatprep.mubr.bf16.mxu0 %v973_v53 }
  0x56   :  { %617 = vmatmul.mubr.bf16.gmra.mxu1 %v972_v54 }
  0x57   :  { %808 = vmatprep.mubr.msk.bf16.mxu1 %vm422_vm0, %v976_v55 }
  0x5b   :  { %536 = vmatmul.mubr.bf16.gmra.mxu0 %v975_v56 }
  0x5e   :  { %625 = vmatmul.mubr.bf16.gmra.mxu1 %v978_v57 }
  0x5f   :  { %809 = vmatprep.mubr.msk.bf16.mxu1 %vm422_vm0, %v979_v58 }
  0x66   :  { %633 = vmatmul.mubr.bf16.gmra.mxu1 %v981_v59 }
  0xe3   :  { %v858_v60 = vpop.f32.mrf.mxu0 }
  0xe5   :  { %v859_v61 = vpop.f32.mrf.mxu0 }
  0xe6   :  { %v860_v63 = vadd.f32 %v859_v61, %v858_v60 }
  0xe7   :  { %v861_v62 = vpop.f32.mrf.mxu0 }
  0xe8   :  { %v482_v5 = vadd.f32 %v860_v63, %v1202_v1 }
  0xe9   :  { %v862_v0 = vpop.f32.mrf.mxu0 }
  0xea   :  { %v863_v3 = vadd.f32 %v862_v0, %v861_v62 }
  0xeb   :  { %v864_v2 = vpop.f32.mrf.mxu0 }
  0xec   :  { %v485_v13 = vadd.f32 %v863_v3, %v1202_v1 }
  0xed   :  { %v865_v4 = vpop.f32.mrf.mxu0 }
  0xee   :  { %v578_v6 = vpop.f32.mrf.mxu1  ;;  %v866_v10 = vadd.f32 %v865_v4, %v864_v2 }
  0xef   :  { %v579_v7 = vadd.f32 %v578_v6, %v482_v5  ;;  %v867_v8 = vpop.f32.mrf.mxu0 }
  0xf0   :  { %v580_v9 = vpop.f32.mrf.mxu1  ;;  %v490_v22 = vadd.f32 %v866_v10, %v1202_v1 }
  0xf1   :  { %v641_v11 = vmax.f32 %v579_v7, 0.0  ;;  %v868_v12 = vpop.f32.mrf.mxu0 }
  0xf2   :  { %v581_v14 = vpop.f32.mrf.mxu1  ;;  %v869_v19 = vadd.f32 %v868_v12, %v867_v8 }
  0xf3   :  { %v826_v15 = vpack.c.bf16 %v641_v11, %v641_v11  ;;  %v582_v16 = vadd.f32 %v581_v14, %v485_v13  ;;  %v870_v17 = vpop.f32.mrf.mxu0 }
  0xf4   :  { %v583_v18 = vpop.f32.mrf.mxu1  ;;  %v493_v31 = vadd.f32 %v869_v19, %v1202_v1 }
  0xf5   :  { %722 = vst.msk [vmem:[%s1287_s3] sm:$0xf] %vm721_vm1, %v826_v15  ;;  %v642_v20 = vmax.f32 %v582_v16, 0.0  ;;  %v871_v21 = vpop.f32.mrf.mxu0 }
  0xf6   :  { %v586_v23 = vpop.f32.mrf.mxu1  ;;  %v872_v28 = vadd.f32 %v871_v21, %v870_v17 }
  0xf7   :  { %v827_v24 = vpack.c.bf16 %v642_v20, %v642_v20  ;;  %v587_v25 = vadd.f32 %v586_v23, %v490_v22  ;;  %v873_v26 = vpop.f32.mrf.mxu0 }
  0xf8   :  { %v588_v27 = vpop.f32.mrf.mxu1  ;;  %v498_v40 = vadd.f32 %v872_v28, %v1202_v1 }
  0xf9   :  { %723 = vst.msk [vmem:[%s1287_s3 + $0x4] sm:$0xf] %vm721_vm1, %v827_v24  ;;  %v643_v29 = vmax.f32 %v587_v25, 0.0  ;;  %v874_v30 = vpop.f32.mrf.mxu0 }
  0xfa   :  { %v589_v32 = vpop.f32.mrf.mxu1  ;;  %v875_v37 = vadd.f32 %v874_v30, %v873_v26 }
  0xfb   :  { %v828_v33 = vpack.c.bf16 %v643_v29, %v643_v29  ;;  %v590_v34 = vadd.f32 %v589_v32, %v493_v31  ;;  %v876_v35 = vpop.f32.mrf.mxu0 }
  0xfc   :  { %v591_v36 = vpop.f32.mrf.mxu1  ;;  %v501_v49 = vadd.f32 %v875_v37, %v1202_v1 }
  0xfd   :  { %724 = vst.msk [vmem:[%s1287_s3 + $0x8] sm:$0xf] %vm721_vm1, %v828_v33  ;;  %v644_v38 = vmax.f32 %v590_v34, 0.0  ;;  %v877_v39 = vpop.f32.mrf.mxu0 }
  0xfe   :  { %v594_v41 = vpop.f32.mrf.mxu1  ;;  %v878_v46 = vadd.f32 %v877_v39, %v876_v35 }
  0xff   :  { %v829_v42 = vpack.c.bf16 %v644_v38, %v644_v38  ;;  %v595_v43 = vadd.f32 %v594_v41, %v498_v40  ;;  %v879_v44 = vpop.f32.mrf.mxu0 }
 0x100   :  { %v596_v45 = vpop.f32.mrf.mxu1  ;;  %v506_v58 = vadd.f32 %v878_v46, %v1202_v1 }
 0x101   :  { %725 = vst.msk [vmem:[%s1287_s3 + $0xc] sm:$0xf] %vm721_vm1, %v829_v42  ;;  %v645_v47 = vmax.f32 %v595_v43, 0.0  ;;  %v880_v48 = vpop.f32.mrf.mxu0 }
 0x102   :  { %v597_v50 = vpop.f32.mrf.mxu1  ;;  %v881_v55 = vadd.f32 %v880_v48, %v879_v44 }
 0x103   :  { %v830_v51 = vpack.c.bf16 %v645_v47, %v645_v47  ;;  %v598_v52 = vadd.f32 %v597_v50, %v501_v49  ;;  %v882_v53 = vpop.f32.mrf.mxu0 }
 0x104   :  { %v599_v54 = vpop.f32.mrf.mxu1  ;;  %v509_v4 = vadd.f32 %v881_v55, %v1202_v1 }
 0x105   :  { %726 = vst.msk [vmem:[%s1287_s3 + $0x10] sm:$0xf] %vm721_vm1, %v830_v51  ;;  %v646_v56 = vmax.f32 %v598_v52, 0.0  ;;  %v883_v57 = vpop.f32.mrf.mxu0 }
 0x106   :  { %v602_v59 = vpop.f32.mrf.mxu1  ;;  %v884_v0 = vadd.f32 %v883_v57, %v882_v53 }
 0x107   :  { %v831_v60 = vpack.c.bf16 %v646_v56, %v646_v56  ;;  %v603_v61 = vadd.f32 %v602_v59, %v506_v58  ;;  %v885_v62 = vpop.f32.mrf.mxu0 }
 0x108   :  { %v604_v63 = vpop.f32.mrf.mxu1  ;;  %v514_v13 = vadd.f32 %v884_v0, %v1202_v1 }
 0x109   :  { %727 = vst.msk [vmem:[%s1287_s3 + $0x14] sm:$0xf] %vm721_vm1, %v831_v60  ;;  %v647_v2 = vmax.f32 %v603_v61, 0.0  ;;  %v886_v3 = vpop.f32.mrf.mxu0 }
 0x10a   :  { %v605_v5 = vpop.f32.mrf.mxu1  ;;  %v887_v10 = vadd.f32 %v886_v3, %v885_v62 }
 0x10b   :  { %v832_v6 = vpack.c.bf16 %v647_v2, %v647_v2  ;;  %v606_v7 = vadd.f32 %v605_v5, %v509_v4  ;;  %v888_v8 = vpop.f32.mrf.mxu0 }
 0x10c   :  { %v607_v9 = vpop.f32.mrf.mxu1  ;;  %v517_v22 = vadd.f32 %v887_v10, %v1202_v1 }
 0x10d   :  { %728 = vst.msk [vmem:[%s1287_s3 + $0x18] sm:$0xf] %vm721_vm1, %v832_v6  ;;  %v648_v11 = vmax.f32 %v606_v7, 0.0  ;;  %v889_v12 = vpop.f32.mrf.mxu0 }
 0x10e   :  { %v610_v14 = vpop.f32.mrf.mxu1  ;;  %v890_v19 = vadd.f32 %v889_v12, %v888_v8 }
 0x10f   :  { %v833_v15 = vpack.c.bf16 %v648_v11, %v648_v11  ;;  %v611_v16 = vadd.f32 %v610_v14, %v514_v13  ;;  %v891_v17 = vpop.f32.mrf.mxu0 }
 0x110   :  { %v612_v18 = vpop.f32.mrf.mxu1  ;;  %v522_v31 = vadd.f32 %v890_v19, %v1202_v1 }
 0x111   :  { %729 = vst.msk [vmem:[%s1287_s3 + $0x1c] sm:$0xf] %vm721_vm1, %v833_v15  ;;  %v649_v20 = vmax.f32 %v611_v16, 0.0  ;;  %v892_v21 = vpop.f32.mrf.mxu0 }
 0x112   :  { %v613_v23 = vpop.f32.mrf.mxu1  ;;  %v893_v28 = vadd.f32 %v892_v21, %v891_v17 }
 0x113   :  { %v834_v24 = vpack.c.bf16 %v649_v20, %v649_v20  ;;  %v614_v25 = vadd.f32 %v613_v23, %v517_v22  ;;  %v894_v26 = vpop.f32.mrf.mxu0 }
 0x114   :  { %v615_v27 = vpop.f32.mrf.mxu1  ;;  %v525_v40 = vadd.f32 %v893_v28, %v1202_v1 }
 0x115   :  { %730 = vst.msk [vmem:[%s1287_s3 + $0x20] sm:$0xf] %vm721_vm1, %v834_v24  ;;  %v650_v29 = vmax.f32 %v614_v25, 0.0  ;;  %v895_v30 = vpop.f32.mrf.mxu0 }
 0x116   :  { %v618_v32 = vpop.f32.mrf.mxu1  ;;  %v896_v37 = vadd.f32 %v895_v30, %v894_v26 }
 0x117   :  { %v835_v33 = vpack.c.bf16 %v650_v29, %v650_v29  ;;  %v619_v34 = vadd.f32 %v618_v32, %v522_v31  ;;  %v897_v35 = vpop.f32.mrf.mxu0 }
 0x118   :  { %v620_v36 = vpop.f32.mrf.mxu1  ;;  %v530_v49 = vadd.f32 %v896_v37, %v1202_v1 }
 0x119   :  { %731 = vst.msk [vmem:[%s1287_s3 + $0x24] sm:$0xf] %vm721_vm1, %v835_v33  ;;  %v651_v38 = vmax.f32 %v619_v34, 0.0  ;;  %v898_v39 = vpop.f32.mrf.mxu0 }
 0x11a   :  { %v621_v41 = vpop.f32.mrf.mxu1  ;;  %v899_v46 = vadd.f32 %v898_v39, %v897_v35 }
 0x11b   :  { %v836_v42 = vpack.c.bf16 %v651_v38, %v651_v38  ;;  %v622_v43 = vadd.f32 %v621_v41, %v525_v40  ;;  %v900_v44 = vpop.f32.mrf.mxu0 }
 0x11c   :  { %v623_v45 = vpop.f32.mrf.mxu1  ;;  %v533_v57 = vadd.f32 %v899_v46, %v1202_v1 }
 0x11d   :  { %732 = vst.msk [vmem:[%s1287_s3 + $0x28] sm:$0xf] %vm721_vm1, %v836_v42  ;;  %v652_v47 = vmax.f32 %v622_v43, 0.0  ;;  %v901_v48 = vpop.f32.mrf.mxu0 }
 0x11e   :  { %v626_v50 = vpop.f32.mrf.mxu1  ;;  %v902_v55 = vadd.f32 %v901_v48, %v900_v44 }
 0x11f   :  { %v837_v51 = vpack.c.bf16 %v652_v47, %v652_v47  ;;  %v627_v52 = vadd.f32 %v626_v50, %v530_v49  ;;  %v903_v53 = vpop.f32.mrf.mxu0 }
 0x120   :  { %v628_v54 = vpop.f32.mrf.mxu1  ;;  %v538_v2 = vadd.f32 %v902_v55, %v1202_v1 }
 0x121   :  { %733 = vst.msk [vmem:[%s1287_s3 + $0x2c] sm:$0xf] %vm721_vm1, %v837_v51  ;;  %v653_v56 = vmax.f32 %v627_v52, 0.0  ;;  %v904_v58 = vpop.f32.mrf.mxu0 }
 0x122   :  { %v629_v59 = vpop.f32.mrf.mxu1  ;;  %v905_v63 = vadd.f32 %v904_v58, %v903_v53 }
 0x123   :  { %v838_v60 = vpack.c.bf16 %v653_v56, %v653_v56  ;;  %v630_v61 = vadd.f32 %v629_v59, %v533_v57 }
 0x124   :  { %v631_v62 = vpop.f32.mrf.mxu1  ;;  %v541_v8 = vadd.f32 %v905_v63, %v1202_v1 }
 0x125   :  { %734 = vst.msk [vmem:[%s1287_s3 + $0x30] sm:$0xf] %vm721_vm1, %v838_v60  ;;  %v654_v0 = vmax.f32 %v630_v61, 0.0 }
 0x126   :  { %v634_v3 = vpop.f32.mrf.mxu1 }
 0x127   :  { %v839_v4 = vpack.c.bf16 %v654_v0, %v654_v0  ;;  %v635_v5 = vadd.f32 %v634_v3, %v538_v2 }
 0x128   :  { %v636_v6 = vpop.f32.mrf.mxu1 }
 0x129   :  { %735 = vst.msk [vmem:[%s1287_s3 + $0x34] sm:$0xf] %vm721_vm1, %v839_v4  ;;  %v655_v7 = vmax.f32 %v635_v5, 0.0 }
 0x12a   :  { %v637_v9 = vpop.f32.mrf.mxu1 }
 0x12b   :  { %v840_v10 = vpack.c.bf16 %v655_v7, %v655_v7  ;;  %v638_v11 = vadd.f32 %v637_v9, %v541_v8 }
 0x12c   :  { %v639_v12 = vpop.f32.mrf.mxu1 }
 0x12d   :  { %736 = vst.msk [vmem:[%s1287_s3 + $0x38] sm:$0xf] %vm721_vm1, %v840_v10  ;;  %v656_v13 = vmax.f32 %v638_v11, 0.0 }
 0x12f   :  { %v841_v14 = vpack.c.bf16 %v656_v13, %v656_v13 }
 0x131   :  { %737 = vst.msk [vmem:[%s1287_s3 + $0x3c] sm:$0xf] %vm721_vm1, %v841_v14 }

// kernel: encoder_conv_only_forward.10
= control target key start
LH: loop header
LB: loop body
LE: loop exit
PB: predicated region body
PF: predicated region fallthrough
CT: control target
= control target key end

     0   :  { %v904_v38 = vmov 0.0   ;;  %vm905_vm0 = vmmov 0   ;;  %vm497_vm1 = vcmask 785408   ;;  %vm675_vm2 = vcmask 519168   ;;  %s1118_s1 = inlined_call_operand.vmem [shape: bf16[864,64], index: 1, kind: input, shape index: {}]   ;;  %s1119_s0 = inlined_call_operand.vmem [shape: bf16[16,864], index: 0, kind: input, shape index: {}]   ;;  %s1120_s2 = inlined_call_operand.vmem [shape: f32[1,64], index: 2, kind: input, shape index: {}]   ;;  %s1121_s3 = inlined_call_operand.vmem [shape: bf16[16,64], index: 3, kind: output, shape index: {}]  }
   0x1   :  { %v840_v0 = vld [vmem:[%s1118_s1 + $0x78] sm:$0xff]   ;;  %v844_v4 = vld [vmem:[%s1118_s1 + $0x70] sm:$0xff]   ;;  %v848_v8 = vld [vmem:[%s1118_s1 + $0x68] sm:$0xff]  }
   0x2   :  { %v841_v1 = vld [vmem:[%s1118_s1 + $0x38] sm:$0xff]   ;;  %749 = vmatprep.subr.bf16.mxu0 %v840_v0  ;;  %v845_v5 = vld [vmem:[%s1118_s1 + $0x30] sm:$0xff]   ;;  %v849_v9 = vld [vmem:[%s1118_s1 + $0x28] sm:$0xff]  }
   0x3   :  { %v842_v2 = vld [vmem:[%s1118_s1 + $0xf8] sm:$0xff]   ;;  %750 = vmatpush3.bf16.msra.mxu0 %v841_v1  ;;  %v846_v6 = vld [vmem:[%s1118_s1 + $0xf0] sm:$0xff]   ;;  %v850_v10 = vld [vmem:[%s1118_s1 + $0xe8] sm:$0xff]  }
   0x4   :  { %v843_v3 = vld [vmem:[%s1118_s1 + $0xb8] sm:$0xff]   ;;  %771 = vmatprep.subr.bf16.mxu1 %v842_v2  ;;  %751 = vmatprep.subr.bf16.mxu0 %v844_v4  ;;  %v847_v7 = vld [vmem:[%s1118_s1 + $0xb0] sm:$0xff]   ;;  %v851_v11 = vld [vmem:[%s1118_s1 + $0xa8] sm:$0xff]  }
   0x5   :  { %772 = vmatpush3.bf16.msra.mxu1 %v843_v3  ;;  %v852_v12 = vld [vmem:[%s1118_s1 + $0x60] sm:$0xff]   ;;  %v856_v16 = vld [vmem:[%s1118_s1 + $0x58] sm:$0xff]   ;;  %v860_v20 = vld [vmem:[%s1118_s1 + $0x50] sm:$0xff]  }
   0x6   :  { %773 = vmatprep.subr.bf16.mxu1 %v846_v6  ;;  %v853_v13 = vld [vmem:[%s1118_s1 + $0x20] sm:$0xff]   ;;  %v857_v17 = vld [vmem:[%s1118_s1 + $0x18] sm:$0xff]   ;;  %v861_v21 = vld [vmem:[%s1118_s1 + $0x10] sm:$0xff]  }
   0x7   :  { %752 = vmatpush3.bf16.msra.mxu0 %v845_v5  ;;  %v854_v14 = vld [vmem:[%s1118_s1 + $0xe0] sm:$0xff]   ;;  %v858_v18 = vld [vmem:[%s1118_s1 + $0xd8] sm:$0xff]   ;;  %v862_v22 = vld [vmem:[%s1118_s1 + $0xd0] sm:$0xff]  }
   0x8   :  { %753 = vmatprep.subr.bf16.mxu0 %v848_v8  ;;  %v855_v15 = vld [vmem:[%s1118_s1 + $0xa0] sm:$0xff]   ;;  %v859_v19 = vld [vmem:[%s1118_s1 + $0x98] sm:$0xff]   ;;  %v863_v23 = vld [vmem:[%s1118_s1 + $0x90] sm:$0xff]  }
   0x9   :  { %774 = vmatpush3.bf16.msra.mxu1 %v847_v7  ;;  %v864_v24 = vld [vmem:[%s1118_s1 + $0x48] sm:$0xff]   ;;  %v868_v28 = vld [vmem:[%s1118_s1 + $0x40] sm:$0xff]   ;;  %v875_v34 = vld [vmem:[%s1118_s1 + $0x178] sm:$0xff]  }
   0xa   :  { %775 = vmatprep.subr.bf16.mxu1 %v850_v10  ;;  %v865_v25 = vld [vmem:[%s1118_s1 + $0x8] sm:$0xff]   ;;  %v869_v29 = vld [vmem:[%s1118_s1] sm:$0xff]   ;;  %v879_v37 = vld [vmem:[%s1118_s1 + $0x138] sm:$0xff]  }
   0xb   :  { %754 = vmatpush3.bf16.msra.mxu0 %v849_v9  ;;  %v866_v26 = vld [vmem:[%s1118_s1 + $0xc8] sm:$0xff]   ;;  %v870_v30 = vld [vmem:[%s1118_s1 + $0xc0] sm:$0xff]   ;;  %v880_v39 = vld [vmem:[%s1118_s1 + $0x170] sm:$0xff]  }
   0xc   :  { %755 = vmatprep.subr.bf16.mxu0 %v852_v12  ;;  %v867_v27 = vld [vmem:[%s1118_s1 + $0x88] sm:$0xff]   ;;  %v871_v31 = vld [vmem:[%s1119_s0] ss:$28 sps:$4 sm:$0xff]   ;;  %v881_v40 = vld [vmem:[%s1118_s1 + $0x130] sm:$0xff]  }
   0xd   :  { %776 = vmatpush3.bf16.msra.mxu1 %v851_v11  ;;  %v873_v32 = vld [vmem:[%s1119_s0 + $0x4] ss:$28 sps:$4 sm:$0xff]   ;;  %v878_v36 = vld [vmem:[%s1119_s0 + $0xc] ss:$28 sps:$4 sm:$0xff]   ;;  %v888_v47 = vld [vmem:[%s1118_s1 + $0x158] sm:$0xff]  }
   0xe   :  { %777 = vmatprep.subr.bf16.mxu1 %v854_v14  ;;  %v874_v33 = vld [vmem:[%s1118_s1 + $0x80] sm:$0xff]   ;;  %533 = vmatprep.mubr.bf16.mxu0 %v873_v32  ;;  %v882_v41 = vld [vmem:[%s1118_s1 + $0x168] sm:$0xff]   ;;  %v890_v48 = vld [vmem:[%s1118_s1 + $0x198] sm:$0xff]  }
   0xf   :  { %756 = vmatpush3.bf16.msra.mxu0 %v853_v13  ;;  %v876_v35 = vld [vmem:[%s1119_s0 + $0x8] ss:$28 sps:$4 sm:$0xff]   ;;  %574 = vmatprep.mubr.bf16.mxu1 %v878_v36  ;;  %v889_v49 = vld [vmem:[%s1118_s1 + $0x118] sm:$0xff]   ;;  %v891_v50 = vld [vmem:[%s1118_s1 + $0x150] sm:$0xff]  }
  0x10   :  { %757 = vmatprep.subr.bf16.mxu0 %v856_v16  ;;  %v884_v42 = vld [vmem:[%s1118_s1 + $0x1a8] sm:$0xff]   ;;  %v885_v44 = vld [vmem:[%s1118_s1 + $0x160] sm:$0xff]   ;;  %v893_v51 = vld [vmem:[%s1118_s1 + $0x190] sm:$0xff]  }
  0x11   :  { %778 = vmatpush3.bf16.msra.mxu1 %v855_v15  ;;  %v883_v43 = vld [vmem:[%s1118_s1 + $0x128] sm:$0xff]   ;;  %v887_v45 = vld [vmem:[%s1118_s1 + $0x1a0] sm:$0xff]   ;;  %v892_v52 = vld [vmem:[%s1118_s1 + $0x110] sm:$0xff]  }
  0x12   :  { %779 = vmatprep.subr.bf16.mxu1 %v858_v18  ;;  %v886_v46 = vld [vmem:[%s1118_s1 + $0x120] sm:$0xff]   ;;  %v894_v53 = vld [vmem:[%s1118_s1 + $0x148] sm:$0xff]   ;;  %v902_v55 = vld [vmem:[%s1119_s0 + $0x14] ss:$28 sps:$4 sm:$0xff]  }
  0x13   :  { %758 = vmatpush3.bf16.msra.mxu0 %v857_v17  ;;  %v896_v54 = vld [vmem:[%s1118_s1 + $0x188] sm:$0xff]   ;;  %v897_v57 = vld [vmem:[%s1118_s1 + $0x140] sm:$0xff]   ;;  %v903_v60 = vld [vmem:[%s1119_s0 + $0x18] ss:$28 sps:$4 sm:$0xff]  }
  0x14   :  { %759 = vmatprep.subr.bf16.mxu0 %v860_v20  ;;  %v895_v56 = vld [vmem:[%s1118_s1 + $0x108] sm:$0xff]   ;;  %v899_v58 = vld [vmem:[%s1118_s1 + $0x180] sm:$0xff]  }
  0x15   :  { %780 = vmatpush3.bf16.msra.mxu1 %v859_v19  ;;  %v898_v59 = vld [vmem:[%s1118_s1 + $0x100] sm:$0xff]   ;;  %v900_v61 = vld [vmem:[%s1119_s0 + $0x10] ss:$28 sps:$4 sm:$0xff]  }
  0x16   :  { %781 = vmatprep.subr.bf16.mxu1 %v862_v22  ;;  %v682_v6 = vld [vmem:[%s1120_s2] ss:$0 sm:$0xff] }
  0x17   :  { %760 = vmatpush3.bf16.msra.mxu0 %v861_v21 }
  0x18   :  { %761 = vmatprep.subr.bf16.mxu0 %v864_v24 }
  0x19   :  { %782 = vmatpush3.bf16.msra.mxu1 %v863_v23 }
  0x1a   :  { %783 = vmatprep.subr.bf16.mxu1 %v866_v26 }
  0x1b   :  { %762 = vmatpush3.bf16.msra.mxu0 %v865_v25 }
  0x1c   :  { %763 = vmatprep.subr.bf16.mxu0 %v868_v28 }
  0x1d   :  { %784 = vmatpush3.bf16.msra.mxu1 %v867_v27 }
  0x1e   :  { %785 = vmatprep.subr.bf16.mxu1 %v870_v30 }
  0x1f   :  { %764 = vmatpush3.bf16.msra.mxu0 %v869_v29 }
  0x20   :  { %793 = vmatprep.subr.bf16.mxu0 %v875_v34 }
  0x21   :  { %786 = vmatpush3.bf16.msra.mxu1 %v874_v33 }
  0x22   :  { %534 = vmatmul.mubr.bf16.vlgmr.msra.gmra.mxu0 %v871_v31  ;;  %822 = vmatprep.subr.bf16.mxu1 %v904_v38 }
  0x23   :  { %794 = vmatpush3.bf16.msra.mxu0 %v879_v37  ;;  %615 = vmatprep.mubr.bf16.mxu0 %v902_v55 }
  0x24   :  { %575 = vmatmul.mubr.bf16.vlgmr.msra.gmra.mxu1 %v876_v35  ;;  %795 = vmatprep.subr.bf16.mxu0 %v880_v39 }
  0x25   :  { %834 = vmatprep.mubr.msk.bf16.mxu1 %vm905_vm0, %v904_v38  ;;  %823 = vmatpush3.bf16.msra.mxu1 %v884_v42 }
  0x26   :  { %824 = vmatprep.subr.bf16.mxu1 %v904_v38 }
  0x27   :  { %796 = vmatpush3.bf16.msra.mxu0 %v881_v40 }
  0x28   :  { %797 = vmatprep.subr.bf16.mxu0 %v882_v41 }
  0x29   :  { %825 = vmatpush3.bf16.msra.mxu1 %v887_v45 }
  0x2a   :  { %826 = vmatprep.subr.bf16.mxu1 %v904_v38 }
  0x2b   :  { %798 = vmatpush3.bf16.msra.mxu0 %v883_v43 }
  0x2c   :  { %799 = vmatprep.subr.bf16.mxu0 %v885_v44 }
  0x2d   :  { %827 = vmatpush3.bf16.msra.mxu1 %v890_v48 }
  0x2e   :  { %828 = vmatprep.subr.bf16.mxu1 %v904_v38 }
  0x2f   :  { %800 = vmatpush3.bf16.msra.mxu0 %v886_v46 }
  0x30   :  { %801 = vmatprep.subr.bf16.mxu0 %v888_v47 }
  0x31   :  { %829 = vmatpush3.bf16.msra.mxu1 %v893_v51 }
  0x32   :  { %830 = vmatprep.subr.bf16.mxu1 %v904_v38 }
  0x33   :  { %802 = vmatpush3.bf16.msra.mxu0 %v889_v49 }
  0x34   :  { %803 = vmatprep.subr.bf16.mxu0 %v891_v50 }
  0x35   :  { %831 = vmatpush3.bf16.msra.mxu1 %v896_v54 }
  0x36   :  { %832 = vmatprep.subr.bf16.mxu1 %v904_v38 }
  0x37   :  { %804 = vmatpush3.bf16.msra.mxu0 %v892_v52 }
  0x38   :  { %805 = vmatprep.subr.bf16.mxu0 %v894_v53 }
  0x39   :  { %833 = vmatpush3.bf16.msra.mxu1 %v899_v58 }
  0x3b   :  { %806 = vmatpush3.bf16.msra.mxu0 %v895_v56 }
  0x3c   :  { %807 = vmatprep.subr.bf16.mxu0 %v897_v57  ;;  %835 = vmatmul.mubr.msk.bf16.vlgmr.msra.gmra.mxu1 %vm497_vm1, %v903_v60 }
  0x3f   :  { %808 = vmatpush3.bf16.msra.mxu0 %v898_v59 }
  0x42   :  { %616 = vmatmul.mubr.bf16.vlgmr.msra.gmra.mxu0 %v900_v61 }
  0xe2   :  { %v765_v63 = vpop.f32.mrf.mxu0 }
  0xe4   :  { %v787_v62 = vpop.f32.mrf.mxu1  ;;  %v766_v1 = vpop.f32.mrf.mxu0 }
  0xe5   :  { %v767_v4 = vadd.f32 %v766_v1, %v765_v63 }
  0xe6   :  { %v788_v0 = vpop.f32.mrf.mxu1  ;;  %v768_v3 = vpop.f32.mrf.mxu0 }
  0xe7   :  { %v536_v9 = vadd.f32 %v767_v4, %v682_v6  ;;  %v789_v10 = vadd.f32 %v788_v0, %v787_v62 }
  0xe8   :  { %v790_v2 = vpop.f32.mrf.mxu1  ;;  %v769_v7 = vpop.f32.mrf.mxu0 }
  0xe9   :  { %v770_v11 = vadd.f32 %v769_v7, %v768_v3  ;;  %v577_v16 = vadd.f32 %v789_v10, %v536_v9 }
  0xea   :  { %v791_v5 = vpop.f32.mrf.mxu1 }
  0xeb   :  { %v539_v17 = vadd.f32 %v770_v11, %v682_v6  ;;  %v792_v18 = vadd.f32 %v791_v5, %v790_v2 }
  0xed   :  { %v580_v24 = vadd.f32 %v792_v18, %v539_v17 }
  0xfc   :  { %v658_v8 = vpop.f32.mrf.mxu1 }
  0xfe   :  { %v836_v12 = vpop.f32.mrf.mxu1 }
 0x100   :  { %v661_v14 = vpop.f32.mrf.mxu1 }
 0x102   :  { %v809_v13 = vpop.f32.mrf.mxu0  ;;  %v837_v20 = vpop.f32.mrf.mxu1 }
 0x104   :  { %v810_v15 = vpop.f32.mrf.mxu0 }
 0x105   :  { %v811_v19 = vadd.f32 %v810_v15, %v809_v13 }
 0x106   :  { %v812_v21 = vpop.f32.mrf.mxu0 }
 0x107   :  { %v618_v22 = vadd.f32 %v811_v19, %v577_v16 }
 0x108   :  { %v813_v23 = vpop.f32.mrf.mxu0 }
 0x109   :  { %v659_v25 = vadd.f32 %v658_v8, %v618_v22  ;;  %v814_v26 = vadd.f32 %v813_v23, %v812_v21 }
 0x10b   :  { %v665_v27 = vmax.f32 %v659_v25, 0.0  ;;  %v621_v28 = vadd.f32 %v814_v26, %v580_v24 }
 0x10d   :  { %v747_v29 = vpack.c.bf16 %v665_v27, %v665_v27  ;;  %v662_v30 = vadd.f32 %v661_v14, %v621_v28 }
 0x10f   :  { %676 = vst.msk [vmem:[%s1121_s3] sm:$0xf] %vm675_vm2, %v747_v29  ;;  %v666_v31 = vmax.f32 %v662_v30, 0.0 }
 0x111   :  { %v748_v32 = vpack.c.bf16 %v666_v31, %v666_v31 }
 0x113   :  { %677 = vst.msk [vmem:[%s1121_s3 + $0x4] sm:$0xf] %vm675_vm2, %v748_v32 }

// kernel: encoder_conv_only_forward.11
= control target key start
LH: loop header
LB: loop body
LE: loop exit
PB: predicated region body
PF: predicated region fallthrough
CT: control target
= control target key end

     0   :  { %v527_v1 = vmov 0   ;;  %vm91_vm0 = vcmask 523264   ;;  %v36_v42 = vlaneseq  ;;  %s704_s2 = inlined_call_operand.vmem [shape: bf16[64,256], index: 2, kind: input, shape index: {}]   ;;  %s705_s0 = inlined_call_operand.vmem [shape: bf16[16,64], index: 0, kind: input, shape index: {}]   ;;  %s706_s4 = inlined_call_operand.vmem [shape: bf16[256,256], index: 4, kind: input, shape index: {}]   ;;  %s707_s3 = inlined_call_operand.vmem [shape: f32[1,256], index: 3, kind: input, shape index: {}]   ;;  %s708_s1 = inlined_call_operand.vmem [shape: bf16[16,256], index: 1, kind: input, shape index: {}]   ;;  %s709_s5 = inlined_call_operand.vmem [shape: f32[1,256], index: 5, kind: input, shape index: {}]   ;;  %s710_s6 = inlined_call_operand.vmem [shape: bf16[16,256], index: 6, kind: output, shape index: {}]  }
   0x1   :  { %v466_v0 = vld [vmem:[%s704_s2 + $0x34] ss:$8 sps:$4 sm:$0xff]   ;;  %127 = vmatprep.mubr.bf16.mxu0 %v527_v1  ;;  %v468_v2 = vld [vmem:[%s704_s2 + $0x30] ss:$8 sps:$4 sm:$0xff]   ;;  %v469_v3 = vld [vmem:[%s704_s2 + $0x24] ss:$8 sps:$4 sm:$0xff]  }
   0x2   :  { %103 = vmatprep.subr.bf16.mxu0 %v466_v0  ;;  %v471_v4 = vld [vmem:[%s704_s2 + $0x20] ss:$8 sps:$4 sm:$0xff]   ;;  %v472_v5 = vld [vmem:[%s704_s2 + $0x14] ss:$8 sps:$4 sm:$0xff]   ;;  %v474_v6 = vld [vmem:[%s704_s2 + $0x10] ss:$8 sps:$4 sm:$0xff]  }
   0x3   :  { %104 = vmatpush1.bf16.msra.mxu0 %v468_v2  ;;  %v479_v7 = vld [vmem:[%s706_s4 + $0x74] ss:$8 sps:$4 sm:$0xff]   ;;  %v481_v8 = vld [vmem:[%s706_s4 + $0x70] ss:$8 sps:$4 sm:$0xff]   ;;  %v475_v9 = vld [vmem:[%s704_s2 + $0x4] ss:$8 sps:$4 sm:$0xff]  }
   0x4   :  { %105 = vmatprep.subr.bf16.mxu0 %v469_v3  ;;  %v482_v10 = vld [vmem:[%s706_s4 + $0x64] ss:$8 sps:$4 sm:$0xff]   ;;  %354 = vmatprep.subr.bf16.mxu1 %v479_v7  ;;  %v484_v11 = vld [vmem:[%s706_s4 + $0x60] ss:$8 sps:$4 sm:$0xff]   ;;  %v485_v13 = vld [vmem:[%s706_s4 + $0x54] ss:$8 sps:$4 sm:$0xff]  }
   0x5   :  { %355 = vmatpush1.bf16.msra.mxu1 %v481_v8  ;;  %v477_v12 = vld [vmem:[%s704_s2] ss:$8 sps:$4 sm:$0xff]   ;;  %v487_v15 = vld [vmem:[%s706_s4 + $0x50] ss:$8 sps:$4 sm:$0xff]   ;;  %v488_v16 = vld [vmem:[%s706_s4 + $0x44] ss:$8 sps:$4 sm:$0xff]  }
   0x6   :  { %356 = vmatprep.subr.bf16.mxu1 %v482_v10  ;;  %v478_v14 = vld [vmem:[%s705_s0] sm:$0xff]   ;;  %v491_v18 = vld [vmem:[%s706_s4 + $0x34] ss:$8 sps:$4 sm:$0xff]   ;;  %v493_v19 = vld [vmem:[%s706_s4 + $0x30] ss:$8 sps:$4 sm:$0xff]   ;;  %v37_v43 = vshrl.u32 %v36_v42, 7 }
   0x7   :  { %106 = vmatpush1.bf16.msra.mxu0 %v471_v4  ;;  %v490_v17 = vld [vmem:[%s706_s4 + $0x40] ss:$8 sps:$4 sm:$0xff]   ;;  %v494_v20 = vld [vmem:[%s706_s4 + $0x24] ss:$8 sps:$4 sm:$0xff]   ;;  %v497_v22 = vld [vmem:[%s706_s4 + $0x14] ss:$8 sps:$4 sm:$0xff]  }
   0x8   :  { %107 = vmatprep.subr.bf16.mxu0 %v472_v5  ;;  %v496_v21 = vld [vmem:[%s706_s4 + $0x20] ss:$8 sps:$4 sm:$0xff]   ;;  %v499_v23 = vld [vmem:[%s706_s4 + $0x10] ss:$8 sps:$4 sm:$0xff]   ;;  %v500_v24 = vld [vmem:[%s706_s4 + $0x4] ss:$8 sps:$4 sm:$0xff]  }
   0x9   :  { %357 = vmatpush1.bf16.msra.mxu1 %v484_v11  ;;  %v502_v25 = vld [vmem:[%s706_s4] ss:$8 sps:$4 sm:$0xff]   ;;  %v503_v26 = vld [vmem:[%s706_s4 + $0xf4] ss:$8 sps:$4 sm:$0xff]   ;;  %v505_v27 = vld [vmem:[%s706_s4 + $0xf0] ss:$8 sps:$4 sm:$0xff]  }
   0xa   :  { %358 = vmatprep.subr.bf16.mxu1 %v485_v13  ;;  %v506_v28 = vld [vmem:[%s706_s4 + $0xe4] ss:$8 sps:$4 sm:$0xff]   ;;  %v508_v29 = vld [vmem:[%s706_s4 + $0xe0] ss:$8 sps:$4 sm:$0xff]   ;;  %v509_v30 = vld [vmem:[%s706_s4 + $0xd4] ss:$8 sps:$4 sm:$0xff]  }
   0xb   :  { %108 = vmatpush1.bf16.msra.mxu0 %v474_v6  ;;  %v511_v31 = vld [vmem:[%s706_s4 + $0xd0] ss:$8 sps:$4 sm:$0xff]   ;;  %v512_v32 = vld [vmem:[%s706_s4 + $0xc4] ss:$8 sps:$4 sm:$0xff]   ;;  %v514_v33 = vld [vmem:[%s706_s4 + $0xc0] ss:$8 sps:$4 sm:$0xff]  }
   0xc   :  { %109 = vmatprep.subr.bf16.mxu0 %v475_v9  ;;  %v515_v34 = vld [vmem:[%s706_s4 + $0xb4] ss:$8 sps:$4 sm:$0xff]   ;;  %v517_v35 = vld [vmem:[%s706_s4 + $0xb0] ss:$8 sps:$4 sm:$0xff]   ;;  %v518_v36 = vld [vmem:[%s706_s4 + $0xa4] ss:$8 sps:$4 sm:$0xff]  }
   0xd   :  { %359 = vmatpush1.bf16.msra.mxu1 %v487_v15  ;;  %v520_v37 = vld [vmem:[%s706_s4 + $0xa0] ss:$8 sps:$4 sm:$0xff]   ;;  %v521_v38 = vld [vmem:[%s706_s4 + $0x94] ss:$8 sps:$4 sm:$0xff]   ;;  %v523_v39 = vld [vmem:[%s706_s4 + $0x90] ss:$8 sps:$4 sm:$0xff]  }
   0xe   :  { %360 = vmatprep.subr.bf16.mxu1 %v488_v16  ;;  %v524_v40 = vld [vmem:[%s706_s4 + $0x84] ss:$8 sps:$4 sm:$0xff]   ;;  %v526_v41 = vld [vmem:[%s706_s4 + $0x80] ss:$8 sps:$4 sm:$0xff]   ;;  %v42_v44 = vsub.s32 1, %v37_v43  ;;  %v38_v45 = vsub.s32 0, %v37_v43 }
   0xf   :  { %110 = vmatpush1.bf16.msra.mxu0 %v477_v12  ;;  %v34_v46 = vld [vmem:[%s707_s3] sm:$0x3]  ;;  %v139_v49 = vld [vmem:[%s708_s1 + $0x8] sm:$0xff] }
  0x10   :  { %v43_v48 = vrot.slane %v34_v46, %v42_v44  ;;  %v39_v50 = vrot.slane %v34_v46, %v38_v45  ;;  %v138_v52 = vld [vmem:[%s708_s1] sm:$0xff]  ;;  %v142_v54 = vunpack.c.l.bf16 %v139_v49  ;;  %v143_v58 = vunpack.c.h.bf16 %v139_v49 }
  0x11   :  { %361 = vmatpush1.bf16.msra.mxu1 %v490_v17  ;;  %v141_v57 = vunpack.c.h.bf16 %v138_v52  ;;  %v140_v60 = vunpack.c.l.bf16 %v138_v52  ;;  %v182_v5 = vld [vmem:[%s709_s5] sm:$0x3] }
  0x12   :  { %428 = vmatmul.mubr.msk.bf16.vlgmr.msra.gmra.mxu0 %vm91_vm0, %v478_v14  ;;  %362 = vmatprep.subr.bf16.mxu1 %v491_v18  ;;  %v187_v6 = vrot.slane %v182_v5, %v38_v45  ;;  %v191_v7 = vrot.slane %v182_v5, %v42_v44 }
  0x15   :  { %363 = vmatpush1.bf16.msra.mxu1 %v493_v19 }
  0x16   :  { %364 = vmatprep.subr.bf16.mxu1 %v494_v20 }
  0x19   :  { %365 = vmatpush1.bf16.msra.mxu1 %v496_v21 }
  0x1a   :  { %366 = vmatprep.subr.bf16.mxu1 %v497_v22 }
  0x1d   :  { %367 = vmatpush1.bf16.msra.mxu1 %v499_v23 }
  0x1e   :  { %368 = vmatprep.subr.bf16.mxu1 %v500_v24 }
  0x21   :  { %369 = vmatpush1.bf16.msra.mxu1 %v502_v25 }
  0x22   :  { %370 = vmatprep.subr.bf16.mxu1 %v503_v26 }
  0x25   :  { %371 = vmatpush2.bf16.msra.mxu1 %v505_v27 }
  0x26   :  { %372 = vmatprep.subr.bf16.mxu1 %v506_v28 }
  0x29   :  { %373 = vmatpush2.bf16.msra.mxu1 %v508_v29 }
  0x2a   :  { %374 = vmatprep.subr.bf16.mxu1 %v509_v30 }
  0x2d   :  { %375 = vmatpush2.bf16.msra.mxu1 %v511_v31 }
  0x2e   :  { %376 = vmatprep.subr.bf16.mxu1 %v512_v32 }
  0x31   :  { %377 = vmatpush2.bf16.msra.mxu1 %v514_v33 }
  0x32   :  { %378 = vmatprep.subr.bf16.mxu1 %v515_v34 }
  0x35   :  { %379 = vmatpush2.bf16.msra.mxu1 %v517_v35 }
  0x36   :  { %380 = vmatprep.subr.bf16.mxu1 %v518_v36 }
  0x39   :  { %381 = vmatpush2.bf16.msra.mxu1 %v520_v37 }
  0x3a   :  { %382 = vmatprep.subr.bf16.mxu1 %v521_v38 }
  0x3d   :  { %383 = vmatpush2.bf16.msra.mxu1 %v523_v39 }
  0x3e   :  { %384 = vmatprep.subr.bf16.mxu1 %v524_v40 }
  0x41   :  { %385 = vmatpush2.bf16.msra.mxu1 %v526_v41 }
  0xd2   :  { %v129_v47 = vpop.f32.mrf.mxu0 }
  0xd3   :  { %v130_v59 = vadd.f32 %v129_v47, %v39_v50 }
  0xd4   :  { %v131_v51 = vpop.f32.mrf.mxu0 }
  0xd5   :  { %v132_v55 = vadd.f32 %v131_v51, %v43_v48  ;;  %v144_v2 = vadd.f32 %v140_v60, %v130_v59 }
  0xd6   :  { %v133_v53 = vpop.f32.mrf.mxu0 }
  0xd7   :  { %v134_v56 = vadd.f32 %v133_v53, %v39_v50  ;;  %v145_v0 = vadd.f32 %v141_v57, %v132_v55 }
  0xd8   :  { %v135_v61 = vpop.f32.mrf.mxu0 }
  0xd9   :  { %v136_v62 = vadd.f32 %v135_v61, %v43_v48  ;;  %v146_v63 = vadd.f32 %v142_v54, %v134_v56 }
  0xdb   :  { %v147_v1 = vadd.f32 %v143_v58, %v136_v62  ;;  %v148_v4 = vpack.c.bf16 %v146_v63, %v144_v2 }
  0xdd   :  { %v149_v3 = vpack.c.bf16 %v147_v1, %v145_v0 }
  0xdf   :  { %386 = vmatprep.mubr.bf16.mxu1 %v149_v3 }
  0xe0   :  { %387 = vmatmul.mubr.bf16.vlgmr.msra.gmra.mxu1 %v148_v4 }
 0x1a0   :  { %v388_v8 = vpop.f32.mrf.mxu1 }
 0x1a1   :  { %v389_v9 = vadd.f32 %v388_v8, %v187_v6 }
 0x1a2   :  { %v390_v10 = vpop.f32.mrf.mxu1 }
 0x1a3   :  { %v391_v11 = vadd.f32 %v390_v10, %v191_v7  ;;  %v397_v13 = vmax.f32 %v389_v9, 0.0 }
 0x1a4   :  { %v392_v12 = vpop.f32.mrf.mxu1 }
 0x1a5   :  { %v398_v14 = vmax.f32 %v391_v11, 0.0  ;;  %v393_v15 = vadd.f32 %v392_v12, %v187_v6 }
 0x1a6   :  { %v394_v16 = vpop.f32.mrf.mxu1 }
 0x1a7   :  { %v463_v17 = vpack.c.bf16 %v398_v14, %v397_v13  ;;  %v395_v18 = vadd.f32 %v394_v16, %v191_v7  ;;  %v399_v19 = vmax.f32 %v393_v15, 0.0 }
 0x1a9   :  { %413 = vst [vmem:[%s710_s6] sm:$0xff] %v463_v17  ;;  %v400_v20 = vmax.f32 %v395_v18, 0.0 }
 0x1ab   :  { %v464_v21 = vpack.c.bf16 %v400_v20, %v399_v19 }
 0x1ad   :  { %414 = vst [vmem:[%s710_s6 + $0x8] sm:$0xff] %v464_v21 }

// kernel: encoder_conv_only_forward.12
= control target key start
LH: loop header
LB: loop body
LE: loop exit
PB: predicated region body
PF: predicated region fallthrough
CT: control target
= control target key end

     0   :  { %vm103_vm0 = vcmask 261120   ;;  %s976_s2 = inlined_call_operand.vmem [shape: bf16[32,128], index: 2, kind: input, shape index: {}]   ;;  %s977_s0 = inlined_call_operand.vmem [shape: bf16[128,32], index: 0, kind: input, shape index: {}]   ;;  %s978_s4 = inlined_call_operand.vmem [shape: bf16[128,128], index: 4, kind: input, shape index: {}]   ;;  %s979_s1 = inlined_call_operand.vmem [shape: bf16[128,128], index: 1, kind: input, shape index: {}]   ;;  %s980_s3 = inlined_call_operand.vmem [shape: f32[1,128], index: 3, kind: input, shape index: {}]   ;;  %s981_s5 = inlined_call_operand.vmem [shape: f32[1,128], index: 5, kind: input, shape index: {}]   ;;  %s982_s6 = inlined_call_operand.vmem [shape: bf16[128,128], index: 6, kind: output, shape index: {}]  }
   0x1   :  { %v789_v0 = vld [vmem:[%s976_s2 + $0x8] sm:$0xff]   ;;  %v790_v1 = vld [vmem:[%s976_s2] sm:$0xff]   ;;  %v793_v4 = vld [vmem:[%s977_s0 + $0x10] sm:$0xff]  }
   0x2   :  { %721 = vmatprep.subr.bf16.mxu0 %v789_v0  ;;  %v791_v2 = vld [vmem:[%s977_s0] sm:$0xff]   ;;  %v792_v3 = vld [vmem:[%s977_s0 + $0x8] sm:$0xff]   ;;  %v799_v5 = vld [vmem:[%s978_s4 + $0x38] sm:$0xff]  }
   0x3   :  { %722 = vmatpush3.bf16.msra.mxu0 %v789_v0  ;;  %725 = vmatprep.mubr.msk.bf16.mxu0 %vm103_vm0, %v791_v2  ;;  %v800_v6 = vld [vmem:[%s978_s4 + $0x30] sm:$0xff]   ;;  %v794_v7 = vld [vmem:[%s977_s0 + $0x18] sm:$0xff]   ;;  %v795_v8 = vld [vmem:[%s977_s0 + $0x20] sm:$0xff]  }
   0x4   :  { %723 = vmatprep.subr.bf16.mxu0 %v790_v1  ;;  %773 = vmatprep.subr.bf16.mxu1 %v799_v5  ;;  %v801_v9 = vld [vmem:[%s978_s4 + $0x28] sm:$0xff]   ;;  %v802_v10 = vld [vmem:[%s978_s4 + $0x20] sm:$0xff]   ;;  %v803_v12 = vld [vmem:[%s978_s4 + $0x18] sm:$0xff]  }
   0x5   :  { %781 = vmatpush3.bf16.msra.mxu1 %v799_v5  ;;  %v796_v11 = vld [vmem:[%s977_s0 + $0x28] sm:$0xff]   ;;  %v797_v13 = vld [vmem:[%s977_s0 + $0x30] sm:$0xff]   ;;  %v798_v14 = vld [vmem:[%s977_s0 + $0x38] sm:$0xff]  }
   0x6   :  { %774 = vmatprep.subr.bf16.mxu1 %v800_v6  ;;  %v804_v15 = vld [vmem:[%s978_s4 + $0x10] sm:$0xff]   ;;  %v805_v16 = vld [vmem:[%s978_s4 + $0x8] sm:$0xff]   ;;  %v806_v17 = vld [vmem:[%s978_s4] sm:$0xff]  }
   0x7   :  { %724 = vmatpush3.bf16.msra.mxu0 %v790_v1  ;;  %v610_v20 = vld [vmem:[%s979_s1] sm:$0xff]   ;;  %v681_v22 = vld [vmem:[%s979_s1 + $0x8] sm:$0xff]   ;;  %v682_v39 = vld [vmem:[%s979_s1 + $0x10] sm:$0xff]  }
   0x8   :  { %741 = vmatprep.subr.bf16.mxu0 %v799_v5  ;;  %v910_v21 = vld [vmem:[%s980_s3] ss:$0 sm:$0xff]  ;;  %v616_v24 = vunpack.c.h.bf16 %v681_v22  ;;  %v611_v26 = vunpack.c.l.bf16 %v610_v20  ;;  %v612_v28 = vunpack.c.h.bf16 %v610_v20  ;;  %v615_v30 = vunpack.c.l.bf16 %v681_v22  ;;  %v683_v40 = vld [vmem:[%s979_s1 + $0x18] sm:$0xff]   ;;  %v685_v60 = vld [vmem:[%s979_s1 + $0x28] sm:$0xff]  }
   0x9   :  { %782 = vmatpush3.bf16.msra.mxu1 %v800_v6  ;;  %v624_v44 = vunpack.c.h.bf16 %v683_v40  ;;  %v619_v47 = vunpack.c.l.bf16 %v682_v39  ;;  %v620_v48 = vunpack.c.h.bf16 %v682_v39  ;;  %v623_v50 = vunpack.c.l.bf16 %v683_v40  ;;  %v684_v59 = vld [vmem:[%s979_s1 + $0x20] sm:$0xff]  }
   0xa   :  { %726 = vmatmul.mubr.msk.bf16.vlgmr.msra.gmra.mxu0 %vm103_vm0, %v792_v3  ;;  %775 = vmatprep.subr.bf16.mxu1 %v801_v9  ;;  %v632_v63 = vunpack.c.h.bf16 %v685_v60  ;;  %v627_v2 = vunpack.c.l.bf16 %v684_v59 }
   0xb   :  { %729 = vmatprep.mubr.msk.bf16.mxu0 %vm103_vm0, %v793_v4  ;;  %742 = vmatpush3.bf16.msra.mxu0 %v799_v5  ;;  %v628_v4 = vunpack.c.h.bf16 %v684_v59 }
   0xc   :  { %743 = vmatprep.subr.bf16.mxu0 %v800_v6 }
   0xd   :  { %783 = vmatpush3.bf16.msra.mxu1 %v801_v9 }
   0xe   :  { %776 = vmatprep.subr.bf16.mxu1 %v802_v10 }
   0xf   :  { %744 = vmatpush3.bf16.msra.mxu0 %v800_v6  ;;  %v631_v6 = vunpack.c.l.bf16 %v685_v60 }
  0x10   :  { %745 = vmatprep.subr.bf16.mxu0 %v801_v9 }
  0x11   :  { %784 = vmatpush3.bf16.msra.mxu1 %v802_v10 }
  0x12   :  { %730 = vmatmul.mubr.msk.bf16.gmra.mxu0 %vm103_vm0, %v794_v7  ;;  %777 = vmatprep.subr.bf16.mxu1 %v803_v12 }
  0x13   :  { %733 = vmatprep.mubr.msk.bf16.mxu0 %vm103_vm0, %v795_v8  ;;  %746 = vmatpush3.bf16.msra.mxu0 %v801_v9 }
  0x14   :  { %747 = vmatprep.subr.bf16.mxu0 %v802_v10 }
  0x15   :  { %785 = vmatpush3.bf16.msra.mxu1 %v803_v12 }
  0x16   :  { %778 = vmatprep.subr.bf16.mxu1 %v804_v15 }
  0x17   :  { %748 = vmatpush3.bf16.msra.mxu0 %v802_v10 }
  0x18   :  { %749 = vmatprep.subr.bf16.mxu0 %v803_v12 }
  0x19   :  { %786 = vmatpush3.bf16.msra.mxu1 %v804_v15 }
  0x1a   :  { %734 = vmatmul.mubr.msk.bf16.gmra.mxu0 %vm103_vm0, %v796_v11  ;;  %779 = vmatprep.subr.bf16.mxu1 %v805_v16 }
  0x1b   :  { %737 = vmatprep.mubr.msk.bf16.mxu0 %vm103_vm0, %v797_v13  ;;  %750 = vmatpush3.bf16.msra.mxu0 %v803_v12 }
  0x1c   :  { %751 = vmatprep.subr.bf16.mxu0 %v804_v15 }
  0x1d   :  { %787 = vmatpush3.bf16.msra.mxu1 %v805_v16 }
  0x1e   :  { %780 = vmatprep.subr.bf16.mxu1 %v806_v17 }
  0x1f   :  { %752 = vmatpush3.bf16.msra.mxu0 %v804_v15  ;;  %v686_v15 = vld [vmem:[%s979_s1 + $0x30] sm:$0xff]  }
  0x20   :  { %753 = vmatprep.subr.bf16.mxu0 %v805_v16 }
  0x21   :  { %788 = vmatpush3.bf16.msra.mxu1 %v806_v17 }
  0x22   :  { %738 = vmatmul.mubr.msk.bf16.gmra.mxu0 %vm103_vm0, %v798_v14 }
  0x23   :  { %754 = vmatpush3.bf16.msra.mxu0 %v805_v16  ;;  %v687_v16 = vld [vmem:[%s979_s1 + $0x38] sm:$0xff]  }
  0x24   :  { %755 = vmatprep.subr.bf16.mxu0 %v806_v17 }
  0x27   :  { %756 = vmatpush3.bf16.msra.mxu0 %v806_v17 }
  0xca   :  { %v727_v18 = vpop.f32.mrf.mxu0 }
  0xcb   :  { %v171_v29 = vadd.f32 %v727_v18, %v910_v21 }
  0xcc   :  { %v162_v19 = vpop.f32.mrf.mxu0 }
  0xcd   :  { %v163_v25 = vadd.f32 %v910_v21, %v162_v19  ;;  %v259_v37 = vadd.f32 %v615_v30, %v171_v29  ;;  %v640_v19 = vunpack.c.h.bf16 %v687_v16 }
  0xce   :  { %v728_v23 = vpop.f32.mrf.mxu0 }
  0xcf   :  { %v174_v27 = vadd.f32 %v728_v23, %v910_v21  ;;  %v257_v35 = vadd.f32 %v611_v26, %v163_v25  ;;  %v635_v23 = vunpack.c.l.bf16 %v686_v15  ;;  %v636_v25 = vunpack.c.h.bf16 %v686_v15 }
  0xd0   :  { %v165_v31 = vpop.f32.mrf.mxu0 }
  0xd1   :  { %v166_v32 = vadd.f32 %v910_v21, %v165_v31  ;;  %v260_v33 = vadd.f32 %v616_v24, %v174_v27  ;;  %v639_v27 = vunpack.c.l.bf16 %v687_v16 }
  0xd2   :  { %v731_v34 = vpop.f32.mrf.mxu0 }
  0xd3   :  { %v258_v36 = vadd.f32 %v612_v28, %v166_v32  ;;  %v274_v42 = vpack.c.bf16 %v260_v33, %v259_v37  ;;  %v187_v49 = vadd.f32 %v731_v34, %v910_v21  ;;  %v568_v37 = vld [vmem:[%s981_s5] ss:$0 sm:$0xff] }
  0xd4   :  { %v178_v38 = vpop.f32.mrf.mxu0 }
  0xd5   :  { %v273_v41 = vpack.c.bf16 %v258_v36, %v257_v35  ;;  %v179_v45 = vadd.f32 %v910_v21, %v178_v38  ;;  %v263_v57 = vadd.f32 %v623_v50, %v187_v49 }
  0xd6   :  { %v732_v43 = vpop.f32.mrf.mxu0 }
  0xd7   :  { %v190_v46 = vadd.f32 %v732_v43, %v910_v21  ;;  %757 = vmatprep.mubr.bf16.mxu0 %v273_v41  ;;  %v261_v55 = vadd.f32 %v619_v47, %v179_v45 }
  0xd8   :  { %v181_v51 = vpop.f32.mrf.mxu0  ;;  %758 = vmatmul.mubr.bf16.vlgmr.msra.gmra.mxu0 %v274_v42 }
  0xd9   :  { %v182_v52 = vadd.f32 %v910_v21, %v181_v51  ;;  %v264_v53 = vadd.f32 %v624_v44, %v190_v46 }
  0xda   :  { %v735_v54 = vpop.f32.mrf.mxu0 }
  0xdb   :  { %v262_v56 = vadd.f32 %v620_v48, %v182_v52  ;;  %v276_v0 = vpack.c.bf16 %v264_v53, %v263_v57  ;;  %v203_v5 = vadd.f32 %v735_v54, %v910_v21 }
  0xdc   :  { %v194_v58 = vpop.f32.mrf.mxu0 }
  0xdd   :  { %v275_v61 = vpack.c.bf16 %v262_v56, %v261_v55  ;;  %v195_v1 = vadd.f32 %v910_v21, %v194_v58  ;;  %v267_v13 = vadd.f32 %v631_v6, %v203_v5 }
  0xde   :  { %v736_v62 = vpop.f32.mrf.mxu0 }
  0xdf   :  { %v206_v3 = vadd.f32 %v736_v62, %v910_v21  ;;  %761 = vmatprep.mubr.bf16.mxu1 %v275_v61  ;;  %v265_v11 = vadd.f32 %v627_v2, %v195_v1 }
  0xe0   :  { %v197_v7 = vpop.f32.mrf.mxu0  ;;  %762 = vmatmul.mubr.bf16.vlgmr.msra.gmra.mxu1 %v276_v0 }
  0xe1   :  { %v198_v8 = vadd.f32 %v910_v21, %v197_v7  ;;  %v268_v9 = vadd.f32 %v632_v63, %v206_v3 }
  0xe2   :  { %v739_v10 = vpop.f32.mrf.mxu0 }
  0xe3   :  { %v266_v12 = vadd.f32 %v628_v4, %v198_v8  ;;  %v278_v20 = vpack.c.bf16 %v268_v9, %v267_v13  ;;  %v219_v26 = vadd.f32 %v739_v10, %v910_v21 }
  0xe4   :  { %v210_v14 = vpop.f32.mrf.mxu0 }
  0xe5   :  { %v277_v17 = vpack.c.bf16 %v266_v12, %v265_v11  ;;  %v211_v22 = vadd.f32 %v910_v21, %v210_v14  ;;  %v271_v33 = vadd.f32 %v639_v27, %v219_v26 }
  0xe6   :  { %v740_v18 = vpop.f32.mrf.mxu0 }
  0xe7   :  { %v222_v24 = vadd.f32 %v740_v18, %v910_v21  ;;  %765 = vmatprep.mubr.bf16.mxu1 %v277_v17  ;;  %v269_v31 = vadd.f32 %v635_v23, %v211_v22 }
  0xe8   :  { %v213_v28 = vpop.f32.mrf.mxu0  ;;  %766 = vmatmul.mubr.bf16.gmra.mxu1 %v278_v20 }
  0xe9   :  { %v214_v29 = vadd.f32 %v910_v21, %v213_v28  ;;  %v272_v30 = vadd.f32 %v640_v19, %v222_v24 }
  0xeb   :  { %v270_v32 = vadd.f32 %v636_v25, %v214_v29  ;;  %v280_v35 = vpack.c.bf16 %v272_v30, %v271_v33 }
  0xed   :  { %v279_v34 = vpack.c.bf16 %v270_v32, %v269_v31 }
  0xef   :  { %769 = vmatprep.mubr.bf16.mxu1 %v279_v34 }
  0xf0   :  { %770 = vmatmul.mubr.bf16.gmra.mxu1 %v280_v35 }
 0x198   :  { %v759_v36 = vpop.f32.mrf.mxu0 }
 0x199   :  { %v395_v39 = vadd.f32 %v759_v36, %v568_v37 }
 0x19a   :  { %v386_v38 = vpop.f32.mrf.mxu0 }
 0x19b   :  { %v387_v41 = vadd.f32 %v568_v37, %v386_v38  ;;  %v451_v21 = vmax.f32 %v395_v39, 0.0 }
 0x19c   :  { %v760_v40 = vpop.f32.mrf.mxu0 }
 0x19d   :  { %v398_v42 = vadd.f32 %v760_v40, %v568_v37  ;;  %v449_v47 = vmax.f32 %v387_v41, 0.0 }
 0x19e   :  { %v389_v43 = vpop.f32.mrf.mxu0 }
 0x19f   :  { %v452_v44 = vmax.f32 %v398_v42, 0.0  ;;  %v390_v45 = vadd.f32 %v568_v37, %v389_v43 }
 0x1a0   :  { %v763_v46 = vpop.f32.mrf.mxu1 }
 0x1a1   :  { %v649_v48 = vpack.c.bf16 %v452_v44, %v451_v21  ;;  %v450_v49 = vmax.f32 %v390_v45, 0.0  ;;  %v411_v52 = vadd.f32 %v763_v46, %v568_v37 }
 0x1a2   :  { %v402_v50 = vpop.f32.mrf.mxu1 }
 0x1a3   :  { %688 = vst [vmem:[%s982_s6 + $0x8] sm:$0xff] %v649_v48   ;;  %v644_v51 = vpack.c.bf16 %v450_v49, %v449_v47  ;;  %v403_v54 = vadd.f32 %v568_v37, %v402_v50  ;;  %v455_v57 = vmax.f32 %v411_v52, 0.0 }
 0x1a4   :  { %v764_v53 = vpop.f32.mrf.mxu1 }
 0x1a5   :  { %645 = vst [vmem:[%s982_s6] sm:$0xff] %v644_v51   ;;  %v414_v55 = vadd.f32 %v764_v53, %v568_v37  ;;  %v453_v61 = vmax.f32 %v403_v54, 0.0 }
 0x1a6   :  { %v405_v56 = vpop.f32.mrf.mxu1 }
 0x1a7   :  { %v456_v58 = vmax.f32 %v414_v55, 0.0  ;;  %v406_v59 = vadd.f32 %v568_v37, %v405_v56 }
 0x1a8   :  { %v767_v60 = vpop.f32.mrf.mxu1 }
 0x1a9   :  { %v659_v62 = vpack.c.bf16 %v456_v58, %v455_v57  ;;  %v454_v63 = vmax.f32 %v406_v59, 0.0  ;;  %v427_v2 = vadd.f32 %v767_v60, %v568_v37 }
 0x1aa   :  { %v418_v0 = vpop.f32.mrf.mxu1 }
 0x1ab   :  { %690 = vst [vmem:[%s982_s6 + $0x18] sm:$0xff] %v659_v62   ;;  %v654_v1 = vpack.c.bf16 %v454_v63, %v453_v61  ;;  %v419_v4 = vadd.f32 %v568_v37, %v418_v0  ;;  %v459_v7 = vmax.f32 %v427_v2, 0.0 }
 0x1ac   :  { %v768_v3 = vpop.f32.mrf.mxu1 }
 0x1ad   :  { %689 = vst [vmem:[%s982_s6 + $0x10] sm:$0xff] %v654_v1   ;;  %v430_v5 = vadd.f32 %v768_v3, %v568_v37  ;;  %v457_v11 = vmax.f32 %v419_v4, 0.0 }
 0x1ae   :  { %v421_v6 = vpop.f32.mrf.mxu1 }
 0x1af   :  { %v460_v8 = vmax.f32 %v430_v5, 0.0  ;;  %v422_v9 = vadd.f32 %v568_v37, %v421_v6 }
 0x1b0   :  { %v771_v10 = vpop.f32.mrf.mxu1 }
 0x1b1   :  { %v669_v12 = vpack.c.bf16 %v460_v8, %v459_v7  ;;  %v458_v13 = vmax.f32 %v422_v9, 0.0  ;;  %v443_v16 = vadd.f32 %v771_v10, %v568_v37 }
 0x1b2   :  { %v434_v14 = vpop.f32.mrf.mxu1 }
 0x1b3   :  { %692 = vst [vmem:[%s982_s6 + $0x28] sm:$0xff] %v669_v12   ;;  %v664_v15 = vpack.c.bf16 %v458_v13, %v457_v11  ;;  %v435_v18 = vadd.f32 %v568_v37, %v434_v14  ;;  %v463_v22 = vmax.f32 %v443_v16, 0.0 }
 0x1b4   :  { %v772_v17 = vpop.f32.mrf.mxu1 }
 0x1b5   :  { %691 = vst [vmem:[%s982_s6 + $0x20] sm:$0xff] %v664_v15   ;;  %v446_v19 = vadd.f32 %v772_v17, %v568_v37  ;;  %v461_v25 = vmax.f32 %v435_v18, 0.0 }
 0x1b6   :  { %v437_v20 = vpop.f32.mrf.mxu1 }
 0x1b7   :  { %v464_v23 = vmax.f32 %v446_v19, 0.0  ;;  %v438_v24 = vadd.f32 %v568_v37, %v437_v20 }
 0x1b9   :  { %v679_v26 = vpack.c.bf16 %v464_v23, %v463_v22  ;;  %v462_v27 = vmax.f32 %v438_v24, 0.0 }
 0x1bb   :  { %694 = vst [vmem:[%s982_s6 + $0x38] sm:$0xff] %v679_v26   ;;  %v674_v28 = vpack.c.bf16 %v462_v27, %v461_v25 }
 0x1bd   :  { %693 = vst [vmem:[%s982_s6 + $0x30] sm:$0xff] %v674_v28  }

// kernel: encoder_conv_only_forward.13
= control target key start
LH: loop header
LB: loop body
LE: loop exit
PB: predicated region body
PF: predicated region fallthrough
CT: control target
= control target key end

     0   :  { %s3695_s27 = smov 0   ;;  %s4325_s0 = inlined_call_operand.vmem [shape: bf16[1024,16], index: 0, kind: input, shape index: {}]   ;;  %s4326_s1 = inlined_call_operand.vmem [shape: bf16[1024,64], index: 1, kind: input, shape index: {}]   ;;  %s4327_s2 = inlined_call_operand.vmem [shape: bf16[16,64], index: 2, kind: input, shape index: {}]   ;;  %s4328_s3 = inlined_call_operand.vmem [shape: f32[1,64], index: 3, kind: input, shape index: {}]   ;;  %s4329_s4 = inlined_call_operand.vmem [shape: bf16[64,64], index: 4, kind: input, shape index: {}]   ;;  %s4330_s5 = inlined_call_operand.vmem [shape: f32[1,64], index: 5, kind: input, shape index: {}]   ;;  %s4331_s6 = inlined_call_operand.vmem [shape: bf16[64,8], index: 6, kind: input, shape index: {}]   ;;  %s4332_s7 = inlined_call_operand.vmem [shape: f32[1,8], index: 7, kind: input, shape index: {}]   ;;  %s4333_s8 = inlined_call_operand.vmem [shape: f32[1024,8], index: 8, kind: output, shape index: {}]  }
   0x1 LB: > { %s2643_s28 = sadd.s32 4294967295, %s3648_s27   ;;  %p2647_p0 = scmp.ge.s32.totalorder %s3648_s27, 1  ;;  %s3648_s27 = sphi %s3695_s27, %s18_s27  }
   0x2   : > { %p274_p1 = scmp.lt.s32.totalorder %s3648_s27, 3 }
   0x4   : > { %p275_p2 = pnand %p2647_p0, %p274_p1 }
   0x5   : > { %s2648_s9 = sshll.u32 (!%p275_p2), %s2643_s28, 6 }
   0x6   : > { %278 = sbr.rel (%p275_p2) target bundleno = 783 (0x30f), region = 52  ;;  %p314_p3 = scmp.lt.s32.totalorder (!%p275_p2), %s2648_s9, 127 }
   0xb   : > { %v3344_v0 = vld [vmem:[%s4327_s2] sm:$0xff]   ;;  %v3377_v1 = vld [vmem:[%s4329_s4 + $0x18] sm:$0xff]   ;;  %s4335_s9 = smov (!%p314_p3, %s2648_s9), 127  ;;  %vm571_vm0 = vcmask 130048   ;;  %v3378_v10 = vld [vmem:[%s4329_s4 + $0x10] sm:$0xff]   ;;  %vm1220_vm1 = vcmask 523264  }
   0xc   : > { %3124 = vmatprep.subr.bf16.mxu0 %v3344_v0  ;;  %3334 = vmatprep.subr.bf16.mxu1 %v3344_v0  ;;  %s2649_s12 = sshll.u32 %s4335_s9, 2  ;;  %v3379_v13 = vld [vmem:[%s4329_s4 + $0x8] sm:$0xff]   ;;  %v3380_v18 = vld [vmem:[%s4329_s4] sm:$0xff]   ;;  %v3381_v51 = vld [vmem:[%s4331_s6 + $0x18] sm:$0xff]   ;;  %s2653_s19 = sshll.u32 %s4335_s9, 3  ;;  %vm2510_vm2 = vcmask 64512  }
   0xd   : > { %3125 = vmatpush3.bf16.msra.mxu0 %v3344_v0  ;;  %3335 = vmatpush3.bf16.msra.mxu1 %v3344_v0  ;;  %s3717_s15 = scalar_lea.vmem %s4325_s0, %s2649_s12  ;;  %s3797_s24 = scalar_lea.vmem %s4326_s1, %s2649_s12  ;;  %v3803_v40 = vld [vmem:[%s4328_s3] ss:$0 sm:$0xff]  ;;  %v3382_v52 = vld [vmem:[%s4331_s6 + $0x10] sm:$0xff]   ;;  %v3383_v61 = vld [vmem:[%s4331_s6 + $0x8] sm:$0xff]  }
   0xe   : > { %3190 = vmatprep.subr.bf16.mxu1 %v3377_v1  ;;  %v3345_v2 = vld [vmem:[%s3717_s15] sm:$0xff]   ;;  %v3346_v3 = vld [vmem:[%s3717_s15 + $0x8] sm:$0xff]   ;;  %v3347_v4 = vld [vmem:[%s3717_s15 + $0x10] sm:$0xff]   ;;  %3262 = vmatprep.subr.bf16.mxu0 %v3381_v51  ;;  %s4142_s22 = scalar_lea.vmem %s4333_s8, %s2653_s19 }
   0xf   : > { %3126 = vmatprep.mubr.msk.bf16.mxu0 %vm571_vm0, %v3345_v2  ;;  %v3348_v5 = vld [vmem:[%s3717_s15 + $0x18] sm:$0xff]   ;;  %v3349_v6 = vld [vmem:[%s3717_s15 + $0x20] sm:$0xff]   ;;  %v3350_v7 = vld [vmem:[%s3717_s15 + $0x28] sm:$0xff]  }
  0x10   : > { %3127 = vmatmul.mubr.msk.bf16.vlgmr.msra.gmra.mxu0 %vm571_vm0, %v3346_v3  ;;  %v3351_v8 = vld [vmem:[%s3717_s15 + $0x30] sm:$0xff]   ;;  %v3361_v9 = vld [vmem:[%s3717_s15 + $0x80] sm:$0xff]   ;;  %v3362_v11 = vld [vmem:[%s3717_s15 + $0x88] sm:$0xff]  }
  0x11   : > { %3130 = vmatprep.mubr.msk.bf16.mxu0 %vm571_vm0, %v3347_v4  ;;  %3158 = vmatprep.mubr.msk.bf16.mxu1 %vm571_vm0, %v3361_v9  ;;  %v3363_v12 = vld [vmem:[%s3717_s15 + $0x90] sm:$0xff]   ;;  %v3352_v14 = vld [vmem:[%s3717_s15 + $0x38] sm:$0xff]   ;;  %v3353_v15 = vld [vmem:[%s3717_s15 + $0x40] sm:$0xff]  }
  0x12   : > { %3159 = vmatmul.mubr.msk.bf16.vlgmr.msra.gmra.mxu1 %vm571_vm0, %v3362_v11  ;;  %v3364_v16 = vld [vmem:[%s3717_s15 + $0x98] sm:$0xff]   ;;  %v3365_v17 = vld [vmem:[%s3717_s15 + $0xa0] sm:$0xff]   ;;  %v3354_v19 = vld [vmem:[%s3717_s15 + $0x48] sm:$0xff]   ;;  %3263 = vmatpush3.bf16.msra.mxu0 %v3381_v51 }
  0x13   : > { %3162 = vmatprep.mubr.msk.bf16.mxu1 %vm571_vm0, %v3363_v12  ;;  %3191 = vmatpush3.bf16.msra.mxu1 %v3377_v1  ;;  %v3355_v20 = vld [vmem:[%s3717_s15 + $0x50] sm:$0xff]   ;;  %v3366_v21 = vld [vmem:[%s3717_s15 + $0xa8] sm:$0xff]   ;;  %v3356_v23 = vld [vmem:[%s3717_s15 + $0x58] sm:$0xff]  }
  0x14   : > { %3192 = vmatprep.subr.bf16.mxu1 %v3378_v10  ;;  %v3367_v22 = vld [vmem:[%s3717_s15 + $0xb0] sm:$0xff]   ;;  %v3368_v24 = vld [vmem:[%s3717_s15 + $0xb8] sm:$0xff]   ;;  %v3357_v25 = vld [vmem:[%s3717_s15 + $0x60] sm:$0xff]   ;;  %3264 = vmatprep.subr.bf16.mxu0 %v3382_v52 }
  0x15   : > { %v3369_v26 = vld [vmem:[%s3717_s15 + $0xc0] sm:$0xff]   ;;  %v3358_v27 = vld [vmem:[%s3717_s15 + $0x68] sm:$0xff]   ;;  %v3359_v29 = vld [vmem:[%s3717_s15 + $0x70] sm:$0xff]  }
  0x16   : > { %v3370_v28 = vld [vmem:[%s3717_s15 + $0xc8] sm:$0xff]   ;;  %v3371_v30 = vld [vmem:[%s3717_s15 + $0xd0] sm:$0xff]   ;;  %v3360_v31 = vld [vmem:[%s3717_s15 + $0x78] sm:$0xff]   ;;  %3265 = vmatpush3.bf16.msra.mxu0 %v3382_v52 }
  0x17   : > { %3193 = vmatpush3.bf16.msra.mxu1 %v3378_v10  ;;  %v3372_v32 = vld [vmem:[%s3717_s15 + $0xd8] sm:$0xff]   ;;  %v3373_v33 = vld [vmem:[%s3717_s15 + $0xe0] sm:$0xff]   ;;  %v3374_v34 = vld [vmem:[%s3717_s15 + $0xe8] sm:$0xff]   ;;  %3266 = vmatprep.subr.bf16.mxu0 %v3383_v61 }
  0x18   : > { %3131 = vmatmul.mubr.msk.bf16.gmra.mxu0 %vm571_vm0, %v3348_v5  ;;  %3194 = vmatprep.subr.bf16.mxu1 %v3379_v13  ;;  %v3375_v35 = vld [vmem:[%s3717_s15 + $0xf0] sm:$0xff]   ;;  %v3376_v36 = vld [vmem:[%s3717_s15 + $0xf8] sm:$0xff]   ;;  %v2861_v39 = vld [vmem:[%s3797_s24] sm:$0xff]  }
  0x19   : > { %3134 = vmatprep.mubr.msk.bf16.mxu0 %vm571_vm0, %v3349_v6  ;;  %v2988_v41 = vld [vmem:[%s3797_s24 + $0x8] sm:$0xff]   ;;  %v2862_v45 = vunpack.c.l.bf16 %v2861_v39  ;;  %v2863_v47 = vunpack.c.h.bf16 %v2861_v39  ;;  %v2989_v60 = vld [vmem:[%s3797_s24 + $0x10] sm:$0xff]   ;;  %v2990_v63 = vld [vmem:[%s3797_s24 + $0x18] sm:$0xff]  }
  0x1a   : > { %3163 = vmatmul.mubr.msk.bf16.gmra.mxu1 %vm571_vm0, %v3364_v16  ;;  %v2867_v43 = vunpack.c.h.bf16 %v2988_v41  ;;  %v2866_v49 = vunpack.c.l.bf16 %v2988_v41  ;;  %v2875_v2 = vunpack.c.h.bf16 %v2990_v63  ;;  %v2870_v4 = vunpack.c.l.bf16 %v2989_v60  ;;  %v3384_v10 = vld [vmem:[%s4331_s6] sm:$0xff]   ;;  %3267 = vmatpush3.bf16.msra.mxu0 %v3383_v61 }
  0x1b   : > { %3166 = vmatprep.mubr.msk.bf16.mxu1 %vm571_vm0, %v3365_v17  ;;  %3195 = vmatpush3.bf16.msra.mxu1 %v3379_v13  ;;  %v2871_v6 = vunpack.c.h.bf16 %v2989_v60 }
  0x1c   : > { %3196 = vmatprep.subr.bf16.mxu1 %v3380_v18  ;;  %3268 = vmatprep.subr.bf16.mxu0 %v3384_v10 }
  0x1e   : > { %3269 = vmatpush3.bf16.msra.mxu0 %v3384_v10 }
  0x1f   : > { %3197 = vmatpush3.bf16.msra.mxu1 %v3380_v18 }
  0x20   : > { %3135 = vmatmul.mubr.msk.bf16.gmra.mxu0 %vm571_vm0, %v3350_v7 }
  0x21   : > { %3138 = vmatprep.mubr.msk.bf16.mxu0 %vm571_vm0, %v3351_v8  ;;  %v2874_v8 = vunpack.c.l.bf16 %v2990_v63 }
  0x22   : > { %3167 = vmatmul.mubr.msk.bf16.gmra.mxu1 %vm571_vm0, %v3366_v21 }
  0x23   : > { %3170 = vmatprep.mubr.msk.bf16.mxu1 %vm571_vm0, %v3367_v22  ;;  %v2992_v22 = vld [vmem:[%s3797_s24 + $0x28] sm:$0xff]  }
  0x28   : > { %3139 = vmatmul.mubr.msk.bf16.gmra.mxu0 %vm571_vm0, %v3352_v14 }
  0x29   : > { %3142 = vmatprep.mubr.msk.bf16.mxu0 %vm571_vm0, %v3353_v15 }
  0x2a   : > { %3171 = vmatmul.mubr.msk.bf16.gmra.mxu1 %vm571_vm0, %v3368_v24 }
  0x2b   : > { %3174 = vmatprep.mubr.msk.bf16.mxu1 %vm571_vm0, %v3369_v26 }
  0x30   : > { %3143 = vmatmul.mubr.msk.bf16.gmra.mxu0 %vm571_vm0, %v3354_v19  ;;  %v2991_v19 = vld [vmem:[%s3797_s24 + $0x20] sm:$0xff]  }
  0x31   : > { %3146 = vmatprep.mubr.msk.bf16.mxu0 %vm571_vm0, %v3355_v20 }
  0x32   : > { %3175 = vmatmul.mubr.msk.bf16.gmra.mxu1 %vm571_vm0, %v3370_v28  ;;  %v2878_v28 = vunpack.c.l.bf16 %v2991_v19 }
  0x33   : > { %3178 = vmatprep.mubr.msk.bf16.mxu1 %vm571_vm0, %v3371_v30  ;;  %v2879_v30 = vunpack.c.h.bf16 %v2991_v19 }
  0x38   : > { %3147 = vmatmul.mubr.msk.bf16.gmra.mxu0 %vm571_vm0, %v3356_v23 }
  0x39   : > { %3150 = vmatprep.mubr.msk.bf16.mxu0 %vm571_vm0, %v3357_v25  ;;  %v2883_v25 = vunpack.c.h.bf16 %v2992_v22 }
  0x3a   : > { %3179 = vmatmul.mubr.msk.bf16.gmra.mxu1 %vm571_vm0, %v3372_v32  ;;  %v2882_v32 = vunpack.c.l.bf16 %v2992_v22 }
  0x3b   : > { %3182 = vmatprep.mubr.msk.bf16.mxu1 %vm571_vm0, %v3373_v33 }
  0x40   : > { %3151 = vmatmul.mubr.msk.bf16.gmra.mxu0 %vm571_vm0, %v3358_v27 }
  0x41   : > { %3154 = vmatprep.mubr.msk.bf16.mxu0 %vm571_vm0, %v3359_v29 }
  0x42   : > { %3183 = vmatmul.mubr.msk.bf16.gmra.mxu1 %vm571_vm0, %v3374_v34 }
  0x43   : > { %3186 = vmatprep.mubr.msk.bf16.mxu1 %vm571_vm0, %v3375_v35 }
  0x48   : > { %3155 = vmatmul.mubr.msk.bf16.gmra.mxu0 %vm571_vm0, %v3360_v31 }
  0x4a   : > { %3187 = vmatmul.mubr.msk.bf16.gmra.mxu1 %vm571_vm0, %v3376_v36 }
  0xd0   : > { %v3128_v37 = vpop.f32.mrf.mxu0 }
  0xd1   : > { %v711_v48 = vadd.f32 %v3128_v37, %v3803_v40 }
  0xd2   : > { %v702_v38 = vpop.f32.mrf.mxu0  ;;  %v3830_v14 = vpop.f32.mrf.mxu1 }
  0xd3   : > { %v703_v44 = vadd.f32 %v3803_v40, %v702_v38  ;;  %v1087_v58 = vadd.f32 %v2866_v49, %v711_v48 }
  0xd4   : > { %v3129_v42 = vpop.f32.mrf.mxu0  ;;  %v3833_v20 = vpop.f32.mrf.mxu1 }
  0xd5   : > { %v714_v46 = vadd.f32 %v3129_v42, %v3803_v40  ;;  %v1085_v56 = vadd.f32 %v2862_v45, %v703_v44  ;;  %v2993_v44 = vld [vmem:[%s3797_s24 + $0x30] sm:$0xff]  }
  0xd6   : > { %v705_v50 = vpop.f32.mrf.mxu0  ;;  %v3836_v26 = vpop.f32.mrf.mxu1 }
  0xd7   : > { %v706_v53 = vadd.f32 %v3803_v40, %v705_v50  ;;  %v1088_v54 = vadd.f32 %v2867_v43, %v714_v46 }
  0xd8   : > { %v3132_v55 = vpop.f32.mrf.mxu0  ;;  %v3843_v34 = vpop.f32.mrf.mxu1 }
  0xd9   : > { %v1086_v57 = vadd.f32 %v2863_v47, %v706_v53  ;;  %v1150_v0 = vpack.c.bf16 %v1088_v54, %v1087_v58  ;;  %v727_v7 = vadd.f32 %v3132_v55, %v3803_v40  ;;  %v2994_v47 = vld [vmem:[%s3797_s24 + $0x38] sm:$0xff]   ;;  %v2886_v53 = vunpack.c.l.bf16 %v2993_v44 }
  0xda   : > { %v718_v59 = vpop.f32.mrf.mxu0  ;;  %v3846_v38 = vpop.f32.mrf.mxu1  ;;  %v2891_v50 = vunpack.c.h.bf16 %v2994_v47  ;;  %v2887_v55 = vunpack.c.h.bf16 %v2993_v44 }
  0xdb   : > { %v1149_v62 = vpack.c.bf16 %v1086_v57, %v1085_v56  ;;  %v719_v3 = vadd.f32 %v3803_v40, %v718_v59  ;;  %v1091_v17 = vadd.f32 %v2874_v8, %v727_v7  ;;  %v2890_v57 = vunpack.c.l.bf16 %v2994_v47  ;;  %v2996_v7 = vld [vmem:[%s3797_s24 + $0x48] sm:$0xff]  }
  0xdc   : > { %v3133_v1 = vpop.f32.mrf.mxu0  ;;  %v3849_v45 = vpop.f32.mrf.mxu1  ;;  %v2899_v10 = vunpack.c.h.bf16 %v2996_v7 }
  0xdd   : > { %v730_v5 = vadd.f32 %v3133_v1, %v3803_v40  ;;  %3198 = vmatprep.mubr.msk.bf16.mxu1 %vm1220_vm1, %v1149_v62  ;;  %v1089_v15 = vadd.f32 %v2870_v4, %v719_v3  ;;  %v2995_v4 = vld [vmem:[%s3797_s24 + $0x40] sm:$0xff]  }
  0xde   : > { %v721_v9 = vpop.f32.mrf.mxu0  ;;  %3199 = vmatmul.mubr.msk.bf16.vlgmr.msra.gmra.mxu1 %vm1220_vm1, %v1150_v0  ;;  %v3852_v51 = vpop.f32.mrf.mxu1 }
  0xdf   : > { %v722_v11 = vadd.f32 %v3803_v40, %v721_v9  ;;  %v1092_v12 = vadd.f32 %v2875_v2, %v730_v5 }
  0xe0   : > { %v3136_v13 = vpop.f32.mrf.mxu0  ;;  %v3859_v59 = vpop.f32.mrf.mxu1 }
  0xe1   : > { %v1090_v16 = vadd.f32 %v2871_v6, %v722_v11  ;;  %v1152_v23 = vpack.c.bf16 %v1092_v12, %v1091_v17  ;;  %v743_v31 = vadd.f32 %v3136_v13, %v3803_v40  ;;  %v2894_v13 = vunpack.c.l.bf16 %v2995_v4 }
  0xe2   : > { %v734_v18 = vpop.f32.mrf.mxu0  ;;  %v3862_v63 = vpop.f32.mrf.mxu1 }
  0xe3   : > { %v1151_v21 = vpack.c.bf16 %v1090_v16, %v1089_v15  ;;  %v735_v27 = vadd.f32 %v3803_v40, %v734_v18  ;;  %v1095_v42 = vadd.f32 %v2882_v32, %v743_v31  ;;  %v2895_v16 = vunpack.c.h.bf16 %v2995_v4  ;;  %v2997_v31 = vld [vmem:[%s3797_s24 + $0x50] sm:$0xff]  }
  0xe4   : > { %v3137_v24 = vpop.f32.mrf.mxu0  ;;  %v3865_v5 = vpop.f32.mrf.mxu1  ;;  %v2898_v18 = vunpack.c.l.bf16 %v2996_v7 }
  0xe5   : > { %v746_v29 = vadd.f32 %v3137_v24, %v3803_v40  ;;  %3202 = vmatprep.mubr.msk.bf16.mxu1 %vm1220_vm1, %v1151_v21  ;;  %v1093_v39 = vadd.f32 %v2878_v28, %v735_v27 }
  0xe6   : > { %v737_v33 = vpop.f32.mrf.mxu0  ;;  %3203 = vmatmul.mubr.msk.bf16.gmra.mxu1 %vm1220_vm1, %v1152_v23  ;;  %v3868_v11 = vpop.f32.mrf.mxu1 }
  0xe7   : > { %v738_v35 = vadd.f32 %v3803_v40, %v737_v33  ;;  %v1096_v36 = vadd.f32 %v2883_v25, %v746_v29 }
  0xe8   : > { %v3140_v37 = vpop.f32.mrf.mxu0  ;;  %v3875_v21 = vpop.f32.mrf.mxu1 }
  0xe9   : > { %v1094_v41 = vadd.f32 %v2879_v30, %v738_v35  ;;  %v1154_v48 = vpack.c.bf16 %v1096_v36, %v1095_v42  ;;  %v759_v56 = vadd.f32 %v3140_v37, %v3803_v40  ;;  %v2998_v35 = vld [vmem:[%s3797_s24 + $0x58] sm:$0xff]  }
  0xea   : > { %v750_v43 = vpop.f32.mrf.mxu0  ;;  %v3878_v25 = vpop.f32.mrf.mxu1 }
  0xeb   : > { %v1153_v46 = vpack.c.bf16 %v1094_v41, %v1093_v39  ;;  %v751_v52 = vadd.f32 %v3803_v40, %v750_v43  ;;  %v1099_v2 = vadd.f32 %v2890_v57, %v759_v56  ;;  %v2907_v39 = vunpack.c.h.bf16 %v2998_v35 }
  0xec   : > { %v3141_v49 = vpop.f32.mrf.mxu0  ;;  %v3881_v32 = vpop.f32.mrf.mxu1  ;;  %v2902_v43 = vunpack.c.l.bf16 %v2997_v31 }
  0xed   : > { %v762_v54 = vadd.f32 %v3141_v49, %v3803_v40  ;;  %3206 = vmatprep.mubr.msk.bf16.mxu1 %vm1220_vm1, %v1153_v46  ;;  %v1097_v0 = vadd.f32 %v2886_v53, %v751_v52  ;;  %v2903_v46 = vunpack.c.h.bf16 %v2997_v31  ;;  %v831_v31 = vadd.f32 %v3803_v40, %v3833_v20 }
  0xee   : > { %v753_v58 = vpop.f32.mrf.mxu0  ;;  %3207 = vmatmul.mubr.msk.bf16.gmra.mxu1 %vm1220_vm1, %v1154_v48  ;;  %v3884_v41 = vpop.f32.mrf.mxu1  ;;  %v2906_v48 = vunpack.c.l.bf16 %v2998_v35 }
  0xef   : > { %v754_v60 = vadd.f32 %v3803_v40, %v753_v58  ;;  %v1100_v61 = vadd.f32 %v2891_v50, %v762_v54 }
  0xf0   : > { %v3144_v62 = vpop.f32.mrf.mxu0  ;;  %v3892_v54 = vpop.f32.mrf.mxu1 }
  0xf1   : > { %v1098_v1 = vadd.f32 %v2887_v55, %v754_v60  ;;  %v1156_v8 = vpack.c.bf16 %v1100_v61, %v1099_v2  ;;  %v775_v17 = vadd.f32 %v3144_v62, %v3803_v40  ;;  %v2999_v60 = vld [vmem:[%s3797_s24 + $0x60] sm:$0xff]   ;;  %v3000_v62 = vld [vmem:[%s3797_s24 + $0x68] sm:$0xff]  }
  0xf2   : > { %v766_v3 = vpop.f32.mrf.mxu0  ;;  %v2915_v2 = vunpack.c.h.bf16 %v3000_v62 }
  0xf3   : > { %v1155_v6 = vpack.c.bf16 %v1098_v1, %v1097_v0  ;;  %v767_v12 = vadd.f32 %v3803_v40, %v766_v3  ;;  %v1103_v29 = vadd.f32 %v2898_v18, %v775_v17  ;;  %v3896_v3 = vpop.f32.mrf.mxu1 }
  0xf4   : > { %v3145_v9 = vpop.f32.mrf.mxu0 }
  0xf5   : > { %v778_v15 = vadd.f32 %v3145_v9, %v3803_v40  ;;  %3210 = vmatprep.mubr.msk.bf16.mxu1 %vm1220_vm1, %v1155_v6  ;;  %v1101_v27 = vadd.f32 %v2894_v13, %v767_v12  ;;  %v2910_v6 = vunpack.c.l.bf16 %v2999_v60  ;;  %v3905_v18 = vpop.f32.mrf.mxu1 }
  0xf6   : > { %v769_v19 = vpop.f32.mrf.mxu0  ;;  %3211 = vmatmul.mubr.msk.bf16.gmra.mxu1 %vm1220_vm1, %v1156_v8  ;;  %v2911_v8 = vunpack.c.h.bf16 %v2999_v60 }
  0xf7   : > { %v770_v22 = vadd.f32 %v3803_v40, %v769_v19  ;;  %v1104_v23 = vadd.f32 %v2899_v10, %v778_v15  ;;  %v2914_v10 = vunpack.c.l.bf16 %v3000_v62  ;;  %v3003_v15 = vld [vmem:[%s3797_s24 + $0x80] sm:$0xff]  }
  0xf8   : > { %v3148_v24 = vpop.f32.mrf.mxu0  ;;  %v2927_v35 = vunpack.c.h.bf16 %v3003_v15 }
  0xf9   : > { %v1102_v28 = vadd.f32 %v2895_v16, %v770_v22  ;;  %v1158_v36 = vpack.c.bf16 %v1104_v23, %v1103_v29  ;;  %v791_v47 = vadd.f32 %v3148_v24, %v3803_v40 }
  0xfa   : > { %v782_v30 = vpop.f32.mrf.mxu0 }
  0xfb   : > { %v1157_v33 = vpack.c.bf16 %v1102_v28, %v1101_v27  ;;  %v783_v42 = vadd.f32 %v3803_v40, %v782_v30  ;;  %v1107_v57 = vadd.f32 %v2906_v48, %v791_v47  ;;  %v3001_v27 = vld [vmem:[%s3797_s24 + $0x70] sm:$0xff]   ;;  %v2926_v28 = vunpack.c.l.bf16 %v3003_v15  ;;  %v3002_v30 = vld [vmem:[%s3797_s24 + $0x78] sm:$0xff]  }
  0xfc   : > { %v3149_v37 = vpop.f32.mrf.mxu0  ;;  %v2919_v47 = vunpack.c.h.bf16 %v3001_v27  ;;  %v2922_v48 = vunpack.c.l.bf16 %v3002_v30  ;;  %v3006_v15 = vld [vmem:[%s3797_s24 + $0x98] sm:$0xff]  }
  0xfd   : > { %v794_v44 = vadd.f32 %v3149_v37, %v3803_v40  ;;  %3214 = vmatprep.mubr.msk.bf16.mxu1 %vm1220_vm1, %v1157_v33  ;;  %v1105_v55 = vadd.f32 %v2902_v43, %v783_v42  ;;  %v834_v33 = vadd.f32 %v3803_v40, %v3843_v34  ;;  %v3913_v42 = vpop.f32.mrf.mxu1  ;;  %v3004_v34 = vld [vmem:[%s3797_s24 + $0x88] sm:$0xff]  }
  0xfe   : > { %v785_v49 = vpop.f32.mrf.mxu0  ;;  %3215 = vmatmul.mubr.msk.bf16.gmra.mxu1 %vm1220_vm1, %v1158_v36  ;;  %v2930_v62 = vunpack.c.l.bf16 %v3004_v34 }
  0xff   : > { %v786_v50 = vadd.f32 %v3803_v40, %v785_v49  ;;  %v1108_v52 = vadd.f32 %v2907_v39, %v794_v44  ;;  %v2923_v39 = vunpack.c.h.bf16 %v3002_v30  ;;  %v2918_v44 = vunpack.c.l.bf16 %v3001_v27 }
 0x100   : > { %v3152_v53 = vpop.f32.mrf.mxu0  ;;  %v866_v27 = vadd.f32 %v3803_v40, %v3875_v21  ;;  %v855_v30 = vadd.f32 %v3846_v38, %v3803_v40 }
 0x101   : > { %v1106_v56 = vadd.f32 %v2903_v46, %v786_v50  ;;  %v1160_v0 = vpack.c.bf16 %v1108_v52, %v1107_v57  ;;  %v807_v9 = vadd.f32 %v3152_v53, %v3803_v40  ;;  %v1117_v50 = vadd.f32 %v2926_v28, %v831_v31  ;;  %v3923_v57 = vpop.f32.mrf.mxu1 }
 0x102   : > { %v798_v58 = vpop.f32.mrf.mxu0  ;;  %v1118_v53 = vadd.f32 %v2927_v35, %v834_v33  ;;  %v858_v31 = vadd.f32 %v3852_v51, %v3803_v40  ;;  %v2939_v33 = vunpack.c.h.bf16 %v3006_v15  ;;  %v879_v51 = vadd.f32 %v3803_v40, %v3881_v32 }
 0x103   : > { %v1159_v61 = vpack.c.bf16 %v1106_v56, %v1105_v55  ;;  %v799_v4 = vadd.f32 %v3803_v40, %v798_v58  ;;  %v1111_v23 = vadd.f32 %v2914_v10, %v807_v9  ;;  %v3005_v55 = vld [vmem:[%s3797_s24 + $0x90] sm:$0xff]   ;;  %v842_v10 = vadd.f32 %v3836_v26, %v3803_v40 }
 0x104   : > { %v3153_v1 = vpop.f32.mrf.mxu0 }
 0x105   : > { %v810_v7 = vadd.f32 %v3153_v1, %v3803_v40  ;;  %3218 = vmatprep.mubr.msk.bf16.mxu1 %vm1220_vm1, %v1159_v61  ;;  %v1109_v19 = vadd.f32 %v2910_v6, %v799_v4  ;;  %v2935_v1 = vunpack.c.h.bf16 %v3005_v55  ;;  %v1165_v4 = vpack.c.bf16 %v1118_v53, %v1117_v50 }
 0x106   : > { %v801_v12 = vpop.f32.mrf.mxu0  ;;  %3219 = vmatmul.mubr.msk.bf16.gmra.mxu1 %vm1220_vm1, %v1160_v0  ;;  %v2934_v0 = vunpack.c.l.bf16 %v3005_v55  ;;  %v847_v6 = vadd.f32 %v3803_v40, %v3849_v45  ;;  %v874_v50 = vadd.f32 %v3868_v11, %v3803_v40  ;;  %v3010_v55 = vld [vmem:[%s3797_s24 + $0xb8] sm:$0xff]   ;;  %v895_v11 = vadd.f32 %v3803_v40, %v3905_v18 }
 0x107   : > { %v802_v13 = vadd.f32 %v3803_v40, %v801_v12  ;;  %v1112_v16 = vadd.f32 %v2915_v2, %v810_v7  ;;  %v850_v7 = vadd.f32 %v3803_v40, %v3859_v59  ;;  %v2931_v12 = vunpack.c.h.bf16 %v3004_v34  ;;  %v3007_v59 = vld [vmem:[%s3797_s24 + $0xa0] sm:$0xff]  }
 0x108   : > { %v3156_v17 = vpop.f32.mrf.mxu0  ;;  %v2942_v26 = vunpack.c.l.bf16 %v3007_v59  ;;  %v2943_v28 = vunpack.c.h.bf16 %v3007_v59  ;;  %v871_v34 = vadd.f32 %v3862_v63, %v3803_v40 }
 0x109   : > { %v1110_v22 = vadd.f32 %v2911_v8, %v802_v13  ;;  %v1162_v36 = vpack.c.bf16 %v1112_v16, %v1111_v23  ;;  %v823_v20 = vadd.f32 %v3156_v17, %v3803_v40  ;;  %v839_v8 = vadd.f32 %v3830_v14, %v3803_v40  ;;  %v3933_v13 = vpop.f32.mrf.mxu1 }
 0x10a   : > { %v814_v24 = vpop.f32.mrf.mxu0  ;;  %v1121_v16 = vadd.f32 %v2934_v0, %v847_v6  ;;  %v1122_v45 = vadd.f32 %v2935_v1, %v850_v7  ;;  %v1120_v14 = vadd.f32 %v2931_v12, %v842_v10  ;;  %v898_v1 = vadd.f32 %v3803_v40, %v3923_v57  ;;  %v3012_v10 = vld [vmem:[%s3797_s24 + $0xc8] sm:$0xff]  }
 0x10b   : > { %v1161_v29 = vpack.c.bf16 %v1110_v22, %v1109_v19  ;;  %v815_v43 = vadd.f32 %v3803_v40, %v814_v24  ;;  %v1115_v61 = vadd.f32 %v2922_v48, %v823_v20  ;;  %v1119_v17 = vadd.f32 %v2930_v62, %v839_v8  ;;  %v3940_v19 = vpop.f32.mrf.mxu1 }
 0x10c   : > { %v3157_v37 = vpop.f32.mrf.mxu0  ;;  %v2938_v22 = vunpack.c.l.bf16 %v3006_v15  ;;  %v1167_v23 = vpack.c.bf16 %v1122_v45, %v1121_v16  ;;  %v863_v24 = vadd.f32 %v3803_v40, %v3865_v5  ;;  %v1126_v5 = vadd.f32 %v2943_v28, %v866_v27  ;;  %v3013_v15 = vld [vmem:[%s3797_s24 + $0xd0] sm:$0xff]  }
 0x10d   : > { %v826_v46 = vadd.f32 %v3157_v37, %v3803_v40  ;;  %3222 = vmatprep.mubr.msk.bf16.mxu1 %vm1220_vm1, %v1161_v29  ;;  %v1113_v58 = vadd.f32 %v2918_v44, %v815_v43  ;;  %v1166_v29 = vpack.c.bf16 %v1120_v14, %v1119_v17  ;;  %v3950_v35 = vpop.f32.mrf.mxu1  ;;  %v1124_v43 = vadd.f32 %v2939_v33, %v858_v31 }
 0x10e   : > { %v817_v49 = vpop.f32.mrf.mxu0  ;;  %3223 = vmatmul.mubr.msk.bf16.gmra.mxu1 %vm1220_vm1, %v1162_v36  ;;  %v3008_v36 = vld [vmem:[%s3797_s24 + $0xa8] sm:$0xff]   ;;  %v1125_v37 = vadd.f32 %v2942_v26, %v863_v24  ;;  %v1123_v21 = vadd.f32 %v2938_v22, %v855_v30  ;;  %v882_v20 = vadd.f32 %v3803_v40, %v3892_v54  ;;  %v2954_v62 = vunpack.c.l.bf16 %v3010_v55 }
 0x10f   : > { %v818_v52 = vadd.f32 %v3803_v40, %v817_v49  ;;  %v1116_v56 = vadd.f32 %v2923_v39, %v826_v46  ;;  %v3009_v39 = vld [vmem:[%s3797_s24 + $0xb0] sm:$0xff]   ;;  %v913_v44 = vpop.f32.mrf.mxu1  ;;  %v2946_v46 = vunpack.c.l.bf16 %v3008_v36  ;;  %v887_v6 = vadd.f32 %v3878_v25, %v3803_v40 }
 0x110   : > { %v2950_v38 = vunpack.c.l.bf16 %v3009_v39  ;;  %v2951_v48 = vunpack.c.h.bf16 %v3009_v39  ;;  %v1168_v49 = vpack.c.bf16 %v1124_v43, %v1123_v21  ;;  %v890_v7 = vadd.f32 %v3884_v41, %v3803_v40 }
 0x111   : > { %v1114_v60 = vadd.f32 %v2919_v47, %v818_v52  ;;  %v1164_v9 = vpack.c.bf16 %v1116_v56, %v1115_v61  ;;  %v1169_v47 = vpack.c.bf16 %v1126_v5, %v1125_v37  ;;  %v2947_v52 = vunpack.c.h.bf16 %v3008_v36  ;;  %v3964_v53 = vpop.f32.mrf.mxu1 }
 0x112   : > { %v1129_v56 = vadd.f32 %v2950_v38, %v879_v51  ;;  %v1130_v32 = vadd.f32 %v2951_v48, %v882_v20  ;;  %v1127_v54 = vadd.f32 %v2946_v46, %v871_v34  ;;  %v2955_v8 = vunpack.c.h.bf16 %v3010_v55  ;;  %v3016_v20 = vld [vmem:[%s3797_s24 + $0xe8] sm:$0xff]   ;;  %v3017_v34 = vld [vmem:[%s3797_s24 + $0xf0] sm:$0xff]  }
 0x113   : > { %v1163_v2 = vpack.c.bf16 %v1114_v60, %v1113_v58  ;;  %v3011_v58 = vld [vmem:[%s3797_s24 + $0xc0] sm:$0xff]   ;;  %v1128_v60 = vadd.f32 %v2947_v52, %v874_v50  ;;  %v926_v61 = vpop.f32.mrf.mxu1  ;;  %v1131_v57 = vadd.f32 %v2954_v62, %v887_v6  ;;  %v2962_v59 = vunpack.c.l.bf16 %v3012_v10 }
 0x114   : > { %v2958_v63 = vunpack.c.l.bf16 %v3011_v58  ;;  %v1171_v0 = vpack.c.bf16 %v1130_v32, %v1129_v56  ;;  %v1132_v16 = vadd.f32 %v2955_v8, %v890_v7  ;;  %v2966_v25 = vunpack.c.l.bf16 %v3013_v15 }
 0x115   : > { %3226 = vmatprep.mubr.msk.bf16.mxu1 %vm1220_vm1, %v1163_v2  ;;  %v2959_v2 = vunpack.c.h.bf16 %v3011_v58  ;;  %v911_v41 = vadd.f32 %v3803_v40, %v3940_v19  ;;  %v914_v14 = vadd.f32 %v3803_v40, %v913_v44  ;;  %v2967_v22 = vunpack.c.h.bf16 %v3013_v15  ;;  %v3015_v19 = vld [vmem:[%s3797_s24 + $0xe0] sm:$0xff]  }
 0x116   : > { %3227 = vmatmul.mubr.msk.bf16.gmra.mxu1 %vm1220_vm1, %v1164_v9  ;;  %v3185_v9 = vpop.f32.mrf.mxu1  ;;  %v1133_v12 = vadd.f32 %v2958_v63, %v895_v11  ;;  %v1172_v26 = vpack.c.bf16 %v1132_v16, %v1131_v57  ;;  %v906_v24 = vadd.f32 %v3913_v42, %v3803_v40  ;;  %v2963_v27 = vunpack.c.h.bf16 %v3012_v10 }
 0x117   : > { %3230 = vmatprep.mubr.msk.bf16.mxu1 %vm1220_vm1, %v1165_v4  ;;  %v1170_v4 = vpack.c.bf16 %v1128_v60, %v1127_v54  ;;  %v1134_v18 = vadd.f32 %v2959_v2, %v898_v1  ;;  %v1137_v30 = vadd.f32 %v2966_v25, %v911_v41  ;;  %v1138_v31 = vadd.f32 %v2967_v22, %v914_v14 }
 0x118   : > { %v929_v45 = vpop.f32.mrf.mxu1  ;;  %v1136_v36 = vadd.f32 %v2963_v27, %v906_v24  ;;  %v927_v42 = vadd.f32 %v3803_v40, %v926_v61  ;;  %v2975_v43 = vunpack.c.h.bf16 %v3015_v19  ;;  %v919_v46 = vadd.f32 %v3933_v13, %v3803_v40 }
 0x119   : > { %v1173_v17 = vpack.c.bf16 %v1134_v18, %v1133_v12  ;;  %v1175_v39 = vpack.c.bf16 %v1138_v31, %v1137_v30  ;;  %v930_v21 = vadd.f32 %v3803_v40, %v929_v45  ;;  %v922_v38 = vadd.f32 %v3950_v35, %v3803_v40  ;;  %v4019_v45 = vld [vmem:[%s4330_s5] ss:$0 sm:$0xff] }
 0x11a   : > { %v3188_v28 = vpop.f32.mrf.mxu1  ;;  %v2978_v56 = vunpack.c.l.bf16 %v3016_v20  ;;  %v2982_v32 = vunpack.c.l.bf16 %v3017_v34  ;;  %v2983_v54 = vunpack.c.h.bf16 %v3017_v34  ;;  %v935_v61 = vadd.f32 %v3964_v53, %v3803_v40 }
 0x11b   : > { %v938_v62 = vadd.f32 %v3185_v9, %v3803_v40  ;;  %v2979_v63 = vunpack.c.h.bf16 %v3016_v20  ;;  %v951_v10 = vadd.f32 %v3188_v28, %v3803_v40 }
 0x11c   : > { %v942_v37 = vpop.f32.mrf.mxu1  ;;  %v1143_v1 = vadd.f32 %v2978_v56, %v935_v61 }
 0x11d   : > { %v943_v58 = vadd.f32 %v3803_v40, %v942_v37  ;;  %v1144_v2 = vadd.f32 %v2979_v63, %v938_v62 }
 0x11e   : > { %3231 = vmatmul.mubr.msk.bf16.gmra.mxu1 %vm1220_vm1, %v1166_v29  ;;  %v3014_v29 = vld [vmem:[%s3797_s24 + $0xd8] sm:$0xff]   ;;  %v3189_v51 = vpop.f32.mrf.mxu1 }
 0x11f   : > { %3234 = vmatprep.mubr.msk.bf16.mxu1 %vm1220_vm1, %v1167_v23  ;;  %v903_v23 = vadd.f32 %v3896_v3, %v3803_v40  ;;  %v2970_v5 = vunpack.c.l.bf16 %v3014_v29  ;;  %v2974_v3 = vunpack.c.l.bf16 %v3015_v19  ;;  %v1178_v8 = vpack.c.bf16 %v1144_v2, %v1143_v1 }
 0x120   : > { %v945_v55 = vpop.f32.mrf.mxu1  ;;  %v954_v12 = vadd.f32 %v3189_v51, %v3803_v40 }
 0x121   : > { %v1135_v33 = vadd.f32 %v2962_v59, %v903_v23  ;;  %v1141_v48 = vadd.f32 %v2974_v3, %v927_v42  ;;  %v1139_v50 = vadd.f32 %v2970_v5, %v919_v46  ;;  %v946_v35 = vadd.f32 %v3803_v40, %v945_v55 }
 0x123   : > { %v1174_v44 = vpack.c.bf16 %v1136_v36, %v1135_v33  ;;  %v1146_v11 = vadd.f32 %v2983_v54, %v946_v35 }
 0x126   : > { %3235 = vmatmul.mubr.msk.bf16.gmra.mxu1 %vm1220_vm1, %v1168_v49  ;;  %v1142_v49 = vadd.f32 %v2975_v43, %v930_v21 }
 0x127   : > { %3238 = vmatprep.mubr.msk.bf16.mxu1 %vm1220_vm1, %v1169_v47  ;;  %v2971_v47 = vunpack.c.h.bf16 %v3014_v29 }
 0x128   : > { %v1177_v13 = vpack.c.bf16 %v1142_v49, %v1141_v48 }
 0x129   : > { %v1140_v52 = vadd.f32 %v2971_v47, %v922_v38 }
 0x12b   : > { %v1176_v60 = vpack.c.bf16 %v1140_v52, %v1139_v50 }
 0x12e   : > { %3239 = vmatmul.mubr.msk.bf16.gmra.mxu1 %vm1220_vm1, %v1170_v4  ;;  %v3018_v4 = vld [vmem:[%s3797_s24 + $0xf8] sm:$0xff]  }
 0x12f   : > { %3242 = vmatprep.mubr.msk.bf16.mxu1 %vm1220_vm1, %v1171_v0  ;;  %v1145_v0 = vadd.f32 %v2982_v32, %v943_v58  ;;  %v2986_v6 = vunpack.c.l.bf16 %v3018_v4  ;;  %v2987_v53 = vunpack.c.h.bf16 %v3018_v4 }
 0x131   : > { %v1179_v7 = vpack.c.bf16 %v1146_v11, %v1145_v0  ;;  %v1147_v9 = vadd.f32 %v2986_v6, %v951_v10  ;;  %v1148_v18 = vadd.f32 %v2987_v53, %v954_v12 }
 0x133   : > { %v1180_v15 = vpack.c.bf16 %v1148_v18, %v1147_v9 }
 0x136   : > { %3243 = vmatmul.mubr.msk.bf16.gmra.mxu1 %vm1220_vm1, %v1172_v26 }
 0x137   : > { %3246 = vmatprep.mubr.msk.bf16.mxu1 %vm1220_vm1, %v1173_v17 }
 0x13e   : > { %3247 = vmatmul.mubr.msk.bf16.gmra.mxu1 %vm1220_vm1, %v1174_v44 }
 0x13f   : > { %3250 = vmatprep.mubr.msk.bf16.mxu1 %vm1220_vm1, %v1175_v39 }
 0x146   : > { %3251 = vmatmul.mubr.msk.bf16.gmra.mxu1 %vm1220_vm1, %v1176_v60 }
 0x147   : > { %3254 = vmatprep.mubr.msk.bf16.mxu1 %vm1220_vm1, %v1177_v13 }
 0x14e   : > { %3255 = vmatmul.mubr.msk.bf16.gmra.mxu1 %vm1220_vm1, %v1178_v8 }
 0x14f   : > { %3258 = vmatprep.mubr.msk.bf16.mxu1 %vm1220_vm1, %v1179_v7 }
 0x156   : > { %3259 = vmatmul.mubr.msk.bf16.gmra.mxu1 %vm1220_vm1, %v1180_v15 }
 0x19e   : > { %v3200_v57 = vpop.f32.mrf.mxu1 }
 0x19f   : > { %v1360_v17 = vadd.f32 %v3200_v57, %v4019_v45 }
 0x1a0   : > { %v1351_v16 = vpop.f32.mrf.mxu1 }
 0x1a1   : > { %v1352_v40 = vadd.f32 %v4019_v45, %v1351_v16  ;;  %v1608_v27 = vmax.f32 %v1360_v17, 0.0 }
 0x1a2   : > { %v3201_v59 = vpop.f32.mrf.mxu1 }
 0x1a3   : > { %v1363_v25 = vadd.f32 %v3201_v59, %v4019_v45  ;;  %v1606_v23 = vmax.f32 %v1352_v40, 0.0 }
 0x1a4   : > { %v1354_v41 = vpop.f32.mrf.mxu1 }
 0x1a5   : > { %v1355_v14 = vadd.f32 %v4019_v45, %v1354_v41  ;;  %v1609_v22 = vmax.f32 %v1363_v25, 0.0 }
 0x1a6   : > { %v3204_v26 = vpop.f32.mrf.mxu1 }
 0x1a7   : > { %v1607_v24 = vmax.f32 %v1355_v14, 0.0  ;;  %v1671_v30 = vpack.c.bf16 %v1609_v22, %v1608_v27  ;;  %v1376_v36 = vadd.f32 %v3204_v26, %v4019_v45 }
 0x1a8   : > { %v1367_v28 = vpop.f32.mrf.mxu1 }
 0x1a9   : > { %v1670_v29 = vpack.c.bf16 %v1607_v24, %v1606_v23  ;;  %v1368_v19 = vadd.f32 %v4019_v45, %v1367_v28  ;;  %v1612_v43 = vmax.f32 %v1376_v36, 0.0 }
 0x1aa   : > { %v3205_v31 = vpop.f32.mrf.mxu1 }
 0x1ab   : > { %v1379_v33 = vadd.f32 %v3205_v31, %v4019_v45  ;;  %3270 = vmatprep.mubr.msk.bf16.mxu0 %vm1220_vm1, %v1670_v29  ;;  %v1610_v42 = vmax.f32 %v1368_v19, 0.0 }
 0x1ac   : > { %v1370_v37 = vpop.f32.mrf.mxu1  ;;  %3271 = vmatmul.mubr.msk.bf16.vlgmr.msra.gmra.mxu0 %vm1220_vm1, %v1671_v30 }
 0x1ad   : > { %v1371_v5 = vadd.f32 %v4019_v45, %v1370_v37  ;;  %v1613_v3 = vmax.f32 %v1379_v33, 0.0 }
 0x1ae   : > { %v3208_v39 = vpop.f32.mrf.mxu1 }
 0x1af   : > { %v1611_v21 = vmax.f32 %v1371_v5, 0.0  ;;  %v1673_v38 = vpack.c.bf16 %v1613_v3, %v1612_v43  ;;  %v1392_v48 = vadd.f32 %v3208_v39, %v4019_v45 }
 0x1b0   : > { %v1383_v44 = vpop.f32.mrf.mxu1 }
 0x1b1   : > { %v1672_v46 = vpack.c.bf16 %v1611_v21, %v1610_v42  ;;  %v1384_v51 = vadd.f32 %v4019_v45, %v1383_v44  ;;  %v1616_v32 = vmax.f32 %v1392_v48, 0.0 }
 0x1b2   : > { %v3209_v47 = vpop.f32.mrf.mxu1 }
 0x1b3   : > { %v1395_v20 = vadd.f32 %v3209_v47, %v4019_v45  ;;  %3274 = vmatprep.mubr.msk.bf16.mxu0 %vm1220_vm1, %v1672_v46  ;;  %v1614_v55 = vmax.f32 %v1384_v51, 0.0 }
 0x1b4   : > { %v1386_v49 = vpop.f32.mrf.mxu1  ;;  %3275 = vmatmul.mubr.msk.bf16.gmra.mxu0 %vm1220_vm1, %v1673_v38 }
 0x1b5   : > { %v1387_v34 = vadd.f32 %v4019_v45, %v1386_v49  ;;  %v1617_v50 = vmax.f32 %v1395_v20, 0.0 }
 0x1b6   : > { %v3212_v52 = vpop.f32.mrf.mxu1 }
 0x1b7   : > { %v1615_v56 = vmax.f32 %v1387_v34, 0.0  ;;  %v1675_v35 = vpack.c.bf16 %v1617_v50, %v1616_v32  ;;  %v1408_v62 = vadd.f32 %v3212_v52, %v4019_v45 }
 0x1b8   : > { %v1399_v13 = vpop.f32.mrf.mxu1 }
 0x1b9   : > { %v1674_v58 = vpack.c.bf16 %v1615_v56, %v1614_v55  ;;  %v1400_v60 = vadd.f32 %v4019_v45, %v1399_v13  ;;  %v1620_v6 = vmax.f32 %v1408_v62, 0.0 }
 0x1ba   : > { %v3213_v54 = vpop.f32.mrf.mxu1 }
 0x1bb   : > { %v1411_v61 = vadd.f32 %v3213_v54, %v4019_v45  ;;  %3278 = vmatprep.mubr.msk.bf16.mxu0 %vm1220_vm1, %v1674_v58  ;;  %v1618_v2 = vmax.f32 %v1400_v60, 0.0 }
 0x1bc   : > { %v1402_v63 = vpop.f32.mrf.mxu1  ;;  %3279 = vmatmul.mubr.msk.bf16.gmra.mxu0 %vm1220_vm1, %v1675_v35 }
 0x1bd   : > { %v1403_v0 = vadd.f32 %v4019_v45, %v1402_v63  ;;  %v1621_v11 = vmax.f32 %v1411_v61, 0.0 }
 0x1be   : > { %v3216_v1 = vpop.f32.mrf.mxu1 }
 0x1bf   : > { %v1619_v4 = vmax.f32 %v1403_v0, 0.0  ;;  %v1677_v10 = vpack.c.bf16 %v1621_v11, %v1620_v6  ;;  %v1424_v18 = vadd.f32 %v3216_v1, %v4019_v45 }
 0x1c0   : > { %v1415_v7 = vpop.f32.mrf.mxu1 }
 0x1c1   : > { %v1676_v8 = vpack.c.bf16 %v1619_v4, %v1618_v2  ;;  %v1416_v53 = vadd.f32 %v4019_v45, %v1415_v7  ;;  %v1624_v17 = vmax.f32 %v1424_v18, 0.0 }
 0x1c2   : > { %v3217_v12 = vpop.f32.mrf.mxu1 }
 0x1c3   : > { %v1427_v9 = vadd.f32 %v3217_v12, %v4019_v45  ;;  %3282 = vmatprep.mubr.msk.bf16.mxu0 %vm1220_vm1, %v1676_v8  ;;  %v1622_v40 = vmax.f32 %v1416_v53, 0.0 }
 0x1c4   : > { %v1418_v15 = vpop.f32.mrf.mxu1  ;;  %3283 = vmatmul.mubr.msk.bf16.gmra.mxu0 %vm1220_vm1, %v1677_v10 }
 0x1c5   : > { %v1419_v57 = vadd.f32 %v4019_v45, %v1418_v15  ;;  %v1625_v16 = vmax.f32 %v1427_v9, 0.0 }
 0x1c6   : > { %v3220_v59 = vpop.f32.mrf.mxu1 }
 0x1c7   : > { %v1623_v25 = vmax.f32 %v1419_v57, 0.0  ;;  %v1679_v22 = vpack.c.bf16 %v1625_v16, %v1624_v17  ;;  %v1440_v27 = vadd.f32 %v3220_v59, %v4019_v45 }
 0x1c8   : > { %v1431_v41 = vpop.f32.mrf.mxu1 }
 0x1c9   : > { %v1678_v14 = vpack.c.bf16 %v1623_v25, %v1622_v40  ;;  %v1432_v23 = vadd.f32 %v4019_v45, %v1431_v41  ;;  %v1628_v36 = vmax.f32 %v1440_v27, 0.0 }
 0x1ca   : > { %v3221_v26 = vpop.f32.mrf.mxu1 }
 0x1cb   : > { %v1443_v24 = vadd.f32 %v3221_v26, %v4019_v45  ;;  %3286 = vmatprep.mubr.msk.bf16.mxu0 %vm1220_vm1, %v1678_v14  ;;  %v1626_v19 = vmax.f32 %v1432_v23, 0.0 }
 0x1cc   : > { %v1434_v28 = vpop.f32.mrf.mxu1  ;;  %3287 = vmatmul.mubr.msk.bf16.gmra.mxu0 %vm1220_vm1, %v1679_v22 }
 0x1cd   : > { %v1435_v29 = vadd.f32 %v4019_v45, %v1434_v28  ;;  %v1629_v30 = vmax.f32 %v1443_v24, 0.0 }
 0x1ce   : > { %v3224_v31 = vpop.f32.mrf.mxu1 }
 0x1cf   : > { %v1627_v33 = vmax.f32 %v1435_v29, 0.0  ;;  %v1681_v3 = vpack.c.bf16 %v1629_v30, %v1628_v36  ;;  %v1456_v43 = vadd.f32 %v3224_v31, %v4019_v45 }
 0x1d0   : > { %v1447_v37 = vpop.f32.mrf.mxu1 }
 0x1d1   : > { %v1680_v5 = vpack.c.bf16 %v1627_v33, %v1626_v19  ;;  %v1448_v42 = vadd.f32 %v4019_v45, %v1447_v37  ;;  %v1632_v48 = vmax.f32 %v1456_v43, 0.0 }
 0x1d2   : > { %v3225_v39 = vpop.f32.mrf.mxu1 }
 0x1d3   : > { %v1459_v21 = vadd.f32 %v3225_v39, %v4019_v45  ;;  %3290 = vmatprep.mubr.msk.bf16.mxu0 %vm1220_vm1, %v1680_v5  ;;  %v1630_v51 = vmax.f32 %v1448_v42, 0.0 }
 0x1d4   : > { %v1450_v44 = vpop.f32.mrf.mxu1  ;;  %3291 = vmatmul.mubr.msk.bf16.gmra.mxu0 %vm1220_vm1, %v1681_v3 }
 0x1d5   : > { %v1451_v46 = vadd.f32 %v4019_v45, %v1450_v44  ;;  %v1633_v38 = vmax.f32 %v1459_v21, 0.0 }
 0x1d6   : > { %v3228_v47 = vpop.f32.mrf.mxu1 }
 0x1d7   : > { %v1631_v20 = vmax.f32 %v1451_v46, 0.0  ;;  %v1683_v50 = vpack.c.bf16 %v1633_v38, %v1632_v48  ;;  %v1472_v32 = vadd.f32 %v3228_v47, %v4019_v45 }
 0x1d8   : > { %v1463_v49 = vpop.f32.mrf.mxu1 }
 0x1d9   : > { %v1682_v34 = vpack.c.bf16 %v1631_v20, %v1630_v51  ;;  %v1464_v55 = vadd.f32 %v4019_v45, %v1463_v49  ;;  %v1636_v62 = vmax.f32 %v1472_v32, 0.0 }
 0x1da   : > { %v3229_v52 = vpop.f32.mrf.mxu1 }
 0x1db   : > { %v1475_v56 = vadd.f32 %v3229_v52, %v4019_v45  ;;  %3294 = vmatprep.mubr.msk.bf16.mxu0 %vm1220_vm1, %v1682_v34  ;;  %v1634_v60 = vmax.f32 %v1464_v55, 0.0 }
 0x1dc   : > { %v1466_v13 = vpop.f32.mrf.mxu1  ;;  %3295 = vmatmul.mubr.msk.bf16.gmra.mxu0 %vm1220_vm1, %v1683_v50 }
 0x1dd   : > { %v1467_v58 = vadd.f32 %v4019_v45, %v1466_v13  ;;  %v1637_v35 = vmax.f32 %v1475_v56, 0.0 }
 0x1de   : > { %v3232_v54 = vpop.f32.mrf.mxu1 }
 0x1df   : > { %v1635_v61 = vmax.f32 %v1467_v58, 0.0  ;;  %v1685_v11 = vpack.c.bf16 %v1637_v35, %v1636_v62  ;;  %v1488_v6 = vadd.f32 %v3232_v54, %v4019_v45 }
 0x1e0   : > { %v1479_v63 = vpop.f32.mrf.mxu1 }
 0x1e1   : > { %v1684_v0 = vpack.c.bf16 %v1635_v61, %v1634_v60  ;;  %v1480_v2 = vadd.f32 %v4019_v45, %v1479_v63  ;;  %v1640_v18 = vmax.f32 %v1488_v6, 0.0 }
 0x1e2   : > { %v3233_v1 = vpop.f32.mrf.mxu1 }
 0x1e3   : > { %v1491_v4 = vadd.f32 %v3233_v1, %v4019_v45  ;;  %3298 = vmatprep.mubr.msk.bf16.mxu0 %vm1220_vm1, %v1684_v0  ;;  %v1638_v53 = vmax.f32 %v1480_v2, 0.0 }
 0x1e4   : > { %v1482_v7 = vpop.f32.mrf.mxu1  ;;  %3299 = vmatmul.mubr.msk.bf16.gmra.mxu0 %vm1220_vm1, %v1685_v11 }
 0x1e5   : > { %v1483_v8 = vadd.f32 %v4019_v45, %v1482_v7  ;;  %v1641_v10 = vmax.f32 %v1491_v4, 0.0 }
 0x1e6   : > { %v3236_v12 = vpop.f32.mrf.mxu1 }
 0x1e7   : > { %v1639_v9 = vmax.f32 %v1483_v8, 0.0  ;;  %v1687_v16 = vpack.c.bf16 %v1641_v10, %v1640_v18  ;;  %v1504_v17 = vadd.f32 %v3236_v12, %v4019_v45 }
 0x1e8   : > { %v1495_v15 = vpop.f32.mrf.mxu1 }
 0x1e9   : > { %v1686_v57 = vpack.c.bf16 %v1639_v9, %v1638_v53  ;;  %v1496_v40 = vadd.f32 %v4019_v45, %v1495_v15  ;;  %v1644_v27 = vmax.f32 %v1504_v17, 0.0 }
 0x1ea   : > { %v3237_v59 = vpop.f32.mrf.mxu1 }
 0x1eb   : > { %v1507_v25 = vadd.f32 %v3237_v59, %v4019_v45  ;;  %3302 = vmatprep.mubr.msk.bf16.mxu0 %vm1220_vm1, %v1686_v57  ;;  %v1642_v23 = vmax.f32 %v1496_v40, 0.0 }
 0x1ec   : > { %v1498_v41 = vpop.f32.mrf.mxu1  ;;  %3303 = vmatmul.mubr.msk.bf16.gmra.mxu0 %vm1220_vm1, %v1687_v16 }
 0x1ed   : > { %v1499_v14 = vadd.f32 %v4019_v45, %v1498_v41  ;;  %v1645_v22 = vmax.f32 %v1507_v25, 0.0 }
 0x1ee   : > { %v3240_v26 = vpop.f32.mrf.mxu1 }
 0x1ef   : > { %v1643_v24 = vmax.f32 %v1499_v14, 0.0  ;;  %v1689_v30 = vpack.c.bf16 %v1645_v22, %v1644_v27  ;;  %v1520_v36 = vadd.f32 %v3240_v26, %v4019_v45 }
 0x1f0   : > { %v1511_v28 = vpop.f32.mrf.mxu1 }
 0x1f1   : > { %v1688_v29 = vpack.c.bf16 %v1643_v24, %v1642_v23  ;;  %v1512_v19 = vadd.f32 %v4019_v45, %v1511_v28  ;;  %v1648_v43 = vmax.f32 %v1520_v36, 0.0 }
 0x1f2   : > { %v3241_v31 = vpop.f32.mrf.mxu1 }
 0x1f3   : > { %v1523_v33 = vadd.f32 %v3241_v31, %v4019_v45  ;;  %3306 = vmatprep.mubr.msk.bf16.mxu0 %vm1220_vm1, %v1688_v29  ;;  %v1646_v42 = vmax.f32 %v1512_v19, 0.0 }
 0x1f4   : > { %v1514_v37 = vpop.f32.mrf.mxu1  ;;  %3307 = vmatmul.mubr.msk.bf16.gmra.mxu0 %vm1220_vm1, %v1689_v30 }
 0x1f5   : > { %v1515_v5 = vadd.f32 %v4019_v45, %v1514_v37  ;;  %v1649_v3 = vmax.f32 %v1523_v33, 0.0 }
 0x1f6   : > { %v3244_v39 = vpop.f32.mrf.mxu1 }
 0x1f7   : > { %v1647_v21 = vmax.f32 %v1515_v5, 0.0  ;;  %v1691_v38 = vpack.c.bf16 %v1649_v3, %v1648_v43  ;;  %v1536_v48 = vadd.f32 %v3244_v39, %v4019_v45 }
 0x1f8   : > { %v1527_v44 = vpop.f32.mrf.mxu1 }
 0x1f9   : > { %v1690_v46 = vpack.c.bf16 %v1647_v21, %v1646_v42  ;;  %v1528_v51 = vadd.f32 %v4019_v45, %v1527_v44  ;;  %v1652_v32 = vmax.f32 %v1536_v48, 0.0 }
 0x1fa   : > { %v3245_v47 = vpop.f32.mrf.mxu1 }
 0x1fb   : > { %v1539_v20 = vadd.f32 %v3245_v47, %v4019_v45  ;;  %3310 = vmatprep.mubr.msk.bf16.mxu0 %vm1220_vm1, %v1690_v46  ;;  %v1650_v55 = vmax.f32 %v1528_v51, 0.0 }
 0x1fc   : > { %v1530_v49 = vpop.f32.mrf.mxu1  ;;  %3311 = vmatmul.mubr.msk.bf16.gmra.mxu0 %vm1220_vm1, %v1691_v38 }
 0x1fd   : > { %v1531_v34 = vadd.f32 %v4019_v45, %v1530_v49  ;;  %v1653_v50 = vmax.f32 %v1539_v20, 0.0 }
 0x1fe   : > { %v3248_v52 = vpop.f32.mrf.mxu1 }
 0x1ff   : > { %v1651_v56 = vmax.f32 %v1531_v34, 0.0  ;;  %v1693_v35 = vpack.c.bf16 %v1653_v50, %v1652_v32  ;;  %v1552_v62 = vadd.f32 %v3248_v52, %v4019_v45  ;;  %v4120_v34 = vld [vmem:[%s4332_s7] ss:$0 sm:$0xff] }
 0x200   : > { %v1543_v13 = vpop.f32.mrf.mxu1 }
 0x201   : > { %v1692_v58 = vpack.c.bf16 %v1651_v56, %v1650_v55  ;;  %v1544_v60 = vadd.f32 %v4019_v45, %v1543_v13  ;;  %v1656_v6 = vmax.f32 %v1552_v62, 0.0 }
 0x202   : > { %v3249_v54 = vpop.f32.mrf.mxu1 }
 0x203   : > { %v1555_v61 = vadd.f32 %v3249_v54, %v4019_v45  ;;  %3314 = vmatprep.mubr.msk.bf16.mxu0 %vm1220_vm1, %v1692_v58  ;;  %v1654_v2 = vmax.f32 %v1544_v60, 0.0 }
 0x204   : > { %v1546_v63 = vpop.f32.mrf.mxu1  ;;  %3315 = vmatmul.mubr.msk.bf16.gmra.mxu0 %vm1220_vm1, %v1693_v35 }
 0x205   : > { %v1547_v0 = vadd.f32 %v4019_v45, %v1546_v63  ;;  %v1657_v11 = vmax.f32 %v1555_v61, 0.0 }
 0x206   : > { %v3252_v1 = vpop.f32.mrf.mxu1 }
 0x207   : > { %v1655_v4 = vmax.f32 %v1547_v0, 0.0  ;;  %v1695_v10 = vpack.c.bf16 %v1657_v11, %v1656_v6  ;;  %v1568_v18 = vadd.f32 %v3252_v1, %v4019_v45 }
 0x208   : > { %v1559_v7 = vpop.f32.mrf.mxu1 }
 0x209   : > { %v1694_v8 = vpack.c.bf16 %v1655_v4, %v1654_v2  ;;  %v1560_v53 = vadd.f32 %v4019_v45, %v1559_v7  ;;  %v1660_v17 = vmax.f32 %v1568_v18, 0.0 }
 0x20a   : > { %v3253_v12 = vpop.f32.mrf.mxu1 }
 0x20b   : > { %v1571_v9 = vadd.f32 %v3253_v12, %v4019_v45  ;;  %3318 = vmatprep.mubr.msk.bf16.mxu0 %vm1220_vm1, %v1694_v8  ;;  %v1658_v40 = vmax.f32 %v1560_v53, 0.0 }
 0x20c   : > { %v1562_v15 = vpop.f32.mrf.mxu1  ;;  %3319 = vmatmul.mubr.msk.bf16.gmra.mxu0 %vm1220_vm1, %v1695_v10 }
 0x20d   : > { %v1563_v57 = vadd.f32 %v4019_v45, %v1562_v15  ;;  %v1661_v16 = vmax.f32 %v1571_v9, 0.0 }
 0x20e   : > { %v3256_v59 = vpop.f32.mrf.mxu1 }
 0x20f   : > { %v1659_v25 = vmax.f32 %v1563_v57, 0.0  ;;  %v1697_v22 = vpack.c.bf16 %v1661_v16, %v1660_v17  ;;  %v1584_v27 = vadd.f32 %v3256_v59, %v4019_v45 }
 0x210   : > { %v1575_v41 = vpop.f32.mrf.mxu1 }
 0x211   : > { %v1696_v14 = vpack.c.bf16 %v1659_v25, %v1658_v40  ;;  %v1576_v23 = vadd.f32 %v4019_v45, %v1575_v41  ;;  %v1664_v36 = vmax.f32 %v1584_v27, 0.0 }
 0x212   : > { %v3257_v26 = vpop.f32.mrf.mxu1 }
 0x213   : > { %v1587_v24 = vadd.f32 %v3257_v26, %v4019_v45  ;;  %3322 = vmatprep.mubr.msk.bf16.mxu0 %vm1220_vm1, %v1696_v14  ;;  %v1662_v19 = vmax.f32 %v1576_v23, 0.0 }
 0x214   : > { %v1578_v28 = vpop.f32.mrf.mxu1  ;;  %3323 = vmatmul.mubr.msk.bf16.gmra.mxu0 %vm1220_vm1, %v1697_v22 }
 0x215   : > { %v1579_v29 = vadd.f32 %v4019_v45, %v1578_v28  ;;  %v1665_v30 = vmax.f32 %v1587_v24, 0.0 }
 0x216   : > { %v3260_v31 = vpop.f32.mrf.mxu1 }
 0x217   : > { %v1663_v33 = vmax.f32 %v1579_v29, 0.0  ;;  %v1699_v3 = vpack.c.bf16 %v1665_v30, %v1664_v36  ;;  %v1600_v43 = vadd.f32 %v3260_v31, %v4019_v45 }
 0x218   : > { %v1591_v37 = vpop.f32.mrf.mxu1 }
 0x219   : > { %v1698_v5 = vpack.c.bf16 %v1663_v33, %v1662_v19  ;;  %v1592_v42 = vadd.f32 %v4019_v45, %v1591_v37  ;;  %v1668_v20 = vmax.f32 %v1600_v43, 0.0 }
 0x21a   : > { %v3261_v39 = vpop.f32.mrf.mxu1 }
 0x21b   : > { %v1603_v21 = vadd.f32 %v3261_v39, %v4019_v45  ;;  %3326 = vmatprep.mubr.msk.bf16.mxu0 %vm1220_vm1, %v1698_v5  ;;  %v1666_v47 = vmax.f32 %v1592_v42, 0.0 }
 0x21c   : > { %v1594_v44 = vpop.f32.mrf.mxu1  ;;  %3327 = vmatmul.mubr.msk.bf16.gmra.mxu0 %vm1220_vm1, %v1699_v3 }
 0x21d   : > { %v1595_v46 = vadd.f32 %v4019_v45, %v1594_v44  ;;  %v1669_v38 = vmax.f32 %v1603_v21, 0.0 }
 0x21f   : > { %v1667_v51 = vmax.f32 %v1595_v46, 0.0  ;;  %v1701_v49 = vpack.c.bf16 %v1669_v38, %v1668_v20 }
 0x221   : > { %v1700_v48 = vpack.c.bf16 %v1667_v51, %v1666_v47 }
 0x223   : > { %3330 = vmatprep.mubr.msk.bf16.mxu0 %vm1220_vm1, %v1700_v48 }
 0x224   : > { %3331 = vmatmul.mubr.msk.bf16.gmra.mxu0 %vm1220_vm1, %v1701_v49 }
 0x26c   : > { %v3272_v50 = vpop.f32.mrf.mxu0 }
 0x26d   : > { %v1880_v52 = vadd.f32 %v3272_v50, %v4120_v34 }
 0x26e   : > { %v1871_v55 = vpop.f32.mrf.mxu0 }
 0x26f   : > { %v2796_v45 = vmul.f32 -1.442695, %v1880_v52  ;;  %v1872_v56 = vadd.f32 %v4120_v34, %v1871_v55 }
 0x270   : > { %v3273_v32 = vpop.f32.mrf.mxu0 }
 0x271   : > { %3385 = vpow2.f32 %v2796_v45  ;;  %v2794_v13 = vmul.f32 -1.442695, %v1872_v56  ;;  %v1883_v58 = vadd.f32 %v3273_v32, %v4120_v34 }
 0x272   : > { %v1874_v35 = vpop.f32.mrf.mxu0 }
 0x273   : > { %3387 = vpow2.f32 %v2794_v13  ;;  %v2797_v54 = vmul.f32 -1.442695, %v1883_v58  ;;  %v1875_v60 = vadd.f32 %v4120_v34, %v1874_v35 }
 0x274   : > { %v3276_v61 = vpop.f32.mrf.mxu0 }
 0x275   : > { %3389 = vpow2.f32 %v2797_v54  ;;  %v2795_v62 = vmul.f32 -1.442695, %v1875_v60  ;;  %v1896_v63 = vadd.f32 %v3276_v61, %v4120_v34 }
 0x276   : > { %v1887_v0 = vpop.f32.mrf.mxu0 }
 0x277   : > { %3391 = vpow2.f32 %v2795_v62  ;;  %v2800_v11 = vmul.f32 -1.442695, %v1896_v63  ;;  %v1888_v1 = vadd.f32 %v4120_v34, %v1887_v0 }
 0x278   : > { %v3277_v2 = vpop.f32.mrf.mxu0 }
 0x279   : > { %3393 = vpow2.f32 %v2800_v11  ;;  %v2798_v4 = vmul.f32 -1.442695, %v1888_v1  ;;  %v1899_v6 = vadd.f32 %v3277_v2, %v4120_v34 }
 0x27a   : > { %v1890_v7 = vpop.f32.mrf.mxu0 }
 0x27b   : > { %3395 = vpow2.f32 %v2798_v4  ;;  %v2801_v8 = vmul.f32 -1.442695, %v1899_v6  ;;  %v1891_v10 = vadd.f32 %v4120_v34, %v1890_v7 }
 0x27c   : > { %v3280_v12 = vpop.f32.mrf.mxu0 }
 0x27d   : > { %3397 = vpow2.f32 %v2801_v8  ;;  %v2799_v53 = vmul.f32 -1.442695, %v1891_v10  ;;  %v1912_v9 = vadd.f32 %v3280_v12, %v4120_v34 }
 0x27e   : > { %v3386_v18 = vpop.eup %3385  ;;  %v1903_v15 = vpop.f32.mrf.mxu0 }
 0x27f   : > { %v2320_v57 = vadd.f32 1.0, %v3386_v18  ;;  %3399 = vpow2.f32 %v2799_v53  ;;  %v2804_v16 = vmul.f32 -1.442695, %v1912_v9  ;;  %v1904_v59 = vadd.f32 %v4120_v34, %v1903_v15 }
 0x280   : > { %v3388_v40 = vpop.eup %3387  ;;  %v3281_v25 = vpop.f32.mrf.mxu0 }
 0x281   : > { %3401 = vrcp.f32 %v2320_v57  ;;  %v2318_v17 = vadd.f32 1.0, %v3388_v40  ;;  %v2802_v41 = vmul.f32 -1.442695, %v1904_v59  ;;  %v1915_v14 = vadd.f32 %v3281_v25, %v4120_v34 }
 0x282   : > { %v3390_v22 = vpop.eup %3389  ;;  %3403 = vpow2.f32 %v2804_v16  ;;  %v1906_v26 = vpop.f32.mrf.mxu0 }
 0x283   : > { %3405 = vrcp.f32 %v2318_v17  ;;  %v2321_v23 = vadd.f32 1.0, %v3390_v22  ;;  %v2805_v24 = vmul.f32 -1.442695, %v1915_v14  ;;  %v1907_v27 = vadd.f32 %v4120_v34, %v1906_v26 }
 0x284   : > { %v3392_v28 = vpop.eup %3391  ;;  %3407 = vpow2.f32 %v2802_v41  ;;  %v3284_v29 = vpop.f32.mrf.mxu0 }
 0x285   : > { %3409 = vrcp.f32 %v2321_v23  ;;  %v2319_v30 = vadd.f32 1.0, %v3392_v28  ;;  %v2803_v31 = vmul.f32 -1.442695, %v1907_v27  ;;  %v1928_v19 = vadd.f32 %v3284_v29, %v4120_v34 }
 0x286   : > { %v3394_v33 = vpop.eup %3393  ;;  %3411 = vpow2.f32 %v2805_v24  ;;  %v1919_v36 = vpop.f32.mrf.mxu0 }
 0x287   : > { %3413 = vrcp.f32 %v2319_v30  ;;  %v2324_v37 = vadd.f32 1.0, %v3394_v33  ;;  %v2808_v5 = vmul.f32 -1.442695, %v1928_v19  ;;  %v1920_v3 = vadd.f32 %v4120_v34, %v1919_v36 }
 0x288   : > { %v3396_v39 = vpop.eup %3395  ;;  %3415 = vpow2.f32 %v2803_v31  ;;  %v3285_v42 = vpop.f32.mrf.mxu0 }
 0x289   : > { %3417 = vrcp.f32 %v2324_v37  ;;  %v2322_v21 = vadd.f32 1.0, %v3396_v39  ;;  %v2806_v43 = vmul.f32 -1.442695, %v1920_v3  ;;  %v1931_v44 = vadd.f32 %v3285_v42, %v4120_v34 }
 0x28a   : > { %v3398_v46 = vpop.eup %3397  ;;  %3419 = vpow2.f32 %v2808_v5  ;;  %v1922_v38 = vpop.f32.mrf.mxu0 }
 0x28b   : > { %3421 = vrcp.f32 %v2322_v21  ;;  %v2325_v47 = vadd.f32 1.0, %v3398_v46  ;;  %v2809_v51 = vmul.f32 -1.442695, %v1931_v44  ;;  %v1923_v20 = vadd.f32 %v4120_v34, %v1922_v38 }
 0x28c   : > { %v3400_v48 = vpop.eup %3399  ;;  %3423 = vpow2.f32 %v2806_v43  ;;  %v3288_v49 = vpop.f32.mrf.mxu0 }
 0x28d   : > { %3425 = vrcp.f32 %v2325_v47  ;;  %v2323_v50 = vadd.f32 1.0, %v3400_v48  ;;  %v2807_v52 = vmul.f32 -1.442695, %v1923_v20  ;;  %v1944_v55 = vadd.f32 %v3288_v49, %v4120_v34 }
 0x28e   : > { %v3402_v45 = vpop.eup %3401  ;;  %3427 = vpow2.f32 %v2809_v51  ;;  %v1935_v56 = vpop.f32.mrf.mxu0 }
 0x28f   : > { %v3404_v32 = vpop.eup %3403  ;;  %2513 = vst.msk [vmem:[%s4142_s22 + $0x10] sm:$0xff] %vm2510_vm2, %v3402_v45  ;;  %3429 = vrcp.f32 %v2323_v50  ;;  %v2812_v13 = vmul.f32 -1.442695, %v1944_v55  ;;  %v1936_v58 = vadd.f32 %v4120_v34, %v1935_v56 }
 0x290   : > { %v3406_v35 = vpop.eup %3405  ;;  %v2328_v54 = vadd.f32 1.0, %v3404_v32  ;;  %3431 = vpow2.f32 %v2807_v52  ;;  %v3289_v60 = vpop.f32.mrf.mxu0 }
 0x291   : > { %v3408_v61 = vpop.eup %3407  ;;  %2511 = vst.msk [vmem:[%s4142_s22] sm:$0xff] %vm2510_vm2, %v3406_v35  ;;  %3433 = vpow2.f32 %v2812_v13  ;;  %v2810_v62 = vmul.f32 -1.442695, %v1936_v58  ;;  %v1947_v63 = vadd.f32 %v3289_v60, %v4120_v34 }
 0x292   : > { %v3410_v0 = vpop.eup %3409  ;;  %3435 = vrcp.f32 %v2328_v54  ;;  %v2326_v11 = vadd.f32 1.0, %v3408_v61  ;;  %v1938_v1 = vpop.f32.mrf.mxu0 }
 0x293   : > { %v3412_v2 = vpop.eup %3411  ;;  %2514 = vst.msk [vmem:[%s4142_s22 + $0x18] sm:$0xff] %vm2510_vm2, %v3410_v0  ;;  %3437 = vpow2.f32 %v2810_v62  ;;  %v2813_v4 = vmul.f32 -1.442695, %v1947_v63  ;;  %v1939_v6 = vadd.f32 %v4120_v34, %v1938_v1 }
 0x294   : > { %v3414_v7 = vpop.eup %3413  ;;  %3439 = vrcp.f32 %v2326_v11  ;;  %v2329_v8 = vadd.f32 1.0, %v3412_v2  ;;  %v3292_v10 = vpop.f32.mrf.mxu0 }
 0x295   : > { %v3416_v12 = vpop.eup %3415  ;;  %2512 = vst.msk [vmem:[%s4142_s22 + $0x8] sm:$0xff] %vm2510_vm2, %v3414_v7  ;;  %3441 = vpow2.f32 %v2813_v4  ;;  %v2811_v53 = vmul.f32 -1.442695, %v1939_v6  ;;  %v1960_v9 = vadd.f32 %v3292_v10, %v4120_v34 }
 0x296   : > { %v3418_v18 = vpop.eup %3417  ;;  %3443 = vrcp.f32 %v2329_v8  ;;  %v2327_v15 = vadd.f32 1.0, %v3416_v12  ;;  %v1951_v57 = vpop.f32.mrf.mxu0 }
 0x297   : > { %v3420_v16 = vpop.eup %3419  ;;  %2517 = vst.msk [vmem:[%s4142_s22 + $0x30] sm:$0xff] %vm2510_vm2, %v3418_v18  ;;  %3445 = vpow2.f32 %v2811_v53  ;;  %v2816_v59 = vmul.f32 -1.442695, %v1960_v9  ;;  %v1952_v40 = vadd.f32 %v4120_v34, %v1951_v57 }
 0x298   : > { %v3422_v25 = vpop.eup %3421  ;;  %3447 = vrcp.f32 %v2327_v15  ;;  %v2332_v17 = vadd.f32 1.0, %v3420_v16  ;;  %v3293_v41 = vpop.f32.mrf.mxu0 }
 0x299   : > { %v3424_v14 = vpop.eup %3423  ;;  %2515 = vst.msk [vmem:[%s4142_s22 + $0x20] sm:$0xff] %vm2510_vm2, %v3422_v25  ;;  %3449 = vpow2.f32 %v2816_v59  ;;  %v2814_v22 = vmul.f32 -1.442695, %v1952_v40  ;;  %v1963_v26 = vadd.f32 %v3293_v41, %v4120_v34 }
 0x29a   : > { %v3426_v23 = vpop.eup %3425  ;;  %3451 = vrcp.f32 %v2332_v17  ;;  %v2330_v24 = vadd.f32 1.0, %v3424_v14  ;;  %v1954_v27 = vpop.f32.mrf.mxu0 }
 0x29b   : > { %v3428_v28 = vpop.eup %3427  ;;  %2518 = vst.msk [vmem:[%s4142_s22 + $0x38] sm:$0xff] %vm2510_vm2, %v3426_v23  ;;  %3453 = vpow2.f32 %v2814_v22  ;;  %v2817_v29 = vmul.f32 -1.442695, %v1963_v26  ;;  %v1955_v30 = vadd.f32 %v4120_v34, %v1954_v27 }
 0x29c   : > { %v3430_v31 = vpop.eup %3429  ;;  %3455 = vrcp.f32 %v2330_v24  ;;  %v2333_v19 = vadd.f32 1.0, %v3428_v28  ;;  %v3296_v33 = vpop.f32.mrf.mxu0 }
 0x29d   : > { %v3432_v36 = vpop.eup %3431  ;;  %2516 = vst.msk [vmem:[%s4142_s22 + $0x28] sm:$0xff] %vm2510_vm2, %v3430_v31  ;;  %3457 = vpow2.f32 %v2817_v29  ;;  %v2815_v37 = vmul.f32 -1.442695, %v1955_v30  ;;  %v1976_v5 = vadd.f32 %v3296_v33, %v4120_v34 }
 0x29e   : > { %v3434_v3 = vpop.eup %3433  ;;  %3459 = vrcp.f32 %v2333_v19  ;;  %v2331_v39 = vadd.f32 1.0, %v3432_v36  ;;  %v1967_v42 = vpop.f32.mrf.mxu0 }
 0x29f   : > { %v3436_v21 = vpop.eup %3435  ;;  %v2336_v43 = vadd.f32 1.0, %v3434_v3  ;;  %3461 = vpow2.f32 %v2815_v37  ;;  %v2820_v44 = vmul.f32 -1.442695, %v1976_v5  ;;  %v1968_v46 = vadd.f32 %v4120_v34, %v1967_v42 }
 0x2a0   : > { %v3438_v38 = vpop.eup %3437  ;;  %2521 = vst.msk [vmem:[%s4142_s22 + $0x50] sm:$0xff] %vm2510_vm2, %v3436_v21  ;;  %3463 = vrcp.f32 %v2331_v39  ;;  %v3297_v47 = vpop.f32.mrf.mxu0 }
 0x2a1   : > { %v3440_v51 = vpop.eup %3439  ;;  %3465 = vrcp.f32 %v2336_v43  ;;  %v2334_v20 = vadd.f32 1.0, %v3438_v38  ;;  %v2818_v48 = vmul.f32 -1.442695, %v1968_v46  ;;  %v1979_v49 = vadd.f32 %v3297_v47, %v4120_v34 }
 0x2a2   : > { %v3442_v50 = vpop.eup %3441  ;;  %2519 = vst.msk [vmem:[%s4142_s22 + $0x40] sm:$0xff] %vm2510_vm2, %v3440_v51  ;;  %3467 = vpow2.f32 %v2820_v44  ;;  %v1970_v52 = vpop.f32.mrf.mxu0 }
 0x2a3   : > { %v3444_v55 = vpop.eup %3443  ;;  %3469 = vrcp.f32 %v2334_v20  ;;  %v2337_v45 = vadd.f32 1.0, %v3442_v50  ;;  %v2821_v56 = vmul.f32 -1.442695, %v1979_v49  ;;  %v1971_v32 = vadd.f32 %v4120_v34, %v1970_v52 }
 0x2a4   : > { %v3446_v13 = vpop.eup %3445  ;;  %2522 = vst.msk [vmem:[%s4142_s22 + $0x58] sm:$0xff] %vm2510_vm2, %v3444_v55  ;;  %3471 = vpow2.f32 %v2818_v48  ;;  %v3300_v58 = vpop.f32.mrf.mxu0 }
 0x2a5   : > { %v3448_v35 = vpop.eup %3447  ;;  %3473 = vrcp.f32 %v2337_v45  ;;  %v2335_v54 = vadd.f32 1.0, %v3446_v13  ;;  %v2819_v60 = vmul.f32 -1.442695, %v1971_v32  ;;  %v1992_v61 = vadd.f32 %v3300_v58, %v4120_v34 }
 0x2a6   : > { %v3450_v62 = vpop.eup %3449  ;;  %2520 = vst.msk [vmem:[%s4142_s22 + $0x48] sm:$0xff] %vm2510_vm2, %v3448_v35  ;;  %3475 = vpow2.f32 %v2821_v56  ;;  %v1983_v63 = vpop.f32.mrf.mxu0 }
 0x2a7   : > { %v3452_v0 = vpop.eup %3451  ;;  %3477 = vrcp.f32 %v2335_v54  ;;  %v2340_v11 = vadd.f32 1.0, %v3450_v62  ;;  %v2824_v1 = vmul.f32 -1.442695, %v1992_v61  ;;  %v1984_v2 = vadd.f32 %v4120_v34, %v1983_v63 }
 0x2a8   : > { %v3454_v4 = vpop.eup %3453  ;;  %2525 = vst.msk [vmem:[%s4142_s22 + $0x70] sm:$0xff] %vm2510_vm2, %v3452_v0  ;;  %3479 = vpow2.f32 %v2819_v60  ;;  %v3301_v6 = vpop.f32.mrf.mxu0 }
 0x2a9   : > { %v3456_v7 = vpop.eup %3455  ;;  %3481 = vrcp.f32 %v2340_v11  ;;  %v2338_v8 = vadd.f32 1.0, %v3454_v4  ;;  %v2822_v10 = vmul.f32 -1.442695, %v1984_v2  ;;  %v1995_v12 = vadd.f32 %v3301_v6, %v4120_v34 }
 0x2aa   : > { %v3458_v53 = vpop.eup %3457  ;;  %2523 = vst.msk [vmem:[%s4142_s22 + $0x60] sm:$0xff] %vm2510_vm2, %v3456_v7  ;;  %3483 = vpow2.f32 %v2824_v1  ;;  %v1986_v9 = vpop.f32.mrf.mxu0 }
 0x2ab   : > { %v3460_v18 = vpop.eup %3459  ;;  %3485 = vrcp.f32 %v2338_v8  ;;  %v2341_v15 = vadd.f32 1.0, %v3458_v53  ;;  %v2825_v57 = vmul.f32 -1.442695, %v1995_v12  ;;  %v1987_v16 = vadd.f32 %v4120_v34, %v1986_v9 }
 0x2ac   : > { %v3462_v59 = vpop.eup %3461  ;;  %2526 = vst.msk [vmem:[%s4142_s22 + $0x78] sm:$0xff] %vm2510_vm2, %v3460_v18  ;;  %3487 = vpow2.f32 %v2822_v10  ;;  %v3304_v40 = vpop.f32.mrf.mxu0 }
 0x2ad   : > { %v3464_v25 = vpop.eup %3463  ;;  %3489 = vrcp.f32 %v2341_v15  ;;  %v2339_v17 = vadd.f32 1.0, %v3462_v59  ;;  %v2823_v41 = vmul.f32 -1.442695, %v1987_v16  ;;  %v2008_v14 = vadd.f32 %v3304_v40, %v4120_v34 }
 0x2ae   : > { %v3466_v22 = vpop.eup %3465  ;;  %2524 = vst.msk [vmem:[%s4142_s22 + $0x68] sm:$0xff] %vm2510_vm2, %v3464_v25  ;;  %3491 = vpow2.f32 %v2825_v57  ;;  %v1999_v26 = vpop.f32.mrf.mxu0 }
 0x2af   : > { %v3468_v23 = vpop.eup %3467  ;;  %2529 = vst.msk [vmem:[%s4142_s22 + $0x90] sm:$0xff] %vm2510_vm2, %v3466_v22  ;;  %3493 = vrcp.f32 %v2339_v17  ;;  %v2828_v24 = vmul.f32 -1.442695, %v2008_v14  ;;  %v2000_v27 = vadd.f32 %v4120_v34, %v1999_v26 }
 0x2b0   : > { %v3470_v28 = vpop.eup %3469  ;;  %v2344_v29 = vadd.f32 1.0, %v3468_v23  ;;  %3495 = vpow2.f32 %v2823_v41  ;;  %v3305_v30 = vpop.f32.mrf.mxu0 }
 0x2b1   : > { %v3472_v31 = vpop.eup %3471  ;;  %2527 = vst.msk [vmem:[%s4142_s22 + $0x80] sm:$0xff] %vm2510_vm2, %v3470_v28  ;;  %3497 = vpow2.f32 %v2828_v24  ;;  %v2826_v19 = vmul.f32 -1.442695, %v2000_v27  ;;  %v2011_v33 = vadd.f32 %v3305_v30, %v4120_v34 }
 0x2b2   : > { %v3474_v36 = vpop.eup %3473  ;;  %3499 = vrcp.f32 %v2344_v29  ;;  %v2342_v37 = vadd.f32 1.0, %v3472_v31  ;;  %v2002_v5 = vpop.f32.mrf.mxu0 }
 0x2b3   : > { %v3476_v3 = vpop.eup %3475  ;;  %2530 = vst.msk [vmem:[%s4142_s22 + $0x98] sm:$0xff] %vm2510_vm2, %v3474_v36  ;;  %3501 = vpow2.f32 %v2826_v19  ;;  %v2829_v39 = vmul.f32 -1.442695, %v2011_v33  ;;  %v2003_v42 = vadd.f32 %v4120_v34, %v2002_v5 }
 0x2b4   : > { %v3478_v21 = vpop.eup %3477  ;;  %3503 = vrcp.f32 %v2342_v37  ;;  %v2345_v43 = vadd.f32 1.0, %v3476_v3  ;;  %v3308_v44 = vpop.f32.mrf.mxu0 }
 0x2b5   : > { %v3480_v46 = vpop.eup %3479  ;;  %2528 = vst.msk [vmem:[%s4142_s22 + $0x88] sm:$0xff] %vm2510_vm2, %v3478_v21  ;;  %3505 = vpow2.f32 %v2829_v39  ;;  %v2827_v38 = vmul.f32 -1.442695, %v2003_v42  ;;  %v2024_v47 = vadd.f32 %v3308_v44, %v4120_v34 }
 0x2b6   : > { %v3482_v51 = vpop.eup %3481  ;;  %3507 = vrcp.f32 %v2345_v43  ;;  %v2343_v20 = vadd.f32 1.0, %v3480_v46  ;;  %v2015_v48 = vpop.f32.mrf.mxu0 }
 0x2b7   : > { %v3484_v49 = vpop.eup %3483  ;;  %2533 = vst.msk [vmem:[%s4142_s22 + $0xb0] sm:$0xff] %vm2510_vm2, %v3482_v51  ;;  %3509 = vpow2.f32 %v2827_v38  ;;  %v2832_v50 = vmul.f32 -1.442695, %v2024_v47  ;;  %v2016_v52 = vadd.f32 %v4120_v34, %v2015_v48 }
 0x2b8   : > { %v3486_v55 = vpop.eup %3485  ;;  %3511 = vrcp.f32 %v2343_v20  ;;  %v2348_v45 = vadd.f32 1.0, %v3484_v49  ;;  %v3309_v56 = vpop.f32.mrf.mxu0 }
 0x2b9   : > { %v3488_v32 = vpop.eup %3487  ;;  %2531 = vst.msk [vmem:[%s4142_s22 + $0xa0] sm:$0xff] %vm2510_vm2, %v3486_v55  ;;  %3513 = vpow2.f32 %v2832_v50  ;;  %v2830_v13 = vmul.f32 -1.442695, %v2016_v52  ;;  %v2027_v58 = vadd.f32 %v3309_v56, %v4120_v34 }
 0x2ba   : > { %v3490_v35 = vpop.eup %3489  ;;  %3515 = vrcp.f32 %v2348_v45  ;;  %v2346_v54 = vadd.f32 1.0, %v3488_v32  ;;  %v2018_v60 = vpop.f32.mrf.mxu0 }
 0x2bb   : > { %v3492_v61 = vpop.eup %3491  ;;  %2534 = vst.msk [vmem:[%s4142_s22 + $0xb8] sm:$0xff] %vm2510_vm2, %v3490_v35  ;;  %3517 = vpow2.f32 %v2830_v13  ;;  %v2833_v62 = vmul.f32 -1.442695, %v2027_v58  ;;  %v2019_v63 = vadd.f32 %v4120_v34, %v2018_v60 }
 0x2bc   : > { %v3494_v0 = vpop.eup %3493  ;;  %3519 = vrcp.f32 %v2346_v54  ;;  %v2349_v11 = vadd.f32 1.0, %v3492_v61  ;;  %v3312_v1 = vpop.f32.mrf.mxu0 }
 0x2bd   : > { %v3496_v2 = vpop.eup %3495  ;;  %2532 = vst.msk [vmem:[%s4142_s22 + $0xa8] sm:$0xff] %vm2510_vm2, %v3494_v0  ;;  %3521 = vpow2.f32 %v2833_v62  ;;  %v2831_v4 = vmul.f32 -1.442695, %v2019_v63  ;;  %v2040_v6 = vadd.f32 %v3312_v1, %v4120_v34 }
 0x2be   : > { %v3498_v7 = vpop.eup %3497  ;;  %3523 = vrcp.f32 %v2349_v11  ;;  %v2347_v8 = vadd.f32 1.0, %v3496_v2  ;;  %v2031_v10 = vpop.f32.mrf.mxu0 }
 0x2bf   : > { %v3500_v12 = vpop.eup %3499  ;;  %v2352_v53 = vadd.f32 1.0, %v3498_v7  ;;  %3525 = vpow2.f32 %v2831_v4  ;;  %v2836_v9 = vmul.f32 -1.442695, %v2040_v6  ;;  %v2032_v18 = vadd.f32 %v4120_v34, %v2031_v10 }
 0x2c0   : > { %v3502_v15 = vpop.eup %3501  ;;  %2537 = vst.msk [vmem:[%s4142_s22 + $0xd0] sm:$0xff] %vm2510_vm2, %v3500_v12  ;;  %3527 = vrcp.f32 %v2347_v8  ;;  %v3313_v57 = vpop.f32.mrf.mxu0 }
 0x2c1   : > { %v3504_v16 = vpop.eup %3503  ;;  %3529 = vrcp.f32 %v2352_v53  ;;  %v2350_v59 = vadd.f32 1.0, %v3502_v15  ;;  %v2834_v40 = vmul.f32 -1.442695, %v2032_v18  ;;  %v2043_v25 = vadd.f32 %v3313_v57, %v4120_v34 }
 0x2c2   : > { %v3506_v17 = vpop.eup %3505  ;;  %2535 = vst.msk [vmem:[%s4142_s22 + $0xc0] sm:$0xff] %vm2510_vm2, %v3504_v16  ;;  %3531 = vpow2.f32 %v2836_v9  ;;  %v2034_v41 = vpop.f32.mrf.mxu0 }
 0x2c3   : > { %v3508_v14 = vpop.eup %3507  ;;  %3533 = vrcp.f32 %v2350_v59  ;;  %v2353_v22 = vadd.f32 1.0, %v3506_v17  ;;  %v2837_v26 = vmul.f32 -1.442695, %v2043_v25  ;;  %v2035_v23 = vadd.f32 %v4120_v34, %v2034_v41 }
 0x2c4   : > { %v3510_v24 = vpop.eup %3509  ;;  %2538 = vst.msk [vmem:[%s4142_s22 + $0xd8] sm:$0xff] %vm2510_vm2, %v3508_v14  ;;  %3535 = vpow2.f32 %v2834_v40  ;;  %v3316_v27 = vpop.f32.mrf.mxu0 }
 0x2c5   : > { %v3512_v28 = vpop.eup %3511  ;;  %3537 = vrcp.f32 %v2353_v22  ;;  %v2351_v29 = vadd.f32 1.0, %v3510_v24  ;;  %v2835_v30 = vmul.f32 -1.442695, %v2035_v23  ;;  %v2056_v31 = vadd.f32 %v3316_v27, %v4120_v34 }
 0x2c6   : > { %v3514_v19 = vpop.eup %3513  ;;  %2536 = vst.msk [vmem:[%s4142_s22 + $0xc8] sm:$0xff] %vm2510_vm2, %v3512_v28  ;;  %3539 = vpow2.f32 %v2837_v26  ;;  %v2047_v33 = vpop.f32.mrf.mxu0 }
 0x2c7   : > { %v3516_v36 = vpop.eup %3515  ;;  %3541 = vrcp.f32 %v2351_v29  ;;  %v2356_v37 = vadd.f32 1.0, %v3514_v19  ;;  %v2840_v5 = vmul.f32 -1.442695, %v2056_v31  ;;  %v2048_v3 = vadd.f32 %v4120_v34, %v2047_v33 }
 0x2c8   : > { %v3518_v39 = vpop.eup %3517  ;;  %2541 = vst.msk [vmem:[%s4142_s22 + $0xf0] sm:$0xff] %vm2510_vm2, %v3516_v36  ;;  %3543 = vpow2.f32 %v2835_v30  ;;  %v3317_v42 = vpop.f32.mrf.mxu0 }
 0x2c9   : > { %v3520_v21 = vpop.eup %3519  ;;  %3545 = vrcp.f32 %v2356_v37  ;;  %v2354_v43 = vadd.f32 1.0, %v3518_v39  ;;  %v2838_v44 = vmul.f32 -1.442695, %v2048_v3  ;;  %v2059_v46 = vadd.f32 %v3317_v42, %v4120_v34 }
 0x2ca   : > { %v3522_v38 = vpop.eup %3521  ;;  %2539 = vst.msk [vmem:[%s4142_s22 + $0xe0] sm:$0xff] %vm2510_vm2, %v3520_v21  ;;  %3547 = vpow2.f32 %v2840_v5  ;;  %v2050_v47 = vpop.f32.mrf.mxu0 }
 0x2cb   : > { %v3524_v51 = vpop.eup %3523  ;;  %3549 = vrcp.f32 %v2354_v43  ;;  %v2357_v20 = vadd.f32 1.0, %v3522_v38  ;;  %v2841_v48 = vmul.f32 -1.442695, %v2059_v46  ;;  %v2051_v49 = vadd.f32 %v4120_v34, %v2050_v47 }
 0x2cc   : > { %v3526_v50 = vpop.eup %3525  ;;  %2542 = vst.msk [vmem:[%s4142_s22 + $0xf8] sm:$0xff] %vm2510_vm2, %v3524_v51  ;;  %3551 = vpow2.f32 %v2838_v44  ;;  %v3320_v52 = vpop.f32.mrf.mxu0 }
 0x2cd   : > { %v3528_v55 = vpop.eup %3527  ;;  %3553 = vrcp.f32 %v2357_v20  ;;  %v2355_v45 = vadd.f32 1.0, %v3526_v50  ;;  %v2839_v56 = vmul.f32 -1.442695, %v2051_v49  ;;  %v2072_v32 = vadd.f32 %v3320_v52, %v4120_v34 }
 0x2ce   : > { %v3530_v13 = vpop.eup %3529  ;;  %2540 = vst.msk [vmem:[%s4142_s22 + $0xe8] sm:$0xff] %vm2510_vm2, %v3528_v55  ;;  %3555 = vpow2.f32 %v2841_v48  ;;  %v2063_v58 = vpop.f32.mrf.mxu0 }
 0x2cf   : > { %v3532_v35 = vpop.eup %3531  ;;  %2545 = vst.msk [vmem:[%s4142_s22 + $0x110] sm:$0xff] %vm2510_vm2, %v3530_v13  ;;  %3557 = vrcp.f32 %v2355_v45  ;;  %v2844_v54 = vmul.f32 -1.442695, %v2072_v32  ;;  %v2064_v60 = vadd.f32 %v4120_v34, %v2063_v58 }
 0x2d0   : > { %v3534_v61 = vpop.eup %3533  ;;  %v2360_v62 = vadd.f32 1.0, %v3532_v35  ;;  %3559 = vpow2.f32 %v2839_v56  ;;  %v3321_v63 = vpop.f32.mrf.mxu0 }
 0x2d1   : > { %v3536_v0 = vpop.eup %3535  ;;  %2543 = vst.msk [vmem:[%s4142_s22 + $0x100] sm:$0xff] %vm2510_vm2, %v3534_v61  ;;  %3561 = vpow2.f32 %v2844_v54  ;;  %v2842_v11 = vmul.f32 -1.442695, %v2064_v60  ;;  %v2075_v1 = vadd.f32 %v3321_v63, %v4120_v34 }
 0x2d2   : > { %v3538_v2 = vpop.eup %3537  ;;  %3563 = vrcp.f32 %v2360_v62  ;;  %v2358_v4 = vadd.f32 1.0, %v3536_v0  ;;  %v2066_v6 = vpop.f32.mrf.mxu0 }
 0x2d3   : > { %v3540_v7 = vpop.eup %3539  ;;  %2546 = vst.msk [vmem:[%s4142_s22 + $0x118] sm:$0xff] %vm2510_vm2, %v3538_v2  ;;  %3565 = vpow2.f32 %v2842_v11  ;;  %v2845_v8 = vmul.f32 -1.442695, %v2075_v1  ;;  %v2067_v10 = vadd.f32 %v4120_v34, %v2066_v6 }
 0x2d4   : > { %v3542_v12 = vpop.eup %3541  ;;  %3567 = vrcp.f32 %v2358_v4  ;;  %v2361_v53 = vadd.f32 1.0, %v3540_v7  ;;  %v3324_v9 = vpop.f32.mrf.mxu0 }
 0x2d5   : > { %v3544_v18 = vpop.eup %3543  ;;  %2544 = vst.msk [vmem:[%s4142_s22 + $0x108] sm:$0xff] %vm2510_vm2, %v3542_v12  ;;  %3569 = vpow2.f32 %v2845_v8  ;;  %v2843_v15 = vmul.f32 -1.442695, %v2067_v10  ;;  %v2088_v57 = vadd.f32 %v3324_v9, %v4120_v34 }
 0x2d6   : > { %v3546_v16 = vpop.eup %3545  ;;  %3571 = vrcp.f32 %v2361_v53  ;;  %v2359_v59 = vadd.f32 1.0, %v3544_v18  ;;  %v2079_v40 = vpop.f32.mrf.mxu0 }
 0x2d7   : > { %v3548_v25 = vpop.eup %3547  ;;  %2549 = vst.msk [vmem:[%s4142_s22 + $0x130] sm:$0xff] %vm2510_vm2, %v3546_v16  ;;  %3573 = vpow2.f32 %v2843_v15  ;;  %v2848_v17 = vmul.f32 -1.442695, %v2088_v57  ;;  %v2080_v41 = vadd.f32 %v4120_v34, %v2079_v40 }
 0x2d8   : > { %v3550_v14 = vpop.eup %3549  ;;  %3575 = vrcp.f32 %v2359_v59  ;;  %v2364_v22 = vadd.f32 1.0, %v3548_v25  ;;  %v3325_v26 = vpop.f32.mrf.mxu0  ;;  %v3641_v25 = vld [vmem:[%s4332_s7] ss:$0 sm:$0xff] }
 0x2d9   : > { %v3552_v23 = vpop.eup %3551  ;;  %2547 = vst.msk [vmem:[%s4142_s22 + $0x120] sm:$0xff] %vm2510_vm2, %v3550_v14  ;;  %3577 = vpow2.f32 %v2848_v17  ;;  %v2846_v24 = vmul.f32 -1.442695, %v2080_v41  ;;  %v2091_v27 = vadd.f32 %v3325_v26, %v4120_v34 }
 0x2da   : > { %v3554_v28 = vpop.eup %3553  ;;  %3579 = vrcp.f32 %v2364_v22  ;;  %v2362_v29 = vadd.f32 1.0, %v3552_v23  ;;  %v2082_v30 = vpop.f32.mrf.mxu0 }
 0x2db   : > { %v3556_v31 = vpop.eup %3555  ;;  %2550 = vst.msk [vmem:[%s4142_s22 + $0x138] sm:$0xff] %vm2510_vm2, %v3554_v28  ;;  %3581 = vpow2.f32 %v2846_v24  ;;  %v2849_v19 = vmul.f32 -1.442695, %v2091_v27  ;;  %v2083_v33 = vadd.f32 %v4120_v34, %v2082_v30 }
 0x2dc   : > { %v3558_v36 = vpop.eup %3557  ;;  %3583 = vrcp.f32 %v2362_v29  ;;  %v2365_v37 = vadd.f32 1.0, %v3556_v31  ;;  %v3328_v5 = vpop.f32.mrf.mxu0 }
 0x2dd   : > { %v3560_v3 = vpop.eup %3559  ;;  %2548 = vst.msk [vmem:[%s4142_s22 + $0x128] sm:$0xff] %vm2510_vm2, %v3558_v36  ;;  %3585 = vpow2.f32 %v2849_v19  ;;  %v2847_v39 = vmul.f32 -1.442695, %v2083_v33  ;;  %v2104_v42 = vadd.f32 %v3328_v5, %v4120_v34 }
 0x2de   : > { %v3562_v21 = vpop.eup %3561  ;;  %3587 = vrcp.f32 %v2365_v37  ;;  %v2363_v43 = vadd.f32 1.0, %v3560_v3  ;;  %v2095_v44 = vpop.f32.mrf.mxu0 }
 0x2df   : > { %v3564_v46 = vpop.eup %3563  ;;  %v2368_v38 = vadd.f32 1.0, %v3562_v21  ;;  %3589 = vpow2.f32 %v2847_v39  ;;  %v2852_v47 = vmul.f32 -1.442695, %v2104_v42  ;;  %v2096_v51 = vadd.f32 %v4120_v34, %v2095_v44 }
 0x2e0   : > { %v3566_v20 = vpop.eup %3565  ;;  %2553 = vst.msk [vmem:[%s4142_s22 + $0x150] sm:$0xff] %vm2510_vm2, %v3564_v46  ;;  %3591 = vrcp.f32 %v2363_v43  ;;  %v3329_v48 = vpop.f32.mrf.mxu0 }
 0x2e1   : > { %v3568_v49 = vpop.eup %3567  ;;  %3593 = vrcp.f32 %v2368_v38  ;;  %v2366_v50 = vadd.f32 1.0, %v3566_v20  ;;  %v2850_v52 = vmul.f32 -1.442695, %v2096_v51  ;;  %v2107_v55 = vadd.f32 %v3329_v48, %v4120_v34 }
 0x2e2   : > { %v3570_v45 = vpop.eup %3569  ;;  %2551 = vst.msk [vmem:[%s4142_s22 + $0x140] sm:$0xff] %vm2510_vm2, %v3568_v49  ;;  %3595 = vpow2.f32 %v2852_v47  ;;  %v2098_v56 = vpop.f32.mrf.mxu0 }
 0x2e3   : > { %v3572_v32 = vpop.eup %3571  ;;  %3597 = vrcp.f32 %v2366_v50  ;;  %v2369_v13 = vadd.f32 1.0, %v3570_v45  ;;  %v2853_v58 = vmul.f32 -1.442695, %v2107_v55  ;;  %v2099_v35 = vadd.f32 %v4120_v34, %v2098_v56 }
 0x2e4   : > { %v3574_v54 = vpop.eup %3573  ;;  %2554 = vst.msk [vmem:[%s4142_s22 + $0x158] sm:$0xff] %vm2510_vm2, %v3572_v32  ;;  %3599 = vpow2.f32 %v2850_v52  ;;  %v3332_v60 = vpop.f32.mrf.mxu0 }
 0x2e5   : > { %v3576_v61 = vpop.eup %3575  ;;  %3601 = vrcp.f32 %v2369_v13  ;;  %v2367_v62 = vadd.f32 1.0, %v3574_v54  ;;  %v2851_v63 = vmul.f32 -1.442695, %v2099_v35  ;;  %v2120_v0 = vadd.f32 %v3332_v60, %v4120_v34 }
 0x2e6   : > { %v3578_v11 = vpop.eup %3577  ;;  %2552 = vst.msk [vmem:[%s4142_s22 + $0x148] sm:$0xff] %vm2510_vm2, %v3576_v61  ;;  %3603 = vpow2.f32 %v2853_v58  ;;  %v2111_v1 = vpop.f32.mrf.mxu0 }
 0x2e7   : > { %v3580_v2 = vpop.eup %3579  ;;  %3605 = vrcp.f32 %v2367_v62  ;;  %v2372_v4 = vadd.f32 1.0, %v3578_v11  ;;  %v2856_v6 = vmul.f32 -1.442695, %v2120_v0  ;;  %v2112_v7 = vadd.f32 %v4120_v34, %v2111_v1 }
 0x2e8   : > { %v3582_v8 = vpop.eup %3581  ;;  %2557 = vst.msk [vmem:[%s4142_s22 + $0x170] sm:$0xff] %vm2510_vm2, %v3580_v2  ;;  %3607 = vpow2.f32 %v2851_v63  ;;  %v3333_v10 = vpop.f32.mrf.mxu0 }
 0x2e9   : > { %v3584_v12 = vpop.eup %3583  ;;  %3609 = vrcp.f32 %v2372_v4  ;;  %v2370_v53 = vadd.f32 1.0, %v3582_v8  ;;  %v2854_v9 = vmul.f32 -1.442695, %v2112_v7  ;;  %v2123_v18 = vadd.f32 %v3333_v10, %v4120_v34 }
 0x2ea   : > { %v3586_v15 = vpop.eup %3585  ;;  %2555 = vst.msk [vmem:[%s4142_s22 + $0x160] sm:$0xff] %vm2510_vm2, %v3584_v12  ;;  %3611 = vpow2.f32 %v2856_v6  ;;  %v2114_v57 = vpop.f32.mrf.mxu0 }
 0x2eb   : > { %v3588_v16 = vpop.eup %3587  ;;  %3613 = vrcp.f32 %v2370_v53  ;;  %v2373_v59 = vadd.f32 1.0, %v3586_v15  ;;  %v2857_v40 = vmul.f32 -1.442695, %v2123_v18  ;;  %v2115_v17 = vadd.f32 %v3641_v25, %v2114_v57 }
 0x2ec   : > { %v3590_v41 = vpop.eup %3589  ;;  %2558 = vst.msk [vmem:[%s4142_s22 + $0x178] sm:$0xff] %vm2510_vm2, %v3588_v16  ;;  %3615 = vpow2.f32 %v2854_v9 }
 0x2ed   : > { %v3592_v34 = vpop.eup %3591  ;;  %3617 = vrcp.f32 %v2373_v59  ;;  %v2371_v14 = vadd.f32 1.0, %v3590_v41  ;;  %v2855_v22 = vmul.f32 -1.442695, %v2115_v17 }
 0x2ee   : > { %v3594_v26 = vpop.eup %3593  ;;  %2556 = vst.msk [vmem:[%s4142_s22 + $0x168] sm:$0xff] %vm2510_vm2, %v3592_v34  ;;  %3619 = vpow2.f32 %v2857_v40 }
 0x2ef   : > { %v3596_v23 = vpop.eup %3595  ;;  %2561 = vst.msk [vmem:[%s4142_s22 + $0x190] sm:$0xff] %vm2510_vm2, %v3594_v26  ;;  %3621 = vrcp.f32 %v2371_v14 }
 0x2f0   : > { %v3598_v24 = vpop.eup %3597  ;;  %v2376_v27 = vadd.f32 1.0, %v3596_v23  ;;  %3623 = vpow2.f32 %v2855_v22 }
 0x2f1   : > { %v3600_v28 = vpop.eup %3599  ;;  %2559 = vst.msk [vmem:[%s4142_s22 + $0x180] sm:$0xff] %vm2510_vm2, %v3598_v24 }
 0x2f2   : > { %v3602_v29 = vpop.eup %3601  ;;  %3625 = vrcp.f32 %v2376_v27  ;;  %v2374_v30 = vadd.f32 1.0, %v3600_v28 }
 0x2f3   : > { %v3604_v31 = vpop.eup %3603  ;;  %2562 = vst.msk [vmem:[%s4142_s22 + $0x198] sm:$0xff] %vm2510_vm2, %v3602_v29 }
 0x2f4   : > { %v3606_v19 = vpop.eup %3605  ;;  %3627 = vrcp.f32 %v2374_v30  ;;  %v2377_v33 = vadd.f32 1.0, %v3604_v31 }
 0x2f5   : > { %v3608_v36 = vpop.eup %3607  ;;  %2560 = vst.msk [vmem:[%s4142_s22 + $0x188] sm:$0xff] %vm2510_vm2, %v3606_v19 }
 0x2f6   : > { %v3610_v37 = vpop.eup %3609  ;;  %3629 = vrcp.f32 %v2377_v33  ;;  %v2375_v5 = vadd.f32 1.0, %v3608_v36 }
 0x2f7   : > { %v3612_v3 = vpop.eup %3611  ;;  %2565 = vst.msk [vmem:[%s4142_s22 + $0x1b0] sm:$0xff] %vm2510_vm2, %v3610_v37 }
 0x2f8   : > { %v3614_v39 = vpop.eup %3613  ;;  %3631 = vrcp.f32 %v2375_v5  ;;  %v2380_v42 = vadd.f32 1.0, %v3612_v3 }
 0x2f9   : > { %v3616_v21 = vpop.eup %3615  ;;  %2563 = vst.msk [vmem:[%s4142_s22 + $0x1a0] sm:$0xff] %vm2510_vm2, %v3614_v39 }
 0x2fa   : > { %v3618_v43 = vpop.eup %3617  ;;  %3633 = vrcp.f32 %v2380_v42  ;;  %v2378_v44 = vadd.f32 1.0, %v3616_v21 }
 0x2fb   : > { %v3620_v46 = vpop.eup %3619  ;;  %2566 = vst.msk [vmem:[%s4142_s22 + $0x1b8] sm:$0xff] %vm2510_vm2, %v3618_v43 }
 0x2fc   : > { %v3622_v38 = vpop.eup %3621  ;;  %3635 = vrcp.f32 %v2378_v44  ;;  %v2381_v47 = vadd.f32 1.0, %v3620_v46 }
 0x2fd   : > { %v3624_v51 = vpop.eup %3623  ;;  %2564 = vst.msk [vmem:[%s4142_s22 + $0x1a8] sm:$0xff] %vm2510_vm2, %v3622_v38 }
 0x2fe   : > { %3637 = vrcp.f32 %v2381_v47  ;;  %v2379_v20 = vadd.f32 1.0, %v3624_v51 }
 0x2ff   : > { %v3626_v48 = vpop.eup %3625 }
 0x300   : > { %2569 = vst.msk [vmem:[%s4142_s22 + $0x1d0] sm:$0xff] %vm2510_vm2, %v3626_v48  ;;  %3639 = vrcp.f32 %v2379_v20 }
 0x301   : > { %v3628_v49 = vpop.eup %3627 }
 0x302   : > { %2567 = vst.msk [vmem:[%s4142_s22 + $0x1c0] sm:$0xff] %vm2510_vm2, %v3628_v49 }
 0x303   : > { %v3630_v50 = vpop.eup %3629 }
 0x304   : > { %2570 = vst.msk [vmem:[%s4142_s22 + $0x1d8] sm:$0xff] %vm2510_vm2, %v3630_v50 }
 0x305   : > { %v3632_v52 = vpop.eup %3631 }
 0x306   : > { %2568 = vst.msk [vmem:[%s4142_s22 + $0x1c8] sm:$0xff] %vm2510_vm2, %v3632_v52 }
 0x307   : > { %v3634_v55 = vpop.eup %3633 }
 0x308   : > { %2573 = vst.msk [vmem:[%s4142_s22 + $0x1f0] sm:$0xff] %vm2510_vm2, %v3634_v55 }
 0x309   : > { %v3636_v45 = vpop.eup %3635 }
 0x30a   : > { %2571 = vst.msk [vmem:[%s4142_s22 + $0x1e0] sm:$0xff] %vm2510_vm2, %v3636_v45 }
 0x30b   : > { %v3638_v56 = vpop.eup %3637 }
 0x30c   : > { %2574 = vst.msk [vmem:[%s4142_s22 + $0x1f8] sm:$0xff] %vm2510_vm2, %v3638_v56 }
 0x30d   : > { %v3640_v32 = vpop.eup %3639 }
 0x30e   : > { %2572 = vst.msk [vmem:[%s4142_s22 + $0x1e8] sm:$0xff] %vm2510_vm2, %v3640_v32 }
 0x30f PF: > { %s18_s27 = sadd.s32 1, %s3648_s27  }
 0x310   : > { %p15_p4 = scmp.ge.s32.totalorder %s18_s27, 4  }
 0x312   :  { %17 = sbr.rel (!%p15_p4) target bundleno = 1 (0x1), region = 85 }

</bundles_post_ra>
